<compile_context>
chip_gen: v7x
topology: tpu7x:2x2x1
jax: 0.10.0
libtpu: 0.0.40
codegen_flags: <defaults>
</compile_context>

<pallas_src>
import math
import jax
import jax.numpy as jnp
import numpy as np
from jax.experimental import pallas as pl
from jax.experimental.pallas import tpu as pltpu

SQRT2 = math.sqrt(2.0)
NEG_SLOPE = 0.2          # FusedLeakyReLU negative slope
_LANE = 128

# normalized 4x4 blur kernel built from blur_kernel=[1, 3, 3, 1]
_BLUR_1D = np.array([1.0, 3.0, 3.0, 1.0], dtype=np.float64)
_BLUR_2D = np.outer(_BLUR_1D, _BLUR_1D)
_BLUR_2D = (_BLUR_2D / _BLUR_2D.sum()).astype(np.float32)


def _round_up(x, m):
    return ((x + m - 1) // m) * m


def _divisors_desc(n):
    return [d for d in range(n, 0, -1) if n % d == 0]


def _vmem_budget():
    """Per-generation scoped-VMEM limit and planning budget (bytes)."""
    try:
        cap = int(pltpu.get_tpu_info().vmem_capacity_bytes)
    except Exception:
        cap = 64 << 20                       # conservative (v7x physical VMEM)
    limit = min((cap * 3) // 4, 112 << 20)   # ~96 MiB on v5e/v6e, ~48 MiB on v7x
    return limit, (limit * 4) // 5


# ----------------------------------------------------------------------------
# Pallas kernels
# ----------------------------------------------------------------------------
def _conv1_kernel(x_ref, w_ref, b_ref, o_ref):
    """3x3 stride-1 conv + bias + leaky ReLU (sqrt(2) gain folded into W/b).

    x_ref: (1, H+2, W+2, Cp)  padded input, resident per batch item
    w_ref: (9, Cp, C1p)       per-tap weight matrices
    b_ref: (1, C1p)           bias (f32)
    o_ref: (1, TH, W, C1p)    one output row band (bf16)
    """
    th, w_out, c1p = o_ref.shape[1], o_ref.shape[2], o_ref.shape[3]
    row0 = pl.program_id(1) * th
    acc = jnp.zeros((th * w_out, c1p), jnp.float32)
    for kh in range(3):
        for kw in range(3):
            win = x_ref[0, pl.ds(row0 + kh, th), kw:kw + w_out, :]
            acc = acc + jnp.dot(win.reshape(th * w_out, -1),
                                w_ref[kh * 3 + kw],
                                preferred_element_type=jnp.float32)
    z = acc + b_ref[...]
    z = jnp.where(z >= 0, z, NEG_SLOPE * z)
    o_ref[...] = z.reshape(1, th, w_out, c1p).astype(o_ref.dtype)


def _conv2_skip_kernel(y_ref, x_ref, w2_ref, b2_ref, ws_ref, bs_ref,
                       o_ref, acc2_ref, accs_ref):
    """Fused (blur o conv2 as 6x6 s2) + FusedLeakyReLU + (blur o skip as 4x4 s2)
    + residual merge.  Input channels are tiled on grid axis 2 ("arbitrary").

    y_ref:  (1, 4, Hq, Wq, CK)  phase-split padded conv1 output (phase = 2*q+p)
    x_ref:  (1, 4, Hs, Ws, CK)  phase-split padded block input
    w2_ref: (36, CK, C2p)   b2_ref: (1, C2p)
    ws_ref: (16, CK, C2p)   bs_ref: (1, C2p)
    o_ref:  (1, TH, Wo, C2p) bf16
    acc2_ref / accs_ref: (TH*Wo, C2p) f32 accumulators (persist across k)
    """
    th, wo, c2p = o_ref.shape[1], o_ref.shape[2], o_ref.shape[3]
    row0 = pl.program_id(1) * th
    k = pl.program_id(2)

    @pl.when(k == 0)
    def _():
        acc2_ref[...] = jnp.zeros_like(acc2_ref)
        accs_ref[...] = jnp.zeros_like(accs_ref)

    a_main = acc2_ref[...]
    for kh in range(6):
        q, j = kh % 2, kh // 2
        for kw in range(6):
            p, m = kw % 2, kw // 2
            win = y_ref[0, 2 * q + p, pl.ds(row0 + j, th), m:m + wo, :]
            a_main = a_main + jnp.dot(win.reshape(th * wo, -1),
                                      w2_ref[kh * 6 + kw],
                                      preferred_element_type=jnp.float32)
    acc2_ref[...] = a_main

    a_skip = accs_ref[...]
    for kh in range(4):
        q, j = kh % 2, kh // 2
        for kw in range(4):
            p, m = kw % 2, kw // 2
            win = x_ref[0, 2 * q + p, pl.ds(row0 + j, th), m:m + wo, :]
            a_skip = a_skip + jnp.dot(win.reshape(th * wo, -1),
                                      ws_ref[kh * 4 + kw],
                                      preferred_element_type=jnp.float32)
    accs_ref[...] = a_skip

    @pl.when(k == pl.num_programs(2) - 1)
    def _():
        z = a_main + b2_ref[...]
        z = jnp.where(z >= 0, z, NEG_SLOPE * z)   # *sqrt2 cancels the /sqrt2 merge
        out = z + a_skip + bs_ref[...]            # skip path carries /sqrt2 already
        o_ref[...] = out.reshape(1, th, wo, c2p).astype(o_ref.dtype)


# ----------------------------------------------------------------------------
# pallas_call wrappers
# ----------------------------------------------------------------------------
def _conv1_pallas(xpad, w1t, b1, th, vmem_limit):
    n, hp, wp, cinp = xpad.shape
    h, w = hp - 2, wp - 2
    c1p = w1t.shape[-1]
    flops = 2 * n * h * w * 9 * cinp * c1p
    bytes_accessed = xpad.size * 2 + w1t.size * 2 + b1.size * 4 + n * h * w * c1p * 2
    return pl.pallas_call(
        _conv1_kernel,
        out_shape=jax.ShapeDtypeStruct((n, h, w, c1p), jnp.bfloat16),
        grid_spec=pltpu.PrefetchScalarGridSpec(
            num_scalar_prefetch=0,
            grid=(n, h // th),
            in_specs=[
                pl.BlockSpec((1, hp, wp, cinp), lambda i, b: (i, 0, 0, 0)),
                pl.BlockSpec((9, cinp, c1p), lambda i, b: (0, 0, 0)),
                pl.BlockSpec((1, c1p), lambda i, b: (0, 0)),
            ],
            out_specs=pl.BlockSpec((1, th, w, c1p), lambda i, b: (i, b, 0, 0)),
        ),
        compiler_params=pltpu.CompilerParams(
            dimension_semantics=("parallel", "parallel"),
            vmem_limit_bytes=vmem_limit),
        cost_estimate=pl.CostEstimate(flops=flops, transcendentals=0,
                                      bytes_accessed=bytes_accessed),
    )(xpad, w1t, b1)


def _conv2_skip_pallas(yph, xph, w2t, b2, wst, bs, out_hw, th, ck, vmem_limit):
    n = yph.shape[0]
    hq, wq = yph.shape[2], yph.shape[3]
    hs, ws_cols = xph.shape[2], xph.shape[3]
    cinp = yph.shape[4]
    c2p = w2t.shape[-1]
    ho, wo = out_hw
    n_kc = cinp // ck
    flops = 2 * n * ho * wo * (36 + 16) * cinp * c2p
    bytes_accessed = ((yph.size + xph.size + w2t.size + wst.size) * 2
                      + (b2.size + bs.size) * 4 + n * ho * wo * c2p * 2)
    return pl.pallas_call(
        _conv2_skip_kernel,
        out_shape=jax.ShapeDtypeStruct((n, ho, wo, c2p), jnp.bfloat16),
        grid_spec=pltpu.PrefetchScalarGridSpec(
            num_scalar_prefetch=0,
            grid=(n, ho // th, n_kc),
            in_specs=[
                pl.BlockSpec((1, 4, hq, wq, ck), lambda i, b, k: (i, 0, 0, 0, k)),
                pl.BlockSpec((1, 4, hs, ws_cols, ck), lambda i, b, k: (i, 0, 0, 0, k)),
                pl.BlockSpec((36, ck, c2p), lambda i, b, k: (0, k, 0)),
                pl.BlockSpec((1, c2p), lambda i, b, k: (0, 0)),
                pl.BlockSpec((16, ck, c2p), lambda i, b, k: (0, k, 0)),
                pl.BlockSpec((1, c2p), lambda i, b, k: (0, 0)),
            ],
            out_specs=pl.BlockSpec((1, th, wo, c2p), lambda i, b, k: (i, b, 0, 0)),
            scratch_shapes=[pltpu.VMEM((th * wo, c2p), jnp.float32),
                            pltpu.VMEM((th * wo, c2p), jnp.float32)],
        ),
        compiler_params=pltpu.CompilerParams(
            dimension_semantics=("parallel", "parallel", "arbitrary"),
            vmem_limit_bytes=vmem_limit),
        cost_estimate=pl.CostEstimate(flops=flops, transcendentals=0,
                                      bytes_accessed=bytes_accessed),
    )(yph, xph, w2t, b2, wst, bs)


# ----------------------------------------------------------------------------
# VMEM-aware tile selection (accounts for 2x double-buffering of ALL blocks)
# ----------------------------------------------------------------------------
def _pick_band1(h, w, cinp, c1p, budget):
    fixed = 2 * ((h + 2) * (w + 2) * cinp * 2)       # resident padded input
    fixed += 2 * (9 * cinp * c1p * 2) + 2 * (c1p * 4)
    per_row = w * c1p * 12                           # out bf16 x2 buf + f32 acc/value
    if fixed + per_row > budget:
        raise ValueError(
            "conv1: padded input does not fit VMEM budget; "
            "TODO(synk): halo row-band streaming for very large spatial inputs")
    for th in _divisors_desc(h):
        if fixed + th * per_row <= budget:
            return th
    return 1


def _pick_conv2_tiles(ho, wo, hq, wq, hs, ws_cols, cinp, c2p, budget):
    ck_candidates = [d for d in range(cinp, _LANE - 1, -_LANE) if cinp % d == 0]
    per_row = wo * c2p * 16                          # out bf16 x2 + two f32 accs + value
    for ck in ck_candidates:
        fixed = 2 * (4 * hq * wq * ck * 2)           # phase-split conv1 output block
        fixed += 2 * (4 * hs * ws_cols * ck * 2)     # phase-split skip input block
        fixed += 2 * (36 * ck * c2p * 2)             # conv2 tap weights (x2 buffers)
        fixed += 2 * (16 * ck * c2p * 2)             # skip tap weights
        fixed += 4 * (c2p * 4)                       # biases
        if fixed + per_row > budget:
            continue
        for th in _divisors_desc(ho):
            if fixed + th * per_row <= budget:
                return ck, th
    raise ValueError(
        "conv2+skip: no (channel-chunk, row-band) tiling fits VMEM budget; "
        "TODO(synk): halo row-band streaming for very large spatial inputs")


# ----------------------------------------------------------------------------
# Plain-JAX glue (padding, blur folding, weight reshuffles, phase split)
# ----------------------------------------------------------------------------
def _fold_blur(w_oihw, blur2d):
    """Fold a preceding depthwise FIR blur into the conv weight (exact)."""
    o, i, kh, kw = w_oihw.shape
    bh, bw = blur2d.shape
    out = jnp.zeros((o, i, kh + bh - 1, kw + bw - 1), jnp.float32)
    for a in range(kh):
        for b in range(kw):
            out = out.at[:, :, a:a + bh, b:b + bw].add(
                w_oihw[:, :, a:a + 1, b:b + 1] * blur2d[None, None])
    return out


def _taps(w_oihw, cin_p, cout_p):
    """OIHW weight -> (KH*KW, cin_p, cout_p) per-tap matrices, zero padded, bf16."""
    o, i, kh, kw = w_oihw.shape
    t = jnp.transpose(w_oihw, (2, 3, 1, 0)).reshape(kh * kw, i, o)
    t = jnp.pad(t, ((0, 0), (0, cin_p - i), (0, cout_p - o)))
    return t.astype(jnp.bfloat16)


def _pad_lanes(a, width):
    pad = width - a.shape[-1]
    if pad <= 0:
        return a
    return jnp.pad(a, [(0, 0)] * (a.ndim - 1) + [(0, pad)])


def _phase_split(a_nhwc):
    """(N, 2R, 2C, F) -> (N, 4, R, C, F); phase index = 2*(row parity) + col parity."""
    n, h, w, f = a_nhwc.shape
    a = a_nhwc.reshape(n, h // 2, 2, w // 2, 2, f)
    a = jnp.transpose(a, (0, 2, 4, 1, 3, 5))
    return a.reshape(n, 4, h // 2, w // 2, f)


# ----------------------------------------------------------------------------
# ResBlock forward
# ----------------------------------------------------------------------------
def resblock_forward(x_nchw, params):
    x = jnp.transpose(x_nchw, (0, 2, 3, 1)).astype(jnp.float32)   # NHWC
    n, h, w, cin = x.shape
    cout = params["w2"].shape[0]
    assert h % 2 == 0 and w % 2 == 0, "stride-2 downsample needs even H, W"
    ho, wo = h // 2, w // 2
    blur = jnp.asarray(_BLUR_2D)

    cinp = _round_up(max(cin, _LANE), _LANE)
    c1p = cinp                                   # conv1 keeps the channel count
    c2p = _round_up(max(cout, _LANE), 256 if cout > _LANE else _LANE)

    vmem_limit, budget = _vmem_budget()

    # padded, channel-padded bf16 input (shared by conv1 and the skip path)
    xpad = jnp.pad(x, ((0, 0), (1, 1), (1, 1), (0, cinp - cin))).astype(jnp.bfloat16)

    # --- conv1: EqualConv2d 3x3 s1 p1 + FusedLeakyReLU (sqrt(2) folded into W,b)
    scale1 = 1.0 / math.sqrt(cin * 9)
    w1t = _taps(params["w1"].astype(jnp.float32) * (scale1 * SQRT2), cinp, c1p)
    b1 = _pad_lanes((params["b1"] * SQRT2).reshape(1, -1).astype(jnp.float32), c1p)

    th1 = _pick_band1(h, w, cinp, c1p, budget)
    y1 = _conv1_pallas(xpad, w1t, b1, th1, vmem_limit)            # (n,h,w,c1p) bf16

    # --- conv2 path: Blur(pad 2,2) + 3x3 s2 conv folded into one 6x6 s2 conv
    scale2 = 1.0 / math.sqrt(cin * 9)
    w2t = _taps(_fold_blur(params["w2"].astype(jnp.float32) * scale2, blur), cinp, c2p)
    b2 = _pad_lanes(params["b2"].reshape(1, -1).astype(jnp.float32), c2p)

    # --- skip path: Blur(pad 1,1) + 1x1 s2 conv folded into one 4x4 s2 conv,
    #     with the final /sqrt(2) folded into its weight and bias.
    scale_s = 1.0 / math.sqrt(cin)
    wst = _taps(_fold_blur(params["ws"].astype(jnp.float32) * (scale_s / SQRT2), blur),
                cinp, c2p)
    bs = _pad_lanes((params["bs"] / SQRT2).reshape(1, -1).astype(jnp.float32), c2p)

    # Phase-split the stride-2 conv inputs so the fused kernel only needs
    # contiguous static window slices (no strided VMEM reads, no im2col).
    yph = _phase_split(jnp.pad(y1, ((0, 0), (2, 2), (2, 2), (0, 0))))
    xph = _phase_split(xpad)

    ck, th2 = _pick_conv2_tiles(ho, wo, (h + 4) // 2, (w + 4) // 2,
                                (h + 2) // 2, (w + 2) // 2, cinp, c2p, budget)
    out = _conv2_skip_pallas(yph, xph, w2t, b2, wst, bs,
                             (ho, wo), th2, ck, vmem_limit)       # (n,ho,wo,c2p) bf16

    out = out[:, :, :, :cout]
    return jnp.transpose(out, (0, 3, 1, 2)).astype(jnp.float32)   # NCHW, f32 boundary


# ----------------------------------------------------------------------------
# Pure-JAX f32 reference (correctness check only)
# ----------------------------------------------------------------------------
def _ref_forward(x_nchw, params):
    def equal_conv(x, w, scale, stride, padding, bias=None):
        y = jax.lax.conv_general_dilated(
            x, w * scale, (stride, stride),
            [(padding, padding), (padding, padding)],
            dimension_numbers=("NCHW", "OIHW", "NCHW"))
        if bias is not None:
            y = y + bias.reshape(1, -1, 1, 1)
        return y

    def flrelu(x, b):
        x = x + b.reshape(1, -1, 1, 1)
        return jnp.where(x >= 0, x, NEG_SLOPE * x) * SQRT2

    def blur(x, pad):
        c = x.shape[1]
        kd = jnp.tile(jnp.asarray(_BLUR_2D).reshape(1, 1, 4, 4), (c, 1, 1, 1))
        xp = jnp.pad(x, ((0, 0), (0, 0), (pad[0], pad[1]), (pad[0], pad[1])))
        return jax.lax.conv_general_dilated(
            xp, kd, (1, 1), "VALID", feature_group_count=c,
            dimension_numbers=("NCHW", "OIHW", "NCHW"))

    cin = x_nchw.shape[1]
    o = flrelu(equal_conv(x_nchw, params["w1"], 1.0 / math.sqrt(cin * 9), 1, 1),
               params["b1"])
    o = blur(o, (2, 2))
    o = flrelu(equal_conv(o, params["w2"], 1.0 / math.sqrt(cin * 9), 2, 0),
               params["b2"])
    s = blur(x_nchw, (1, 1))
    s = equal_conv(s, params["ws"], 1.0 / math.sqrt(cin * 1), 2, 0, bias=params["bs"])
    return (o + s) / SQRT2


def _check_fold_blur():
    """Tight f32 check that blur(pad 2,2) -> 3x3 s2 == folded 6x6 s2 conv."""
    k1, k2 = jax.random.split(jax.random.PRNGKey(1))
    x = jax.random.normal(k1, (1, 3, 12, 12), jnp.float32)
    wt = jax.random.normal(k2, (5, 3, 3, 3), jnp.float32)
    blur = jnp.asarray(_BLUR_2D)
    c = x.shape[1]
    kd = jnp.tile(blur.reshape(1, 1, 4, 4), (c, 1, 1, 1))
    xp = jnp.pad(x, ((0, 0), (0, 0), (2, 2), (2, 2)))
    xb = jax.lax.conv_general_dilated(xp, kd, (1, 1), "VALID",
                                      feature_group_count=c,
                                      dimension_numbers=("NCHW", "OIHW", "NCHW"))
    ref = jax.lax.conv_general_dilated(xb, wt, (2, 2), "VALID",
                                       dimension_numbers=("NCHW", "OIHW", "NCHW"))
    got = jax.lax.conv_general_dilated(xp, _fold_blur(wt, blur), (2, 2), "VALID",
                                       dimension_numbers=("NCHW", "OIHW", "NCHW"))
    assert jnp.allclose(got, ref, rtol=1e-4, atol=1e-4), "blur folding mismatch"


def _make_params(key, cin, cout):
    ks = jax.random.split(key, 6)
    return {
        "w1": jax.random.normal(ks[0], (cin, cin, 3, 3), jnp.float32),
        "b1": 0.1 * jax.random.normal(ks[1], (cin,), jnp.float32),
        "w2": jax.random.normal(ks[2], (cout, cin, 3, 3), jnp.float32),
        "b2": 0.1 * jax.random.normal(ks[3], (cout,), jnp.float32),
        "ws": jax.random.normal(ks[4], (cout, cin, 1, 1), jnp.float32),
        "bs": 0.1 * jax.random.normal(ks[5], (cout,), jnp.float32),
    }


# ----------------------------------------------------------------------------
if __name__ == "__main__":
    _check_fold_blur()

    # primary small-shape check (matches the module spec sizes)
    key = jax.random.PRNGKey(0)
    kx, kp = jax.random.split(key)
    N, CIN, COUT, H = 2, 4, 8, 16
    x = jax.random.normal(kx, (N, CIN, H, H), jnp.float32)
    params = _make_params(kp, CIN, COUT)

    fwd = jax.jit(resblock_forward)
    out = jax.block_until_ready(fwd(x, params))
    ref = _ref_forward(x, params)
    assert out.shape == (N, COUT, H // 2, H // 2), out.shape
    assert jnp.allclose(out, ref, rtol=5e-2, atol=5e-2), \
        float(jnp.max(jnp.abs(out - ref)))

    # secondary shape to guard blur/scale folding and band/chunk selection
    kx2, kp2 = jax.random.split(jax.random.PRNGKey(2))
    N2, CIN2, COUT2, H2 = 1, 8, 16, 32
    x2 = jax.random.normal(kx2, (N2, CIN2, H2, H2), jnp.float32)
    params2 = _make_params(kp2, CIN2, COUT2)
    out2 = jax.block_until_ready(jax.jit(resblock_forward)(x2, params2))
    ref2 = _ref_forward(x2, params2)
    assert out2.shape == (N2, COUT2, H2 // 2, H2 // 2), out2.shape
    # bf16 MXU operands vs pure-f32 reference -> loose tolerance here
    assert jnp.allclose(out2, ref2, rtol=5e-2, atol=1e-1), \
        float(jnp.max(jnp.abs(out2 - ref2)))

    print("KERNEL_OK")
</pallas_src>

<mosaic_0001>
module attributes {stable_mosaic.version = 11 : i64} {
  func.func @_conv1_kernel(%arg0: i32, %arg1: i32, %arg2: memref<1x18x18x128xbf16, #tpu.memory_space<vmem>>, %arg3: memref<9x128x128xbf16, #tpu.memory_space<vmem>>, %arg4: memref<1x128xf32, #tpu.memory_space<vmem>>, %arg5: memref<1x16x16x128xbf16, #tpu.memory_space<vmem>>) attributes {dimension_semantics = [#tpu.dimension_semantics<parallel>, #tpu.dimension_semantics<parallel>], iteration_bounds = array<i64: 2, 1>, scalar_prefetch = 0 : i64, scratch_operands = 0 : i64, tpu.core_type = #tpu.core_type<tc>, window_params = [{transform_indices = @transform_0, window_bounds = array<i64: 1, 18, 18, 128>}, {pipeline_mode = #tpu.pipeline_mode<synchronous>, transform_indices = @transform_1, window_bounds = array<i64: 9, 128, 128>}, {pipeline_mode = #tpu.pipeline_mode<synchronous>, transform_indices = @transform_2, window_bounds = array<i64: 1, 128>}, {transform_indices = @transform_3, window_bounds = array<i64: 1, 16, 16, 128>}]} {
    %c16_i32 = arith.constant 16 : i32
    %0 = arith.muli %arg1, %c16_i32 : i32
    %cst = arith.constant 0.000000e+00 : f32
    %1 = vector.broadcast %cst : f32 to vector<256x128xf32>
    %c0_i32 = arith.constant 0 : i32
    %2 = arith.addi %0, %c0_i32 : i32
    %c0 = arith.constant 0 : index
    %3 = arith.index_cast %2 : i32 to index
    %c0_0 = arith.constant 0 : index
    %c0_1 = arith.constant 0 : index
    %4 = vector.load %arg2[%c0, %3, %c0_0, %c0_1] : memref<1x18x18x128xbf16, #tpu.memory_space<vmem>>, vector<1x16x16x128xbf16>
    %5 = vector.shape_cast %4 : vector<1x16x16x128xbf16> to vector<16x16x128xbf16>
    %6 = vector.shape_cast %5 : vector<16x16x128xbf16> to vector<256x128xbf16>
    %c0_2 = arith.constant 0 : index
    %c0_3 = arith.constant 0 : index
    %c0_4 = arith.constant 0 : index
    %7 = vector.load %arg3[%c0_2, %c0_3, %c0_4] : memref<9x128x128xbf16, #tpu.memory_space<vmem>>, vector<1x128x128xbf16>
    %8 = vector.shape_cast %7 : vector<1x128x128xbf16> to vector<128x128xbf16>
    %cst_5 = arith.constant dense<0.000000e+00> : vector<256x128xf32>
    %9 = tpu.matmul %6, %8, %cst_5 {dimension_numbers = #tpu.dot_dimension_numbers<[1], [0], [0], [1], [0, 0, 1, 1], [], []>} : vector<256x128xbf16>, vector<128x128xbf16>, vector<256x128xf32> -> vector<256x128xf32>
    %10 = arith.addf %1, %9 : vector<256x128xf32>
    %c0_i32_6 = arith.constant 0 : i32
    %11 = arith.addi %0, %c0_i32_6 : i32
    %c0_7 = arith.constant 0 : index
    %12 = arith.index_cast %11 : i32 to index
    %c1 = arith.constant 1 : index
    %c0_8 = arith.constant 0 : index
    %13 = vector.load %arg2[%c0_7, %12, %c1, %c0_8] : memref<1x18x18x128xbf16, #tpu.memory_space<vmem>>, vector<1x16x16x128xbf16>
    %14 = vector.shape_cast %13 : vector<1x16x16x128xbf16> to vector<16x16x128xbf16>
    %15 = vector.shape_cast %14 : vector<16x16x128xbf16> to vector<256x128xbf16>
    %c1_9 = arith.constant 1 : index
    %c0_10 = arith.constant 0 : index
    %c0_11 = arith.constant 0 : index
    %16 = vector.load %arg3[%c1_9, %c0_10, %c0_11] : memref<9x128x128xbf16, #tpu.memory_space<vmem>>, vector<1x128x128xbf16>
    %17 = vector.shape_cast %16 : vector<1x128x128xbf16> to vector<128x128xbf16>
    %cst_12 = arith.constant dense<0.000000e+00> : vector<256x128xf32>
    %18 = tpu.matmul %15, %17, %cst_12 {dimension_numbers = #tpu.dot_dimension_numbers<[1], [0], [0], [1], [0, 0, 1, 1], [], []>} : vector<256x128xbf16>, vector<128x128xbf16>, vector<256x128xf32> -> vector<256x128xf32>
    %19 = arith.addf %10, %18 : vector<256x128xf32>
    %c0_i32_13 = arith.constant 0 : i32
    %20 = arith.addi %0, %c0_i32_13 : i32
    %c0_14 = arith.constant 0 : index
    %21 = arith.index_cast %20 : i32 to index
    %c2 = arith.constant 2 : index
    %c0_15 = arith.constant 0 : index
    %22 = vector.load %arg2[%c0_14, %21, %c2, %c0_15] : memref<1x18x18x128xbf16, #tpu.memory_space<vmem>>, vector<1x16x16x128xbf16>
    %23 = vector.shape_cast %22 : vector<1x16x16x128xbf16> to vector<16x16x128xbf16>
    %24 = vector.shape_cast %23 : vector<16x16x128xbf16> to vector<256x128xbf16>
    %c2_16 = arith.constant 2 : index
    %c0_17 = arith.constant 0 : index
    %c0_18 = arith.constant 0 : index
    %25 = vector.load %arg3[%c2_16, %c0_17, %c0_18] : memref<9x128x128xbf16, #tpu.memory_space<vmem>>, vector<1x128x128xbf16>
    %26 = vector.shape_cast %25 : vector<1x128x128xbf16> to vector<128x128xbf16>
    %cst_19 = arith.constant dense<0.000000e+00> : vector<256x128xf32>
    %27 = tpu.matmul %24, %26, %cst_19 {dimension_numbers = #tpu.dot_dimension_numbers<[1], [0], [0], [1], [0, 0, 1, 1], [], []>} : vector<256x128xbf16>, vector<128x128xbf16>, vector<256x128xf32> -> vector<256x128xf32>
    %28 = arith.addf %19, %27 : vector<256x128xf32>
    %c1_i32 = arith.constant 1 : i32
    %29 = arith.addi %0, %c1_i32 : i32
    %c0_20 = arith.constant 0 : index
    %30 = arith.index_cast %29 : i32 to index
    %c0_21 = arith.constant 0 : index
    %c0_22 = arith.constant 0 : index
    %31 = vector.load %arg2[%c0_20, %30, %c0_21, %c0_22] : memref<1x18x18x128xbf16, #tpu.memory_space<vmem>>, vector<1x16x16x128xbf16>
    %32 = vector.shape_cast %31 : vector<1x16x16x128xbf16> to vector<16x16x128xbf16>
    %33 = vector.shape_cast %32 : vector<16x16x128xbf16> to vector<256x128xbf16>
    %c3 = arith.constant 3 : index
    %c0_23 = arith.constant 0 : index
    %c0_24 = arith.constant 0 : index
    %34 = vector.load %arg3[%c3, %c0_23, %c0_24] : memref<9x128x128xbf16, #tpu.memory_space<vmem>>, vector<1x128x128xbf16>
    %35 = vector.shape_cast %34 : vector<1x128x128xbf16> to vector<128x128xbf16>
    %cst_25 = arith.constant dense<0.000000e+00> : vector<256x128xf32>
    %36 = tpu.matmul %33, %35, %cst_25 {dimension_numbers = #tpu.dot_dimension_numbers<[1], [0], [0], [1], [0, 0, 1, 1], [], []>} : vector<256x128xbf16>, vector<128x128xbf16>, vector<256x128xf32> -> vector<256x128xf32>
    %37 = arith.addf %28, %36 : vector<256x128xf32>
    %c1_i32_26 = arith.constant 1 : i32
    %38 = arith.addi %0, %c1_i32_26 : i32
    %c0_27 = arith.constant 0 : index
    %39 = arith.index_cast %38 : i32 to index
    %c1_28 = arith.constant 1 : index
    %c0_29 = arith.constant 0 : index
    %40 = vector.load %arg2[%c0_27, %39, %c1_28, %c0_29] : memref<1x18x18x128xbf16, #tpu.memory_space<vmem>>, vector<1x16x16x128xbf16>
    %41 = vector.shape_cast %40 : vector<1x16x16x128xbf16> to vector<16x16x128xbf16>
    %42 = vector.shape_cast %41 : vector<16x16x128xbf16> to vector<256x128xbf16>
    %c4 = arith.constant 4 : index
    %c0_30 = arith.constant 0 : index
    %c0_31 = arith.constant 0 : index
    %43 = vector.load %arg3[%c4, %c0_30, %c0_31] : memref<9x128x128xbf16, #tpu.memory_space<vmem>>, vector<1x128x128xbf16>
    %44 = vector.shape_cast %43 : vector<1x128x128xbf16> to vector<128x128xbf16>
    %cst_32 = arith.constant dense<0.000000e+00> : vector<256x128xf32>
    %45 = tpu.matmul %42, %44, %cst_32 {dimension_numbers = #tpu.dot_dimension_numbers<[1], [0], [0], [1], [0, 0, 1, 1], [], []>} : vector<256x128xbf16>, vector<128x128xbf16>, vector<256x128xf32> -> vector<256x128xf32>
    %46 = arith.addf %37, %45 : vector<256x128xf32>
    %c1_i32_33 = arith.constant 1 : i32
    %47 = arith.addi %0, %c1_i32_33 : i32
    %c0_34 = arith.constant 0 : index
    %48 = arith.index_cast %47 : i32 to index
    %c2_35 = arith.constant 2 : index
    %c0_36 = arith.constant 0 : index
    %49 = vector.load %arg2[%c0_34, %48, %c2_35, %c0_36] : memref<1x18x18x128xbf16, #tpu.memory_space<vmem>>, vector<1x16x16x128xbf16>
    %50 = vector.shape_cast %49 : vector<1x16x16x128xbf16> to vector<16x16x128xbf16>
    %51 = vector.shape_cast %50 : vector<16x16x128xbf16> to vector<256x128xbf16>
    %c5 = arith.constant 5 : index
    %c0_37 = arith.constant 0 : index
    %c0_38 = arith.constant 0 : index
    %52 = vector.load %arg3[%c5, %c0_37, %c0_38] : memref<9x128x128xbf16, #tpu.memory_space<vmem>>, vector<1x128x128xbf16>
    %53 = vector.shape_cast %52 : vector<1x128x128xbf16> to vector<128x128xbf16>
    %cst_39 = arith.constant dense<0.000000e+00> : vector<256x128xf32>
    %54 = tpu.matmul %51, %53, %cst_39 {dimension_numbers = #tpu.dot_dimension_numbers<[1], [0], [0], [1], [0, 0, 1, 1], [], []>} : vector<256x128xbf16>, vector<128x128xbf16>, vector<256x128xf32> -> vector<256x128xf32>
    %55 = arith.addf %46, %54 : vector<256x128xf32>
    %c2_i32 = arith.constant 2 : i32
    %56 = arith.addi %0, %c2_i32 : i32
    %c0_40 = arith.constant 0 : index
    %57 = arith.index_cast %56 : i32 to index
    %c0_41 = arith.constant 0 : index
    %c0_42 = arith.constant 0 : index
    %58 = vector.load %arg2[%c0_40, %57, %c0_41, %c0_42] : memref<1x18x18x128xbf16, #tpu.memory_space<vmem>>, vector<1x16x16x128xbf16>
    %59 = vector.shape_cast %58 : vector<1x16x16x128xbf16> to vector<16x16x128xbf16>
    %60 = vector.shape_cast %59 : vector<16x16x128xbf16> to vector<256x128xbf16>
    %c6 = arith.constant 6 : index
    %c0_43 = arith.constant 0 : index
    %c0_44 = arith.constant 0 : index
    %61 = vector.load %arg3[%c6, %c0_43, %c0_44] : memref<9x128x128xbf16, #tpu.memory_space<vmem>>, vector<1x128x128xbf16>
    %62 = vector.shape_cast %61 : vector<1x128x128xbf16> to vector<128x128xbf16>
    %cst_45 = arith.constant dense<0.000000e+00> : vector<256x128xf32>
    %63 = tpu.matmul %60, %62, %cst_45 {dimension_numbers = #tpu.dot_dimension_numbers<[1], [0], [0], [1], [0, 0, 1, 1], [], []>} : vector<256x128xbf16>, vector<128x128xbf16>, vector<256x128xf32> -> vector<256x128xf32>
    %64 = arith.addf %55, %63 : vector<256x128xf32>
    %c2_i32_46 = arith.constant 2 : i32
    %65 = arith.addi %0, %c2_i32_46 : i32
    %c0_47 = arith.constant 0 : index
    %66 = arith.index_cast %65 : i32 to index
    %c1_48 = arith.constant 1 : index
    %c0_49 = arith.constant 0 : index
    %67 = vector.load %arg2[%c0_47, %66, %c1_48, %c0_49] : memref<1x18x18x128xbf16, #tpu.memory_space<vmem>>, vector<1x16x16x128xbf16>
    %68 = vector.shape_cast %67 : vector<1x16x16x128xbf16> to vector<16x16x128xbf16>
    %69 = vector.shape_cast %68 : vector<16x16x128xbf16> to vector<256x128xbf16>
    %c7 = arith.constant 7 : index
    %c0_50 = arith.constant 0 : index
    %c0_51 = arith.constant 0 : index
    %70 = vector.load %arg3[%c7, %c0_50, %c0_51] : memref<9x128x128xbf16, #tpu.memory_space<vmem>>, vector<1x128x128xbf16>
    %71 = vector.shape_cast %70 : vector<1x128x128xbf16> to vector<128x128xbf16>
    %cst_52 = arith.constant dense<0.000000e+00> : vector<256x128xf32>
    %72 = tpu.matmul %69, %71, %cst_52 {dimension_numbers = #tpu.dot_dimension_numbers<[1], [0], [0], [1], [0, 0, 1, 1], [], []>} : vector<256x128xbf16>, vector<128x128xbf16>, vector<256x128xf32> -> vector<256x128xf32>
    %73 = arith.addf %64, %72 : vector<256x128xf32>
    %c2_i32_53 = arith.constant 2 : i32
    %74 = arith.addi %0, %c2_i32_53 : i32
    %c0_54 = arith.constant 0 : index
    %75 = arith.index_cast %74 : i32 to index
    %c2_55 = arith.constant 2 : index
    %c0_56 = arith.constant 0 : index
    %76 = vector.load %arg2[%c0_54, %75, %c2_55, %c0_56] : memref<1x18x18x128xbf16, #tpu.memory_space<vmem>>, vector<1x16x16x128xbf16>
    %77 = vector.shape_cast %76 : vector<1x16x16x128xbf16> to vector<16x16x128xbf16>
    %78 = vector.shape_cast %77 : vector<16x16x128xbf16> to vector<256x128xbf16>
    %c8 = arith.constant 8 : index
    %c0_57 = arith.constant 0 : index
    %c0_58 = arith.constant 0 : index
    %79 = vector.load %arg3[%c8, %c0_57, %c0_58] : memref<9x128x128xbf16, #tpu.memory_space<vmem>>, vector<1x128x128xbf16>
    %80 = vector.shape_cast %79 : vector<1x128x128xbf16> to vector<128x128xbf16>
    %cst_59 = arith.constant dense<0.000000e+00> : vector<256x128xf32>
    %81 = tpu.matmul %78, %80, %cst_59 {dimension_numbers = #tpu.dot_dimension_numbers<[1], [0], [0], [1], [0, 0, 1, 1], [], []>} : vector<256x128xbf16>, vector<128x128xbf16>, vector<256x128xf32> -> vector<256x128xf32>
    %82 = arith.addf %73, %81 : vector<256x128xf32>
    %c0_60 = arith.constant 0 : index
    %c0_61 = arith.constant 0 : index
    %83 = vector.load %arg4[%c0_60, %c0_61] : memref<1x128xf32, #tpu.memory_space<vmem>>, vector<1x128xf32>
    %84 = vector.broadcast %83 : vector<1x128xf32> to vector<256x128xf32>
    %85 = arith.addf %82, %84 : vector<256x128xf32>
    %cst_62 = arith.constant 0.000000e+00 : f32
    %86 = vector.broadcast %cst_62 : f32 to vector<256x128xf32>
    %87 = arith.cmpf oge, %85, %86 : vector<256x128xf32>
    %cst_63 = arith.constant 2.000000e-01 : f32
    %88 = vector.broadcast %cst_63 : f32 to vector<256x128xf32>
    %89 = arith.mulf %88, %85 : vector<256x128xf32>
    %90 = arith.select %87, %85, %89 : vector<256x128xi1>, vector<256x128xf32>
    %91 = vector.shape_cast %90 : vector<256x128xf32> to vector<1x16x16x128xf32>
    %92 = arith.truncf %91 : vector<1x16x16x128xf32> to vector<1x16x16x128xbf16>
    %c0_64 = arith.constant 0 : index
    %c0_65 = arith.constant 0 : index
    %c0_66 = arith.constant 0 : index
    %c0_67 = arith.constant 0 : index
    %93 = vector.load %arg5[%c0_64, %c0_65, %c0_66, %c0_67] : memref<1x16x16x128xbf16, #tpu.memory_space<vmem>>, vector<1x16x16x128xbf16>
    tpu.vector_store %arg5[%c0_64, %c0_65, %c0_66, %c0_67], %92 {strides = array<i32>} : memref<1x16x16x128xbf16, #tpu.memory_space<vmem>>, vector<1x16x16x128xbf16>,
    return
  }
  func.func @transform_0(%arg0: i32, %arg1: i32) -> (i32, i32, i32, i32) {
    %c0_i32 = arith.constant 0 : i32
    %c0_i32_0 = arith.constant 0 : i32
    %c0_i32_1 = arith.constant 0 : i32
    %c0_i32_2 = arith.constant 0 : i32
    return %arg0, %c0_i32, %c0_i32_0, %c0_i32_1 : i32, i32, i32, i32
  }
  func.func @transform_1(%arg0: i32, %arg1: i32) -> (i32, i32, i32) {
    %c0_i32 = arith.constant 0 : i32
    %c0_i32_0 = arith.constant 0 : i32
    %c0_i32_1 = arith.constant 0 : i32
    %c0_i32_2 = arith.constant 0 : i32
    return %c0_i32, %c0_i32_0, %c0_i32_1 : i32, i32, i32
  }
  func.func @transform_2(%arg0: i32, %arg1: i32) -> (i32, i32) {
    %c0_i32 = arith.constant 0 : i32
    %c0_i32_0 = arith.constant 0 : i32
    %c0_i32_1 = arith.constant 0 : i32
    return %c0_i32, %c0_i32_0 : i32, i32
  }
  func.func @transform_3(%arg0: i32, %arg1: i32) -> (i32, i32, i32, i32) {
    %c0_i32 = arith.constant 0 : i32
    %c0_i32_0 = arith.constant 0 : i32
    %c0_i32_1 = arith.constant 0 : i32
    return %arg0, %arg1, %c0_i32, %c0_i32_0 : i32, i32, i32, i32
  }
}

module attributes {stable_mosaic.version = 11 : i64} {
  func.func @_conv2_skip_kernel(%arg0: i32, %arg1: i32, %arg2: i32, %arg3: memref<1x4x10x10x128xbf16, #tpu.memory_space<vmem>>, %arg4: memref<1x4x9x9x128xbf16, #tpu.memory_space<vmem>>, %arg5: memref<36x128x128xbf16, #tpu.memory_space<vmem>>, %arg6: memref<1x128xf32, #tpu.memory_space<vmem>>, %arg7: memref<16x128x128xbf16, #tpu.memory_space<vmem>>, %arg8: memref<1x128xf32, #tpu.memory_space<vmem>>, %arg9: memref<1x8x8x128xbf16, #tpu.memory_space<vmem>>, %arg10: memref<64x128xf32, #tpu.memory_space<vmem>>, %arg11: memref<64x128xf32, #tpu.memory_space<vmem>>) attributes {dimension_semantics = [#tpu.dimension_semantics<parallel>, #tpu.dimension_semantics<parallel>, #tpu.dimension_semantics<arbitrary>], iteration_bounds = array<i64: 2, 1, 1>, scalar_prefetch = 0 : i64, scratch_operands = 2 : i64, tpu.core_type = #tpu.core_type<tc>, window_params = [{transform_indices = @transform_0, window_bounds = array<i64: 1, 4, 10, 10, 128>}, {transform_indices = @transform_1, window_bounds = array<i64: 1, 4, 9, 9, 128>}, {transform_indices = @transform_2, window_bounds = array<i64: 36, 128, 128>}, {pipeline_mode = #tpu.pipeline_mode<synchronous>, transform_indices = @transform_3, window_bounds = array<i64: 1, 128>}, {transform_indices = @transform_4, window_bounds = array<i64: 16, 128, 128>}, {pipeline_mode = #tpu.pipeline_mode<synchronous>, transform_indices = @transform_5, window_bounds = array<i64: 1, 128>}, {transform_indices = @transform_6, window_bounds = array<i64: 1, 8, 8, 128>}]} {
    %c8_i32 = arith.constant 8 : i32
    %0 = arith.muli %arg1, %c8_i32 : i32
    %c0_i32 = arith.constant 0 : i32
    %1 = arith.cmpi eq, %arg2, %c0_i32 : i32
    %2 = arith.extui %1 : i1 to i32
    %c0_i32_0 = arith.constant 0 : i32
    %3 = arith.cmpi ne, %2, %c0_i32_0 : i32
    scf.if %3 {
      %cst_440 = arith.constant 0.000000e+00 : f32
      %479 = vector.broadcast %cst_440 : f32 to vector<64x128xf32>
      %c0_441 = arith.constant 0 : index
      %c0_442 = arith.constant 0 : index
      %480 = vector.load %arg10[%c0_441, %c0_442] : memref<64x128xf32, #tpu.memory_space<vmem>>, vector<64x128xf32>
      tpu.vector_store %arg10[%c0_441, %c0_442], %479 {strides = array<i32>} : memref<64x128xf32, #tpu.memory_space<vmem>>, vector<64x128xf32>,
      %cst_443 = arith.constant 0.000000e+00 : f32
      %481 = vector.broadcast %cst_443 : f32 to vector<64x128xf32>
      %c0_444 = arith.constant 0 : index
      %c0_445 = arith.constant 0 : index
      %482 = vector.load %arg11[%c0_444, %c0_445] : memref<64x128xf32, #tpu.memory_space<vmem>>, vector<64x128xf32>
      tpu.vector_store %arg11[%c0_444, %c0_445], %481 {strides = array<i32>} : memref<64x128xf32, #tpu.memory_space<vmem>>, vector<64x128xf32>,
    } else {
    }
    %c0 = arith.constant 0 : index
    %c0_1 = arith.constant 0 : index
    %4 = vector.load %arg10[%c0, %c0_1] : memref<64x128xf32, #tpu.memory_space<vmem>>, vector<64x128xf32>
    %c0_i32_2 = arith.constant 0 : i32
    %5 = arith.addi %0, %c0_i32_2 : i32
    %c0_3 = arith.constant 0 : index
    %c0_4 = arith.constant 0 : index
    %6 = arith.index_cast %5 : i32 to index
    %c0_5 = arith.constant 0 : index
    %c0_6 = arith.constant 0 : index
    %7 = vector.load %arg3[%c0_3, %c0_4, %6, %c0_5, %c0_6] : memref<1x4x10x10x128xbf16, #tpu.memory_space<vmem>>, vector<1x1x8x8x128xbf16>
    %8 = vector.shape_cast %7 : vector<1x1x8x8x128xbf16> to vector<8x8x128xbf16>
    %9 = vector.shape_cast %8 : vector<8x8x128xbf16> to vector<64x128xbf16>
    %c0_7 = arith.constant 0 : index
    %c0_8 = arith.constant 0 : index
    %c0_9 = arith.constant 0 : index
    %10 = vector.load %arg5[%c0_7, %c0_8, %c0_9] : memref<36x128x128xbf16, #tpu.memory_space<vmem>>, vector<1x128x128xbf16>
    %11 = vector.shape_cast %10 : vector<1x128x128xbf16> to vector<128x128xbf16>
    %cst = arith.constant dense<0.000000e+00> : vector<64x128xf32>
    %12 = tpu.matmul %9, %11, %cst {dimension_numbers = #tpu.dot_dimension_numbers<[1], [0], [0], [1], [0, 0, 1, 1], [], []>} : vector<64x128xbf16>, vector<128x128xbf16>, vector<64x128xf32> -> vector<64x128xf32>
    %13 = arith.addf %4, %12 : vector<64x128xf32>
    %c0_i32_10 = arith.constant 0 : i32
    %14 = arith.addi %0, %c0_i32_10 : i32
    %c0_11 = arith.constant 0 : index
    %c1 = arith.constant 1 : index
    %15 = arith.index_cast %14 : i32 to index
    %c0_12 = arith.constant 0 : index
    %c0_13 = arith.constant 0 : index
    %16 = vector.load %arg3[%c0_11, %c1, %15, %c0_12, %c0_13] : memref<1x4x10x10x128xbf16, #tpu.memory_space<vmem>>, vector<1x1x8x8x128xbf16>
    %17 = vector.shape_cast %16 : vector<1x1x8x8x128xbf16> to vector<8x8x128xbf16>
    %18 = vector.shape_cast %17 : vector<8x8x128xbf16> to vector<64x128xbf16>
    %c1_14 = arith.constant 1 : index
    %c0_15 = arith.constant 0 : index
    %c0_16 = arith.constant 0 : index
    %19 = vector.load %arg5[%c1_14, %c0_15, %c0_16] : memref<36x128x128xbf16, #tpu.memory_space<vmem>>, vector<1x128x128xbf16>
    %20 = vector.shape_cast %19 : vector<1x128x128xbf16> to vector<128x128xbf16>
    %cst_17 = arith.constant dense<0.000000e+00> : vector<64x128xf32>
    %21 = tpu.matmul %18, %20, %cst_17 {dimension_numbers = #tpu.dot_dimension_numbers<[1], [0], [0], [1], [0, 0, 1, 1], [], []>} : vector<64x128xbf16>, vector<128x128xbf16>, vector<64x128xf32> -> vector<64x128xf32>
    %22 = arith.addf %13, %21 : vector<64x128xf32>
    %c0_i32_18 = arith.constant 0 : i32
    %23 = arith.addi %0, %c0_i32_18 : i32
    %c0_19 = arith.constant 0 : index
    %c0_20 = arith.constant 0 : index
    %24 = arith.index_cast %23 : i32 to index
    %c1_21 = arith.constant 1 : index
    %c0_22 = arith.constant 0 : index
    %25 = vector.load %arg3[%c0_19, %c0_20, %24, %c1_21, %c0_22] : memref<1x4x10x10x128xbf16, #tpu.memory_space<vmem>>, vector<1x1x8x8x128xbf16>
    %26 = vector.shape_cast %25 : vector<1x1x8x8x128xbf16> to vector<8x8x128xbf16>
    %27 = vector.shape_cast %26 : vector<8x8x128xbf16> to vector<64x128xbf16>
    %c2 = arith.constant 2 : index
    %c0_23 = arith.constant 0 : index
    %c0_24 = arith.constant 0 : index
    %28 = vector.load %arg5[%c2, %c0_23, %c0_24] : memref<36x128x128xbf16, #tpu.memory_space<vmem>>, vector<1x128x128xbf16>
    %29 = vector.shape_cast %28 : vector<1x128x128xbf16> to vector<128x128xbf16>
    %cst_25 = arith.constant dense<0.000000e+00> : vector<64x128xf32>
    %30 = tpu.matmul %27, %29, %cst_25 {dimension_numbers = #tpu.dot_dimension_numbers<[1], [0], [0], [1], [0, 0, 1, 1], [], []>} : vector<64x128xbf16>, vector<128x128xbf16>, vector<64x128xf32> -> vector<64x128xf32>
    %31 = arith.addf %22, %30 : vector<64x128xf32>
    %c0_i32_26 = arith.constant 0 : i32
    %32 = arith.addi %0, %c0_i32_26 : i32
    %c0_27 = arith.constant 0 : index
    %c1_28 = arith.constant 1 : index
    %33 = arith.index_cast %32 : i32 to index
    %c1_29 = arith.constant 1 : index
    %c0_30 = arith.constant 0 : index
    %34 = vector.load %arg3[%c0_27, %c1_28, %33, %c1_29, %c0_30] : memref<1x4x10x10x128xbf16, #tpu.memory_space<vmem>>, vector<1x1x8x8x128xbf16>
    %35 = vector.shape_cast %34 : vector<1x1x8x8x128xbf16> to vector<8x8x128xbf16>
    %36 = vector.shape_cast %35 : vector<8x8x128xbf16> to vector<64x128xbf16>
    %c3 = arith.constant 3 : index
    %c0_31 = arith.constant 0 : index
    %c0_32 = arith.constant 0 : index
    %37 = vector.load %arg5[%c3, %c0_31, %c0_32] : memref<36x128x128xbf16, #tpu.memory_space<vmem>>, vector<1x128x128xbf16>
    %38 = vector.shape_cast %37 : vector<1x128x128xbf16> to vector<128x128xbf16>
    %cst_33 = arith.constant dense<0.000000e+00> : vector<64x128xf32>
    %39 = tpu.matmul %36, %38, %cst_33 {dimension_numbers = #tpu.dot_dimension_numbers<[1], [0], [0], [1], [0, 0, 1, 1], [], []>} : vector<64x128xbf16>, vector<128x128xbf16>, vector<64x128xf32> -> vector<64x128xf32>
    %40 = arith.addf %31, %39 : vector<64x128xf32>
    %c0_i32_34 = arith.constant 0 : i32
    %41 = arith.addi %0, %c0_i32_34 : i32
    %c0_35 = arith.constant 0 : index
    %c0_36 = arith.constant 0 : index
    %42 = arith.index_cast %41 : i32 to index
    %c2_37 = arith.constant 2 : index
    %c0_38 = arith.constant 0 : index
    %43 = vector.load %arg3[%c0_35, %c0_36, %42, %c2_37, %c0_38] : memref<1x4x10x10x128xbf16, #tpu.memory_space<vmem>>, vector<1x1x8x8x128xbf16>
    %44 = vector.shape_cast %43 : vector<1x1x8x8x128xbf16> to vector<8x8x128xbf16>
    %45 = vector.shape_cast %44 : vector<8x8x128xbf16> to vector<64x128xbf16>
    %c4 = arith.constant 4 : index
    %c0_39 = arith.constant 0 : index
    %c0_40 = arith.constant 0 : index
    %46 = vector.load %arg5[%c4, %c0_39, %c0_40] : memref<36x128x128xbf16, #tpu.memory_space<vmem>>, vector<1x128x128xbf16>
    %47 = vector.shape_cast %46 : vector<1x128x128xbf16> to vector<128x128xbf16>
    %cst_41 = arith.constant dense<0.000000e+00> : vector<64x128xf32>
    %48 = tpu.matmul %45, %47, %cst_41 {dimension_numbers = #tpu.dot_dimension_numbers<[1], [0], [0], [1], [0, 0, 1, 1], [], []>} : vector<64x128xbf16>, vector<128x128xbf16>, vector<64x128xf32> -> vector<64x128xf32>
    %49 = arith.addf %40, %48 : vector<64x128xf32>
    %c0_i32_42 = arith.constant 0 : i32
    %50 = arith.addi %0, %c0_i32_42 : i32
    %c0_43 = arith.constant 0 : index
    %c1_44 = arith.constant 1 : index
    %51 = arith.index_cast %50 : i32 to index
    %c2_45 = arith.constant 2 : index
    %c0_46 = arith.constant 0 : index
    %52 = vector.load %arg3[%c0_43, %c1_44, %51, %c2_45, %c0_46] : memref<1x4x10x10x128xbf16, #tpu.memory_space<vmem>>, vector<1x1x8x8x128xbf16>
    %53 = vector.shape_cast %52 : vector<1x1x8x8x128xbf16> to vector<8x8x128xbf16>
    %54 = vector.shape_cast %53 : vector<8x8x128xbf16> to vector<64x128xbf16>
    %c5 = arith.constant 5 : index
    %c0_47 = arith.constant 0 : index
    %c0_48 = arith.constant 0 : index
    %55 = vector.load %arg5[%c5, %c0_47, %c0_48] : memref<36x128x128xbf16, #tpu.memory_space<vmem>>, vector<1x128x128xbf16>
    %56 = vector.shape_cast %55 : vector<1x128x128xbf16> to vector<128x128xbf16>
    %cst_49 = arith.constant dense<0.000000e+00> : vector<64x128xf32>
    %57 = tpu.matmul %54, %56, %cst_49 {dimension_numbers = #tpu.dot_dimension_numbers<[1], [0], [0], [1], [0, 0, 1, 1], [], []>} : vector<64x128xbf16>, vector<128x128xbf16>, vector<64x128xf32> -> vector<64x128xf32>
    %58 = arith.addf %49, %57 : vector<64x128xf32>
    %c0_i32_50 = arith.constant 0 : i32
    %59 = arith.addi %0, %c0_i32_50 : i32
    %c0_51 = arith.constant 0 : index
    %c2_52 = arith.constant 2 : index
    %60 = arith.index_cast %59 : i32 to index
    %c0_53 = arith.constant 0 : index
    %c0_54 = arith.constant 0 : index
    %61 = vector.load %arg3[%c0_51, %c2_52, %60, %c0_53, %c0_54] : memref<1x4x10x10x128xbf16, #tpu.memory_space<vmem>>, vector<1x1x8x8x128xbf16>
    %62 = vector.shape_cast %61 : vector<1x1x8x8x128xbf16> to vector<8x8x128xbf16>
    %63 = vector.shape_cast %62 : vector<8x8x128xbf16> to vector<64x128xbf16>
    %c6 = arith.constant 6 : index
    %c0_55 = arith.constant 0 : index
    %c0_56 = arith.constant 0 : index
    %64 = vector.load %arg5[%c6, %c0_55, %c0_56] : memref<36x128x128xbf16, #tpu.memory_space<vmem>>, vector<1x128x128xbf16>
    %65 = vector.shape_cast %64 : vector<1x128x128xbf16> to vector<128x128xbf16>
    %cst_57 = arith.constant dense<0.000000e+00> : vector<64x128xf32>
    %66 = tpu.matmul %63, %65, %cst_57 {dimension_numbers = #tpu.dot_dimension_numbers<[1], [0], [0], [1], [0, 0, 1, 1], [], []>} : vector<64x128xbf16>, vector<128x128xbf16>, vector<64x128xf32> -> vector<64x128xf32>
    %67 = arith.addf %58, %66 : vector<64x128xf32>
    %c0_i32_58 = arith.constant 0 : i32
    %68 = arith.addi %0, %c0_i32_58 : i32
    %c0_59 = arith.constant 0 : index
    %c3_60 = arith.constant 3 : index
    %69 = arith.index_cast %68 : i32 to index
    %c0_61 = arith.constant 0 : index
    %c0_62 = arith.constant 0 : index
    %70 = vector.load %arg3[%c0_59, %c3_60, %69, %c0_61, %c0_62] : memref<1x4x10x10x128xbf16, #tpu.memory_space<vmem>>, vector<1x1x8x8x128xbf16>
    %71 = vector.shape_cast %70 : vector<1x1x8x8x128xbf16> to vector<8x8x128xbf16>
    %72 = vector.shape_cast %71 : vector<8x8x128xbf16> to vector<64x128xbf16>
    %c7 = arith.constant 7 : index
    %c0_63 = arith.constant 0 : index
    %c0_64 = arith.constant 0 : index
    %73 = vector.load %arg5[%c7, %c0_63, %c0_64] : memref<36x128x128xbf16, #tpu.memory_space<vmem>>, vector<1x128x128xbf16>
    %74 = vector.shape_cast %73 : vector<1x128x128xbf16> to vector<128x128xbf16>
    %cst_65 = arith.constant dense<0.000000e+00> : vector<64x128xf32>
    %75 = tpu.matmul %72, %74, %cst_65 {dimension_numbers = #tpu.dot_dimension_numbers<[1], [0], [0], [1], [0, 0, 1, 1], [], []>} : vector<64x128xbf16>, vector<128x128xbf16>, vector<64x128xf32> -> vector<64x128xf32>
    %76 = arith.addf %67, %75 : vector<64x128xf32>
    %c0_i32_66 = arith.constant 0 : i32
    %77 = arith.addi %0, %c0_i32_66 : i32
    %c0_67 = arith.constant 0 : index
    %c2_68 = arith.constant 2 : index
    %78 = arith.index_cast %77 : i32 to index
    %c1_69 = arith.constant 1 : index
    %c0_70 = arith.constant 0 : index
    %79 = vector.load %arg3[%c0_67, %c2_68, %78, %c1_69, %c0_70] : memref<1x4x10x10x128xbf16, #tpu.memory_space<vmem>>, vector<1x1x8x8x128xbf16>
    %80 = vector.shape_cast %79 : vector<1x1x8x8x128xbf16> to vector<8x8x128xbf16>
    %81 = vector.shape_cast %80 : vector<8x8x128xbf16> to vector<64x128xbf16>
    %c8 = arith.constant 8 : index
    %c0_71 = arith.constant 0 : index
    %c0_72 = arith.constant 0 : index
    %82 = vector.load %arg5[%c8, %c0_71, %c0_72] : memref<36x128x128xbf16, #tpu.memory_space<vmem>>, vector<1x128x128xbf16>
    %83 = vector.shape_cast %82 : vector<1x128x128xbf16> to vector<128x128xbf16>
    %cst_73 = arith.constant dense<0.000000e+00> : vector<64x128xf32>
    %84 = tpu.matmul %81, %83, %cst_73 {dimension_numbers = #tpu.dot_dimension_numbers<[1], [0], [0], [1], [0, 0, 1, 1], [], []>} : vector<64x128xbf16>, vector<128x128xbf16>, vector<64x128xf32> -> vector<64x128xf32>
    %85 = arith.addf %76, %84 : vector<64x128xf32>
    %c0_i32_74 = arith.constant 0 : i32
    %86 = arith.addi %0, %c0_i32_74 : i32
    %c0_75 = arith.constant 0 : index
    %c3_76 = arith.constant 3 : index
    %87 = arith.index_cast %86 : i32 to index
    %c1_77 = arith.constant 1 : index
    %c0_78 = arith.constant 0 : index
    %88 = vector.load %arg3[%c0_75, %c3_76, %87, %c1_77, %c0_78] : memref<1x4x10x10x128xbf16, #tpu.memory_space<vmem>>, vector<1x1x8x8x128xbf16>
    %89 = vector.shape_cast %88 : vector<1x1x8x8x128xbf16> to vector<8x8x128xbf16>
    %90 = vector.shape_cast %89 : vector<8x8x128xbf16> to vector<64x128xbf16>
    %c9 = arith.constant 9 : index
    %c0_79 = arith.constant 0 : index
    %c0_80 = arith.constant 0 : index
    %91 = vector.load %arg5[%c9, %c0_79, %c0_80] : memref<36x128x128xbf16, #tpu.memory_space<vmem>>, vector<1x128x128xbf16>
    %92 = vector.shape_cast %91 : vector<1x128x128xbf16> to vector<128x128xbf16>
    %cst_81 = arith.constant dense<0.000000e+00> : vector<64x128xf32>
    %93 = tpu.matmul %90, %92, %cst_81 {dimension_numbers = #tpu.dot_dimension_numbers<[1], [0], [0], [1], [0, 0, 1, 1], [], []>} : vector<64x128xbf16>, vector<128x128xbf16>, vector<64x128xf32> -> vector<64x128xf32>
    %94 = arith.addf %85, %93 : vector<64x128xf32>
    %c0_i32_82 = arith.constant 0 : i32
    %95 = arith.addi %0, %c0_i32_82 : i32
    %c0_83 = arith.constant 0 : index
    %c2_84 = arith.constant 2 : index
    %96 = arith.index_cast %95 : i32 to index
    %c2_85 = arith.constant 2 : index
    %c0_86 = arith.constant 0 : index
    %97 = vector.load %arg3[%c0_83, %c2_84, %96, %c2_85, %c0_86] : memref<1x4x10x10x128xbf16, #tpu.memory_space<vmem>>, vector<1x1x8x8x128xbf16>
    %98 = vector.shape_cast %97 : vector<1x1x8x8x128xbf16> to vector<8x8x128xbf16>
    %99 = vector.shape_cast %98 : vector<8x8x128xbf16> to vector<64x128xbf16>
    %c10 = arith.constant 10 : index
    %c0_87 = arith.constant 0 : index
    %c0_88 = arith.constant 0 : index
    %100 = vector.load %arg5[%c10, %c0_87, %c0_88] : memref<36x128x128xbf16, #tpu.memory_space<vmem>>, vector<1x128x128xbf16>
    %101 = vector.shape_cast %100 : vector<1x128x128xbf16> to vector<128x128xbf16>
    %cst_89 = arith.constant dense<0.000000e+00> : vector<64x128xf32>
    %102 = tpu.matmul %99, %101, %cst_89 {dimension_numbers = #tpu.dot_dimension_numbers<[1], [0], [0], [1], [0, 0, 1, 1], [], []>} : vector<64x128xbf16>, vector<128x128xbf16>, vector<64x128xf32> -> vector<64x128xf32>
    %103 = arith.addf %94, %102 : vector<64x128xf32>
    %c0_i32_90 = arith.constant 0 : i32
    %104 = arith.addi %0, %c0_i32_90 : i32
    %c0_91 = arith.constant 0 : index
    %c3_92 = arith.constant 3 : index
    %105 = arith.index_cast %104 : i32 to index
    %c2_93 = arith.constant 2 : index
    %c0_94 = arith.constant 0 : index
    %106 = vector.load %arg3[%c0_91, %c3_92, %105, %c2_93, %c0_94] : memref<1x4x10x10x128xbf16, #tpu.memory_space<vmem>>, vector<1x1x8x8x128xbf16>
    %107 = vector.shape_cast %106 : vector<1x1x8x8x128xbf16> to vector<8x8x128xbf16>
    %108 = vector.shape_cast %107 : vector<8x8x128xbf16> to vector<64x128xbf16>
    %c11 = arith.constant 11 : index
    %c0_95 = arith.constant 0 : index
    %c0_96 = arith.constant 0 : index
    %109 = vector.load %arg5[%c11, %c0_95, %c0_96] : memref<36x128x128xbf16, #tpu.memory_space<vmem>>, vector<1x128x128xbf16>
    %110 = vector.shape_cast %109 : vector<1x128x128xbf16> to vector<128x128xbf16>
    %cst_97 = arith.constant dense<0.000000e+00> : vector<64x128xf32>
    %111 = tpu.matmul %108, %110, %cst_97 {dimension_numbers = #tpu.dot_dimension_numbers<[1], [0], [0], [1], [0, 0, 1, 1], [], []>} : vector<64x128xbf16>, vector<128x128xbf16>, vector<64x128xf32> -> vector<64x128xf32>
    %112 = arith.addf %103, %111 : vector<64x128xf32>
    %c1_i32 = arith.constant 1 : i32
    %113 = arith.addi %0, %c1_i32 : i32
    %c0_98 = arith.constant 0 : index
    %c0_99 = arith.constant 0 : index
    %114 = arith.index_cast %113 : i32 to index
    %c0_100 = arith.constant 0 : index
    %c0_101 = arith.constant 0 : index
    %115 = vector.load %arg3[%c0_98, %c0_99, %114, %c0_100, %c0_101] : memref<1x4x10x10x128xbf16, #tpu.memory_space<vmem>>, vector<1x1x8x8x128xbf16>
    %116 = vector.shape_cast %115 : vector<1x1x8x8x128xbf16> to vector<8x8x128xbf16>
    %117 = vector.shape_cast %116 : vector<8x8x128xbf16> to vector<64x128xbf16>
    %c12 = arith.constant 12 : index
    %c0_102 = arith.constant 0 : index
    %c0_103 = arith.constant 0 : index
    %118 = vector.load %arg5[%c12, %c0_102, %c0_103] : memref<36x128x128xbf16, #tpu.memory_space<vmem>>, vector<1x128x128xbf16>
    %119 = vector.shape_cast %118 : vector<1x128x128xbf16> to vector<128x128xbf16>
    %cst_104 = arith.constant dense<0.000000e+00> : vector<64x128xf32>
    %120 = tpu.matmul %117, %119, %cst_104 {dimension_numbers = #tpu.dot_dimension_numbers<[1], [0], [0], [1], [0, 0, 1, 1], [], []>} : vector<64x128xbf16>, vector<128x128xbf16>, vector<64x128xf32> -> vector<64x128xf32>
    %121 = arith.addf %112, %120 : vector<64x128xf32>
    %c1_i32_105 = arith.constant 1 : i32
    %122 = arith.addi %0, %c1_i32_105 : i32
    %c0_106 = arith.constant 0 : index
    %c1_107 = arith.constant 1 : index
    %123 = arith.index_cast %122 : i32 to index
    %c0_108 = arith.constant 0 : index
    %c0_109 = arith.constant 0 : index
    %124 = vector.load %arg3[%c0_106, %c1_107, %123, %c0_108, %c0_109] : memref<1x4x10x10x128xbf16, #tpu.memory_space<vmem>>, vector<1x1x8x8x128xbf16>
    %125 = vector.shape_cast %124 : vector<1x1x8x8x128xbf16> to vector<8x8x128xbf16>
    %126 = vector.shape_cast %125 : vector<8x8x128xbf16> to vector<64x128xbf16>
    %c13 = arith.constant 13 : index
    %c0_110 = arith.constant 0 : index
    %c0_111 = arith.constant 0 : index
    %127 = vector.load %arg5[%c13, %c0_110, %c0_111] : memref<36x128x128xbf16, #tpu.memory_space<vmem>>, vector<1x128x128xbf16>
    %128 = vector.shape_cast %127 : vector<1x128x128xbf16> to vector<128x128xbf16>
    %cst_112 = arith.constant dense<0.000000e+00> : vector<64x128xf32>
    %129 = tpu.matmul %126, %128, %cst_112 {dimension_numbers = #tpu.dot_dimension_numbers<[1], [0], [0], [1], [0, 0, 1, 1], [], []>} : vector<64x128xbf16>, vector<128x128xbf16>, vector<64x128xf32> -> vector<64x128xf32>
    %130 = arith.addf %121, %129 : vector<64x128xf32>
    %c1_i32_113 = arith.constant 1 : i32
    %131 = arith.addi %0, %c1_i32_113 : i32
    %c0_114 = arith.constant 0 : index
    %c0_115 = arith.constant 0 : index
    %132 = arith.index_cast %131 : i32 to index
    %c1_116 = arith.constant 1 : index
    %c0_117 = arith.constant 0 : index
    %133 = vector.load %arg3[%c0_114, %c0_115, %132, %c1_116, %c0_117] : memref<1x4x10x10x128xbf16, #tpu.memory_space<vmem>>, vector<1x1x8x8x128xbf16>
    %134 = vector.shape_cast %133 : vector<1x1x8x8x128xbf16> to vector<8x8x128xbf16>
    %135 = vector.shape_cast %134 : vector<8x8x128xbf16> to vector<64x128xbf16>
    %c14 = arith.constant 14 : index
    %c0_118 = arith.constant 0 : index
    %c0_119 = arith.constant 0 : index
    %136 = vector.load %arg5[%c14, %c0_118, %c0_119] : memref<36x128x128xbf16, #tpu.memory_space<vmem>>, vector<1x128x128xbf16>
    %137 = vector.shape_cast %136 : vector<1x128x128xbf16> to vector<128x128xbf16>
    %cst_120 = arith.constant dense<0.000000e+00> : vector<64x128xf32>
    %138 = tpu.matmul %135, %137, %cst_120 {dimension_numbers = #tpu.dot_dimension_numbers<[1], [0], [0], [1], [0, 0, 1, 1], [], []>} : vector<64x128xbf16>, vector<128x128xbf16>, vector<64x128xf32> -> vector<64x128xf32>
    %139 = arith.addf %130, %138 : vector<64x128xf32>
    %c1_i32_121 = arith.constant 1 : i32
    %140 = arith.addi %0, %c1_i32_121 : i32
    %c0_122 = arith.constant 0 : index
    %c1_123 = arith.constant 1 : index
    %141 = arith.index_cast %140 : i32 to index
    %c1_124 = arith.constant 1 : index
    %c0_125 = arith.constant 0 : index
    %142 = vector.load %arg3[%c0_122, %c1_123, %141, %c1_124, %c0_125] : memref<1x4x10x10x128xbf16, #tpu.memory_space<vmem>>, vector<1x1x8x8x128xbf16>
    %143 = vector.shape_cast %142 : vector<1x1x8x8x128xbf16> to vector<8x8x128xbf16>
    %144 = vector.shape_cast %143 : vector<8x8x128xbf16> to vector<64x128xbf16>
    %c15 = arith.constant 15 : index
    %c0_126 = arith.constant 0 : index
    %c0_127 = arith.constant 0 : index
    %145 = vector.load %arg5[%c15, %c0_126, %c0_127] : memref<36x128x128xbf16, #tpu.memory_space<vmem>>, vector<1x128x128xbf16>
    %146 = vector.shape_cast %145 : vector<1x128x128xbf16> to vector<128x128xbf16>
    %cst_128 = arith.constant dense<0.000000e+00> : vector<64x128xf32>
    %147 = tpu.matmul %144, %146, %cst_128 {dimension_numbers = #tpu.dot_dimension_numbers<[1], [0], [0], [1], [0, 0, 1, 1], [], []>} : vector<64x128xbf16>, vector<128x128xbf16>, vector<64x128xf32> -> vector<64x128xf32>
    %148 = arith.addf %139, %147 : vector<64x128xf32>
    %c1_i32_129 = arith.constant 1 : i32
    %149 = arith.addi %0, %c1_i32_129 : i32
    %c0_130 = arith.constant 0 : index
    %c0_131 = arith.constant 0 : index
    %150 = arith.index_cast %149 : i32 to index
    %c2_132 = arith.constant 2 : index
    %c0_133 = arith.constant 0 : index
    %151 = vector.load %arg3[%c0_130, %c0_131, %150, %c2_132, %c0_133] : memref<1x4x10x10x128xbf16, #tpu.memory_space<vmem>>, vector<1x1x8x8x128xbf16>
    %152 = vector.shape_cast %151 : vector<1x1x8x8x128xbf16> to vector<8x8x128xbf16>
    %153 = vector.shape_cast %152 : vector<8x8x128xbf16> to vector<64x128xbf16>
    %c16 = arith.constant 16 : index
    %c0_134 = arith.constant 0 : index
    %c0_135 = arith.constant 0 : index
    %154 = vector.load %arg5[%c16, %c0_134, %c0_135] : memref<36x128x128xbf16, #tpu.memory_space<vmem>>, vector<1x128x128xbf16>
    %155 = vector.shape_cast %154 : vector<1x128x128xbf16> to vector<128x128xbf16>
    %cst_136 = arith.constant dense<0.000000e+00> : vector<64x128xf32>
    %156 = tpu.matmul %153, %155, %cst_136 {dimension_numbers = #tpu.dot_dimension_numbers<[1], [0], [0], [1], [0, 0, 1, 1], [], []>} : vector<64x128xbf16>, vector<128x128xbf16>, vector<64x128xf32> -> vector<64x128xf32>
    %157 = arith.addf %148, %156 : vector<64x128xf32>
    %c1_i32_137 = arith.constant 1 : i32
    %158 = arith.addi %0, %c1_i32_137 : i32
    %c0_138 = arith.constant 0 : index
    %c1_139 = arith.constant 1 : index
    %159 = arith.index_cast %158 : i32 to index
    %c2_140 = arith.constant 2 : index
    %c0_141 = arith.constant 0 : index
    %160 = vector.load %arg3[%c0_138, %c1_139, %159, %c2_140, %c0_141] : memref<1x4x10x10x128xbf16, #tpu.memory_space<vmem>>, vector<1x1x8x8x128xbf16>
    %161 = vector.shape_cast %160 : vector<1x1x8x8x128xbf16> to vector<8x8x128xbf16>
    %162 = vector.shape_cast %161 : vector<8x8x128xbf16> to vector<64x128xbf16>
    %c17 = arith.constant 17 : index
    %c0_142 = arith.constant 0 : index
    %c0_143 = arith.constant 0 : index
    %163 = vector.load %arg5[%c17, %c0_142, %c0_143] : memref<36x128x128xbf16, #tpu.memory_space<vmem>>, vector<1x128x128xbf16>
    %164 = vector.shape_cast %163 : vector<1x128x128xbf16> to vector<128x128xbf16>
    %cst_144 = arith.constant dense<0.000000e+00> : vector<64x128xf32>
    %165 = tpu.matmul %162, %164, %cst_144 {dimension_numbers = #tpu.dot_dimension_numbers<[1], [0], [0], [1], [0, 0, 1, 1], [], []>} : vector<64x128xbf16>, vector<128x128xbf16>, vector<64x128xf32> -> vector<64x128xf32>
    %166 = arith.addf %157, %165 : vector<64x128xf32>
    %c1_i32_145 = arith.constant 1 : i32
    %167 = arith.addi %0, %c1_i32_145 : i32
    %c0_146 = arith.constant 0 : index
    %c2_147 = arith.constant 2 : index
    %168 = arith.index_cast %167 : i32 to index
    %c0_148 = arith.constant 0 : index
    %c0_149 = arith.constant 0 : index
    %169 = vector.load %arg3[%c0_146, %c2_147, %168, %c0_148, %c0_149] : memref<1x4x10x10x128xbf16, #tpu.memory_space<vmem>>, vector<1x1x8x8x128xbf16>
    %170 = vector.shape_cast %169 : vector<1x1x8x8x128xbf16> to vector<8x8x128xbf16>
    %171 = vector.shape_cast %170 : vector<8x8x128xbf16> to vector<64x128xbf16>
    %c18 = arith.constant 18 : index
    %c0_150 = arith.constant 0 : index
    %c0_151 = arith.constant 0 : index
    %172 = vector.load %arg5[%c18, %c0_150, %c0_151] : memref<36x128x128xbf16, #tpu.memory_space<vmem>>, vector<1x128x128xbf16>
    %173 = vector.shape_cast %172 : vector<1x128x128xbf16> to vector<128x128xbf16>
    %cst_152 = arith.constant dense<0.000000e+00> : vector<64x128xf32>
    %174 = tpu.matmul %171, %173, %cst_152 {dimension_numbers = #tpu.dot_dimension_numbers<[1], [0], [0], [1], [0, 0, 1, 1], [], []>} : vector<64x128xbf16>, vector<128x128xbf16>, vector<64x128xf32> -> vector<64x128xf32>
    %175 = arith.addf %166, %174 : vector<64x128xf32>
    %c1_i32_153 = arith.constant 1 : i32
    %176 = arith.addi %0, %c1_i32_153 : i32
    %c0_154 = arith.constant 0 : index
    %c3_155 = arith.constant 3 : index
    %177 = arith.index_cast %176 : i32 to index
    %c0_156 = arith.constant 0 : index
    %c0_157 = arith.constant 0 : index
    %178 = vector.load %arg3[%c0_154, %c3_155, %177, %c0_156, %c0_157] : memref<1x4x10x10x128xbf16, #tpu.memory_space<vmem>>, vector<1x1x8x8x128xbf16>
    %179 = vector.shape_cast %178 : vector<1x1x8x8x128xbf16> to vector<8x8x128xbf16>
    %180 = vector.shape_cast %179 : vector<8x8x128xbf16> to vector<64x128xbf16>
    %c19 = arith.constant 19 : index
    %c0_158 = arith.constant 0 : index
    %c0_159 = arith.constant 0 : index
    %181 = vector.load %arg5[%c19, %c0_158, %c0_159] : memref<36x128x128xbf16, #tpu.memory_space<vmem>>, vector<1x128x128xbf16>
    %182 = vector.shape_cast %181 : vector<1x128x128xbf16> to vector<128x128xbf16>
    %cst_160 = arith.constant dense<0.000000e+00> : vector<64x128xf32>
    %183 = tpu.matmul %180, %182, %cst_160 {dimension_numbers = #tpu.dot_dimension_numbers<[1], [0], [0], [1], [0, 0, 1, 1], [], []>} : vector<64x128xbf16>, vector<128x128xbf16>, vector<64x128xf32> -> vector<64x128xf32>
    %184 = arith.addf %175, %183 : vector<64x128xf32>
    %c1_i32_161 = arith.constant 1 : i32
    %185 = arith.addi %0, %c1_i32_161 : i32
    %c0_162 = arith.constant 0 : index
    %c2_163 = arith.constant 2 : index
    %186 = arith.index_cast %185 : i32 to index
    %c1_164 = arith.constant 1 : index
    %c0_165 = arith.constant 0 : index
    %187 = vector.load %arg3[%c0_162, %c2_163, %186, %c1_164, %c0_165] : memref<1x4x10x10x128xbf16, #tpu.memory_space<vmem>>, vector<1x1x8x8x128xbf16>
    %188 = vector.shape_cast %187 : vector<1x1x8x8x128xbf16> to vector<8x8x128xbf16>
    %189 = vector.shape_cast %188 : vector<8x8x128xbf16> to vector<64x128xbf16>
    %c20 = arith.constant 20 : index
    %c0_166 = arith.constant 0 : index
    %c0_167 = arith.constant 0 : index
    %190 = vector.load %arg5[%c20, %c0_166, %c0_167] : memref<36x128x128xbf16, #tpu.memory_space<vmem>>, vector<1x128x128xbf16>
    %191 = vector.shape_cast %190 : vector<1x128x128xbf16> to vector<128x128xbf16>
    %cst_168 = arith.constant dense<0.000000e+00> : vector<64x128xf32>
    %192 = tpu.matmul %189, %191, %cst_168 {dimension_numbers = #tpu.dot_dimension_numbers<[1], [0], [0], [1], [0, 0, 1, 1], [], []>} : vector<64x128xbf16>, vector<128x128xbf16>, vector<64x128xf32> -> vector<64x128xf32>
    %193 = arith.addf %184, %192 : vector<64x128xf32>
    %c1_i32_169 = arith.constant 1 : i32
    %194 = arith.addi %0, %c1_i32_169 : i32
    %c0_170 = arith.constant 0 : index
    %c3_171 = arith.constant 3 : index
    %195 = arith.index_cast %194 : i32 to index
    %c1_172 = arith.constant 1 : index
    %c0_173 = arith.constant 0 : index
    %196 = vector.load %arg3[%c0_170, %c3_171, %195, %c1_172, %c0_173] : memref<1x4x10x10x128xbf16, #tpu.memory_space<vmem>>, vector<1x1x8x8x128xbf16>
    %197 = vector.shape_cast %196 : vector<1x1x8x8x128xbf16> to vector<8x8x128xbf16>
    %198 = vector.shape_cast %197 : vector<8x8x128xbf16> to vector<64x128xbf16>
    %c21 = arith.constant 21 : index
    %c0_174 = arith.constant 0 : index
    %c0_175 = arith.constant 0 : index
    %199 = vector.load %arg5[%c21, %c0_174, %c0_175] : memref<36x128x128xbf16, #tpu.memory_space<vmem>>, vector<1x128x128xbf16>
    %200 = vector.shape_cast %199 : vector<1x128x128xbf16> to vector<128x128xbf16>
    %cst_176 = arith.constant dense<0.000000e+00> : vector<64x128xf32>
    %201 = tpu.matmul %198, %200, %cst_176 {dimension_numbers = #tpu.dot_dimension_numbers<[1], [0], [0], [1], [0, 0, 1, 1], [], []>} : vector<64x128xbf16>, vector<128x128xbf16>, vector<64x128xf32> -> vector<64x128xf32>
    %202 = arith.addf %193, %201 : vector<64x128xf32>
    %c1_i32_177 = arith.constant 1 : i32
    %203 = arith.addi %0, %c1_i32_177 : i32
    %c0_178 = arith.constant 0 : index
    %c2_179 = arith.constant 2 : index
    %204 = arith.index_cast %203 : i32 to index
    %c2_180 = arith.constant 2 : index
    %c0_181 = arith.constant 0 : index
    %205 = vector.load %arg3[%c0_178, %c2_179, %204, %c2_180, %c0_181] : memref<1x4x10x10x128xbf16, #tpu.memory_space<vmem>>, vector<1x1x8x8x128xbf16>
    %206 = vector.shape_cast %205 : vector<1x1x8x8x128xbf16> to vector<8x8x128xbf16>
    %207 = vector.shape_cast %206 : vector<8x8x128xbf16> to vector<64x128xbf16>
    %c22 = arith.constant 22 : index
    %c0_182 = arith.constant 0 : index
    %c0_183 = arith.constant 0 : index
    %208 = vector.load %arg5[%c22, %c0_182, %c0_183] : memref<36x128x128xbf16, #tpu.memory_space<vmem>>, vector<1x128x128xbf16>
    %209 = vector.shape_cast %208 : vector<1x128x128xbf16> to vector<128x128xbf16>
    %cst_184 = arith.constant dense<0.000000e+00> : vector<64x128xf32>
    %210 = tpu.matmul %207, %209, %cst_184 {dimension_numbers = #tpu.dot_dimension_numbers<[1], [0], [0], [1], [0, 0, 1, 1], [], []>} : vector<64x128xbf16>, vector<128x128xbf16>, vector<64x128xf32> -> vector<64x128xf32>
    %211 = arith.addf %202, %210 : vector<64x128xf32>
    %c1_i32_185 = arith.constant 1 : i32
    %212 = arith.addi %0, %c1_i32_185 : i32
    %c0_186 = arith.constant 0 : index
    %c3_187 = arith.constant 3 : index
    %213 = arith.index_cast %212 : i32 to index
    %c2_188 = arith.constant 2 : index
    %c0_189 = arith.constant 0 : index
    %214 = vector.load %arg3[%c0_186, %c3_187, %213, %c2_188, %c0_189] : memref<1x4x10x10x128xbf16, #tpu.memory_space<vmem>>, vector<1x1x8x8x128xbf16>
    %215 = vector.shape_cast %214 : vector<1x1x8x8x128xbf16> to vector<8x8x128xbf16>
    %216 = vector.shape_cast %215 : vector<8x8x128xbf16> to vector<64x128xbf16>
    %c23 = arith.constant 23 : index
    %c0_190 = arith.constant 0 : index
    %c0_191 = arith.constant 0 : index
    %217 = vector.load %arg5[%c23, %c0_190, %c0_191] : memref<36x128x128xbf16, #tpu.memory_space<vmem>>, vector<1x128x128xbf16>
    %218 = vector.shape_cast %217 : vector<1x128x128xbf16> to vector<128x128xbf16>
    %cst_192 = arith.constant dense<0.000000e+00> : vector<64x128xf32>
    %219 = tpu.matmul %216, %218, %cst_192 {dimension_numbers = #tpu.dot_dimension_numbers<[1], [0], [0], [1], [0, 0, 1, 1], [], []>} : vector<64x128xbf16>, vector<128x128xbf16>, vector<64x128xf32> -> vector<64x128xf32>
    %220 = arith.addf %211, %219 : vector<64x128xf32>
    %c2_i32 = arith.constant 2 : i32
    %221 = arith.addi %0, %c2_i32 : i32
    %c0_193 = arith.constant 0 : index
    %c0_194 = arith.constant 0 : index
    %222 = arith.index_cast %221 : i32 to index
    %c0_195 = arith.constant 0 : index
    %c0_196 = arith.constant 0 : index
    %223 = vector.load %arg3[%c0_193, %c0_194, %222, %c0_195, %c0_196] : memref<1x4x10x10x128xbf16, #tpu.memory_space<vmem>>, vector<1x1x8x8x128xbf16>
    %224 = vector.shape_cast %223 : vector<1x1x8x8x128xbf16> to vector<8x8x128xbf16>
    %225 = vector.shape_cast %224 : vector<8x8x128xbf16> to vector<64x128xbf16>
    %c24 = arith.constant 24 : index
    %c0_197 = arith.constant 0 : index
    %c0_198 = arith.constant 0 : index
    %226 = vector.load %arg5[%c24, %c0_197, %c0_198] : memref<36x128x128xbf16, #tpu.memory_space<vmem>>, vector<1x128x128xbf16>
    %227 = vector.shape_cast %226 : vector<1x128x128xbf16> to vector<128x128xbf16>
    %cst_199 = arith.constant dense<0.000000e+00> : vector<64x128xf32>
    %228 = tpu.matmul %225, %227, %cst_199 {dimension_numbers = #tpu.dot_dimension_numbers<[1], [0], [0], [1], [0, 0, 1, 1], [], []>} : vector<64x128xbf16>, vector<128x128xbf16>, vector<64x128xf32> -> vector<64x128xf32>
    %229 = arith.addf %220, %228 : vector<64x128xf32>
    %c2_i32_200 = arith.constant 2 : i32
    %230 = arith.addi %0, %c2_i32_200 : i32
    %c0_201 = arith.constant 0 : index
    %c1_202 = arith.constant 1 : index
    %231 = arith.index_cast %230 : i32 to index
    %c0_203 = arith.constant 0 : index
    %c0_204 = arith.constant 0 : index
    %232 = vector.load %arg3[%c0_201, %c1_202, %231, %c0_203, %c0_204] : memref<1x4x10x10x128xbf16, #tpu.memory_space<vmem>>, vector<1x1x8x8x128xbf16>
    %233 = vector.shape_cast %232 : vector<1x1x8x8x128xbf16> to vector<8x8x128xbf16>
    %234 = vector.shape_cast %233 : vector<8x8x128xbf16> to vector<64x128xbf16>
    %c25 = arith.constant 25 : index
    %c0_205 = arith.constant 0 : index
    %c0_206 = arith.constant 0 : index
    %235 = vector.load %arg5[%c25, %c0_205, %c0_206] : memref<36x128x128xbf16, #tpu.memory_space<vmem>>, vector<1x128x128xbf16>
    %236 = vector.shape_cast %235 : vector<1x128x128xbf16> to vector<128x128xbf16>
    %cst_207 = arith.constant dense<0.000000e+00> : vector<64x128xf32>
    %237 = tpu.matmul %234, %236, %cst_207 {dimension_numbers = #tpu.dot_dimension_numbers<[1], [0], [0], [1], [0, 0, 1, 1], [], []>} : vector<64x128xbf16>, vector<128x128xbf16>, vector<64x128xf32> -> vector<64x128xf32>
    %238 = arith.addf %229, %237 : vector<64x128xf32>
    %c2_i32_208 = arith.constant 2 : i32
    %239 = arith.addi %0, %c2_i32_208 : i32
    %c0_209 = arith.constant 0 : index
    %c0_210 = arith.constant 0 : index
    %240 = arith.index_cast %239 : i32 to index
    %c1_211 = arith.constant 1 : index
    %c0_212 = arith.constant 0 : index
    %241 = vector.load %arg3[%c0_209, %c0_210, %240, %c1_211, %c0_212] : memref<1x4x10x10x128xbf16, #tpu.memory_space<vmem>>, vector<1x1x8x8x128xbf16>
    %242 = vector.shape_cast %241 : vector<1x1x8x8x128xbf16> to vector<8x8x128xbf16>
    %243 = vector.shape_cast %242 : vector<8x8x128xbf16> to vector<64x128xbf16>
    %c26 = arith.constant 26 : index
    %c0_213 = arith.constant 0 : index
    %c0_214 = arith.constant 0 : index
    %244 = vector.load %arg5[%c26, %c0_213, %c0_214] : memref<36x128x128xbf16, #tpu.memory_space<vmem>>, vector<1x128x128xbf16>
    %245 = vector.shape_cast %244 : vector<1x128x128xbf16> to vector<128x128xbf16>
    %cst_215 = arith.constant dense<0.000000e+00> : vector<64x128xf32>
    %246 = tpu.matmul %243, %245, %cst_215 {dimension_numbers = #tpu.dot_dimension_numbers<[1], [0], [0], [1], [0, 0, 1, 1], [], []>} : vector<64x128xbf16>, vector<128x128xbf16>, vector<64x128xf32> -> vector<64x128xf32>
    %247 = arith.addf %238, %246 : vector<64x128xf32>
    %c2_i32_216 = arith.constant 2 : i32
    %248 = arith.addi %0, %c2_i32_216 : i32
    %c0_217 = arith.constant 0 : index
    %c1_218 = arith.constant 1 : index
    %249 = arith.index_cast %248 : i32 to index
    %c1_219 = arith.constant 1 : index
    %c0_220 = arith.constant 0 : index
    %250 = vector.load %arg3[%c0_217, %c1_218, %249, %c1_219, %c0_220] : memref<1x4x10x10x128xbf16, #tpu.memory_space<vmem>>, vector<1x1x8x8x128xbf16>
    %251 = vector.shape_cast %250 : vector<1x1x8x8x128xbf16> to vector<8x8x128xbf16>
    %252 = vector.shape_cast %251 : vector<8x8x128xbf16> to vector<64x128xbf16>
    %c27 = arith.constant 27 : index
    %c0_221 = arith.constant 0 : index
    %c0_222 = arith.constant 0 : index
    %253 = vector.load %arg5[%c27, %c0_221, %c0_222] : memref<36x128x128xbf16, #tpu.memory_space<vmem>>, vector<1x128x128xbf16>
    %254 = vector.shape_cast %253 : vector<1x128x128xbf16> to vector<128x128xbf16>
    %cst_223 = arith.constant dense<0.000000e+00> : vector<64x128xf32>
    %255 = tpu.matmul %252, %254, %cst_223 {dimension_numbers = #tpu.dot_dimension_numbers<[1], [0], [0], [1], [0, 0, 1, 1], [], []>} : vector<64x128xbf16>, vector<128x128xbf16>, vector<64x128xf32> -> vector<64x128xf32>
    %256 = arith.addf %247, %255 : vector<64x128xf32>
    %c2_i32_224 = arith.constant 2 : i32
    %257 = arith.addi %0, %c2_i32_224 : i32
    %c0_225 = arith.constant 0 : index
    %c0_226 = arith.constant 0 : index
    %258 = arith.index_cast %257 : i32 to index
    %c2_227 = arith.constant 2 : index
    %c0_228 = arith.constant 0 : index
    %259 = vector.load %arg3[%c0_225, %c0_226, %258, %c2_227, %c0_228] : memref<1x4x10x10x128xbf16, #tpu.memory_space<vmem>>, vector<1x1x8x8x128xbf16>
    %260 = vector.shape_cast %259 : vector<1x1x8x8x128xbf16> to vector<8x8x128xbf16>
    %261 = vector.shape_cast %260 : vector<8x8x128xbf16> to vector<64x128xbf16>
    %c28 = arith.constant 28 : index
    %c0_229 = arith.constant 0 : index
    %c0_230 = arith.constant 0 : index
    %262 = vector.load %arg5[%c28, %c0_229, %c0_230] : memref<36x128x128xbf16, #tpu.memory_space<vmem>>, vector<1x128x128xbf16>
    %263 = vector.shape_cast %262 : vector<1x128x128xbf16> to vector<128x128xbf16>
    %cst_231 = arith.constant dense<0.000000e+00> : vector<64x128xf32>
    %264 = tpu.matmul %261, %263, %cst_231 {dimension_numbers = #tpu.dot_dimension_numbers<[1], [0], [0], [1], [0, 0, 1, 1], [], []>} : vector<64x128xbf16>, vector<128x128xbf16>, vector<64x128xf32> -> vector<64x128xf32>
    %265 = arith.addf %256, %264 : vector<64x128xf32>
    %c2_i32_232 = arith.constant 2 : i32
    %266 = arith.addi %0, %c2_i32_232 : i32
    %c0_233 = arith.constant 0 : index
    %c1_234 = arith.constant 1 : index
    %267 = arith.index_cast %266 : i32 to index
    %c2_235 = arith.constant 2 : index
    %c0_236 = arith.constant 0 : index
    %268 = vector.load %arg3[%c0_233, %c1_234, %267, %c2_235, %c0_236] : memref<1x4x10x10x128xbf16, #tpu.memory_space<vmem>>, vector<1x1x8x8x128xbf16>
    %269 = vector.shape_cast %268 : vector<1x1x8x8x128xbf16> to vector<8x8x128xbf16>
    %270 = vector.shape_cast %269 : vector<8x8x128xbf16> to vector<64x128xbf16>
    %c29 = arith.constant 29 : index
    %c0_237 = arith.constant 0 : index
    %c0_238 = arith.constant 0 : index
    %271 = vector.load %arg5[%c29, %c0_237, %c0_238] : memref<36x128x128xbf16, #tpu.memory_space<vmem>>, vector<1x128x128xbf16>
    %272 = vector.shape_cast %271 : vector<1x128x128xbf16> to vector<128x128xbf16>
    %cst_239 = arith.constant dense<0.000000e+00> : vector<64x128xf32>
    %273 = tpu.matmul %270, %272, %cst_239 {dimension_numbers = #tpu.dot_dimension_numbers<[1], [0], [0], [1], [0, 0, 1, 1], [], []>} : vector<64x128xbf16>, vector<128x128xbf16>, vector<64x128xf32> -> vector<64x128xf32>
    %274 = arith.addf %265, %273 : vector<64x128xf32>
    %c2_i32_240 = arith.constant 2 : i32
    %275 = arith.addi %0, %c2_i32_240 : i32
    %c0_241 = arith.constant 0 : index
    %c2_242 = arith.constant 2 : index
    %276 = arith.index_cast %275 : i32 to index
    %c0_243 = arith.constant 0 : index
    %c0_244 = arith.constant 0 : index
    %277 = vector.load %arg3[%c0_241, %c2_242, %276, %c0_243, %c0_244] : memref<1x4x10x10x128xbf16, #tpu.memory_space<vmem>>, vector<1x1x8x8x128xbf16>
    %278 = vector.shape_cast %277 : vector<1x1x8x8x128xbf16> to vector<8x8x128xbf16>
    %279 = vector.shape_cast %278 : vector<8x8x128xbf16> to vector<64x128xbf16>
    %c30 = arith.constant 30 : index
    %c0_245 = arith.constant 0 : index
    %c0_246 = arith.constant 0 : index
    %280 = vector.load %arg5[%c30, %c0_245, %c0_246] : memref<36x128x128xbf16, #tpu.memory_space<vmem>>, vector<1x128x128xbf16>
    %281 = vector.shape_cast %280 : vector<1x128x128xbf16> to vector<128x128xbf16>
    %cst_247 = arith.constant dense<0.000000e+00> : vector<64x128xf32>
    %282 = tpu.matmul %279, %281, %cst_247 {dimension_numbers = #tpu.dot_dimension_numbers<[1], [0], [0], [1], [0, 0, 1, 1], [], []>} : vector<64x128xbf16>, vector<128x128xbf16>, vector<64x128xf32> -> vector<64x128xf32>
    %283 = arith.addf %274, %282 : vector<64x128xf32>
    %c2_i32_248 = arith.constant 2 : i32
    %284 = arith.addi %0, %c2_i32_248 : i32
    %c0_249 = arith.constant 0 : index
    %c3_250 = arith.constant 3 : index
    %285 = arith.index_cast %284 : i32 to index
    %c0_251 = arith.constant 0 : index
    %c0_252 = arith.constant 0 : index
    %286 = vector.load %arg3[%c0_249, %c3_250, %285, %c0_251, %c0_252] : memref<1x4x10x10x128xbf16, #tpu.memory_space<vmem>>, vector<1x1x8x8x128xbf16>
    %287 = vector.shape_cast %286 : vector<1x1x8x8x128xbf16> to vector<8x8x128xbf16>
    %288 = vector.shape_cast %287 : vector<8x8x128xbf16> to vector<64x128xbf16>
    %c31 = arith.constant 31 : index
    %c0_253 = arith.constant 0 : index
    %c0_254 = arith.constant 0 : index
    %289 = vector.load %arg5[%c31, %c0_253, %c0_254] : memref<36x128x128xbf16, #tpu.memory_space<vmem>>, vector<1x128x128xbf16>
    %290 = vector.shape_cast %289 : vector<1x128x128xbf16> to vector<128x128xbf16>
    %cst_255 = arith.constant dense<0.000000e+00> : vector<64x128xf32>
    %291 = tpu.matmul %288, %290, %cst_255 {dimension_numbers = #tpu.dot_dimension_numbers<[1], [0], [0], [1], [0, 0, 1, 1], [], []>} : vector<64x128xbf16>, vector<128x128xbf16>, vector<64x128xf32> -> vector<64x128xf32>
    %292 = arith.addf %283, %291 : vector<64x128xf32>
    %c2_i32_256 = arith.constant 2 : i32
    %293 = arith.addi %0, %c2_i32_256 : i32
    %c0_257 = arith.constant 0 : index
    %c2_258 = arith.constant 2 : index
    %294 = arith.index_cast %293 : i32 to index
    %c1_259 = arith.constant 1 : index
    %c0_260 = arith.constant 0 : index
    %295 = vector.load %arg3[%c0_257, %c2_258, %294, %c1_259, %c0_260] : memref<1x4x10x10x128xbf16, #tpu.memory_space<vmem>>, vector<1x1x8x8x128xbf16>
    %296 = vector.shape_cast %295 : vector<1x1x8x8x128xbf16> to vector<8x8x128xbf16>
    %297 = vector.shape_cast %296 : vector<8x8x128xbf16> to vector<64x128xbf16>
    %c32 = arith.constant 32 : index
    %c0_261 = arith.constant 0 : index
    %c0_262 = arith.constant 0 : index
    %298 = vector.load %arg5[%c32, %c0_261, %c0_262] : memref<36x128x128xbf16, #tpu.memory_space<vmem>>, vector<1x128x128xbf16>
    %299 = vector.shape_cast %298 : vector<1x128x128xbf16> to vector<128x128xbf16>
    %cst_263 = arith.constant dense<0.000000e+00> : vector<64x128xf32>
    %300 = tpu.matmul %297, %299, %cst_263 {dimension_numbers = #tpu.dot_dimension_numbers<[1], [0], [0], [1], [0, 0, 1, 1], [], []>} : vector<64x128xbf16>, vector<128x128xbf16>, vector<64x128xf32> -> vector<64x128xf32>
    %301 = arith.addf %292, %300 : vector<64x128xf32>
    %c2_i32_264 = arith.constant 2 : i32
    %302 = arith.addi %0, %c2_i32_264 : i32
    %c0_265 = arith.constant 0 : index
    %c3_266 = arith.constant 3 : index
    %303 = arith.index_cast %302 : i32 to index
    %c1_267 = arith.constant 1 : index
    %c0_268 = arith.constant 0 : index
    %304 = vector.load %arg3[%c0_265, %c3_266, %303, %c1_267, %c0_268] : memref<1x4x10x10x128xbf16, #tpu.memory_space<vmem>>, vector<1x1x8x8x128xbf16>
    %305 = vector.shape_cast %304 : vector<1x1x8x8x128xbf16> to vector<8x8x128xbf16>
    %306 = vector.shape_cast %305 : vector<8x8x128xbf16> to vector<64x128xbf16>
    %c33 = arith.constant 33 : index
    %c0_269 = arith.constant 0 : index
    %c0_270 = arith.constant 0 : index
    %307 = vector.load %arg5[%c33, %c0_269, %c0_270] : memref<36x128x128xbf16, #tpu.memory_space<vmem>>, vector<1x128x128xbf16>
    %308 = vector.shape_cast %307 : vector<1x128x128xbf16> to vector<128x128xbf16>
    %cst_271 = arith.constant dense<0.000000e+00> : vector<64x128xf32>
    %309 = tpu.matmul %306, %308, %cst_271 {dimension_numbers = #tpu.dot_dimension_numbers<[1], [0], [0], [1], [0, 0, 1, 1], [], []>} : vector<64x128xbf16>, vector<128x128xbf16>, vector<64x128xf32> -> vector<64x128xf32>
    %310 = arith.addf %301, %309 : vector<64x128xf32>
    %c2_i32_272 = arith.constant 2 : i32
    %311 = arith.addi %0, %c2_i32_272 : i32
    %c0_273 = arith.constant 0 : index
    %c2_274 = arith.constant 2 : index
    %312 = arith.index_cast %311 : i32 to index
    %c2_275 = arith.constant 2 : index
    %c0_276 = arith.constant 0 : index
    %313 = vector.load %arg3[%c0_273, %c2_274, %312, %c2_275, %c0_276] : memref<1x4x10x10x128xbf16, #tpu.memory_space<vmem>>, vector<1x1x8x8x128xbf16>
    %314 = vector.shape_cast %313 : vector<1x1x8x8x128xbf16> to vector<8x8x128xbf16>
    %315 = vector.shape_cast %314 : vector<8x8x128xbf16> to vector<64x128xbf16>
    %c34 = arith.constant 34 : index
    %c0_277 = arith.constant 0 : index
    %c0_278 = arith.constant 0 : index
    %316 = vector.load %arg5[%c34, %c0_277, %c0_278] : memref<36x128x128xbf16, #tpu.memory_space<vmem>>, vector<1x128x128xbf16>
    %317 = vector.shape_cast %316 : vector<1x128x128xbf16> to vector<128x128xbf16>
    %cst_279 = arith.constant dense<0.000000e+00> : vector<64x128xf32>
    %318 = tpu.matmul %315, %317, %cst_279 {dimension_numbers = #tpu.dot_dimension_numbers<[1], [0], [0], [1], [0, 0, 1, 1], [], []>} : vector<64x128xbf16>, vector<128x128xbf16>, vector<64x128xf32> -> vector<64x128xf32>
    %319 = arith.addf %310, %318 : vector<64x128xf32>
    %c2_i32_280 = arith.constant 2 : i32
    %320 = arith.addi %0, %c2_i32_280 : i32
    %c0_281 = arith.constant 0 : index
    %c3_282 = arith.constant 3 : index
    %321 = arith.index_cast %320 : i32 to index
    %c2_283 = arith.constant 2 : index
    %c0_284 = arith.constant 0 : index
    %322 = vector.load %arg3[%c0_281, %c3_282, %321, %c2_283, %c0_284] : memref<1x4x10x10x128xbf16, #tpu.memory_space<vmem>>, vector<1x1x8x8x128xbf16>
    %323 = vector.shape_cast %322 : vector<1x1x8x8x128xbf16> to vector<8x8x128xbf16>
    %324 = vector.shape_cast %323 : vector<8x8x128xbf16> to vector<64x128xbf16>
    %c35 = arith.constant 35 : index
    %c0_285 = arith.constant 0 : index
    %c0_286 = arith.constant 0 : index
    %325 = vector.load %arg5[%c35, %c0_285, %c0_286] : memref<36x128x128xbf16, #tpu.memory_space<vmem>>, vector<1x128x128xbf16>
    %326 = vector.shape_cast %325 : vector<1x128x128xbf16> to vector<128x128xbf16>
    %cst_287 = arith.constant dense<0.000000e+00> : vector<64x128xf32>
    %327 = tpu.matmul %324, %326, %cst_287 {dimension_numbers = #tpu.dot_dimension_numbers<[1], [0], [0], [1], [0, 0, 1, 1], [], []>} : vector<64x128xbf16>, vector<128x128xbf16>, vector<64x128xf32> -> vector<64x128xf32>
    %328 = arith.addf %319, %327 : vector<64x128xf32>
    %c0_288 = arith.constant 0 : index
    %c0_289 = arith.constant 0 : index
    %329 = vector.load %arg10[%c0_288, %c0_289] : memref<64x128xf32, #tpu.memory_space<vmem>>, vector<64x128xf32>
    tpu.vector_store %arg10[%c0_288, %c0_289], %328 {strides = array<i32>} : memref<64x128xf32, #tpu.memory_space<vmem>>, vector<64x128xf32>,
    %c0_290 = arith.constant 0 : index
    %c0_291 = arith.constant 0 : index
    %330 = vector.load %arg11[%c0_290, %c0_291] : memref<64x128xf32, #tpu.memory_space<vmem>>, vector<64x128xf32>
    %c0_i32_292 = arith.constant 0 : i32
    %331 = arith.addi %0, %c0_i32_292 : i32
    %c0_293 = arith.constant 0 : index
    %c0_294 = arith.constant 0 : index
    %332 = arith.index_cast %331 : i32 to index
    %c0_295 = arith.constant 0 : index
    %c0_296 = arith.constant 0 : index
    %333 = vector.load %arg4[%c0_293, %c0_294, %332, %c0_295, %c0_296] : memref<1x4x9x9x128xbf16, #tpu.memory_space<vmem>>, vector<1x1x8x8x128xbf16>
    %334 = vector.shape_cast %333 : vector<1x1x8x8x128xbf16> to vector<8x8x128xbf16>
    %335 = vector.shape_cast %334 : vector<8x8x128xbf16> to vector<64x128xbf16>
    %c0_297 = arith.constant 0 : index
    %c0_298 = arith.constant 0 : index
    %c0_299 = arith.constant 0 : index
    %336 = vector.load %arg7[%c0_297, %c0_298, %c0_299] : memref<16x128x128xbf16, #tpu.memory_space<vmem>>, vector<1x128x128xbf16>
    %337 = vector.shape_cast %336 : vector<1x128x128xbf16> to vector<128x128xbf16>
    %cst_300 = arith.constant dense<0.000000e+00> : vector<64x128xf32>
    %338 = tpu.matmul %335, %337, %cst_300 {dimension_numbers = #tpu.dot_dimension_numbers<[1], [0], [0], [1], [0, 0, 1, 1], [], []>} : vector<64x128xbf16>, vector<128x128xbf16>, vector<64x128xf32> -> vector<64x128xf32>
    %339 = arith.addf %330, %338 : vector<64x128xf32>
    %c0_i32_301 = arith.constant 0 : i32
    %340 = arith.addi %0, %c0_i32_301 : i32
    %c0_302 = arith.constant 0 : index
    %c1_303 = arith.constant 1 : index
    %341 = arith.index_cast %340 : i32 to index
    %c0_304 = arith.constant 0 : index
    %c0_305 = arith.constant 0 : index
    %342 = vector.load %arg4[%c0_302, %c1_303, %341, %c0_304, %c0_305] : memref<1x4x9x9x128xbf16, #tpu.memory_space<vmem>>, vector<1x1x8x8x128xbf16>
    %343 = vector.shape_cast %342 : vector<1x1x8x8x128xbf16> to vector<8x8x128xbf16>
    %344 = vector.shape_cast %343 : vector<8x8x128xbf16> to vector<64x128xbf16>
    %c1_306 = arith.constant 1 : index
    %c0_307 = arith.constant 0 : index
    %c0_308 = arith.constant 0 : index
    %345 = vector.load %arg7[%c1_306, %c0_307, %c0_308] : memref<16x128x128xbf16, #tpu.memory_space<vmem>>, vector<1x128x128xbf16>
    %346 = vector.shape_cast %345 : vector<1x128x128xbf16> to vector<128x128xbf16>
    %cst_309 = arith.constant dense<0.000000e+00> : vector<64x128xf32>
    %347 = tpu.matmul %344, %346, %cst_309 {dimension_numbers = #tpu.dot_dimension_numbers<[1], [0], [0], [1], [0, 0, 1, 1], [], []>} : vector<64x128xbf16>, vector<128x128xbf16>, vector<64x128xf32> -> vector<64x128xf32>
    %348 = arith.addf %339, %347 : vector<64x128xf32>
    %c0_i32_310 = arith.constant 0 : i32
    %349 = arith.addi %0, %c0_i32_310 : i32
    %c0_311 = arith.constant 0 : index
    %c0_312 = arith.constant 0 : index
    %350 = arith.index_cast %349 : i32 to index
    %c1_313 = arith.constant 1 : index
    %c0_314 = arith.constant 0 : index
    %351 = vector.load %arg4[%c0_311, %c0_312, %350, %c1_313, %c0_314] : memref<1x4x9x9x128xbf16, #tpu.memory_space<vmem>>, vector<1x1x8x8x128xbf16>
    %352 = vector.shape_cast %351 : vector<1x1x8x8x128xbf16> to vector<8x8x128xbf16>
    %353 = vector.shape_cast %352 : vector<8x8x128xbf16> to vector<64x128xbf16>
    %c2_315 = arith.constant 2 : index
    %c0_316 = arith.constant 0 : index
    %c0_317 = arith.constant 0 : index
    %354 = vector.load %arg7[%c2_315, %c0_316, %c0_317] : memref<16x128x128xbf16, #tpu.memory_space<vmem>>, vector<1x128x128xbf16>
    %355 = vector.shape_cast %354 : vector<1x128x128xbf16> to vector<128x128xbf16>
    %cst_318 = arith.constant dense<0.000000e+00> : vector<64x128xf32>
    %356 = tpu.matmul %353, %355, %cst_318 {dimension_numbers = #tpu.dot_dimension_numbers<[1], [0], [0], [1], [0, 0, 1, 1], [], []>} : vector<64x128xbf16>, vector<128x128xbf16>, vector<64x128xf32> -> vector<64x128xf32>
    %357 = arith.addf %348, %356 : vector<64x128xf32>
    %c0_i32_319 = arith.constant 0 : i32
    %358 = arith.addi %0, %c0_i32_319 : i32
    %c0_320 = arith.constant 0 : index
    %c1_321 = arith.constant 1 : index
    %359 = arith.index_cast %358 : i32 to index
    %c1_322 = arith.constant 1 : index
    %c0_323 = arith.constant 0 : index
    %360 = vector.load %arg4[%c0_320, %c1_321, %359, %c1_322, %c0_323] : memref<1x4x9x9x128xbf16, #tpu.memory_space<vmem>>, vector<1x1x8x8x128xbf16>
    %361 = vector.shape_cast %360 : vector<1x1x8x8x128xbf16> to vector<8x8x128xbf16>
    %362 = vector.shape_cast %361 : vector<8x8x128xbf16> to vector<64x128xbf16>
    %c3_324 = arith.constant 3 : index
    %c0_325 = arith.constant 0 : index
    %c0_326 = arith.constant 0 : index
    %363 = vector.load %arg7[%c3_324, %c0_325, %c0_326] : memref<16x128x128xbf16, #tpu.memory_space<vmem>>, vector<1x128x128xbf16>
    %364 = vector.shape_cast %363 : vector<1x128x128xbf16> to vector<128x128xbf16>
    %cst_327 = arith.constant dense<0.000000e+00> : vector<64x128xf32>
    %365 = tpu.matmul %362, %364, %cst_327 {dimension_numbers = #tpu.dot_dimension_numbers<[1], [0], [0], [1], [0, 0, 1, 1], [], []>} : vector<64x128xbf16>, vector<128x128xbf16>, vector<64x128xf32> -> vector<64x128xf32>
    %366 = arith.addf %357, %365 : vector<64x128xf32>
    %c0_i32_328 = arith.constant 0 : i32
    %367 = arith.addi %0, %c0_i32_328 : i32
    %c0_329 = arith.constant 0 : index
    %c2_330 = arith.constant 2 : index
    %368 = arith.index_cast %367 : i32 to index
    %c0_331 = arith.constant 0 : index
    %c0_332 = arith.constant 0 : index
    %369 = vector.load %arg4[%c0_329, %c2_330, %368, %c0_331, %c0_332] : memref<1x4x9x9x128xbf16, #tpu.memory_space<vmem>>, vector<1x1x8x8x128xbf16>
    %370 = vector.shape_cast %369 : vector<1x1x8x8x128xbf16> to vector<8x8x128xbf16>
    %371 = vector.shape_cast %370 : vector<8x8x128xbf16> to vector<64x128xbf16>
    %c4_333 = arith.constant 4 : index
    %c0_334 = arith.constant 0 : index
    %c0_335 = arith.constant 0 : index
    %372 = vector.load %arg7[%c4_333, %c0_334, %c0_335] : memref<16x128x128xbf16, #tpu.memory_space<vmem>>, vector<1x128x128xbf16>
    %373 = vector.shape_cast %372 : vector<1x128x128xbf16> to vector<128x128xbf16>
    %cst_336 = arith.constant dense<0.000000e+00> : vector<64x128xf32>
    %374 = tpu.matmul %371, %373, %cst_336 {dimension_numbers = #tpu.dot_dimension_numbers<[1], [0], [0], [1], [0, 0, 1, 1], [], []>} : vector<64x128xbf16>, vector<128x128xbf16>, vector<64x128xf32> -> vector<64x128xf32>
    %375 = arith.addf %366, %374 : vector<64x128xf32>
    %c0_i32_337 = arith.constant 0 : i32
    %376 = arith.addi %0, %c0_i32_337 : i32
    %c0_338 = arith.constant 0 : index
    %c3_339 = arith.constant 3 : index
    %377 = arith.index_cast %376 : i32 to index
    %c0_340 = arith.constant 0 : index
    %c0_341 = arith.constant 0 : index
    %378 = vector.load %arg4[%c0_338, %c3_339, %377, %c0_340, %c0_341] : memref<1x4x9x9x128xbf16, #tpu.memory_space<vmem>>, vector<1x1x8x8x128xbf16>
    %379 = vector.shape_cast %378 : vector<1x1x8x8x128xbf16> to vector<8x8x128xbf16>
    %380 = vector.shape_cast %379 : vector<8x8x128xbf16> to vector<64x128xbf16>
    %c5_342 = arith.constant 5 : index
    %c0_343 = arith.constant 0 : index
    %c0_344 = arith.constant 0 : index
    %381 = vector.load %arg7[%c5_342, %c0_343, %c0_344] : memref<16x128x128xbf16, #tpu.memory_space<vmem>>, vector<1x128x128xbf16>
    %382 = vector.shape_cast %381 : vector<1x128x128xbf16> to vector<128x128xbf16>
    %cst_345 = arith.constant dense<0.000000e+00> : vector<64x128xf32>
    %383 = tpu.matmul %380, %382, %cst_345 {dimension_numbers = #tpu.dot_dimension_numbers<[1], [0], [0], [1], [0, 0, 1, 1], [], []>} : vector<64x128xbf16>, vector<128x128xbf16>, vector<64x128xf32> -> vector<64x128xf32>
    %384 = arith.addf %375, %383 : vector<64x128xf32>
    %c0_i32_346 = arith.constant 0 : i32
    %385 = arith.addi %0, %c0_i32_346 : i32
    %c0_347 = arith.constant 0 : index
    %c2_348 = arith.constant 2 : index
    %386 = arith.index_cast %385 : i32 to index
    %c1_349 = arith.constant 1 : index
    %c0_350 = arith.constant 0 : index
    %387 = vector.load %arg4[%c0_347, %c2_348, %386, %c1_349, %c0_350] : memref<1x4x9x9x128xbf16, #tpu.memory_space<vmem>>, vector<1x1x8x8x128xbf16>
    %388 = vector.shape_cast %387 : vector<1x1x8x8x128xbf16> to vector<8x8x128xbf16>
    %389 = vector.shape_cast %388 : vector<8x8x128xbf16> to vector<64x128xbf16>
    %c6_351 = arith.constant 6 : index
    %c0_352 = arith.constant 0 : index
    %c0_353 = arith.constant 0 : index
    %390 = vector.load %arg7[%c6_351, %c0_352, %c0_353] : memref<16x128x128xbf16, #tpu.memory_space<vmem>>, vector<1x128x128xbf16>
    %391 = vector.shape_cast %390 : vector<1x128x128xbf16> to vector<128x128xbf16>
    %cst_354 = arith.constant dense<0.000000e+00> : vector<64x128xf32>
    %392 = tpu.matmul %389, %391, %cst_354 {dimension_numbers = #tpu.dot_dimension_numbers<[1], [0], [0], [1], [0, 0, 1, 1], [], []>} : vector<64x128xbf16>, vector<128x128xbf16>, vector<64x128xf32> -> vector<64x128xf32>
    %393 = arith.addf %384, %392 : vector<64x128xf32>
    %c0_i32_355 = arith.constant 0 : i32
    %394 = arith.addi %0, %c0_i32_355 : i32
    %c0_356 = arith.constant 0 : index
    %c3_357 = arith.constant 3 : index
    %395 = arith.index_cast %394 : i32 to index
    %c1_358 = arith.constant 1 : index
    %c0_359 = arith.constant 0 : index
    %396 = vector.load %arg4[%c0_356, %c3_357, %395, %c1_358, %c0_359] : memref<1x4x9x9x128xbf16, #tpu.memory_space<vmem>>, vector<1x1x8x8x128xbf16>
    %397 = vector.shape_cast %396 : vector<1x1x8x8x128xbf16> to vector<8x8x128xbf16>
    %398 = vector.shape_cast %397 : vector<8x8x128xbf16> to vector<64x128xbf16>
    %c7_360 = arith.constant 7 : index
    %c0_361 = arith.constant 0 : index
    %c0_362 = arith.constant 0 : index
    %399 = vector.load %arg7[%c7_360, %c0_361, %c0_362] : memref<16x128x128xbf16, #tpu.memory_space<vmem>>, vector<1x128x128xbf16>
    %400 = vector.shape_cast %399 : vector<1x128x128xbf16> to vector<128x128xbf16>
    %cst_363 = arith.constant dense<0.000000e+00> : vector<64x128xf32>
    %401 = tpu.matmul %398, %400, %cst_363 {dimension_numbers = #tpu.dot_dimension_numbers<[1], [0], [0], [1], [0, 0, 1, 1], [], []>} : vector<64x128xbf16>, vector<128x128xbf16>, vector<64x128xf32> -> vector<64x128xf32>
    %402 = arith.addf %393, %401 : vector<64x128xf32>
    %c1_i32_364 = arith.constant 1 : i32
    %403 = arith.addi %0, %c1_i32_364 : i32
    %c0_365 = arith.constant 0 : index
    %c0_366 = arith.constant 0 : index
    %404 = arith.index_cast %403 : i32 to index
    %c0_367 = arith.constant 0 : index
    %c0_368 = arith.constant 0 : index
    %405 = vector.load %arg4[%c0_365, %c0_366, %404, %c0_367, %c0_368] : memref<1x4x9x9x128xbf16, #tpu.memory_space<vmem>>, vector<1x1x8x8x128xbf16>
    %406 = vector.shape_cast %405 : vector<1x1x8x8x128xbf16> to vector<8x8x128xbf16>
    %407 = vector.shape_cast %406 : vector<8x8x128xbf16> to vector<64x128xbf16>
    %c8_369 = arith.constant 8 : index
    %c0_370 = arith.constant 0 : index
    %c0_371 = arith.constant 0 : index
    %408 = vector.load %arg7[%c8_369, %c0_370, %c0_371] : memref<16x128x128xbf16, #tpu.memory_space<vmem>>, vector<1x128x128xbf16>
    %409 = vector.shape_cast %408 : vector<1x128x128xbf16> to vector<128x128xbf16>
    %cst_372 = arith.constant dense<0.000000e+00> : vector<64x128xf32>
    %410 = tpu.matmul %407, %409, %cst_372 {dimension_numbers = #tpu.dot_dimension_numbers<[1], [0], [0], [1], [0, 0, 1, 1], [], []>} : vector<64x128xbf16>, vector<128x128xbf16>, vector<64x128xf32> -> vector<64x128xf32>
    %411 = arith.addf %402, %410 : vector<64x128xf32>
    %c1_i32_373 = arith.constant 1 : i32
    %412 = arith.addi %0, %c1_i32_373 : i32
    %c0_374 = arith.constant 0 : index
    %c1_375 = arith.constant 1 : index
    %413 = arith.index_cast %412 : i32 to index
    %c0_376 = arith.constant 0 : index
    %c0_377 = arith.constant 0 : index
    %414 = vector.load %arg4[%c0_374, %c1_375, %413, %c0_376, %c0_377] : memref<1x4x9x9x128xbf16, #tpu.memory_space<vmem>>, vector<1x1x8x8x128xbf16>
    %415 = vector.shape_cast %414 : vector<1x1x8x8x128xbf16> to vector<8x8x128xbf16>
    %416 = vector.shape_cast %415 : vector<8x8x128xbf16> to vector<64x128xbf16>
    %c9_378 = arith.constant 9 : index
    %c0_379 = arith.constant 0 : index
    %c0_380 = arith.constant 0 : index
    %417 = vector.load %arg7[%c9_378, %c0_379, %c0_380] : memref<16x128x128xbf16, #tpu.memory_space<vmem>>, vector<1x128x128xbf16>
    %418 = vector.shape_cast %417 : vector<1x128x128xbf16> to vector<128x128xbf16>
    %cst_381 = arith.constant dense<0.000000e+00> : vector<64x128xf32>
    %419 = tpu.matmul %416, %418, %cst_381 {dimension_numbers = #tpu.dot_dimension_numbers<[1], [0], [0], [1], [0, 0, 1, 1], [], []>} : vector<64x128xbf16>, vector<128x128xbf16>, vector<64x128xf32> -> vector<64x128xf32>
    %420 = arith.addf %411, %419 : vector<64x128xf32>
    %c1_i32_382 = arith.constant 1 : i32
    %421 = arith.addi %0, %c1_i32_382 : i32
    %c0_383 = arith.constant 0 : index
    %c0_384 = arith.constant 0 : index
    %422 = arith.index_cast %421 : i32 to index
    %c1_385 = arith.constant 1 : index
    %c0_386 = arith.constant 0 : index
    %423 = vector.load %arg4[%c0_383, %c0_384, %422, %c1_385, %c0_386] : memref<1x4x9x9x128xbf16, #tpu.memory_space<vmem>>, vector<1x1x8x8x128xbf16>
    %424 = vector.shape_cast %423 : vector<1x1x8x8x128xbf16> to vector<8x8x128xbf16>
    %425 = vector.shape_cast %424 : vector<8x8x128xbf16> to vector<64x128xbf16>
    %c10_387 = arith.constant 10 : index
    %c0_388 = arith.constant 0 : index
    %c0_389 = arith.constant 0 : index
    %426 = vector.load %arg7[%c10_387, %c0_388, %c0_389] : memref<16x128x128xbf16, #tpu.memory_space<vmem>>, vector<1x128x128xbf16>
    %427 = vector.shape_cast %426 : vector<1x128x128xbf16> to vector<128x128xbf16>
    %cst_390 = arith.constant dense<0.000000e+00> : vector<64x128xf32>
    %428 = tpu.matmul %425, %427, %cst_390 {dimension_numbers = #tpu.dot_dimension_numbers<[1], [0], [0], [1], [0, 0, 1, 1], [], []>} : vector<64x128xbf16>, vector<128x128xbf16>, vector<64x128xf32> -> vector<64x128xf32>
    %429 = arith.addf %420, %428 : vector<64x128xf32>
    %c1_i32_391 = arith.constant 1 : i32
    %430 = arith.addi %0, %c1_i32_391 : i32
    %c0_392 = arith.constant 0 : index
    %c1_393 = arith.constant 1 : index
    %431 = arith.index_cast %430 : i32 to index
    %c1_394 = arith.constant 1 : index
    %c0_395 = arith.constant 0 : index
    %432 = vector.load %arg4[%c0_392, %c1_393, %431, %c1_394, %c0_395] : memref<1x4x9x9x128xbf16, #tpu.memory_space<vmem>>, vector<1x1x8x8x128xbf16>
    %433 = vector.shape_cast %432 : vector<1x1x8x8x128xbf16> to vector<8x8x128xbf16>
    %434 = vector.shape_cast %433 : vector<8x8x128xbf16> to vector<64x128xbf16>
    %c11_396 = arith.constant 11 : index
    %c0_397 = arith.constant 0 : index
    %c0_398 = arith.constant 0 : index
    %435 = vector.load %arg7[%c11_396, %c0_397, %c0_398] : memref<16x128x128xbf16, #tpu.memory_space<vmem>>, vector<1x128x128xbf16>
    %436 = vector.shape_cast %435 : vector<1x128x128xbf16> to vector<128x128xbf16>
    %cst_399 = arith.constant dense<0.000000e+00> : vector<64x128xf32>
    %437 = tpu.matmul %434, %436, %cst_399 {dimension_numbers = #tpu.dot_dimension_numbers<[1], [0], [0], [1], [0, 0, 1, 1], [], []>} : vector<64x128xbf16>, vector<128x128xbf16>, vector<64x128xf32> -> vector<64x128xf32>
    %438 = arith.addf %429, %437 : vector<64x128xf32>
    %c1_i32_400 = arith.constant 1 : i32
    %439 = arith.addi %0, %c1_i32_400 : i32
    %c0_401 = arith.constant 0 : index
    %c2_402 = arith.constant 2 : index
    %440 = arith.index_cast %439 : i32 to index
    %c0_403 = arith.constant 0 : index
    %c0_404 = arith.constant 0 : index
    %441 = vector.load %arg4[%c0_401, %c2_402, %440, %c0_403, %c0_404] : memref<1x4x9x9x128xbf16, #tpu.memory_space<vmem>>, vector<1x1x8x8x128xbf16>
    %442 = vector.shape_cast %441 : vector<1x1x8x8x128xbf16> to vector<8x8x128xbf16>
    %443 = vector.shape_cast %442 : vector<8x8x128xbf16> to vector<64x128xbf16>
    %c12_405 = arith.constant 12 : index
    %c0_406 = arith.constant 0 : index
    %c0_407 = arith.constant 0 : index
    %444 = vector.load %arg7[%c12_405, %c0_406, %c0_407] : memref<16x128x128xbf16, #tpu.memory_space<vmem>>, vector<1x128x128xbf16>
    %445 = vector.shape_cast %444 : vector<1x128x128xbf16> to vector<128x128xbf16>
    %cst_408 = arith.constant dense<0.000000e+00> : vector<64x128xf32>
    %446 = tpu.matmul %443, %445, %cst_408 {dimension_numbers = #tpu.dot_dimension_numbers<[1], [0], [0], [1], [0, 0, 1, 1], [], []>} : vector<64x128xbf16>, vector<128x128xbf16>, vector<64x128xf32> -> vector<64x128xf32>
    %447 = arith.addf %438, %446 : vector<64x128xf32>
    %c1_i32_409 = arith.constant 1 : i32
    %448 = arith.addi %0, %c1_i32_409 : i32
    %c0_410 = arith.constant 0 : index
    %c3_411 = arith.constant 3 : index
    %449 = arith.index_cast %448 : i32 to index
    %c0_412 = arith.constant 0 : index
    %c0_413 = arith.constant 0 : index
    %450 = vector.load %arg4[%c0_410, %c3_411, %449, %c0_412, %c0_413] : memref<1x4x9x9x128xbf16, #tpu.memory_space<vmem>>, vector<1x1x8x8x128xbf16>
    %451 = vector.shape_cast %450 : vector<1x1x8x8x128xbf16> to vector<8x8x128xbf16>
    %452 = vector.shape_cast %451 : vector<8x8x128xbf16> to vector<64x128xbf16>
    %c13_414 = arith.constant 13 : index
    %c0_415 = arith.constant 0 : index
    %c0_416 = arith.constant 0 : index
    %453 = vector.load %arg7[%c13_414, %c0_415, %c0_416] : memref<16x128x128xbf16, #tpu.memory_space<vmem>>, vector<1x128x128xbf16>
    %454 = vector.shape_cast %453 : vector<1x128x128xbf16> to vector<128x128xbf16>
    %cst_417 = arith.constant dense<0.000000e+00> : vector<64x128xf32>
    %455 = tpu.matmul %452, %454, %cst_417 {dimension_numbers = #tpu.dot_dimension_numbers<[1], [0], [0], [1], [0, 0, 1, 1], [], []>} : vector<64x128xbf16>, vector<128x128xbf16>, vector<64x128xf32> -> vector<64x128xf32>
    %456 = arith.addf %447, %455 : vector<64x128xf32>
    %c1_i32_418 = arith.constant 1 : i32
    %457 = arith.addi %0, %c1_i32_418 : i32
    %c0_419 = arith.constant 0 : index
    %c2_420 = arith.constant 2 : index
    %458 = arith.index_cast %457 : i32 to index
    %c1_421 = arith.constant 1 : index
    %c0_422 = arith.constant 0 : index
    %459 = vector.load %arg4[%c0_419, %c2_420, %458, %c1_421, %c0_422] : memref<1x4x9x9x128xbf16, #tpu.memory_space<vmem>>, vector<1x1x8x8x128xbf16>
    %460 = vector.shape_cast %459 : vector<1x1x8x8x128xbf16> to vector<8x8x128xbf16>
    %461 = vector.shape_cast %460 : vector<8x8x128xbf16> to vector<64x128xbf16>
    %c14_423 = arith.constant 14 : index
    %c0_424 = arith.constant 0 : index
    %c0_425 = arith.constant 0 : index
    %462 = vector.load %arg7[%c14_423, %c0_424, %c0_425] : memref<16x128x128xbf16, #tpu.memory_space<vmem>>, vector<1x128x128xbf16>
    %463 = vector.shape_cast %462 : vector<1x128x128xbf16> to vector<128x128xbf16>
    %cst_426 = arith.constant dense<0.000000e+00> : vector<64x128xf32>
    %464 = tpu.matmul %461, %463, %cst_426 {dimension_numbers = #tpu.dot_dimension_numbers<[1], [0], [0], [1], [0, 0, 1, 1], [], []>} : vector<64x128xbf16>, vector<128x128xbf16>, vector<64x128xf32> -> vector<64x128xf32>
    %465 = arith.addf %456, %464 : vector<64x128xf32>
    %c1_i32_427 = arith.constant 1 : i32
    %466 = arith.addi %0, %c1_i32_427 : i32
    %c0_428 = arith.constant 0 : index
    %c3_429 = arith.constant 3 : index
    %467 = arith.index_cast %466 : i32 to index
    %c1_430 = arith.constant 1 : index
    %c0_431 = arith.constant 0 : index
    %468 = vector.load %arg4[%c0_428, %c3_429, %467, %c1_430, %c0_431] : memref<1x4x9x9x128xbf16, #tpu.memory_space<vmem>>, vector<1x1x8x8x128xbf16>
    %469 = vector.shape_cast %468 : vector<1x1x8x8x128xbf16> to vector<8x8x128xbf16>
    %470 = vector.shape_cast %469 : vector<8x8x128xbf16> to vector<64x128xbf16>
    %c15_432 = arith.constant 15 : index
    %c0_433 = arith.constant 0 : index
    %c0_434 = arith.constant 0 : index
    %471 = vector.load %arg7[%c15_432, %c0_433, %c0_434] : memref<16x128x128xbf16, #tpu.memory_space<vmem>>, vector<1x128x128xbf16>
    %472 = vector.shape_cast %471 : vector<1x128x128xbf16> to vector<128x128xbf16>
    %cst_435 = arith.constant dense<0.000000e+00> : vector<64x128xf32>
    %473 = tpu.matmul %470, %472, %cst_435 {dimension_numbers = #tpu.dot_dimension_numbers<[1], [0], [0], [1], [0, 0, 1, 1], [], []>} : vector<64x128xbf16>, vector<128x128xbf16>, vector<64x128xf32> -> vector<64x128xf32>
    %474 = arith.addf %465, %473 : vector<64x128xf32>
    %c0_436 = arith.constant 0 : index
    %c0_437 = arith.constant 0 : index
    %475 = vector.load %arg11[%c0_436, %c0_437] : memref<64x128xf32, #tpu.memory_space<vmem>>, vector<64x128xf32>
    tpu.vector_store %arg11[%c0_436, %c0_437], %474 {strides = array<i32>} : memref<64x128xf32, #tpu.memory_space<vmem>>, vector<64x128xf32>,
    %c0_i32_438 = arith.constant 0 : i32
    %476 = arith.cmpi eq, %arg2, %c0_i32_438 : i32
    %477 = arith.extui %476 : i1 to i32
    %c0_i32_439 = arith.constant 0 : i32
    %478 = arith.cmpi ne, %477, %c0_i32_439 : i32
    scf.if %478 {
      %c0_440 = arith.constant 0 : index
      %c0_441 = arith.constant 0 : index
      %479 = vector.load %arg6[%c0_440, %c0_441] : memref<1x128xf32, #tpu.memory_space<vmem>>, vector<1x128xf32>
      %480 = vector.broadcast %479 : vector<1x128xf32> to vector<64x128xf32>
      %481 = arith.addf %328, %480 : vector<64x128xf32>
      %cst_442 = arith.constant 0.000000e+00 : f32
      %482 = vector.broadcast %cst_442 : f32 to vector<64x128xf32>
      %483 = arith.cmpf oge, %481, %482 : vector<64x128xf32>
      %cst_443 = arith.constant 2.000000e-01 : f32
      %484 = vector.broadcast %cst_443 : f32 to vector<64x128xf32>
      %485 = arith.mulf %484, %481 : vector<64x128xf32>
      %486 = arith.select %483, %481, %485 : vector<64x128xi1>, vector<64x128xf32>
      %487 = arith.addf %486, %474 : vector<64x128xf32>
      %c0_444 = arith.constant 0 : index
      %c0_445 = arith.constant 0 : index
      %488 = vector.load %arg8[%c0_444, %c0_445] : memref<1x128xf32, #tpu.memory_space<vmem>>, vector<1x128xf32>
      %489 = vector.broadcast %488 : vector<1x128xf32> to vector<64x128xf32>
      %490 = arith.addf %487, %489 : vector<64x128xf32>
      %491 = vector.shape_cast %490 : vector<64x128xf32> to vector<1x8x8x128xf32>
      %492 = arith.truncf %491 : vector<1x8x8x128xf32> to vector<1x8x8x128xbf16>
      %c0_446 = arith.constant 0 : index
      %c0_447 = arith.constant 0 : index
      %c0_448 = arith.constant 0 : index
      %c0_449 = arith.constant 0 : index
      %493 = vector.load %arg9[%c0_446, %c0_447, %c0_448, %c0_449] : memref<1x8x8x128xbf16, #tpu.memory_space<vmem>>, vector<1x8x8x128xbf16>
      tpu.vector_store %arg9[%c0_446, %c0_447, %c0_448, %c0_449], %492 {strides = array<i32>} : memref<1x8x8x128xbf16, #tpu.memory_space<vmem>>, vector<1x8x8x128xbf16>,
    } else {
    }
    return
  }
  func.func @transform_0(%arg0: i32, %arg1: i32, %arg2: i32) -> (i32, i32, i32, i32, i32) {
    %c0_i32 = arith.constant 0 : i32
    %c0_i32_0 = arith.constant 0 : i32
    %c0_i32_1 = arith.constant 0 : i32
    %c0_i32_2 = arith.constant 0 : i32
    return %arg0, %c0_i32, %c0_i32_0, %c0_i32_1, %arg2 : i32, i32, i32, i32, i32
  }
  func.func @transform_1(%arg0: i32, %arg1: i32, %arg2: i32) -> (i32, i32, i32, i32, i32) {
    %c0_i32 = arith.constant 0 : i32
    %c0_i32_0 = arith.constant 0 : i32
    %c0_i32_1 = arith.constant 0 : i32
    %c0_i32_2 = arith.constant 0 : i32
    return %arg0, %c0_i32, %c0_i32_0, %c0_i32_1, %arg2 : i32, i32, i32, i32, i32
  }
  func.func @transform_2(%arg0: i32, %arg1: i32, %arg2: i32) -> (i32, i32, i32) {
    %c0_i32 = arith.constant 0 : i32
    %c0_i32_0 = arith.constant 0 : i32
    %c0_i32_1 = arith.constant 0 : i32
    return %c0_i32, %arg2, %c0_i32_0 : i32, i32, i32
  }
  func.func @transform_3(%arg0: i32, %arg1: i32, %arg2: i32) -> (i32, i32) {
    %c0_i32 = arith.constant 0 : i32
    %c0_i32_0 = arith.constant 0 : i32
    %c0_i32_1 = arith.constant 0 : i32
    return %c0_i32, %c0_i32_0 : i32, i32
  }
  func.func @transform_4(%arg0: i32, %arg1: i32, %arg2: i32) -> (i32, i32, i32) {
    %c0_i32 = arith.constant 0 : i32
    %c0_i32_0 = arith.constant 0 : i32
    %c0_i32_1 = arith.constant 0 : i32
    return %c0_i32, %arg2, %c0_i32_0 : i32, i32, i32
  }
  func.func @transform_5(%arg0: i32, %arg1: i32, %arg2: i32) -> (i32, i32) {
    %c0_i32 = arith.constant 0 : i32
    %c0_i32_0 = arith.constant 0 : i32
    %c0_i32_1 = arith.constant 0 : i32
    return %c0_i32, %c0_i32_0 : i32, i32
  }
  func.func @transform_6(%arg0: i32, %arg1: i32, %arg2: i32) -> (i32, i32, i32, i32) {
    %c0_i32 = arith.constant 0 : i32
    %c0_i32_0 = arith.constant 0 : i32
    %c0_i32_1 = arith.constant 0 : i32
    return %arg0, %arg1, %c0_i32, %c0_i32_0 : i32, i32, i32, i32
  }
}

</mosaic_0001>

<bundles_post_ra>
// kernel: resblock_forward.2
= control target key start
LH: loop header
LB: loop body
LE: loop exit
PB: predicated region body
PF: predicated region fallthrough
CT: control target
= control target key end

     0   :  { %s7342_s12 = smov 0   ;;  %s7344_s13 = smov 0   ;;  %s9216_s0 = inlined_call_operand.vmem [shape: bf16[2,18,18,128], index: 0, kind: input, shape index: {}]   ;;  %s9217_s1 = inlined_call_operand.vmem [shape: bf16[9,128,128], index: 1, kind: input, shape index: {}]   ;;  %s9218_s2 = inlined_call_operand.vmem [shape: f32[1,128], index: 2, kind: input, shape index: {}]   ;;  %s9219_s3 = inlined_call_operand.vmem [shape: bf16[2,16,16,128], index: 3, kind: output, shape index: {}]  }
   0x1   :  { %s7346_s14 = smov 0  }
   0x2 LB: > { %s25_s15 = sadd.s32 1, %s7316_s13  ;;  %p5412_p0 = scmp.ge.s32.totalorder %s7320_s14, 1  ;;  %s7320_s14 = sphi %s7346_s14, %s13_s14   ;;  %s7316_s13 = sphi %s7344_s13, %s9287_s13   ;;  %s7312_s12 = sphi %s7342_s12, %s9286_s12  }
   0x3   : > { %p27_p1 = scmp.ge.s32.totalorder %s25_s15, 2  ;;  %p151_p2 = scmp.lt.s32.totalorder %s7320_s14, 3 }
   0x5   : > { %s9289_s15 = smov (%p27_p1, %s25_s15), 0  ;;  %p152_p3 = pnand %p5412_p0, %p151_p2 }
   0x7   : > { %155 = sbr.rel (%p152_p3) target bundleno = 591 (0x24f), region = 32 }
   0xe   : > { %v7108_v0 = vld [vmem:[%s9217_s1 + $0x40] sm:$0xff]   ;;  %p180_p4 = scmp.lt.s32.totalorder %s7312_s12, 1  ;;  %v7110_v2 = vld [vmem:[%s9217_s1 + $0x48] sm:$0xff]   ;;  %v7112_v4 = vld [vmem:[%s9217_s1 + $0x50] sm:$0xff]   ;;  %vm265_vm0 = vsmask.f32 3328 }
   0xf   : > { %v7109_v1 = vld [vmem:[%s9217_s1 + $0x100] sm:$0xff]   ;;  %6379 = vmatprep.subr.bf16.mxu1 %v7108_v0  ;;  %v7111_v3 = vld [vmem:[%s9217_s1 + $0x108] sm:$0xff]   ;;  %v7113_v5 = vld [vmem:[%s9217_s1 + $0x110] sm:$0xff]   ;;  %vm266_vm1 = vsmask.f32 7440  ;;  %vm1295_vm3 = vcmask 1042432  }
  0x10   : > { %6571 = vmatprep.subr.bf16.mxu0 %v7109_v1  ;;  %6380 = vmatpush3.bf16.msra.mxu1 %v7108_v0  ;;  %s9291_s12 = smov (!%p180_p4, %s7312_s12), 1  ;;  %v7114_v6 = vld [vmem:[%s9217_s1 + $0x58] sm:$0xff]   ;;  %v7116_v8 = vld [vmem:[%s9217_s1 + $0x60] sm:$0xff]   ;;  %v7118_v10 = vld [vmem:[%s9217_s1 + $0x68] sm:$0xff]   ;;  %vm1296_vm4 = vcmask 1046532  }
  0x11   : > { %6572 = vmatpush3.bf16.msra.mxu0 %v7109_v1  ;;  %6381 = vmatprep.subr.bf16.mxu1 %v7110_v2  ;;  %v7115_v7 = vld [vmem:[%s9217_s1 + $0x118] sm:$0xff]   ;;  %s7083_s5 = smul.u32 216, %s9291_s12  ;;  %v7117_v9 = vld [vmem:[%s9217_s1 + $0x120] sm:$0xff]   ;;  %v7119_v11 = vld [vmem:[%s9217_s1 + $0x128] sm:$0xff]   ;;  %s6035_s26 = sshll.u32 %s9291_s12, 7 }
  0x12   : > { %6573 = vmatprep.subr.bf16.mxu0 %v7111_v3  ;;  %v7120_v25 = vld [vmem:[%s9217_s1 + $0x70] sm:$0xff]   ;;  %v7122_v36 = vld [vmem:[%s9217_s1 + $0x78] sm:$0xff]   ;;  %vm7428_vm2 = vmor %vm265_vm0, %vm266_vm1  ;;  %s9153_s29 = scalar_lea.vmem %s9219_s3, %s6035_s26 }
  0x13   : > { %s7396_s16 = scalar_lea.vmem %s9216_s0, %s7083_s5  ;;  %v7121_v30 = vld [vmem:[%s9217_s1 + $0x130] sm:$0xff]   ;;  %v7123_v51 = vld [vmem:[%s9217_s1 + $0x138] sm:$0xff]   ;;  %vm7674_vm5 = vmor %vm1295_vm3, %vm1296_vm4 }
  0x14   : > { %6382 = vmatpush3.bf16.msra.mxu1 %v7110_v2  ;;  %v201_v12 = vld [vmem:[%s7396_s16] sm:$0xf]  ;;  %v202_v13 = vld [vmem:[%s7396_s16 + $0x4] sm:$0xf]  ;;  %v249_v14 = vld [vmem:[%s7396_s16 + $0x8] sm:$0x1] }
  0x15   : > { %6574 = vmatpush3.bf16.msra.mxu0 %v7111_v3  ;;  %6383 = vmatprep.subr.bf16.mxu1 %v7112_v4  ;;  %v269_v15 = vshrl.u32 %v201_v12, 16  ;;  %v272_v16 = vshll.u32 %v201_v12, 16  ;;  %v278_v17 = vshll.u32 %v202_v13, 16  ;;  %v282_v18 = vshrl.u32 %v202_v13, 16  ;;  %v5608_v20 = vld [vmem:[%s7396_s16 + $0xc] sm:$0xf] }
  0x16   : > { %6575 = vmatprep.subr.bf16.mxu0 %v7113_v5  ;;  %v288_v19 = vshll.u32 %v249_v14, 16  ;;  %v7409_v23 = vld [vmem:[%s7396_s16 + $0x10] sm:$0xf]  ;;  %v7412_v24 = vld [vmem:[%s7396_s16 + $0x14] sm:$0x1]  ;;  %v2171_v29 = vshrl.u32 %v5608_v20, 16 }
  0x17   : > { %v271_v21 = vrot.slane %v269_v15, 4  ;;  %v274_v22 = vrot.slane %v272_v16, 5  ;;  %v280_v26 = vrot.slane %v278_v17, 5  ;;  %v284_v27 = vrot.slane %v282_v18, 4  ;;  %v203_v35 = vld [vmem:[%s7396_s16 + $0xc] sm:$0xf] }
  0x18   : > { %6384 = vmatpush3.bf16.msra.mxu1 %v7112_v4  ;;  %v290_v28 = vrot.slane %v288_v19, 5  ;;  %v2174_v32 = vshll.u32 %v5608_v20, 16  ;;  %v2180_v33 = vshll.u32 %v7409_v23, 16  ;;  %v2184_v34 = vshrl.u32 %v7409_v23, 16  ;;  %v204_v42 = vld [vmem:[%s7396_s16 + $0x10] sm:$0xf] }
  0x19   : > { %6576 = vmatpush3.bf16.msra.mxu0 %v7113_v5  ;;  %6385 = vmatprep.subr.bf16.mxu1 %v7114_v6  ;;  %v275_v31 = vor.u32 %v274_v22, %v271_v21  ;;  %v285_v38 = vor.u32 %v284_v27, %v280_v26  ;;  %v2173_v39 = vrot.slane %v2171_v29, 4  ;;  %v2190_v40 = vshll.u32 %v7412_v24, 16  ;;  %v250_v55 = vld [vmem:[%s7396_s16 + $0x14] sm:$0x1]  ;;  %v5611_v57 = vld [vmem:[%s7396_s16 + $0x18] sm:$0xf] }
  0x1a   : > { %6577 = vmatprep.subr.bf16.mxu0 %v7115_v7  ;;  %v2945_v41 = vrot.slane %v7412_v24, 5  ;;  %v2176_v44 = vrot.slane %v2174_v32, 5  ;;  %v2182_v45 = vrot.slane %v2180_v33, 5  ;;  %v2186_v46 = vrot.slane %v2184_v34, 4  ;;  %v7445_v62 = vld [vmem:[%s7396_s16 + $0x1c] sm:$0xf] }
  0x1b   : > { %v276_v43 = vrot.slane %v275_v31, 4  ;;  %v286_v47 = vrot.slane %v285_v38, 4  ;;  %v2192_v48 = vrot.slane %v2190_v40, 5  ;;  %v293_v49 = vshrl.u32 %v203_v35, 16  ;;  %v7124_v3 = vld [vmem:[%s9217_s1] sm:$0xff]  }
  0x1c   : > { %6386 = vmatpush3.bf16.msra.mxu1 %v7114_v6  ;;  %v296_v50 = vshll.u32 %v203_v35, 16  ;;  %v2177_v53 = vor.u32 %v2176_v44, %v2173_v39  ;;  %v2187_v54 = vor.u32 %v2186_v46, %v2182_v45  ;;  %v302_v56 = vshll.u32 %v204_v42, 16  ;;  %v7453_v4 = vld [vmem:[%s9217_s1 + $0x140] sm:$0xff]   ;;  %v205_v21 = vld [vmem:[%s7396_s16 + $0x18] sm:$0xf]  ;;  %v7127_v46 = vld [vmem:[%s9217_s1 + $0x8] sm:$0xff]  }
  0x1d   : > { %6578 = vmatpush3.bf16.msra.mxu0 %v7115_v7  ;;  %6387 = vmatprep.subr.bf16.mxu1 %v7116_v8  ;;  %v281_v52 = vsel %vm7428_vm2, %v276_v43, %v280_v26  ;;  %v291_v58 = vsel %vm7428_vm2, %v286_v47, %v290_v28  ;;  %v295_v59 = vrot.slane %v293_v49, 4  ;;  %v306_v61 = vshrl.u32 %v204_v42, 16  ;;  %v206_v28 = vld [vmem:[%s7396_s16 + $0x1c] sm:$0xf]  ;;  %v251_v33 = vld [vmem:[%s7396_s16 + $0x20] sm:$0x1] }
  0x1e   : > { %6579 = vmatprep.subr.bf16.mxu0 %v7117_v9  ;;  %v298_v60 = vrot.slane %v296_v50, 5  ;;  %v5432_v63 = vcombine.low %v281_v52, %v291_v58  ;;  %v2178_v0 = vrot.slane %v2177_v53, 4  ;;  %v2188_v1 = vrot.slane %v2187_v54, 4  ;;  %v5614_v39 = vld [vmem:[%s7396_s16 + $0x24] sm:$0xf] }
  0x1f   : > { %v304_v2 = vrot.slane %v302_v56, 5  ;;  %v308_v6 = vrot.slane %v306_v61, 4  ;;  %v312_v7 = vshll.u32 %v250_v55, 16  ;;  %v2198_v12 = vshll.u32 %v5611_v57, 16  ;;  %v207_v52 = vld [vmem:[%s7396_s16 + $0x24] sm:$0xf] }
  0x20   : > { %6388 = vmatpush3.bf16.msra.mxu1 %v7116_v8  ;;  %v299_v5 = vor.u32 %v298_v60, %v295_v59  ;;  %v7456_v8 = vld [vmem:[%s7396_s16 + $0x20] sm:$0x1]  ;;  %6395 = vmatprep.mubr.bf16.mxu1 %v5432_v63  ;;  %v2204_v19 = vshll.u32 %v7445_v62, 16  ;;  %v2208_v20 = vshrl.u32 %v7445_v62, 16  ;;  %v2949_v27 = vrot.slane %v7445_v62, 5  ;;  %v7126_v63 = vld [vmem:[%s9217_s1 + $0x148] sm:$0xff]  }
  0x21   : > { %6580 = vmatpush3.bf16.msra.mxu0 %v7117_v9  ;;  %6389 = vmatprep.subr.bf16.mxu1 %v7118_v10  ;;  %v2183_v9 = vsel %vm7428_vm2, %v2178_v0, %v2182_v45  ;;  %v309_v15 = vor.u32 %v308_v6, %v304_v2  ;;  %v314_v16 = vrot.slane %v312_v7, 5  ;;  %v2200_v18 = vrot.slane %v2198_v12, 5  ;;  %v7481_v45 = vld [vmem:[%s7396_s16 + $0x28] sm:$0xf] }
  0x22   : > { %6581 = vmatprep.subr.bf16.mxu0 %v7119_v11  ;;  %v300_v14 = vrot.slane %v299_v5, 4  ;;  %v2214_v26 = vshll.u32 %v7456_v8, 16  ;;  %v2210_v31 = vrot.slane %v2208_v20, 4  ;;  %v2952_v32 = vrot.slane %v7456_v8, 5  ;;  %v208_v5 = vld [vmem:[%s7396_s16 + $0x28] sm:$0xf] }
  0x23   : > { %v317_v38 = vshrl.u32 %v205_v21, 16  ;;  %v320_v44 = vshll.u32 %v205_v21, 16  ;;  %v330_v49 = vshrl.u32 %v206_v28, 16  ;;  %v336_v50 = vshll.u32 %v251_v33, 16  ;;  %v7512_v33 = vld [vmem:[%s7396_s16 + $0x34] sm:$0xf] }
  0x24   : > { %6390 = vmatpush3.bf16.msra.mxu1 %v7118_v10  ;;  %v2193_v10 = vsel %vm7428_vm2, %v2188_v1, %v2192_v48  ;;  %v305_v22 = vsel %vm7428_vm2, %v300_v14, %v304_v2  ;;  %v2216_v35 = vrot.slane %v2214_v26, 5  ;;  %v326_v48 = vshll.u32 %v206_v28, 16 }
  0x25   : > { %6582 = vmatpush3.bf16.msra.mxu0 %v7119_v11  ;;  %6391 = vmatprep.subr.bf16.mxu1 %v7120_v25  ;;  %v2195_v11 = vshrl.u32 %v5611_v57, 16  ;;  %v5672_v13 = vcombine.low %v2183_v9, %v2193_v10  ;;  %v319_v47 = vrot.slane %v317_v38, 4  ;;  %v322_v55 = vrot.slane %v320_v44, 5 }
  0x26   : > { %6583 = vmatprep.subr.bf16.mxu0 %v7121_v30  ;;  %v2219_v56 = vshrl.u32 %v5614_v39, 16  ;;  %v328_v57 = vrot.slane %v326_v48, 5  ;;  %v332_v58 = vrot.slane %v330_v49, 4  ;;  %v338_v59 = vrot.slane %v336_v50, 5  ;;  %v7129_v48 = vld [vmem:[%s9217_s1 + $0x158] sm:$0xff]  }
  0x27   : > { %v2197_v17 = vrot.slane %v2195_v11, 4  ;;  %6587 = vmatprep.mubr.bf16.mxu0 %v5672_v13  ;;  %v2222_v60 = vshll.u32 %v5614_v39, 16  ;;  %v323_v0 = vor.u32 %v322_v55, %v319_v47  ;;  %v2228_v2 = vshll.u32 %v7481_v45, 16  ;;  %v252_v11 = vld [vmem:[%s7396_s16 + $0x2c] sm:$0x1] }
  0x28   : > { %6392 = vmatpush3.bf16.msra.mxu1 %v7120_v25  ;;  %v310_v25 = vrot.slane %v309_v15, 4  ;;  %v2221_v1 = vrot.slane %v2219_v56, 4  ;;  %v333_v7 = vor.u32 %v332_v58, %v328_v57  ;;  %v2232_v10 = vshrl.u32 %v7481_v45, 16 }
  0x29   : > { %6584 = vmatpush3.bf16.msra.mxu0 %v7121_v30  ;;  %6393 = vmatprep.subr.bf16.mxu1 %v7122_v36  ;;  %v2201_v29 = vor.u32 %v2200_v18, %v2197_v17  ;;  %v2206_v30 = vrot.slane %v2204_v19, 5  ;;  %v2224_v9 = vrot.slane %v2222_v60, 5  ;;  %v324_v12 = vrot.slane %v323_v0, 4  ;;  %v7136_v60 = vld [vmem:[%s9217_s1 + $0x20] sm:$0xff]  }
  0x2a   : > { %6585 = vmatprep.subr.bf16.mxu0 %v7123_v51  ;;  %v315_v34 = vsel %vm7428_vm2, %v310_v25, %v314_v16  ;;  %v2230_v13 = vrot.slane %v2228_v2, 5  ;;  %v341_v15 = vshrl.u32 %v207_v52, 16  ;;  %v5617_v16 = vld [vmem:[%s7396_s16 + $0x30] sm:$0xf]  ;;  %v334_v17 = vrot.slane %v333_v7, 4 }
  0x2b   : > { %v5433_v40 = vcombine.low %v305_v22, %v315_v34  ;;  %v2202_v42 = vrot.slane %v2201_v29, 4  ;;  %v2211_v43 = vor.u32 %v2210_v31, %v2206_v30  ;;  %v2225_v18 = vor.u32 %v2224_v9, %v2221_v1  ;;  %v7133_v34 = vld [vmem:[%s9217_s1 + $0x18] sm:$0xff]  }
  0x2c   : > { %6394 = vmatpush3.bf16.msra.mxu1 %v7122_v36  ;;  %v7477_v36 = vrot.slane %v2949_v27, 4  ;;  %v2234_v19 = vrot.slane %v2232_v10, 4  ;;  %v344_v20 = vshll.u32 %v207_v52, 16  ;;  %v329_v21 = vsel %vm7428_vm2, %v324_v12, %v328_v57  ;;  %v253_v2 = vld [vmem:[%s7396_s16 + $0x38] sm:$0x1] }
  0x2d   : > { %6586 = vmatpush3.bf16.msra.mxu0 %v7123_v51  ;;  %6427 = vmatprep.subr.bf16.mxu1 %v7124_v3  ;;  %v7487_v51 = vld [vmem:[%s7396_s16 + $0x2c] sm:$0x1]  ;;  %v2207_v53 = vsel %vm7428_vm2, %v2202_v42, %v2206_v30  ;;  %v2212_v54 = vrot.slane %v2211_v43, 4  ;;  %v343_v25 = vrot.slane %v341_v15, 4  ;;  %v350_v26 = vshll.u32 %v208_v5, 16 }
  0x2e   : > { %6619 = vmatprep.subr.bf16.mxu0 %v7453_v4  ;;  %v2238_v14 = vshll.u32 %v7487_v51, 16  ;;  %v339_v28 = vsel %vm7428_vm2, %v334_v17, %v338_v59  ;;  %v2226_v29 = vrot.slane %v2225_v18, 4  ;;  %v2235_v30 = vor.u32 %v2234_v19, %v2230_v13  ;;  %v210_v59 = vld [vmem:[%s7396_s16 + $0x34] sm:$0xf]  ;;  %v5620_v9 = vld [vmem:[%s7396_s16 + $0x3c] sm:$0xf] }
  0x2f   : > { %6396 = vmatmul.mubr.bf16.vlgmr.msra.gmra.mrb[0].mxu1 %v5433_v40  ;;  %v2217_v61 = vsel %vm7428_vm2, %v2212_v54, %v2216_v35  ;;  %v346_v31 = vrot.slane %v344_v20, 5  ;;  %v5434_v35 = vcombine.low %v329_v21, %v339_v28  ;;  %v352_v38 = vrot.slane %v350_v26, 5  ;;  %v209_v54 = vld [vmem:[%s7396_s16 + $0x30] sm:$0xf]  ;;  %v7546_v19 = vld [vmem:[%s7396_s16 + $0x40] sm:$0xf] }
  0x30   : > { %6428 = vmatpush3.bf16.msra.mxu1 %v7124_v3  ;;  %v7130_v3 = vld [vmem:[%s9217_s1 + $0x10] sm:$0xff]   ;;  %v5673_v6 = vcombine.low %v2207_v53, %v2217_v61  ;;  %v2240_v22 = vrot.slane %v2238_v14, 5  ;;  %v354_v39 = vshrl.u32 %v208_v5, 16  ;;  %v360_v40 = vshll.u32 %v252_v11, 16  ;;  %v7138_v14 = vld [vmem:[%s9217_s1 + $0x28] sm:$0xff]   ;;  %v7131_v20 = vld [vmem:[%s9217_s1 + $0x160] sm:$0xff]  }
  0x31   : > { %6429 = vmatprep.subr.bf16.mxu1 %v7127_v46  ;;  %v2231_v42 = vsel %vm7428_vm2, %v2226_v29, %v2230_v13  ;;  %v2236_v43 = vrot.slane %v2235_v30, 4  ;;  %v347_v44 = vor.u32 %v346_v31, %v343_v25  ;;  %v2243_v47 = vshrl.u32 %v5617_v16, 16  ;;  %6399 = vmatprep.mubr.bf16.mxu1 %v5434_v35  ;;  %v7554_v28 = vld [vmem:[%s7396_s16 + $0x44] sm:$0x1]  ;;  %v7140_v35 = vld [vmem:[%s9217_s1 + $0x30] sm:$0xff]  }
  0x32   : > { %6588 = vmatmul.mubr.bf16.vlgmr.msra.gmra.mrb[0].mxu0 %v5673_v6  ;;  %v356_v49 = vrot.slane %v354_v39, 4  ;;  %v362_v50 = vrot.slane %v360_v40, 5  ;;  %v2246_v52 = vshll.u32 %v5617_v16, 16  ;;  %v2252_v53 = vshll.u32 %v7512_v33, 16 }
  0x33   : > { %6620 = vmatpush3.bf16.msra.mxu0 %v7453_v4  ;;  %v7128_v4 = vld [vmem:[%s9217_s1 + $0x150] sm:$0xff]   ;;  %v2241_v55 = vsel %vm7428_vm2, %v2236_v43, %v2240_v22  ;;  %v348_v56 = vrot.slane %v347_v44, 4  ;;  %v2245_v57 = vrot.slane %v2243_v47, 4  ;;  %v2256_v58 = vshrl.u32 %v7512_v33, 16 }
  0x34   : > { %6430 = vmatpush3.bf16.msra.mxu1 %v7127_v46  ;;  %6621 = vmatprep.subr.bf16.mxu0 %v7126_v63  ;;  %v7523_v46 = vld [vmem:[%s7396_s16 + $0x38] sm:$0x1]  ;;  %v5674_v61 = vcombine.low %v2231_v42, %v2241_v55  ;;  %v2248_v0 = vrot.slane %v2246_v52, 5  ;;  %v2254_v1 = vrot.slane %v2252_v53, 5  ;;  %v365_v7 = vshrl.u32 %v209_v54, 16 }
  0x35   : > { %6431 = vmatprep.subr.bf16.mxu1 %v7130_v3  ;;  %v353_v5 = vsel %vm7428_vm2, %v348_v56, %v352_v38  ;;  %v2262_v6 = vshll.u32 %v7523_v46, 16  ;;  %v368_v12 = vshll.u32 %v209_v54, 16  ;;  %v374_v13 = vshll.u32 %v210_v59, 16  ;;  %v212_v55 = vld [vmem:[%s7396_s16 + $0x40] sm:$0xf] }
  0x36   : > { %6591 = vmatprep.mubr.bf16.mxu0 %v5674_v61  ;;  %v2249_v11 = vor.u32 %v2248_v0, %v2245_v57  ;;  %v367_v17 = vrot.slane %v365_v7, 4  ;;  %v378_v18 = vshrl.u32 %v210_v59, 16  ;;  %v2267_v40 = vshrl.u32 %v5620_v9, 16 }
  0x37   : > { %6622 = vmatpush3.bf16.msra.mxu0 %v7126_v63  ;;  %v357_v63 = vor.u32 %v356_v49, %v352_v38  ;;  %v2264_v16 = vrot.slane %v2262_v6, 5  ;;  %v370_v25 = vrot.slane %v368_v12, 5  ;;  %v376_v26 = vrot.slane %v374_v13, 5 }
  0x38   : > { %6432 = vmatpush3.bf16.msra.mxu1 %v7130_v3  ;;  %6623 = vmatprep.subr.bf16.mxu0 %v7128_v4  ;;  %v2258_v3 = vrot.slane %v2256_v58, 4  ;;  %v2250_v22 = vrot.slane %v2249_v11, 4  ;;  %v380_v31 = vrot.slane %v378_v18, 4  ;;  %v2270_v42 = vshll.u32 %v5620_v9, 16  ;;  %v5623_v9 = vld [vmem:[%s7396_s16 + $0x48] sm:$0xf] }
  0x39   : > { %6433 = vmatprep.subr.bf16.mxu1 %v7133_v34  ;;  %v358_v10 = vrot.slane %v357_v63, 4  ;;  %v371_v39 = vor.u32 %v370_v25, %v367_v17  ;;  %v2276_v49 = vshll.u32 %v7546_v19, 16  ;;  %v2269_v53 = vrot.slane %v2267_v40, 4  ;;  %v254_v63 = vld [vmem:[%s7396_s16 + $0x44] sm:$0x1] }
  0x3a   : > { %v2259_v15 = vor.u32 %v2258_v3, %v2254_v1  ;;  %v2255_v38 = vsel %vm7428_vm2, %v2250_v22, %v2254_v1  ;;  %v381_v44 = vor.u32 %v380_v31, %v376_v26  ;;  %v2272_v54 = vrot.slane %v2270_v42, 5  ;;  %v7587_v22 = vld [vmem:[%s7396_s16 + $0x50] sm:$0x1]  ;;  %v7135_v31 = vld [vmem:[%s9217_s1 + $0x178] sm:$0xff]  }
  0x3b   : > { %6624 = vmatpush3.bf16.msra.mxu0 %v7128_v4  ;;  %v363_v21 = vsel %vm7428_vm2, %v358_v10, %v362_v50  ;;  %v384_v4 = vshll.u32 %v253_v2, 16  ;;  %v372_v52 = vrot.slane %v371_v39, 4  ;;  %v2278_v57 = vrot.slane %v2276_v49, 5  ;;  %v7142_v2 = vld [vmem:[%s9217_s1 + $0x38] sm:$0xff]  }
  0x3c   : > { %6434 = vmatpush3.bf16.msra.mxu1 %v7133_v34  ;;  %6625 = vmatprep.subr.bf16.mxu0 %v7129_v48  ;;  %v5435_v29 = vcombine.low %v353_v5, %v363_v21  ;;  %v2260_v30 = vrot.slane %v2259_v15, 4  ;;  %v211_v34 = vld [vmem:[%s7396_s16 + $0x3c] sm:$0xf]  ;;  %v382_v56 = vrot.slane %v381_v44, 4  ;;  %v2280_v58 = vshrl.u32 %v7546_v19, 16  ;;  %v7134_v15 = vld [vmem:[%s9217_s1 + $0x170] sm:$0xff]  }
  0x3d   : > { %6435 = vmatprep.subr.bf16.mxu1 %v7136_v60  ;;  %v386_v47 = vrot.slane %v384_v4, 5  ;;  %v2286_v59 = vshll.u32 %v7554_v28, 16  ;;  %v2273_v61 = vor.u32 %v2272_v54, %v2269_v53  ;;  %v389_v0 = vshrl.u32 %v211_v34, 16  ;;  %v7598_v4 = vld [vmem:[%s9217_s1 + $0x80] sm:$0xff]   ;;  %v214_v53 = vld [vmem:[%s7396_s16 + $0x4c] sm:$0xf] }
  0x3e   : > { %6400 = vmatmul.mubr.bf16.gmra.mrb[4].mxu1 %v5435_v29  ;;  %v2265_v43 = vsel %vm7428_vm2, %v2260_v30, %v2264_v16  ;;  %v392_v1 = vshll.u32 %v211_v34, 16  ;;  %v2282_v3 = vrot.slane %v2280_v58, 4  ;;  %v398_v7 = vshll.u32 %v212_v55, 16  ;;  %v213_v30 = vld [vmem:[%s7396_s16 + $0x48] sm:$0xf] }
  0x3f   : > { %6626 = vmatpush3.bf16.msra.mxu0 %v7129_v48  ;;  %v5675_v50 = vcombine.low %v2255_v38, %v2265_v43  ;;  %v7132_v48 = vld [vmem:[%s9217_s1 + $0x168] sm:$0xff]   ;;  %v387_v5 = vsel %vm7428_vm2, %v382_v56, %v386_v47  ;;  %v2288_v6 = vrot.slane %v2286_v59, 5  ;;  %v2274_v11 = vrot.slane %v2273_v61, 4  ;;  %v255_v54 = vld [vmem:[%s7396_s16 + $0x50] sm:$0x1] }
  0x40   : > { %6436 = vmatpush3.bf16.msra.mxu1 %v7136_v60  ;;  %6627 = vmatprep.subr.bf16.mxu0 %v7131_v20  ;;  %v377_v60 = vsel %vm7428_vm2, %v372_v52, %v376_v26  ;;  %v391_v12 = vrot.slane %v389_v0, 4  ;;  %v394_v13 = vrot.slane %v392_v1, 5  ;;  %v2283_v16 = vor.u32 %v2282_v3, %v2278_v57  ;;  %v5626_v58 = vld [vmem:[%s7396_s16 + $0x54] sm:$0xf]  ;;  %v7612_v0 = vld [vmem:[%s7396_s16 + $0x58] sm:$0xf] }
  0x41   : > { %6437 = vmatprep.subr.bf16.mxu1 %v7138_v14  ;;  %6592 = vmatmul.mubr.bf16.gmra.mrb[4].mxu0 %v5675_v50  ;;  %v5436_v10 = vcombine.low %v377_v60, %v387_v5  ;;  %v400_v17 = vrot.slane %v398_v7, 5  ;;  %v402_v18 = vshrl.u32 %v212_v55, 16  ;;  %v408_v21 = vshll.u32 %v254_v63, 16 }
  0x42   : > { %v395_v25 = vor.u32 %v394_v13, %v391_v12  ;;  %v2291_v26 = vshrl.u32 %v5623_v9, 16  ;;  %v2294_v29 = vshll.u32 %v5623_v9, 16  ;;  %v2284_v34 = vrot.slane %v2283_v16, 4 }
  0x43   : > { %6628 = vmatpush3.bf16.msra.mxu0 %v7131_v20  ;;  %6403 = vmatprep.mubr.bf16.mxu1 %v5436_v10  ;;  %v2279_v20 = vsel %vm7428_vm2, %v2274_v11, %v2278_v57  ;;  %v410_v38 = vrot.slane %v408_v21, 5  ;;  %v2310_v52 = vshll.u32 %v7587_v22, 16  ;;  %v413_v61 = vshrl.u32 %v213_v30, 16 }
  0x44   : > { %6438 = vmatpush3.bf16.msra.mxu1 %v7138_v14  ;;  %v7581_v14 = vld [vmem:[%s7396_s16 + $0x4c] sm:$0xf]  ;;  %6629 = vmatprep.subr.bf16.mxu0 %v7132_v48  ;;  %v396_v40 = vrot.slane %v395_v25, 4  ;;  %v2293_v42 = vrot.slane %v2291_v26, 4  ;;  %v2296_v43 = vrot.slane %v2294_v29, 5  ;;  %v2289_v47 = vsel %vm7428_vm2, %v2284_v34, %v2288_v6  ;;  %v7617_v6 = vld [vmem:[%s9217_s1 + $0x180] sm:$0xff]  }
  0x45   : > { %6439 = vmatprep.subr.bf16.mxu1 %v7140_v35  ;;  %v2300_v39 = vshll.u32 %v7581_v14, 16  ;;  %v2304_v44 = vshrl.u32 %v7581_v14, 16  ;;  %v5676_v55 = vcombine.low %v2279_v20, %v2289_v47  ;;  %v2312_v60 = vrot.slane %v2310_v52, 5  ;;  %v7624_v20 = vld [vmem:[%s7396_s16 + $0x5c] sm:$0x1] }
  0x46   : > { %v2297_v56 = vor.u32 %v2296_v43, %v2293_v42  ;;  %v416_v63 = vshll.u32 %v213_v30, 16  ;;  %v426_v3 = vshrl.u32 %v214_v53, 16  ;;  %v415_v9 = vrot.slane %v413_v61, 4  ;;  %v216_v43 = vld [vmem:[%s7396_s16 + $0x58] sm:$0xf] }
  0x47   : > { %6630 = vmatpush3.bf16.msra.mxu0 %v7132_v48  ;;  %v2302_v50 = vrot.slane %v2300_v39, 5  ;;  %v401_v48 = vsel %vm7428_vm2, %v396_v40, %v400_v17  ;;  %v2306_v57 = vrot.slane %v2304_v44, 4  ;;  %6595 = vmatprep.mubr.bf16.mxu0 %v5676_v55  ;;  %v432_v11 = vshll.u32 %v255_v54, 16  ;;  %v5629_v52 = vld [vmem:[%s7396_s16 + $0x60] sm:$0xf] }
  0x48   : > { %6440 = vmatpush3.bf16.msra.mxu1 %v7140_v35  ;;  %v404_v35 = vrot.slane %v402_v18, 4  ;;  %6631 = vmatprep.subr.bf16.mxu0 %v7134_v15  ;;  %v2298_v1 = vrot.slane %v2297_v56, 4  ;;  %v418_v10 = vrot.slane %v416_v63, 5  ;;  %v428_v18 = vrot.slane %v426_v3, 4 }
  0x49   : > { %6441 = vmatprep.subr.bf16.mxu1 %v7142_v2  ;;  %v2307_v5 = vor.u32 %v2306_v57, %v2302_v50  ;;  %v434_v21 = vrot.slane %v432_v11, 5  ;;  %v2315_v25 = vshrl.u32 %v5626_v58, 16  ;;  %v2318_v29 = vshll.u32 %v5626_v58, 16 }
  0x4a   : > { %v405_v49 = vor.u32 %v404_v35, %v400_v17  ;;  %v2303_v13 = vsel %vm7428_vm2, %v2298_v1, %v2302_v50  ;;  %v419_v17 = vor.u32 %v418_v10, %v415_v9  ;;  %v2324_v30 = vshll.u32 %v7612_v0, 16  ;;  %v215_v35 = vld [vmem:[%s7396_s16 + $0x54] sm:$0xf]  ;;  %v256_v50 = vld [vmem:[%s7396_s16 + $0x5c] sm:$0x1] }
  0x4b   : > { %6632 = vmatpush3.bf16.msra.mxu0 %v7134_v15  ;;  %v2308_v15 = vrot.slane %v2307_v5, 4  ;;  %v2328_v34 = vshrl.u32 %v7612_v0, 16  ;;  %v2317_v42 = vrot.slane %v2315_v25, 4  ;;  %v437_v55 = vshrl.u32 %v215_v35, 16  ;;  %v7652_v25 = vld [vmem:[%s7396_s16 + $0x60] sm:$0xf] }
  0x4c   : > { %6442 = vmatpush3.bf16.msra.mxu1 %v7142_v2  ;;  %v406_v59 = vrot.slane %v405_v49, 4  ;;  %v422_v2 = vshll.u32 %v214_v53, 16  ;;  %6633 = vmatprep.subr.bf16.mxu0 %v7135_v31  ;;  %v420_v39 = vrot.slane %v419_v17, 4  ;;  %v2326_v44 = vrot.slane %v2324_v30, 5  ;;  %v7648_v17 = vld [vmem:[%s7396_s16 + $0x68] sm:$0x1] }
  0x4d   : > { %6475 = vmatprep.subr.bf16.mxu1 %v7598_v4  ;;  %v2313_v26 = vsel %vm7428_vm2, %v2308_v15, %v2312_v60  ;;  %v2330_v47 = vrot.slane %v2328_v34, 4  ;;  %v2334_v49 = vshll.u32 %v7624_v20, 16  ;;  %v7639_v60 = vld [vmem:[%s7396_s16 + $0x64] sm:$0xf]  ;;  %v439_v63 = vrot.slane %v437_v55, 4 }
  0x4e   : > { %v411_v7 = vsel %vm7428_vm2, %v406_v59, %v410_v38  ;;  %v424_v16 = vrot.slane %v422_v2, 5  ;;  %v5677_v38 = vcombine.low %v2303_v13, %v2313_v26  ;;  %v446_v59 = vshll.u32 %v216_v43, 16 }
  0x4f   : > { %v5437_v12 = vcombine.low %v401_v48, %v411_v7  ;;  %6634 = vmatpush3.bf16.msra.mxu0 %v7135_v31  ;;  %v2320_v31 = vrot.slane %v2318_v29, 5  ;;  %v440_v48 = vshll.u32 %v215_v35, 16  ;;  %v2331_v57 = vor.u32 %v2330_v47, %v2326_v44  ;;  %v7655_v35 = vld [vmem:[%s7396_s16 + $0x64] sm:$0xf] }
  0x50   : > { %6667 = vmatprep.subr.bf16.mxu0 %v7617_v6  ;;  %v429_v40 = vor.u32 %v428_v18, %v424_v16  ;;  %6596 = vmatmul.mubr.bf16.gmra.mrb[8].mxu0 %v5677_v38  ;;  %v425_v53 = vsel %vm7428_vm2, %v420_v39, %v424_v16  ;;  %v2336_v58 = vrot.slane %v2334_v49, 5  ;;  %v450_v5 = vshrl.u32 %v216_v43, 16  ;;  %v257_v43 = vld [vmem:[%s7396_s16 + $0x68] sm:$0x1] }
  0x51   : > { %6404 = vmatmul.mubr.bf16.gmra.mrb[8].mxu1 %v5437_v12  ;;  %v2321_v56 = vor.u32 %v2320_v31, %v2317_v42  ;;  %v442_v1 = vrot.slane %v440_v48, 5  ;;  %v2332_v7 = vrot.slane %v2331_v57, 4  ;;  %v448_v9 = vrot.slane %v446_v59, 5 }
  0x52   : > { %v430_v54 = vrot.slane %v429_v40, 4  ;;  %v452_v11 = vrot.slane %v450_v5, 4  ;;  %v456_v12 = vshll.u32 %v256_v50, 16  ;;  %v2339_v13 = vshrl.u32 %v5629_v52, 16  ;;  %v5696_v50 = vld [vmem:[%s7396_s16 + $0xc] sm:$0xe] }
  0x53   : > { %v2322_v3 = vrot.slane %v2321_v56, 4  ;;  %v443_v10 = vor.u32 %v442_v1, %v439_v63  ;;  %v2337_v16 = vsel %vm7428_vm2, %v2332_v7, %v2336_v58  ;;  %v2342_v18 = vshll.u32 %v5629_v52, 16  ;;  %v7670_v5 = vld [vmem:[%s7396_s16 + $0x6c] sm:$0xf] }
  0x54   : > { %v435_v61 = vsel %vm7428_vm2, %v430_v54, %v434_v21  ;;  %v2348_v21 = vshll.u32 %v7639_v60, 16  ;;  %v453_v30 = vor.u32 %v452_v11, %v448_v9  ;;  %v458_v34 = vrot.slane %v456_v12, 5 }
  0x55   : > { %v5438_v2 = vcombine.low %v425_v53, %v435_v61  ;;  %v2327_v15 = vsel %vm7428_vm2, %v2322_v3, %v2326_v44  ;;  %v444_v29 = vrot.slane %v443_v10, 4  ;;  %v2341_v38 = vrot.slane %v2339_v13, 4 }
  0x56   : > { %v5678_v26 = vcombine.low %v2327_v15, %v2337_v16  ;;  %v2344_v39 = vrot.slane %v2342_v18, 5  ;;  %v2350_v40 = vrot.slane %v2348_v21, 5  ;;  %v2352_v42 = vshrl.u32 %v7639_v60, 16  ;;  %v7682_v21 = vld [vmem:[%s7396_s16 + $0x70] sm:$0xf] }
  0x57   : > { %6407 = vmatprep.mubr.bf16.mxu1 %v5438_v2  ;;  %v449_v31 = vsel %vm7428_vm2, %v444_v29, %v448_v9  ;;  %v454_v44 = vrot.slane %v453_v30, 4  ;;  %v2358_v47 = vshll.u32 %v7648_v17, 16  ;;  %v461_v49 = vshrl.u32 %v7652_v25, 16  ;;  %v7226_v9 = vld [vmem:[%s7396_s16 + $0xb4] sm:$0xff]  }
  0x58   : > { %6599 = vmatprep.mubr.bf16.mxu0 %v5678_v26  ;;  %v2345_v52 = vor.u32 %v2344_v39, %v2341_v38  ;;  %v2354_v53 = vrot.slane %v2352_v42, 4  ;;  %v464_v54 = vshll.u32 %v7652_v25, 16  ;;  %v470_v55 = vshll.u32 %v7655_v35, 16 }
  0x59   : > { %v459_v48 = vsel %vm7428_vm2, %v454_v44, %v458_v34  ;;  %v2360_v56 = vrot.slane %v2358_v47, 5  ;;  %v463_v57 = vrot.slane %v461_v49, 4  ;;  %v474_v58 = vshrl.u32 %v7655_v35, 16  ;;  %v7693_v47 = vld [vmem:[%s7396_s16 + $0x78] sm:$0xf] }
  0x5a   : > { %v5439_v59 = vcombine.low %v449_v31, %v459_v48  ;;  %v2346_v61 = vrot.slane %v2345_v52, 4  ;;  %v2355_v63 = vor.u32 %v2354_v53, %v2350_v40  ;;  %v466_v1 = vrot.slane %v464_v54, 5  ;;  %v7704_v54 = vld [vmem:[%s7396_s16 + $0x7c] sm:$0xf] }
  0x5b   : > { %v472_v2 = vrot.slane %v470_v55, 5  ;;  %v476_v3 = vrot.slane %v474_v58, 4  ;;  %v480_v7 = vshll.u32 %v257_v43, 16  ;;  %v5712_v10 = vrot.slane %v5696_v50, 9  ;;  %v259_v58 = vld [vmem:[%s7396_s16 + $0x80] sm:$0x1] }
  0x5c   : > { %6408 = vmatmul.mubr.bf16.gmra.mrb[12].mxu1 %v5439_v59  ;;  %v2351_v11 = vsel %vm7428_vm2, %v2346_v61, %v2350_v40  ;;  %v2356_v12 = vrot.slane %v2355_v63, 4  ;;  %v467_v13 = vor.u32 %v466_v1, %v463_v57  ;;  %v2942_v15 = vrot.slane %v7409_v23, 5  ;;  %v258_v40 = vld [vmem:[%s7396_s16 + $0x74] sm:$0x1]  ;;  %v5697_v23 = vld [vmem:[%s7396_s16 + $0x18] sm:$0xe] }
  0x5d   : > { %v477_v16 = vor.u32 %v476_v3, %v472_v2  ;;  %v482_v18 = vrot.slane %v480_v7, 5  ;;  %v485_v26 = vshrl.u32 %v7670_v5, 16  ;;  %v488_v29 = vshll.u32 %v7670_v5, 16 }
  0x5e   : > { %v2361_v30 = vsel %vm7428_vm2, %v2356_v12, %v2360_v56  ;;  %v468_v34 = vrot.slane %v467_v13, 4  ;;  %v2943_v38 = vsel %vm7674_vm5, %v5712_v10, %v2942_v15  ;;  %v2944_v39 = vrot.slane %v2942_v15, 4  ;;  %v5698_v13 = vld [vmem:[%s7396_s16 + $0x24] sm:$0xe] }
  0x5f   : > { %v5679_v42 = vcombine.low %v2351_v11, %v2361_v30  ;;  %v478_v43 = vrot.slane %v477_v16, 4  ;;  %v487_v31 = vrot.slane %v485_v26, 4  ;;  %v490_v44 = vrot.slane %v488_v29, 5  ;;  %v7726_v16 = vld [vmem:[%s7396_s16 + $0x84] sm:$0xf]  ;;  %v7139_v29 = vld [vmem:[%s9217_s1 + $0x188] sm:$0xff]  }
  0x60   : > { %v473_v49 = vsel %vm7428_vm2, %v468_v34, %v472_v2  ;;  %v2946_v50 = vsel %vm7674_vm5, %v2944_v39, %v2945_v41  ;;  %v494_v52 = vshll.u32 %v7682_v21, 16  ;;  %v498_v53 = vshrl.u32 %v7682_v21, 16 }
  0x61   : > { %6600 = vmatmul.mubr.bf16.gmra.mrb[12].mxu0 %v5679_v42  ;;  %v483_v55 = vsel %vm7428_vm2, %v478_v43, %v482_v18  ;;  %v5744_v48 = vcombine.low %v2943_v38, %v2946_v50  ;;  %v491_v56 = vor.u32 %v490_v44, %v487_v31  ;;  %v504_v57 = vshll.u32 %v258_v40, 16  ;;  %v7734_v40 = vld [vmem:[%s7396_s16 + $0x88] sm:$0xf]  ;;  %v260_v31 = vld [vmem:[%s7396_s16 + $0x8c] sm:$0x1] }
  0x62   : > { %v5440_v59 = vcombine.low %v473_v49, %v483_v55  ;;  %v496_v24 = vrot.slane %v494_v52, 5  ;;  %v500_v61 = vrot.slane %v498_v53, 4  ;;  %v5713_v63 = vrot.slane %v5697_v23, 9 }
  0x63   : > { %6635 = vmatprep.mubr.bf16.mxu0 %v5744_v48  ;;  %v492_v41 = vrot.slane %v491_v56, 4  ;;  %v506_v1 = vrot.slane %v504_v57, 5  ;;  %v2953_v2 = vsel %vm7674_vm5, %v7477_v36, %v2952_v32  ;;  %v509_v3 = vshrl.u32 %v7693_v47, 16 }
  0x64   : > { %6411 = vmatprep.mubr.bf16.mxu1 %v5440_v59  ;;  %v501_v7 = vor.u32 %v500_v61, %v496_v24  ;;  %v2950_v10 = vsel %vm7674_vm5, %v5713_v63, %v2949_v27  ;;  %v512_v11 = vshll.u32 %v7693_v47, 16  ;;  %v518_v12 = vshll.u32 %v7704_v54, 16 }
  0x65   : > { %v497_v8 = vsel %vm7428_vm2, %v492_v41, %v496_v24  ;;  %v5745_v15 = vcombine.low %v2950_v10, %v2953_v2  ;;  %v511_v32 = vrot.slane %v509_v3, 4  ;;  %v522_v36 = vshrl.u32 %v7704_v54, 16  ;;  %v7755_v2 = vld [vmem:[%s7396_s16 + $0x90] sm:$0xf]  ;;  %v7758_v3 = vld [vmem:[%s7396_s16 + $0x94] sm:$0xf] }
  0x66   : > { %v502_v62 = vrot.slane %v501_v7, 4  ;;  %v514_v18 = vrot.slane %v512_v11, 5  ;;  %v520_v26 = vrot.slane %v518_v12, 5  ;;  %v528_v27 = vshll.u32 %v259_v58, 16 }
  0x67   : > { %v524_v30 = vrot.slane %v522_v36, 4  ;;  %v5714_v34 = vrot.slane %v5698_v13, 9  ;;  %v2956_v38 = vrot.slane %v7481_v45, 5  ;;  %v2959_v39 = vrot.slane %v7487_v51, 5  ;;  %v5699_v45 = vld [vmem:[%s7396_s16 + $0x30] sm:$0xe] }
  0x68   : > { %v507_v23 = vsel %vm7428_vm2, %v502_v62, %v506_v1  ;;  %v515_v42 = vor.u32 %v514_v18, %v511_v32  ;;  %v530_v43 = vrot.slane %v528_v27, 5  ;;  %v533_v44 = vshrl.u32 %v7726_v16, 16  ;;  %v261_v62 = vld [vmem:[%s7396_s16 + $0x98] sm:$0x1] }
  0x69   : > { %v5441_v49 = vcombine.low %v497_v8, %v507_v23  ;;  %6636 = vmatmul.mubr.bf16.vlgmr.msra.gmra.mrb[0].mxu0 %v5745_v15  ;;  %v525_v50 = vor.u32 %v524_v30, %v520_v26  ;;  %v2957_v52 = vsel %vm7674_vm5, %v5714_v34, %v2956_v38  ;;  %v2958_v53 = vrot.slane %v2956_v38, 4  ;;  %v7143_v30 = vld [vmem:[%s9217_s1 + $0x198] sm:$0xff]  }
  0x6a   : > { %6668 = vmatpush3.bf16.msra.mxu0 %v7617_v6  ;;  %v516_v51 = vrot.slane %v515_v42, 4  ;;  %v535_v55 = vrot.slane %v533_v44, 4  ;;  %v536_v48 = vshll.u32 %v7726_v16, 16  ;;  %v542_v56 = vshll.u32 %v7734_v40, 16  ;;  %v7141_v6 = vld [vmem:[%s9217_s1 + $0x190] sm:$0xff]  }
  0x6b   : > { %6412 = vmatmul.mubr.bf16.gmra.mrb[16].mxu1 %v5441_v49  ;;  %v526_v57 = vrot.slane %v525_v50, 4  ;;  %v2960_v58 = vsel %vm7674_vm5, %v2958_v53, %v2959_v39  ;;  %v546_v59 = vshrl.u32 %v7734_v40, 16  ;;  %v552_v24 = vshll.u32 %v260_v31, 16  ;;  %6669 = vmatprep.subr.bf16.mxu0 %v7139_v29  ;;  %v5700_v38 = vld [vmem:[%s7396_s16 + $0x3c] sm:$0xe] }
  0x6c   : > { %v521_v61 = vsel %vm7428_vm2, %v516_v51, %v520_v26  ;;  %v5746_v63 = vcombine.low %v2957_v52, %v2960_v58  ;;  %v538_v41 = vrot.slane %v536_v48, 5  ;;  %v544_v1 = vrot.slane %v542_v56, 5  ;;  %v7776_v31 = vld [vmem:[%s7396_s16 + $0x9c] sm:$0xf]  ;;  %v7785_v48 = vld [vmem:[%s7396_s16 + $0xa0] sm:$0xf] }
  0x6d   : > { %v531_v7 = vsel %vm7428_vm2, %v526_v57, %v530_v43  ;;  %v548_v10 = vrot.slane %v546_v59, 4  ;;  %v554_v11 = vrot.slane %v552_v24, 5  ;;  %v5715_v12 = vrot.slane %v5699_v45, 9  ;;  %v7147_v56 = vld [vmem:[%s9217_s1 + $0x1a0] sm:$0xff]  }
  0x6e   : > { %v5442_v13 = vcombine.low %v521_v61, %v531_v7  ;;  %6639 = vmatprep.mubr.bf16.mxu0 %v5746_v63  ;;  %v539_v8 = vor.u32 %v538_v41, %v535_v55  ;;  %v2963_v15 = vrot.slane %v7512_v33, 5  ;;  %v2966_v32 = vrot.slane %v7523_v46, 5  ;;  %6670 = vmatpush3.bf16.msra.mxu0 %v7139_v29  ;;  %v262_v61 = vld [vmem:[%s7396_s16 + $0xa4] sm:$0x1] }
  0x6f   : > { %v549_v36 = vor.u32 %v548_v10, %v544_v1  ;;  %v557_v18 = vshrl.u32 %v7755_v2, 16  ;;  %v560_v26 = vshll.u32 %v7755_v2, 16  ;;  %v566_v27 = vshll.u32 %v7758_v3, 16  ;;  %6671 = vmatprep.subr.bf16.mxu0 %v7141_v6 }
  0x70   : > { %6415 = vmatprep.mubr.bf16.mxu1 %v5442_v13  ;;  %v540_v34 = vrot.slane %v539_v8, 4  ;;  %v2964_v33 = vsel %vm7674_vm5, %v5715_v12, %v2963_v15  ;;  %v2965_v46 = vrot.slane %v2963_v15, 4  ;;  %v570_v29 = vshrl.u32 %v7758_v3, 16  ;;  %v5701_v15 = vld [vmem:[%s7396_s16 + $0x48] sm:$0xe] }
  0x71   : > { %v550_v39 = vrot.slane %v549_v36, 4  ;;  %v559_v23 = vrot.slane %v557_v18, 4  ;;  %v562_v42 = vrot.slane %v560_v26, 5  ;;  %v568_v43 = vrot.slane %v566_v27, 5  ;;  %v7810_v27 = vld [vmem:[%s7396_s16 + $0xa8] sm:$0xf] }
  0x72   : > { %v545_v44 = vsel %vm7428_vm2, %v540_v34, %v544_v1  ;;  %v2967_v49 = vsel %vm7674_vm5, %v2965_v46, %v2966_v32  ;;  %v572_v50 = vrot.slane %v570_v29, 4  ;;  %v576_v52 = vshll.u32 %v261_v62, 16  ;;  %6672 = vmatpush3.bf16.msra.mxu0 %v7141_v6  ;;  %v7151_v32 = vld [vmem:[%s9217_s1 + $0x1a8] sm:$0xff]  }
  0x73   : > { %v555_v53 = vsel %vm7428_vm2, %v550_v39, %v554_v11  ;;  %v5747_v45 = vcombine.low %v2964_v33, %v2967_v49  ;;  %v563_v51 = vor.u32 %v562_v42, %v559_v23  ;;  %v5716_v55 = vrot.slane %v5700_v38, 9  ;;  %6673 = vmatprep.subr.bf16.mxu0 %v7143_v30  ;;  %v7813_v29 = vld [vmem:[%s7396_s16 + $0xac] sm:$0xf] }
  0x74   : > { %v5443_v57 = vcombine.low %v545_v44, %v555_v53  ;;  %v573_v58 = vor.u32 %v572_v50, %v568_v43  ;;  %v578_v59 = vrot.slane %v576_v52, 5  ;;  %v2970_v24 = vrot.slane %v7546_v19, 5  ;;  %v5702_v53 = vld [vmem:[%s7396_s16 + $0x54] sm:$0xe] }
  0x75   : > { %6640 = vmatmul.mubr.bf16.gmra.mrb[4].mxu0 %v5747_v45  ;;  %v564_v6 = vrot.slane %v563_v51, 4  ;;  %v2973_v63 = vrot.slane %v7554_v28, 5  ;;  %v581_v41 = vshrl.u32 %v7776_v31, 16  ;;  %v584_v1 = vshll.u32 %v7776_v31, 16  ;;  %v7155_v45 = vld [vmem:[%s9217_s1 + $0x1b0] sm:$0xff]  }
  0x76   : > { %6416 = vmatmul.mubr.bf16.gmra.mrb[20].mxu1 %v5443_v57  ;;  %v574_v7 = vrot.slane %v573_v58, 4  ;;  %v2971_v10 = vsel %vm7674_vm5, %v5716_v55, %v2970_v24  ;;  %v2972_v11 = vrot.slane %v2970_v24, 4  ;;  %v590_v12 = vshll.u32 %v7785_v48, 16  ;;  %6674 = vmatpush3.bf16.msra.mxu0 %v7143_v30 }
  0x77   : > { %v569_v19 = vsel %vm7428_vm2, %v564_v6, %v568_v43  ;;  %v583_v13 = vrot.slane %v581_v41, 4  ;;  %v586_v28 = vrot.slane %v584_v1, 5  ;;  %v594_v8 = vshrl.u32 %v7785_v48, 16  ;;  %6675 = vmatprep.subr.bf16.mxu0 %v7147_v56  ;;  %v263_v43 = vld [vmem:[%s7396_s16 + $0xb0] sm:$0x1] }
  0x78   : > { %v579_v36 = vsel %vm7428_vm2, %v574_v7, %v578_v59  ;;  %v2974_v62 = vsel %vm7674_vm5, %v2972_v11, %v2973_v63  ;;  %v592_v18 = vrot.slane %v590_v12, 5  ;;  %v600_v26 = vshll.u32 %v262_v61, 16  ;;  %v7833_v41 = vld [vmem:[%s7396_s16 + $0xb4] sm:$0xf]  ;;  %v7838_v12 = vld [vmem:[%s7396_s16 + $0xb8] sm:$0xf] }
  0x79   : > { %v5444_v30 = vcombine.low %v569_v19, %v579_v36  ;;  %v5748_v34 = vcombine.low %v2971_v10, %v2974_v62  ;;  %v587_v33 = vor.u32 %v586_v28, %v583_v13  ;;  %v596_v46 = vrot.slane %v594_v8, 4  ;;  %v264_v19 = vld [vmem:[%s7396_s16 + $0xbc] sm:$0x1] }
  0x7a   : > { %v602_v38 = vrot.slane %v600_v26, 5  ;;  %v5717_v39 = vrot.slane %v5701_v15, 9  ;;  %v2977_v23 = vrot.slane %v7581_v14, 5  ;;  %v2980_v42 = vrot.slane %v7587_v22, 5  ;;  %6676 = vmatpush3.bf16.msra.mxu0 %v7147_v56  ;;  %v7159_v13 = vld [vmem:[%s9217_s1 + $0x1b8] sm:$0xff]  }
  0x7b   : > { %6419 = vmatprep.mubr.bf16.mxu1 %v5444_v30  ;;  %6643 = vmatprep.mubr.bf16.mxu0 %v5748_v34  ;;  %v588_v44 = vrot.slane %v587_v33, 4  ;;  %v597_v49 = vor.u32 %v596_v46, %v592_v18  ;;  %v605_v50 = vshrl.u32 %v7810_v27, 16  ;;  %v608_v52 = vshll.u32 %v7810_v27, 16  ;;  %v5703_v30 = vld [vmem:[%s7396_s16 + $0x60] sm:$0xe] }
  0x7c   : > { %v2978_v14 = vsel %vm7674_vm5, %v5717_v39, %v2977_v23  ;;  %v2979_v22 = vrot.slane %v2977_v23, 4  ;;  %v614_v51 = vshll.u32 %v7813_v29, 16  ;;  %v618_v55 = vshrl.u32 %v7813_v29, 16  ;;  %6677 = vmatprep.subr.bf16.mxu0 %v7151_v32  ;;  %v5633_v39 = vld [vmem:[%s7396_s16 + $0x70] sm:$0xf] }
  0x7d   : > { %v593_v56 = vsel %vm7428_vm2, %v588_v44, %v592_v18  ;;  %v598_v57 = vrot.slane %v597_v49, 4  ;;  %v607_v58 = vrot.slane %v605_v50, 4  ;;  %v610_v59 = vrot.slane %v608_v52, 5  ;;  %v7860_v44 = vld [vmem:[%s9217_s1 + $0x1c0] sm:$0xff]  }
  0x7e   : > { %v2981_v24 = vsel %vm7674_vm5, %v2979_v22, %v2980_v42  ;;  %v616_v61 = vrot.slane %v614_v51, 5  ;;  %v620_v6 = vrot.slane %v618_v55, 4  ;;  %v624_v63 = vshll.u32 %v263_v43, 16  ;;  %6678 = vmatpush3.bf16.msra.mxu0 %v7151_v32  ;;  %v5704_v43 = vld [vmem:[%s7396_s16 + $0x6c] sm:$0xe] }
  0x7f   : > { %v603_v1 = vsel %vm7428_vm2, %v598_v57, %v602_v38  ;;  %v5749_v7 = vcombine.low %v2978_v14, %v2981_v24  ;;  %v611_v10 = vor.u32 %v610_v59, %v607_v58  ;;  %v5718_v11 = vrot.slane %v5702_v53, 9  ;;  %6679 = vmatprep.subr.bf16.mxu0 %v7155_v45  ;;  %v5634_v55 = vld [vmem:[%s7396_s16 + $0x74] sm:$0x1]  ;;  %v5705_v24 = vld [vmem:[%s7396_s16 + $0x78] sm:$0xe] }
  0x80   : > { %v5445_v28 = vcombine.low %v593_v56, %v603_v1  ;;  %v621_v8 = vor.u32 %v620_v6, %v616_v61  ;;  %v626_v15 = vrot.slane %v624_v63, 5  ;;  %v2984_v32 = vrot.slane %v7612_v0, 5 }
  0x81   : > { %6644 = vmatmul.mubr.bf16.gmra.mrb[8].mxu0 %v5749_v7  ;;  %v612_v36 = vrot.slane %v611_v10, 4  ;;  %v2987_v62 = vrot.slane %v7624_v20, 5  ;;  %v629_v18 = vshrl.u32 %v7833_v41, 16  ;;  %v632_v26 = vshll.u32 %v7833_v41, 16 }
  0x82   : > { %6420 = vmatmul.mubr.bf16.gmra.mrb[24].mxu1 %v5445_v28  ;;  %v622_v34 = vrot.slane %v621_v8, 4  ;;  %v2985_v33 = vsel %vm7674_vm5, %v5718_v11, %v2984_v32  ;;  %v2986_v46 = vrot.slane %v2984_v32, 4  ;;  %v638_v38 = vshll.u32 %v7838_v12, 16  ;;  %6680 = vmatpush3.bf16.msra.mxu0 %v7155_v45  ;;  %v7873_v11 = vld [vmem:[%s7396_s16 + $0x7c] sm:$0xf] }
  0x83   : > { %v617_v0 = vsel %vm7428_vm2, %v612_v36, %v616_v61  ;;  %v631_v20 = vrot.slane %v629_v18, 4  ;;  %v634_v23 = vrot.slane %v632_v26, 5  ;;  %v642_v42 = vshrl.u32 %v7838_v12, 16  ;;  %6681 = vmatprep.subr.bf16.mxu0 %v7159_v13  ;;  %v7228_v36 = vld [vmem:[%s7396_s16] sm:$0xf] }
  0x84   : > { %v627_v49 = vsel %vm7428_vm2, %v622_v34, %v626_v15  ;;  %v2988_v50 = vsel %vm7674_vm5, %v2986_v46, %v2987_v62  ;;  %v640_v52 = vrot.slane %v638_v38, 5  ;;  %v648_v53 = vshll.u32 %v264_v19, 16  ;;  %v5639_v15 = vld [vmem:[%s7396_s16 + $0x88] sm:$0xf]  ;;  %v7888_v62 = vld [vmem:[%s7396_s16 + $0x4] sm:$0xf] }
  0x85   : > { %v5446_v45 = vcombine.low %v617_v0, %v627_v49  ;;  %v5750_v14 = vcombine.low %v2985_v33, %v2988_v50  ;;  %v635_v22 = vor.u32 %v634_v23, %v631_v20  ;;  %v644_v51 = vrot.slane %v642_v42, 4  ;;  %v5640_v26 = vld [vmem:[%s7396_s16 + $0x8c] sm:$0x1]  ;;  %v5643_v23 = vld [vmem:[%s7396_s16 + $0x98] sm:$0x1] }
  0x86   : > { %v650_v56 = vrot.slane %v648_v53, 5  ;;  %v5719_v57 = vrot.slane %v5703_v30, 9  ;;  %v2991_v58 = vrot.slane %v7639_v60, 5  ;;  %v2994_v59 = vrot.slane %v7648_v17, 5  ;;  %6682 = vmatpush3.bf16.msra.mxu0 %v7159_v13  ;;  %v7876_v17 = vld [vmem:[%s7396_s16 + $0x80] sm:$0x1] }
  0x87   : > { %6423 = vmatprep.mubr.bf16.mxu1 %v5446_v45  ;;  %6647 = vmatprep.mubr.bf16.mxu0 %v5750_v14  ;;  %v636_v61 = vrot.slane %v635_v22, 4  ;;  %v645_v6 = vor.u32 %v644_v51, %v640_v52  ;;  %v5720_v63 = vrot.slane %v5704_v43, 9  ;;  %v2998_v1 = vrot.slane %v5633_v39, 5  ;;  %v5706_v30 = vld [vmem:[%s7396_s16 + $0x84] sm:$0xe] }
  0x88   : > { %v2992_v7 = vsel %vm7674_vm5, %v5719_v57, %v2991_v58  ;;  %v2993_v10 = vrot.slane %v2991_v58, 4  ;;  %v3001_v60 = vrot.slane %v5634_v55, 5  ;;  %6715 = vmatprep.subr.bf16.mxu0 %v7860_v44  ;;  %v5456_v18 = vcombine.low %v7228_v36, %v7888_v62  ;;  %v5642_v39 = vld [vmem:[%s7396_s16 + $0x94] sm:$0xf]  ;;  %v5707_v42 = vld [vmem:[%s7396_s16 + $0x90] sm:$0xe] }
  0x89   : > { %v641_v19 = vsel %vm7428_vm2, %v636_v61, %v640_v52  ;;  %v646_v13 = vrot.slane %v645_v6, 4  ;;  %v2999_v28 = vsel %vm7674_vm5, %v5720_v63, %v2998_v1  ;;  %v3000_v8 = vrot.slane %v2998_v1, 4  ;;  %v5708_v50 = vld [vmem:[%s7396_s16 + $0x9c] sm:$0xe]  ;;  %v5645_v14 = vld [vmem:[%s7396_s16 + $0xa0] sm:$0xf] }
  0x8a   : > { %v2995_v32 = vsel %vm7674_vm5, %v2993_v10, %v2994_v59  ;;  %v5721_v38 = vrot.slane %v5705_v24, 9  ;;  %v3005_v43 = vrot.slane %v7873_v11, 5  ;;  %v3008_v49 = vrot.slane %v7876_v17, 5  ;;  %v5646_v22 = vld [vmem:[%s7396_s16 + $0xa4] sm:$0x1] }
  0x8b   : > { %v651_v34 = vsel %vm7428_vm2, %v646_v13, %v650_v56  ;;  %v5751_v33 = vcombine.low %v2992_v7, %v2995_v32  ;;  %v3002_v46 = vsel %vm7674_vm5, %v3000_v8, %v3001_v60  ;;  %v5722_v52 = vrot.slane %v5706_v30, 9  ;;  %v5648_v59 = vld [vmem:[%s7396_s16 + $0xac] sm:$0xf]  ;;  %v7912_v61 = vld [vmem:[%s7396_s16 + $0x10] sm:$0xf] }
  0x8c   : > { %v5447_v0 = vcombine.low %v641_v19, %v651_v34  ;;  %v5752_v20 = vcombine.low %v2999_v28, %v3002_v46  ;;  %v3012_v53 = vrot.slane %v5639_v15, 5  ;;  %v3015_v45 = vrot.slane %v5640_v26, 5  ;;  %v7230_v24 = vld [vmem:[%s7396_s16 + $0xc] sm:$0xf]  ;;  %v7232_v8 = vld [vmem:[%s7396_s16 + $0x18] sm:$0xf] }
  0x8d   : > { %6648 = vmatmul.mubr.bf16.gmra.mrb[12].mxu0 %v5751_v33  ;;  %v3006_v51 = vsel %vm7674_vm5, %v5721_v38, %v3005_v43  ;;  %v3007_v55 = vrot.slane %v3005_v43, 4  ;;  %v3019_v58 = vrot.slane %v5642_v39, 5  ;;  %v5457_v6 = vcombine.low %v7230_v24, %v7912_v61  ;;  %v7150_v19 = vld [vmem:[%s9217_s1 + $0x88] sm:$0xff]   ;;  %v7924_v15 = vld [vmem:[%s7396_s16 + $0x1c] sm:$0xf] }
  0x8e   : > { %6424 = vmatmul.mubr.bf16.gmra.mrb[28].mxu1 %v5447_v0  ;;  %6651 = vmatprep.mubr.bf16.mxu0 %v5752_v20  ;;  %v3013_v56 = vsel %vm7674_vm5, %v5722_v52, %v3012_v53  ;;  %v3014_v57 = vrot.slane %v3012_v53, 4  ;;  %v5723_v1 = vrot.slane %v5707_v42, 9  ;;  %v3022_v7 = vrot.slane %v5643_v23, 5  ;;  %v5649_v30 = vld [vmem:[%s7396_s16 + $0xb0] sm:$0x1] }
  0x8f   : > { %6443 = vmatprep.mubr.bf16.mxu1 %v5456_v18  ;;  %v3009_v63 = vsel %vm7674_vm5, %v3007_v55, %v3008_v49  ;;  %v3021_v13 = vrot.slane %v3019_v58, 4  ;;  %v5724_v28 = vrot.slane %v5708_v50, 9  ;;  %v5458_v32 = vcombine.low %v7232_v8, %v7924_v15  ;;  %v5709_v34 = vld [vmem:[%s7396_s16 + $0xa8] sm:$0xe]  ;;  %v5651_v33 = vld [vmem:[%s7396_s16 + $0xb8] sm:$0xf] }
  0x90   : > { %v5753_v10 = vcombine.low %v3006_v51, %v3009_v63  ;;  %v3016_v60 = vsel %vm7674_vm5, %v3014_v57, %v3015_v45  ;;  %v3026_v18 = vrot.slane %v5645_v14, 5  ;;  %v3029_v26 = vrot.slane %v5646_v22, 5  ;;  %v5652_v20 = vld [vmem:[%s7396_s16 + $0xbc] sm:$0x1]  ;;  %v5710_v23 = vld [vmem:[%s7396_s16 + $0xb4] sm:$0xe] }
  0x91   : > { %v5754_v36 = vcombine.low %v3013_v56, %v3016_v60  ;;  %v3033_v38 = vrot.slane %v5648_v59, 5  ;;  %v3020_v39 = vsel %vm7674_vm5, %v5723_v1, %v3019_v58  ;;  %v3023_v0 = vsel %vm7674_vm5, %v3021_v13, %v3022_v7  ;;  %v7154_v50 = vld [vmem:[%s9217_s1 + $0x90] sm:$0xff]   ;;  %v5654_v53 = vld [vmem:[%s7396_s16 + $0xc4] sm:$0xf]  ;;  %v7947_v51 = vld [vmem:[%s7396_s16 + $0x28] sm:$0xf] }
  0x92   : > { %v3028_v46 = vrot.slane %v3026_v18, 4  ;;  %v3027_v42 = vsel %vm7674_vm5, %v5724_v28, %v3026_v18  ;;  %v3040_v49 = vrot.slane %v5651_v33, 5  ;;  %v5725_v52 = vrot.slane %v5709_v34, 9  ;;  %v7234_v22 = vld [vmem:[%s7396_s16 + $0x24] sm:$0xf]  ;;  %v7158_v1 = vld [vmem:[%s9217_s1 + $0x98] sm:$0xff]  }
  0x93   : > { %v5755_v45 = vcombine.low %v3020_v39, %v3023_v0  ;;  %v3035_v14 = vrot.slane %v3033_v38, 4  ;;  %v5459_v55 = vcombine.low %v7234_v22, %v7947_v51  ;;  %v7236_v57 = vld [vmem:[%s7396_s16 + $0x30] sm:$0xf]  ;;  %v7952_v58 = vld [vmem:[%s7396_s16 + $0x34] sm:$0xf]  ;;  %v5726_v24 = vrot.slane %v5710_v23, 9 }
  0x94   : > { %v3030_v43 = vsel %vm7674_vm5, %v3028_v46, %v3029_v26  ;;  %v5460_v59 = vcombine.low %v7236_v57, %v7952_v58  ;;  %v3043_v63 = vrot.slane %v5652_v20, 5  ;;  %v5711_v7 = vld [vmem:[%s7396_s16 + $0xc0] sm:$0xe]  ;;  %v3034_v60 = vsel %vm7674_vm5, %v5725_v52, %v3033_v38  ;;  %v5655_v8 = vld [vmem:[%s7396_s16 + $0xc8] sm:$0x1]  ;;  %v7161_v22 = vld [vmem:[%s7396_s16 + $0x18] sm:$0xff]  }
  0x95   : > { %6652 = vmatmul.mubr.bf16.gmra.mrb[16].mxu0 %v5753_v10  ;;  %v5756_v56 = vcombine.low %v3027_v42, %v3030_v43  ;;  %v3047_v10 = vrot.slane %v5654_v53, 5  ;;  %v3041_v13 = vsel %vm7674_vm5, %v5726_v24, %v3040_v49  ;;  %v5727_v18 = vrot.slane %v5711_v7, 9  ;;  %v7238_v26 = vld [vmem:[%s7396_s16 + $0x3c] sm:$0xf]  ;;  %v7240_v39 = vld [vmem:[%s7396_s16 + $0x48] sm:$0xf] }
  0x96   : > { %6444 = vmatmul.mubr.bf16.vlgmr.msra.gmra.mrb[0].mxu1 %v5457_v6  ;;  %6655 = vmatprep.mubr.bf16.mxu0 %v5754_v36  ;;  %v3042_v6 = vrot.slane %v3040_v49, 4  ;;  %v3050_v38 = vrot.slane %v5655_v8, 5  ;;  %v7978_v0 = vld [vmem:[%s7396_s16 + $0x4c] sm:$0xf]  ;;  %v7175_v49 = vld [vmem:[%s9217_s1 + $0xb0] sm:$0xff]   ;;  %v2400_v52 = vshrl.u32 %v7873_v11, 16 }
  0x97   : > { %6476 = vmatpush3.bf16.msra.mxu1 %v7598_v4  ;;  %6447 = vmatprep.mubr.bf16.mxu1 %v5458_v32  ;;  %v3036_v4 = vrot.slane %v5649_v30, 5  ;;  %v7163_v32 = vld [vmem:[%s9217_s1 + $0xa0] sm:$0xff]   ;;  %v3049_v46 = vrot.slane %v3047_v10, 4  ;;  %v5462_v20 = vcombine.low %v7240_v39, %v7978_v0  ;;  %v7169_v23 = vld [vmem:[%s9217_s1 + $0xa8] sm:$0xff]   ;;  %v3048_v42 = vsel %vm7674_vm5, %v5727_v18, %v3047_v10  ;;  %v7167_v18 = vld [vmem:[%s7396_s16 + $0x30] sm:$0xff]  }
  0x98   : > { %6477 = vmatprep.subr.bf16.mxu1 %v7150_v19  ;;  %v3044_v28 = vsel %vm7674_vm5, %v3042_v6, %v3043_v63  ;;  %v7973_v30 = vld [vmem:[%s7396_s16 + $0x40] sm:$0xf]  ;;  %v8006_v57 = vrot.slane %v2400_v52, 4  ;;  %v7164_v6 = vld [vmem:[%s7396_s16 + $0x24] sm:$0xff]   ;;  %v1307_v7 = vrot.slane %v7912_v61, 5  ;;  %v2406_v8 = vshll.u32 %v7876_v17, 16 }
  0x99   : > { %v5461_v34 = vcombine.low %v7238_v26, %v7973_v30  ;;  %v5758_v33 = vcombine.low %v3041_v13, %v3044_v28  ;;  %v3051_v43 = vsel %vm7674_vm5, %v3049_v46, %v3050_v38  ;;  %v1247_v63 = vld [vmem:[%s7396_s16] sm:$0xe]  ;;  %v1248_v10 = vld [vmem:[%s7396_s16 + $0xc] sm:$0xe]  ;;  %v1314_v13 = vrot.slane %v7924_v15, 5 }
  0x9a   : > { %v5759_v53 = vcombine.low %v3048_v42, %v3051_v43  ;;  %v1250_v61 = vld [vmem:[%s7396_s16 + $0x24] sm:$0xe]  ;;  %v5467_v15 = vcombine.low %v7726_v16, %v7734_v40  ;;  %v5468_v26 = vcombine.low %v7755_v2, %v7758_v3  ;;  %v5480_v17 = vrot.slane %v1247_v63, 9  ;;  %v7246_v38 = vld [vmem:[%s7396_s16 + $0x20] sm:$0x1]  ;;  %v7176_v2 = vld [vmem:[%s7396_s16 + $0x54] sm:$0xff]  }
  0x9b   : > { %6478 = vmatpush3.bf16.msra.mxu1 %v7150_v19  ;;  %v3037_v19 = vsel %vm7674_vm5, %v3035_v14, %v3036_v4  ;;  %v7995_v14 = vld [vmem:[%s7396_s16 + $0x58] sm:$0xf]  ;;  %v1316_v46 = vrot.slane %v1314_v13, 4  ;;  %v1317_v39 = vrot.slane %v7246_v38, 5  ;;  %v7247_v43 = vld [vmem:[%s7396_s16 + $0x2c] sm:$0x1] }
  0x9c   : > { %6479 = vmatprep.subr.bf16.mxu1 %v7154_v50  ;;  %v5757_v36 = vcombine.low %v3034_v60, %v3037_v19  ;;  %v8021_v60 = vld [vmem:[%s9217_s1 + $0xc0] sm:$0xff]   ;;  %v1249_v19 = vld [vmem:[%s7396_s16 + $0x18] sm:$0xe]  ;;  %v7250_v38 = vld [vmem:[%s7396_s16 + $0x50] sm:$0x1]  ;;  %v1349_v16 = vrot.slane %v7995_v14, 5 }
  0x9d   : > { %6656 = vmatmul.mubr.bf16.gmra.mrb[20].mxu0 %v5755_v45  ;;  %v7242_v45 = vld [vmem:[%s7396_s16 + $0x54] sm:$0xf]  ;;  %v8144_v40 = vld [vmem:[%s7396_s16 + $0x64] sm:$0xf] }
  0x9e   : > { %6448 = vmatmul.mubr.bf16.gmra.mrb[4].mxu1 %v5459_v55  ;;  %6659 = vmatprep.mubr.bf16.mxu0 %v5756_v56  ;;  %v5463_v4 = vcombine.low %v7242_v45, %v7995_v14  ;;  %v5464_v55 = vcombine.low %v7652_v25, %v7655_v35  ;;  %v7181_v56 = vld [vmem:[%s9217_s1 + $0xb8] sm:$0xff]   ;;  %v7245_v25 = vld [vmem:[%s7396_s16 + $0x14] sm:$0x1]  ;;  %v7179_v3 = vld [vmem:[%s7396_s16 + $0x60] sm:$0xff]  }
  0x9f   : > { %6451 = vmatprep.mubr.bf16.mxu1 %v5460_v59  ;;  %6480 = vmatpush3.bf16.msra.mxu1 %v7154_v50  ;;  %v2396_v50 = vshll.u32 %v7873_v11, 16  ;;  %v8009_v59 = vld [vmem:[%s7396_s16 + $0x8] sm:$0x1]  ;;  %v1310_v35 = vrot.slane %v7245_v25, 5 }
  0xa0   : > { %6481 = vmatprep.subr.bf16.mxu1 %v7158_v1  ;;  %v1303_v24 = vrot.slane %v8009_v59, 5 }
  0xa1   : > { %v8004_v11 = vrot.slane %v2396_v50, 5 }
  0xa3   : > { %6482 = vmatpush3.bf16.msra.mxu1 %v7158_v1  ;;  %v1300_v1 = vrot.slane %v7888_v62, 5  ;;  %v5465_v62 = vcombine.low %v7670_v5, %v7682_v21  ;;  %v5481_v21 = vrot.slane %v1248_v10, 9  ;;  %v5840_v10 = vld [vmem:[%s7396_s16 + $0x18] sm:$0xf] }
  0xa4   : > { %6483 = vmatprep.subr.bf16.mxu1 %v7163_v32 }
  0xa5   : > { %6660 = vmatmul.mubr.bf16.gmra.mrb[24].mxu0 %v5757_v36  ;;  %v5466_v36 = vcombine.low %v7693_v47, %v7704_v54  ;;  %v1302_v5 = vrot.slane %v1300_v1, 4  ;;  %v7171_v47 = vld [vmem:[%s9217_s1 + $0x1c8] sm:$0xff]   ;;  %v5482_v54 = vrot.slane %v1249_v19, 9  ;;  %v8064_v59 = vsel %vm7674_vm5, %v5480_v17, %v1300_v1  ;;  %v5841_v19 = vld [vmem:[%s7396_s16 + $0x1c] sm:$0xf] }
  0xa6   : > { %6452 = vmatmul.mubr.bf16.gmra.mrb[8].mxu1 %v5461_v34  ;;  %6663 = vmatprep.mubr.bf16.mxu0 %v5758_v33  ;;  %v1328_v34 = vrot.slane %v7952_v58, 5  ;;  %v1309_v33 = vrot.slane %v1307_v7, 4  ;;  %v5483_v58 = vrot.slane %v1250_v61, 9  ;;  %v1342_v1 = vrot.slane %v7978_v0, 5  ;;  %v7173_v0 = vld [vmem:[%s7396_s16 + $0x48] sm:$0xff]  }
  0xa7   : > { %6455 = vmatprep.mubr.bf16.mxu1 %v5462_v20  ;;  %6484 = vmatpush3.bf16.msra.mxu1 %v7163_v32  ;;  %v1321_v32 = vrot.slane %v7947_v51, 5  ;;  %v1251_v51 = vld [vmem:[%s7396_s16 + $0x30] sm:$0xe]  ;;  %v5469_v20 = vcombine.low %v7776_v31, %v7785_v48  ;;  %v8072_v25 = vsel %vm7674_vm5, %v1302_v5, %v1303_v24  ;;  %v8080_v63 = vsel %vm7674_vm5, %v5482_v54, %v1314_v13  ;;  %v1253_v13 = vld [vmem:[%s7396_s16 + $0x48] sm:$0xe] }
  0xa8   : > { %6485 = vmatprep.subr.bf16.mxu1 %v7169_v23  ;;  %v5484_v50 = vrot.slane %v1251_v51, 9  ;;  %v1330_v52 = vrot.slane %v1328_v34, 4  ;;  %v3813_v5 = vshrl.u32 %v5840_v10, 16  ;;  %v3826_v51 = vshrl.u32 %v5841_v19, 16  ;;  %v7182_v48 = vld [vmem:[%s7396_s16 + $0x6c] sm:$0xff]  }
  0xa9   : > { %v1323_v42 = vrot.slane %v1321_v32, 4  ;;  %v8092_v24 = vsel %vm7674_vm5, %v5483_v58, %v1321_v32  ;;  %v7249_v32 = vld [vmem:[%s7396_s16 + $0x44] sm:$0x1]  ;;  %v5486_v54 = vrot.slane %v1253_v13, 9  ;;  %v5844_v13 = vld [vmem:[%s7396_s16 + $0x28] sm:$0xf] }
  0xaa   : > { %v8102_v61 = vsel %vm7674_vm5, %v5484_v50, %v1328_v34  ;;  %v1338_v17 = vrot.slane %v7249_v32, 5  ;;  %v5842_v50 = vld [vmem:[%s7396_s16 + $0x20] sm:$0x1]  ;;  %v1255_v32 = vld [vmem:[%s7396_s16 + $0x60] sm:$0xe] }
  0xab   : > { %6486 = vmatpush3.bf16.msra.mxu1 %v7169_v23  ;;  %v5470_v23 = vcombine.low %v7810_v27, %v7813_v29 }
  0xac   : > { %6487 = vmatprep.subr.bf16.mxu1 %v7175_v49 }
  0xad   : > { %6664 = vmatmul.mubr.bf16.gmra.mrb[28].mxu0 %v5759_v53  ;;  %v7248_v53 = vld [vmem:[%s7396_s16 + $0x38] sm:$0x1] }
  0xae   : > { %6456 = vmatmul.mubr.bf16.gmra.mrb[12].mxu1 %v5463_v4  ;;  %6683 = vmatprep.mubr.bf16.mxu0 %v7161_v22  ;;  %v1331_v45 = vrot.slane %v7248_v53, 5  ;;  %v1252_v4 = vld [vmem:[%s7396_s16 + $0x3c] sm:$0xe]  ;;  %v1335_v22 = vrot.slane %v7973_v30, 5  ;;  %v8068_v30 = vsel %vm7674_vm5, %v5481_v21, %v1307_v7  ;;  %v3816_v21 = vshll.u32 %v5840_v10, 16  ;;  %v7187_v53 = vld [vmem:[%s9217_s1 + $0x1e0] sm:$0xff]  }
  0xaf   : > { %6459 = vmatprep.mubr.bf16.mxu1 %v5464_v55  ;;  %6488 = vmatpush3.bf16.msra.mxu1 %v7175_v49  ;;  %v1324_v49 = vrot.slane %v7247_v43, 5  ;;  %v8055_v55 = vrot.slane %v2406_v8, 5  ;;  %v7170_v7 = vld [vmem:[%s7396_s16 + $0x3c] sm:$0xff]   ;;  %v8088_v8 = vsel %vm7674_vm5, %v1316_v46, %v1317_v39  ;;  %v1344_v46 = vrot.slane %v1342_v1, 4  ;;  %v5846_v43 = vld [vmem:[%s7396_s16 + $0x30] sm:$0xf] }
  0xb0   : > { %6489 = vmatprep.subr.bf16.mxu1 %v7181_v56  ;;  %v1345_v39 = vrot.slane %v7250_v38, 5  ;;  %v3815_v10 = vrot.slane %v3813_v5, 4 }
  0xb1   : > { %9238 = vst [vmem:[#allocation2_spill] sm:$0xff] %v8055_v55 }
  0xb3   : > { %6490 = vmatpush3.bf16.msra.mxu1 %v7181_v56  ;;  %v7177_v56 = vld [vmem:[%s9217_s1 + $0x1d0] sm:$0xff]  }
  0xb4   : > { %6523 = vmatprep.subr.bf16.mxu1 %v8021_v60 }
  0xb5   : > { %6684 = vmatmul.mubr.bf16.vlgmr.msra.gmra.mrb[0].mxu0 %v7164_v6  ;;  %v8076_v6 = vsel %vm7674_vm5, %v1309_v33, %v1310_v35  ;;  %v8096_v35 = vsel %vm7674_vm5, %v1323_v42, %v1324_v49  ;;  %v3822_v33 = vshll.u32 %v5841_v19, 16  ;;  %v3818_v19 = vrot.slane %v3816_v21, 5  ;;  %v1256_v21 = vld [vmem:[%s7396_s16 + $0x6c] sm:$0xe] }
  0xb6   : > { %6460 = vmatmul.mubr.bf16.gmra.mrb[16].mxu1 %v5465_v62  ;;  %6716 = vmatpush3.bf16.msra.mxu0 %v7860_v44  ;;  %v5485_v62 = vrot.slane %v1252_v4, 9  ;;  %v5489_v58 = vrot.slane %v1256_v21, 9 }
  0xb7   : > { %6463 = vmatprep.mubr.bf16.mxu1 %v5466_v36  ;;  %6687 = vmatprep.mubr.bf16.mxu0 %v7167_v18  ;;  %v8106_v36 = vsel %vm7674_vm5, %v1330_v52, %v1331_v45  ;;  %v1337_v18 = vrot.slane %v1335_v22, 4  ;;  %v5843_v52 = vld [vmem:[%s7396_s16 + $0x24] sm:$0xf]  ;;  %v3850_v45 = vshrl.u32 %v5844_v13, 16 }
  0xb8   : > { %6717 = vmatprep.subr.bf16.mxu0 %v7171_v47  ;;  %v8123_v49 = vsel %vm7674_vm5, %v5485_v62, %v1335_v22  ;;  %v8140_v22 = vld [vmem:[%s7396_s16 + $0x54] sm:$0xe]  ;;  %v3828_v62 = vrot.slane %v3826_v51, 4  ;;  %v3837_v38 = vshrl.u32 %v5843_v52, 16  ;;  %v3840_v28 = vshll.u32 %v5843_v52, 16 }
  0xb9   : > { %v8137_v4 = vsel %vm7674_vm5, %v1337_v18, %v1338_v17  ;;  %v3832_v17 = vshll.u32 %v5842_v50, 16  ;;  %v5487_v5 = vrot.slane %v8140_v22, 9  ;;  %v7191_v50 = vld [vmem:[%s9217_s1 + $0x1e8] sm:$0xff]   ;;  %v1351_v52 = vrot.slane %v1349_v16, 4 }
  0xba   : > { %6718 = vmatpush3.bf16.msra.mxu0 %v7171_v47  ;;  %v7183_v47 = vld [vmem:[%s9217_s1 + $0x1d8] sm:$0xff]   ;;  %v3819_v22 = vor.u32 %v3818_v19, %v3815_v10  ;;  %v3839_v34 = vrot.slane %v3837_v38, 4  ;;  %v3842_v44 = vrot.slane %v3840_v28, 5  ;;  %v7255_v10 = vld [vmem:[%s7396_s16 + $0x74] sm:$0x1]  ;;  %v3852_v28 = vrot.slane %v3850_v45, 4 }
  0xbb   : > { %6719 = vmatprep.subr.bf16.mxu0 %v7177_v56  ;;  %v8178_v42 = vrot.slane %v3832_v17, 5  ;;  %v1366_v19 = vrot.slane %v7255_v10, 5  ;;  %v3861_v38 = vshrl.u32 %v5846_v43, 16  ;;  %v8203_v27 = vsel %vm7674_vm5, %v5487_v5, %v1349_v16 }
  0xbc   : > { %v3820_v21 = vrot.slane %v3819_v22, 4 }
  0xbd   : > { %6688 = vmatmul.mubr.bf16.gmra.mrb[4].mxu0 %v7170_v7  ;;  %v8150_v7 = vrot.slane %v3822_v33, 5  ;;  %v7253_v33 = vld [vmem:[%s7396_s16 + $0x70] sm:$0xf] }
  0xbe   : > { %6464 = vmatmul.mubr.bf16.gmra.mrb[20].mxu1 %v5467_v15  ;;  %6691 = vmatprep.mubr.bf16.mxu0 %v7173_v0  ;;  %v1356_v15 = vrot.slane %v8144_v40, 5  ;;  %v7252_v0 = vld [vmem:[%s7396_s16 + $0x5c] sm:$0x1]  ;;  %v1363_v51 = vrot.slane %v7253_v33, 5 }
  0xbf   : > { %6467 = vmatprep.mubr.bf16.mxu1 %v5468_v26  ;;  %6720 = vmatpush3.bf16.msra.mxu0 %v7177_v56  ;;  %v1352_v18 = vrot.slane %v7252_v0, 5  ;;  %v8159_v26 = vsel %vm7674_vm5, %v5486_v54, %v1342_v1  ;;  %v8163_v56 = vsel %vm7674_vm5, %v1344_v46, %v1345_v39  ;;  %v7254_v1 = vld [vmem:[%s7396_s16 + $0x68] sm:$0x1]  ;;  %v3846_v0 = vshll.u32 %v5844_v13, 16  ;;  %v7199_v40 = vld [vmem:[%s9217_s1 + $0x1f8] sm:$0xff]  }
  0xc0   : > { %6721 = vmatprep.subr.bf16.mxu0 %v7183_v47  ;;  %v1359_v54 = vrot.slane %v7254_v1, 5  ;;  %v5488_v46 = vrot.slane %v1255_v32, 9  ;;  %v1358_v39 = vrot.slane %v1356_v15, 4  ;;  %v3829_v33 = vor.u32 %v3828_v62, %v8150_v7  ;;  %v5847_v1 = vld [vmem:[%s7396_s16 + $0x34] sm:$0xf] }
  0xc1   : > { %v1365_v32 = vrot.slane %v1363_v51, 4  ;;  %v5845_v62 = vld [vmem:[%s7396_s16 + $0x2c] sm:$0x1]  ;;  %v8190_v17 = vrot.slane %v3846_v0, 5  ;;  %v3870_v13 = vshll.u32 %v5847_v1, 16  ;;  %v3874_v31 = vshrl.u32 %v5847_v1, 16 }
  0xc2   : > { %v3830_v10 = vrot.slane %v3829_v33, 4  ;;  %v8207_v29 = vsel %vm7674_vm5, %v1351_v52, %v1352_v18  ;;  %v8214_v45 = vsel %vm7674_vm5, %v5488_v46, %v1356_v15  ;;  %v8218_v14 = vsel %vm7674_vm5, %v1358_v39, %v1359_v54  ;;  %v1257_v18 = vld [vmem:[%s7396_s16 + $0x78] sm:$0xe] }
  0xc3   : > { %6722 = vmatpush3.bf16.msra.mxu0 %v7183_v47  ;;  %v8222_v16 = vsel %vm7674_vm5, %v5489_v58, %v1363_v51  ;;  %v8232_v15 = vsel %vm7674_vm5, %v1365_v32, %v1366_v19  ;;  %v3853_v5 = vor.u32 %v3852_v28, %v8190_v17  ;;  %v3863_v52 = vrot.slane %v3861_v38, 4  ;;  %v5849_v58 = vld [vmem:[%s7396_s16 + $0x3c] sm:$0xf]  ;;  %v5850_v51 = vld [vmem:[%s7396_s16 + $0x40] sm:$0xf] }
  0xc4   : > { %6723 = vmatprep.subr.bf16.mxu0 %v7187_v53  ;;  %v3825_v0 = vsel %vm7428_vm2, %v3820_v21, %v8150_v7  ;;  %v3835_v46 = vsel %vm7428_vm2, %v3830_v10, %v8178_v42  ;;  %v8243_v39 = vrot.slane %v3870_v13, 5  ;;  %v3876_v22 = vrot.slane %v3874_v31, 4  ;;  %v7257_v19 = vld [vmem:[%s7396_s16 + $0x80] sm:$0x1]  ;;  %v8402_v47 = vld [vmem:[%s7396_s16 + $0x68] sm:$0x1] }
  0xc5   : > { %6692 = vmatmul.mubr.bf16.gmra.mrb[8].mxu0 %v7176_v2  ;;  %v3864_v2 = vshll.u32 %v5846_v43, 16  ;;  %v3856_v43 = vshll.u32 %v5845_v62, 16  ;;  %v5490_v32 = vrot.slane %v1257_v18, 9  ;;  %v1258_v62 = vld [vmem:[%s7396_s16 + $0x84] sm:$0xe]  ;;  %v3885_v28 = vshrl.u32 %v5849_v58, 16 }
  0xc6   : > { %6468 = vmatmul.mubr.bf16.gmra.mrb[24].mxu1 %v5469_v20  ;;  %6695 = vmatprep.mubr.bf16.mxu0 %v7179_v3  ;;  %v7195_v20 = vld [vmem:[%s9217_s1 + $0x1f0] sm:$0xff]   ;;  %v7256_v3 = vld [vmem:[%s7396_s16 + $0x7c] sm:$0xf]  ;;  %v3888_v7 = vshll.u32 %v5849_v58, 16  ;;  %v3894_v38 = vshll.u32 %v5850_v51, 16  ;;  %v9239_v42 = vcombine.low %v7833_v41, %v7838_v12  ;;  %v8254_v13 = vrot.slane %v3853_v5, 4 }
  0xc7   : > { %6471 = vmatprep.mubr.bf16.mxu1 %v5470_v23  ;;  %6724 = vmatpush3.bf16.msra.mxu0 %v7187_v53  ;;  %v3843_v23 = vor.u32 %v3842_v44, %v3839_v34  ;;  %v7184_v53 = vld [vmem:[%s7396_s16 + $0x78] sm:$0xff]   ;;  %v1370_v44 = vrot.slane %v7256_v3, 5  ;;  %v3866_v54 = vrot.slane %v3864_v2, 5  ;;  %v8247_v1 = vrot.slane %v3856_v43, 5  ;;  %v8259_v21 = vld [vmem:[%s9217_s1 + $0x200] sm:$0xff]   ;;  %9247 = vst [vmem:[#allocation5_spill] sm:$0xff] %v8402_v47 }
  0xc8   : > { %6725 = vmatprep.subr.bf16.mxu0 %v7191_v50  ;;  %v5848_v34 = vld [vmem:[%s7396_s16 + $0x38] sm:$0x1]  ;;  %v3898_v2 = vshrl.u32 %v5850_v51, 16  ;;  %v7186_v43 = vld [vmem:[%s7396_s16 + $0x84] sm:$0xff]   ;;  %v3877_v12 = vor.u32 %v3876_v22, %v8243_v39  ;;  %v3890_v58 = vrot.slane %v3888_v7, 5  ;;  %v8281_v51 = vrot.slane %v3894_v38, 5 }
  0xc9   : > { %v8245_v33 = vrot.slane %v3843_v23, 4  ;;  %v1372_v10 = vrot.slane %v1370_v44, 4  ;;  %v3867_v31 = vor.u32 %v3866_v54, %v3863_v52  ;;  %v9240_v23 = vcombine.low %v8064_v59, %v8072_v25  ;;  %v7258_v18 = vld [vmem:[%s7396_s16 + $0x88] sm:$0xf]  ;;  %v5851_v5 = vld [vmem:[%s7396_s16 + $0x44] sm:$0x1] }
  0xca   : > { %v1377_v3 = vrot.slane %v7258_v18, 5  ;;  %v8272_v59 = vcombine.low %v3825_v0, %v3835_v46  ;;  %v5852_v52 = vld [vmem:[%s7396_s16 + $0x48] sm:$0xf]  ;;  %v3887_v54 = vrot.slane %v3885_v28, 4  ;;  %v3900_v22 = vrot.slane %v3898_v2, 4 }
  0xcb   : > { %6726 = vmatpush3.bf16.msra.mxu0 %v7191_v50  ;;  %v1373_v50 = vrot.slane %v7257_v19, 5  ;;  %v7188_v19 = vld [vmem:[%s7396_s16 + $0x90] sm:$0xff]   ;;  %v3849_v0 = vsel %vm7428_vm2, %v8245_v33, %v8190_v17  ;;  %v3868_v46 = vrot.slane %v3867_v31, 4  ;;  %v3859_v28 = vsel %vm7428_vm2, %v8254_v13, %v8247_v1  ;;  %v8303_v33 = vld [vmem:[%s7396_s16 + $0x58] sm:$0xf]  ;;  %v7189_v31 = vld [vmem:[%s9217_s1 + $0xc8] sm:$0xff]  }
  0xcc   : > { %6727 = vmatprep.subr.bf16.mxu0 %v7195_v20  ;;  %v3878_v38 = vrot.slane %v3877_v12, 4  ;;  %v1379_v2 = vrot.slane %v1377_v3, 4  ;;  %v5855_v17 = vld [vmem:[%s7396_s16 + $0x54] sm:$0xf]  ;;  %v3904_v1 = vshll.u32 %v5851_v5, 16  ;;  %v3909_v13 = vshrl.u32 %v5852_v52, 16 }
  0xcd   : > { %6696 = vmatmul.mubr.bf16.gmra.mrb[12].mxu0 %v7182_v48  ;;  %v3880_v48 = vshll.u32 %v5848_v34, 16  ;;  %v8299_v7 = vsel %vm7674_vm5, %v1372_v10, %v1373_v50  ;;  %v3912_v50 = vshll.u32 %v5852_v52, 16  ;;  %v3891_v10 = vor.u32 %v3890_v58, %v3887_v54  ;;  %v7190_v54 = vld [vmem:[%s7396_s16 + $0x9c] sm:$0xff]   ;;  %v7264_v41 = vld [vmem:[%s7396_s16 + $0xac] sm:$0xf] }
  0xce   : > { %6472 = vmatmul.mubr.bf16.gmra.mrb[28].mxu1 %v9239_v42  ;;  %6699 = vmatprep.mubr.bf16.mxu0 %v7184_v53  ;;  %v5491_v53 = vrot.slane %v1258_v62, 9  ;;  %v7259_v42 = vld [vmem:[%s7396_s16 + $0x8c] sm:$0x1]  ;;  %v3942_v5 = vshll.u32 %v8303_v33, 16  ;;  %v9242_v52 = vcombine.low %v8080_v63, %v8088_v8  ;;  %v8339_v63 = vld [vmem:[%s7396_s16 + $0x50] sm:$0x1] }
  0xcf   : > { %6491 = vmatprep.mubr.bf16.mxu1 %v9240_v23  ;;  %6728 = vmatpush3.bf16.msra.mxu0 %v7195_v20  ;;  %v8278_v20 = vsel %vm7674_vm5, %v5490_v32, %v1370_v44  ;;  %v3882_v62 = vrot.slane %v3880_v48, 5  ;;  %v1380_v23 = vrot.slane %v7259_v42, 5  ;;  %v1259_v44 = vld [vmem:[%s7396_s16 + $0x90] sm:$0xe]  ;;  %v8291_v32 = vld [vmem:[%s7396_s16 + $0x4c] sm:$0xf]  ;;  %v3901_v48 = vor.u32 %v3900_v22, %v8281_v51 }
  0xd0   : > { %6729 = vmatprep.subr.bf16.mxu0 %v7199_v40  ;;  %v3918_v12 = vshll.u32 %v8291_v32, 16  ;;  %v3922_v18 = vshrl.u32 %v8291_v32, 16  ;;  %v9241_v42 = vcombine.low %v8068_v30, %v8076_v6  ;;  %v7193_v30 = vld [vmem:[%s9217_s1 + $0xd0] sm:$0xff]   ;;  %v3873_v6 = vsel %vm7428_vm2, %v3868_v46, %v8243_v39  ;;  %v7192_v8 = vld [vmem:[%s7396_s16 + $0xa8] sm:$0xff]   ;;  %v8346_v39 = vld [vmem:[%s7396_s16 + $0x5c] sm:$0x1] }
  0xd1   : > { %v3883_v58 = vsel %vm7428_vm2, %v3878_v38, %v3882_v62  ;;  %v5492_v22 = vrot.slane %v1259_v44, 9  ;;  %v3914_v25 = vrot.slane %v3912_v50, 5  ;;  %9243 = vst [vmem:[#allocation3_spill] sm:$0xff] %v8346_v39  ;;  %v3892_v46 = vrot.slane %v3891_v10, 4 }
  0xd2   : > { %v3902_v62 = vrot.slane %v3901_v48, 4  ;;  %v8348_v38 = vrot.slane %v3918_v12, 5  ;;  %v8350_v34 = vrot.slane %v3942_v5, 5  ;;  %v8355_v50 = vcombine.low %v3849_v0, %v3859_v28  ;;  %v5858_v28 = vld [vmem:[%s7396_s16 + $0x60] sm:$0xf] }
  0xd3   : > { %6730 = vmatpush3.bf16.msra.mxu0 %v7199_v40  ;;  %v8311_v40 = vsel %vm7674_vm5, %v5491_v53, %v1377_v3  ;;  %v3933_v53 = vshrl.u32 %v5855_v17, 16  ;;  %v3936_v3 = vshll.u32 %v5855_v17, 16  ;;  %v7260_v17 = vld [vmem:[%s7396_s16 + $0x94] sm:$0xf]  ;;  %v8359_v48 = vcombine.low %v3873_v6, %v3883_v58 }
  0xd4   : > { %6763 = vmatprep.subr.bf16.mxu0 %v8259_v21  ;;  %v3928_v0 = vshll.u32 %v8339_v63, 16  ;;  %v3897_v6 = vsel %vm7428_vm2, %v3892_v46, %v8281_v51  ;;  %v9246_v46 = vcombine.low %v8102_v61, %v8106_v36 }
  0xd5   : > { %6700 = vmatmul.mubr.bf16.gmra.mrb[16].mxu0 %v7186_v43  ;;  %v3946_v43 = vshrl.u32 %v8303_v33, 16  ;;  %v3935_v44 = vrot.slane %v3933_v53, 4  ;;  %v7261_v53 = vld [vmem:[%s7396_s16 + $0x98] sm:$0x1] }
  0xd6   : > { %6492 = vmatmul.mubr.bf16.vlgmr.msra.gmra.mrb[0].mxu1 %v9241_v42  ;;  %6703 = vmatprep.mubr.bf16.mxu0 %v7188_v19  ;;  %v8342_v19 = vrot.slane %v3904_v1, 5  ;;  %v1384_v42 = vrot.slane %v7260_v17, 5  ;;  %v7262_v17 = vld [vmem:[%s7396_s16 + $0xa0] sm:$0xf]  ;;  %v3930_v36 = vrot.slane %v3928_v0, 5 }
  0xd7   : > { %6524 = vmatpush3.bf16.msra.mxu1 %v8021_v60  ;;  %6495 = vmatprep.mubr.bf16.mxu1 %v9242_v52  ;;  %v8336_v60 = vsel %vm7674_vm5, %v1379_v2, %v1380_v23  ;;  %v3911_v52 = vrot.slane %v3909_v13, 4  ;;  %v3924_v23 = vrot.slane %v3922_v18, 4  ;;  %v3938_v2 = vrot.slane %v3936_v3, 5  ;;  %v7197_v13 = vld [vmem:[%s9217_s1 + $0xd8] sm:$0xff]  }
  0xd8   : > { %6525 = vmatprep.subr.bf16.mxu1 %v7189_v31  ;;  %v3948_v1 = vrot.slane %v3946_v43, 4  ;;  %v1260_v18 = vld [vmem:[%s7396_s16 + $0x9c] sm:$0xe]  ;;  %v1387_v3 = vrot.slane %v7261_v53, 5  ;;  %v8372_v43 = vld [vmem:[%s7396_s16 + $0x64] sm:$0xf] }
  0xd9   : > { %v3915_v5 = vor.u32 %v3914_v25, %v3911_v52  ;;  %9244 = vst [vmem:[#allocation4_spill] sm:$0xff] %v8372_v43  ;;  %v3925_v58 = vor.u32 %v3924_v23, %v8348_v38  ;;  %v1391_v12 = vrot.slane %v7262_v17, 5  ;;  %v9245_v25 = vcombine.low %v8092_v24, %v8096_v35  ;;  %v7194_v23 = vld [vmem:[%s7396_s16 + $0xb4] sm:$0xff]   ;;  %v7200_v24 = vld [vmem:[%s9217_s1 + $0xe0] sm:$0xff]   ;;  %v5861_v17 = vld [vmem:[%s7396_s16 + $0x6c] sm:$0xf] }
  0xda   : > { %v1386_v52 = vrot.slane %v1384_v42, 4  ;;  %v3939_v53 = vor.u32 %v3938_v2, %v3935_v44  ;;  %v3949_v51 = vor.u32 %v3948_v1, %v8350_v34  ;;  %v3957_v35 = vshrl.u32 %v5858_v28, 16  ;;  %v7263_v2 = vld [vmem:[%s7396_s16 + $0xa4] sm:$0x1] }
  0xdb   : > { %6526 = vmatpush3.bf16.msra.mxu1 %v7189_v31  ;;  %v8366_v31 = vsel %vm7674_vm5, %v5492_v22, %v1384_v42  ;;  %v3952_v22 = vshll.u32 %v8346_v39, 16  ;;  %v3970_v42 = vshrl.u32 %v8372_v43, 16  ;;  %v3916_v61 = vrot.slane %v3915_v5, 4  ;;  %v8541_v39 = vld [vmem:[%s7396_s16 + $0x98] sm:$0x1] }
  0xdc   : > { %6527 = vmatprep.subr.bf16.mxu1 %v7193_v30  ;;  %v5493_v44 = vrot.slane %v1260_v18, 9  ;;  %v1394_v1 = vrot.slane %v7263_v2, 5  ;;  %v3940_v5 = vrot.slane %v3939_v53, 4  ;;  %v3950_v18 = vrot.slane %v3949_v51, 4  ;;  %9260 = vst [vmem:[#allocation14_spill] sm:$0xff] %v8541_v39 }
  0xdd   : > { %6704 = vmatmul.mubr.bf16.gmra.mrb[20].mxu0 %v7190_v54  ;;  %v3907_v54 = vsel %vm7428_vm2, %v3902_v62, %v8342_v19  ;;  %v3966_v19 = vshll.u32 %v8372_v43, 16  ;;  %v7196_v62 = vld [vmem:[%s7396_s16 + $0xc0] sm:$0xff]   ;;  %v3954_v10 = vrot.slane %v3952_v22, 5  ;;  %v8408_v43 = vsel %vm7674_vm5, %v1386_v52, %v1387_v3 }
  0xde   : > { %6496 = vmatmul.mubr.bf16.gmra.mrb[4].mxu1 %v9245_v25  ;;  %6707 = vmatprep.mubr.bf16.mxu0 %v7192_v8  ;;  %v3960_v8 = vshll.u32 %v5858_v28, 16  ;;  %v3926_v25 = vrot.slane %v3925_v58, 4  ;;  %v1398_v28 = vrot.slane %v7264_v41, 5  ;;  %v8404_v55 = vcombine.low %v3897_v6, %v3907_v54  ;;  %v7202_v41 = vld [vmem:[%s9217_s1 + $0xe8] sm:$0xff]  }
  0xdf   : > { %6499 = vmatprep.mubr.bf16.mxu1 %v9246_v46  ;;  %6528 = vmatpush3.bf16.msra.mxu1 %v7193_v30  ;;  %v1261_v30 = vld [vmem:[%s7396_s16 + $0xa8] sm:$0xe]  ;;  %v1393_v46 = vrot.slane %v1391_v12, 4  ;;  %v3959_v0 = vrot.slane %v3957_v35, 4  ;;  %v8410_v58 = vrot.slane %v3966_v19, 5  ;;  %v3972_v22 = vrot.slane %v3970_v42, 4 }
  0xe0   : > { %6529 = vmatprep.subr.bf16.mxu1 %v7197_v13  ;;  %v3962_v2 = vrot.slane %v3960_v8, 5  ;;  %v3921_v3 = vsel %vm7428_vm2, %v3916_v61, %v8348_v38  ;;  %v8420_v6 = vsel %vm7674_vm5, %v5493_v44, %v1391_v12  ;;  %v3981_v54 = vshrl.u32 %v5861_v17, 16  ;;  %v7265_v38 = vld [vmem:[%s7396_s16 + $0xb0] sm:$0x1]  ;;  %v1262_v19 = vld [vmem:[%s7396_s16 + $0xb4] sm:$0xe] }
  0xe1   : > { %v3984_v52 = vshll.u32 %v5861_v17, 16  ;;  %v3931_v53 = vsel %vm7428_vm2, %v3926_v25, %v3930_v36  ;;  %v8429_v51 = vsel %vm7674_vm5, %v1393_v46, %v1394_v1  ;;  %v5494_v35 = vrot.slane %v1261_v30, 9  ;;  %v8451_v30 = vld [vmem:[%s7396_s16 + $0x74] sm:$0x1]  ;;  %v7266_v25 = vld [vmem:[%s7396_s16 + $0xb8] sm:$0xf] }
  0xe2   : > { %v1401_v8 = vrot.slane %v7265_v38, 5  ;;  %v9249_v12 = vcombine.low %v8123_v49, %v8137_v4  ;;  %v3945_v42 = vsel %vm7428_vm2, %v3940_v5, %v8350_v34  ;;  %v3955_v61 = vsel %vm7428_vm2, %v3950_v18, %v3954_v10  ;;  %v7198_v4 = vld [vmem:[%s7396_s16 + $0xcc] sm:$0xff]   ;;  %9251 = vst [vmem:[#allocation7_spill] sm:$0xff] %v8451_v30  ;;  %v5867_v38 = vld [vmem:[%s7396_s16 + $0x84] sm:$0xf] }
  0xe3   : > { %6530 = vmatpush3.bf16.msra.mxu1 %v7197_v13  ;;  %v8423_v13 = vld [vmem:[%s7396_s16 + $0x70] sm:$0xf]  ;;  %v1400_v36 = vrot.slane %v1398_v28, 4  ;;  %v3976_v44 = vshll.u32 %v8402_v47, 16  ;;  %v9250_v49 = vcombine.low %v8159_v26, %v8163_v56  ;;  %v3973_v1 = vor.u32 %v3972_v22, %v8410_v58  ;;  %v8468_v22 = vld [vmem:[%s7396_s16 + $0x7c] sm:$0xf] }
  0xe4   : > { %6531 = vmatprep.subr.bf16.mxu1 %v7200_v24  ;;  %9248 = vst [vmem:[#allocation6_spill] sm:$0xff] %v8423_v13  ;;  %v3990_v34 = vshll.u32 %v8423_v13, 16  ;;  %v3994_v10 = vshrl.u32 %v8423_v13, 16  ;;  %v5495_v17 = vrot.slane %v1262_v19, 9  ;;  %v1405_v46 = vrot.slane %v7266_v25, 5  ;;  %9252 = vst [vmem:[#allocation8_spill] sm:$0xff] %v8468_v22 }
  0xe5   : > { %6708 = vmatmul.mubr.bf16.gmra.mrb[24].mxu0 %v7194_v23  ;;  %v7204_v23 = vld [vmem:[%s9217_s1 + $0xf0] sm:$0xff]   ;;  %v3983_v26 = vrot.slane %v3981_v54, 4  ;;  %v3986_v56 = vrot.slane %v3984_v52, 5  ;;  %v8459_v18 = vcombine.low %v3921_v3, %v3931_v53  ;;  %v8471_v19 = vcombine.low %v3945_v42, %v3955_v61  ;;  %v7267_v3 = vld [vmem:[%s7396_s16 + $0xbc] sm:$0x1] }
  0xe6   : > { %6500 = vmatmul.mubr.bf16.gmra.mrb[8].mxu1 %v9249_v12  ;;  %6711 = vmatprep.mubr.bf16.mxu0 %v7196_v62  ;;  %v3963_v62 = vor.u32 %v3962_v2, %v3959_v0  ;;  %v8465_v2 = vsel %vm7674_vm5, %v5494_v35, %v1398_v28  ;;  %v8475_v54 = vsel %vm7674_vm5, %v1400_v36, %v1401_v8  ;;  %v8477_v52 = vrot.slane %v3976_v44, 5  ;;  %v7206_v12 = vld [vmem:[%s9217_s1 + $0xf8] sm:$0xff]   ;;  %v8484_v28 = vld [vmem:[%s7396_s16 + $0x88] sm:$0xf] }
  0xe7   : > { %6503 = vmatprep.mubr.bf16.mxu1 %v9250_v49  ;;  %6532 = vmatpush3.bf16.msra.mxu1 %v7200_v24  ;;  %v5864_v24 = vld [vmem:[%s7396_s16 + $0x78] sm:$0xf]  ;;  %v1408_v53 = vrot.slane %v7267_v3, 5  ;;  %9253 = vst [vmem:[#allocation9_spill] sm:$0xff] %v8484_v28  ;;  %v8488_v42 = vrot.slane %v3973_v1, 4  ;;  %v8490_v61 = vrot.slane %v3990_v34, 5  ;;  %v8494_v36 = vsel %vm7674_vm5, %v5495_v17, %v1405_v46 }
  0xe8   : > { %6533 = vmatprep.subr.bf16.mxu1 %v7202_v41  ;;  %v8486_v35 = vrot.slane %v3963_v62, 4  ;;  %v3996_v8 = vrot.slane %v3994_v10, 4  ;;  %v1407_v44 = vrot.slane %v1405_v46, 4  ;;  %v3987_v49 = vor.u32 %v3986_v56, %v3983_v26  ;;  %v5870_v3 = vld [vmem:[%s7396_s16 + $0x90] sm:$0xf] }
  0xe9   : > { %v4000_v25 = vshll.u32 %v8451_v30, 16  ;;  %v4008_v0 = vshll.u32 %v5864_v24, 16  ;;  %v4014_v62 = vshll.u32 %v8468_v22, 16  ;;  %v4018_v1 = vshrl.u32 %v8468_v22, 16  ;;  %v8501_v34 = vld [vmem:[%s7396_s16 + $0x94] sm:$0xf] }
  0xea   : > { %9254 = vst [vmem:[#allocation10_spill] sm:$0xff] %v8501_v34  ;;  %v9255_v10 = vcombine.low %v8203_v27, %v8207_v29  ;;  %v4029_v17 = vshrl.u32 %v5867_v38, 16  ;;  %v4032_v46 = vshll.u32 %v5867_v38, 16  ;;  %v4042_v26 = vshrl.u32 %v8484_v28, 16  ;;  %v5873_v38 = vld [vmem:[%s7396_s16 + $0x9c] sm:$0xf] }
  0xeb   : > { %6534 = vmatpush3.bf16.msra.mxu1 %v7202_v41  ;;  %v4005_v41 = vshrl.u32 %v5864_v24, 16  ;;  %v9256_v56 = vcombine.low %v8214_v45, %v8218_v14  ;;  %v3997_v29 = vor.u32 %v3996_v8, %v8490_v61  ;;  %v4056_v24 = vshll.u32 %v5870_v3, 16  ;;  %v8523_v45 = vld [vmem:[%s7396_s16 + $0x80] sm:$0x1] }
  0xec   : > { %6535 = vmatprep.subr.bf16.mxu1 %v7204_v23  ;;  %v8520_v5 = vrot.slane %v4000_v25, 5  ;;  %9257 = vst [vmem:[#allocation11_spill] sm:$0xff] %v8523_v45  ;;  %v4062_v14 = vshll.u32 %v8501_v34, 16  ;;  %v4010_v27 = vrot.slane %v4008_v0, 5  ;;  %v4020_v8 = vrot.slane %v4018_v1, 4 }
  0xed   : > { %6712 = vmatmul.mubr.bf16.gmra.mrb[28].mxu0 %v7198_v4  ;;  %v4038_v4 = vshll.u32 %v8484_v28, 16  ;;  %v8527_v28 = vrot.slane %v4014_v62, 5  ;;  %v8533_v22 = vld [vmem:[%s7396_s16 + $0xa0] sm:$0xf]  ;;  %v4031_v25 = vrot.slane %v4029_v17, 4  ;;  %v4034_v30 = vrot.slane %v4032_v46, 5 }
  0xee   : > { %6504 = vmatmul.mubr.bf16.gmra.mrb[12].mxu1 %v9255_v10  ;;  %6731 = vmatprep.mubr.bf16.mxu0 %v8272_v59  ;;  %v4053_v59 = vshrl.u32 %v5870_v3, 16  ;;  %v8518_v10 = vrot.slane %v3987_v49, 4  ;;  %v8530_v3 = vld [vmem:[%s7396_s16 + $0x8c] sm:$0x1]  ;;  %9259 = vst [vmem:[#allocation13_spill] sm:$0xff] %v8533_v22  ;;  %v4044_v47 = vrot.slane %v4042_v26, 4  ;;  %v8550_v62 = vsel %vm7674_vm5, %v1407_v44, %v1408_v53 }
  0xef   : > { %6507 = vmatprep.mubr.bf16.mxu1 %v9256_v56  ;;  %6536 = vmatpush3.bf16.msra.mxu1 %v7204_v23  ;;  %v4066_v23 = vshrl.u32 %v8501_v34, 16  ;;  %v4007_v56 = vrot.slane %v4005_v41, 4  ;;  %9258 = vst [vmem:[#allocation12_spill] sm:$0xff] %v8530_v3  ;;  %v7203_v49 = vld [vmem:[%s9217_s1 + $0x208] sm:$0xff]   ;;  %v8538_v13 = vrot.slane %v4038_v4, 5  ;;  %v4058_v34 = vrot.slane %v4056_v24, 5 }
  0xf0   : > { %6537 = vmatprep.subr.bf16.mxu1 %v7206_v12  ;;  %v5876_v41 = vld [vmem:[%s7396_s16 + $0xa8] sm:$0xf]  ;;  %v4055_v1 = vrot.slane %v4053_v59, 4  ;;  %v8555_v17 = vld [vmem:[%s9217_s1 + $0x100] sm:$0xff]   ;;  %v8558_v46 = vrot.slane %v4062_v14, 5  ;;  %v4077_v26 = vshrl.u32 %v5873_v38, 16  ;;  %v9262_v24 = vcombine.low %v8222_v16, %v8232_v15 }
  0xf1   : > { %9261 = vst [vmem:[#allocation15_spill] sm:$0xff] %v8555_v17  ;;  %v4068_v4 = vrot.slane %v4066_v23, 4  ;;  %v4080_v0 = vshll.u32 %v5873_v38, 16  ;;  %v8561_v53 = vrot.slane %v3997_v29, 4  ;;  %v4086_v44 = vshll.u32 %v8533_v22, 16  ;;  %v7205_v16 = vld [vmem:[%s9217_s1 + $0x210] sm:$0xff]  }
  0xf2   : > { %v4090_v59 = vshrl.u32 %v8533_v22, 16  ;;  %v4011_v14 = vor.u32 %v4010_v27, %v4007_v56  ;;  %v4021_v38 = vor.u32 %v4020_v8, %v8527_v28  ;;  %v4035_v23 = vor.u32 %v4034_v30, %v4031_v25  ;;  %v8573_v29 = vld [vmem:[%s7396_s16 + $0xac] sm:$0xf]  ;;  %v8586_v25 = vld [vmem:[%s7396_s16 + $0xa4] sm:$0x1] }
  0xf3   : > { %6538 = vmatpush3.bf16.msra.mxu1 %v7206_v12  ;;  %v4024_v12 = vshll.u32 %v8523_v45, 16  ;;  %9263 = vst [vmem:[#allocation16_spill] sm:$0xff] %v8573_v29  ;;  %v4045_v15 = vor.u32 %v4044_v47, %v8538_v13  ;;  %v4101_v27 = vshrl.u32 %v5876_v41, 16  ;;  %v4104_v30 = vshll.u32 %v5876_v41, 16 }
  0xf4   : > { %6811 = vmatprep.subr.bf16.mxu1 %v8555_v17  ;;  %v9264_v17 = vcombine.low %v8278_v20, %v8299_v7  ;;  %v4059_v56 = vor.u32 %v4058_v34, %v4055_v1  ;;  %v4069_v8 = vor.u32 %v4068_v4, %v8558_v46  ;;  %v4079_v20 = vrot.slane %v4077_v26, 4 }
  0xf5   : > { %6732 = vmatmul.mubr.bf16.vlgmr.msra.gmra.mrb[0].mxu0 %v8355_v50  ;;  %v4048_v50 = vshll.u32 %v8530_v3, 16  ;;  %v4082_v7 = vrot.slane %v4080_v0, 5  ;;  %v4114_v22 = vshrl.u32 %v8573_v29, 16  ;;  %v4012_v47 = vrot.slane %v4011_v14, 4  ;;  %v7207_v0 = vld [vmem:[%s9217_s1 + $0x218] sm:$0xff]  }
  0xf6   : > { %6508 = vmatmul.mubr.bf16.gmra.mrb[16].mxu1 %v9262_v24  ;;  %6764 = vmatpush3.bf16.msra.mxu0 %v8259_v21  ;;  %v4072_v21 = vshll.u32 %v8541_v39, 16  ;;  %v4110_v24 = vshll.u32 %v8573_v29, 16  ;;  %v4022_v39 = vrot.slane %v4021_v38, 4  ;;  %v4026_v3 = vrot.slane %v4024_v12, 5 }
  0xf7   : > { %6511 = vmatprep.mubr.bf16.mxu1 %v9264_v17  ;;  %6735 = vmatprep.mubr.bf16.mxu0 %v8359_v48  ;;  %v8588_v17 = vrot.slane %v4086_v44, 5  ;;  %v4092_v48 = vrot.slane %v4090_v59, 4  ;;  %v4050_v41 = vrot.slane %v4048_v50, 5  ;;  %v4036_v34 = vrot.slane %v4035_v23, 4 }
  0xf8   : > { %6765 = vmatprep.subr.bf16.mxu0 %v7203_v49  ;;  %v4046_v1 = vrot.slane %v4045_v15, 4  ;;  %v4103_v4 = vrot.slane %v4101_v27, 4  ;;  %v4106_v45 = vrot.slane %v4104_v30, 5  ;;  %v4060_v26 = vrot.slane %v4059_v56, 4  ;;  %v8654_v27 = vld [vmem:[%s7396_s16 + $0xbc] sm:$0x1] }
  0xf9   : > { %v4074_v44 = vrot.slane %v4072_v21, 5  ;;  %v4083_v59 = vor.u32 %v4082_v7, %v4079_v20  ;;  %v4096_v29 = vshll.u32 %v8586_v25, 16  ;;  %v4093_v12 = vor.u32 %v4092_v48, %v8588_v17  ;;  %v8621_v21 = vld [vmem:[%s7396_s16 + $0xb0] sm:$0x1] }
  0xfa   : > { %6766 = vmatpush3.bf16.msra.mxu0 %v7203_v49  ;;  %v4070_v49 = vrot.slane %v4069_v8, 4  ;;  %v8598_v14 = vrot.slane %v4110_v24, 5  ;;  %v4116_v38 = vrot.slane %v4114_v22, 4  ;;  %v9265_v23 = vor.u32 %v8006_v57, %v8004_v11 }
  0xfb   : > { %6767 = vmatprep.subr.bf16.mxu0 %v7205_v16  ;;  %v9266_v15 = vcombine.low %v8311_v40, %v8336_v60  ;;  %v4003_v22 = vsel %vm7428_vm2, %v8561_v53, %v8520_v5  ;;  %v4017_v57 = vsel %vm7428_vm2, %v4012_v47, %v8527_v28  ;;  %v9267_v40 = vcombine.low %v8366_v31, %v8408_v43  ;;  %v7210_v31 = vld [vmem:[%s9217_s1 + $0x220] sm:$0xff]  }
  0xfc   : > { %v8603_v50 = vrot.slane %v9265_v23, 4  ;;  %v4027_v60 = vsel %vm7428_vm2, %v4022_v39, %v4026_v3  ;;  %v4107_v5 = vor.u32 %v4106_v45, %v4103_v4  ;;  %v4051_v28 = vsel %vm7428_vm2, %v4046_v1, %v4050_v41  ;;  %v5932_v41 = vld [vmem:[%s7396_s16 + $0x48] sm:$0xe] }
  0xfd   : > { %6736 = vmatmul.mubr.bf16.gmra.mrb[4].mxu0 %v8404_v55  ;;  %v3993_v55 = vsel %vm7428_vm2, %v8518_v10, %v8490_v61  ;;  %v5879_v61 = vld [vmem:[%s7396_s16 + $0xb4] sm:$0xf]  ;;  %v8633_v10 = vld [vmem:[%s7396_s16 + $0xb8] sm:$0xf]  ;;  %v4065_v39 = vsel %vm7428_vm2, %v4060_v26, %v8558_v46  ;;  %v8643_v43 = vrot.slane %v4083_v59, 4  ;;  %v8645_v3 = vrot.slane %v4096_v29, 5 }
  0xfe   : > { %6512 = vmatmul.mubr.bf16.gmra.mrb[20].mxu1 %v9266_v15  ;;  %6739 = vmatprep.mubr.bf16.mxu0 %v8459_v18  ;;  %v4041_v18 = vsel %vm7428_vm2, %v4036_v34, %v8538_v13  ;;  %v4075_v13 = vsel %vm7428_vm2, %v4070_v49, %v4074_v44  ;;  %v8649_v45 = vrot.slane %v4093_v12, 4  ;;  %v4117_v53 = vor.u32 %v4116_v38, %v8598_v14  ;;  %v5933_v26 = vld [vmem:[%s7396_s16 + $0x54] sm:$0xe] }
  0xff   : > { %6515 = vmatprep.mubr.bf16.mxu1 %v9267_v40  ;;  %6768 = vmatpush3.bf16.msra.mxu0 %v7205_v16  ;;  %v4120_v16 = vshll.u32 %v8621_v21, 16  ;;  %v9268_v46 = vsel %vm7428_vm2, %v8488_v42, %v8477_v52  ;;  %v9269_v29 = vsel %vm7428_vm2, %v8486_v35, %v8410_v58  ;;  %v4125_v56 = vshrl.u32 %v5879_v61, 16 }
 0x100   : > { %6769 = vmatprep.subr.bf16.mxu0 %v7207_v0  ;;  %v5910_v30 = vcombine.low %v9269_v29, %v9268_v46  ;;  %v4128_v8 = vshll.u32 %v5879_v61, 16  ;;  %v4134_v20 = vshll.u32 %v8633_v10, 16  ;;  %v5526_v7 = vcombine.low %v8465_v2, %v8475_v54  ;;  %v7213_v2 = vld [vmem:[%s9217_s1 + $0x228] sm:$0xff]   ;;  %v5882_v54 = vld [vmem:[%s7396_s16 + $0xc0] sm:$0xf]  ;;  %v9273_v29 = vld [vmem:[#allocation5_spill] sm:$0xff] }
 0x101   : > { %v5527_v48 = vcombine.low %v8494_v36, %v8550_v62  ;;  %v5911_v24 = vcombine.low %v3993_v55, %v4003_v22  ;;  %v8671_v52 = vrot.slane %v4107_v5, 4  ;;  %v5912_v42 = vcombine.low %v4017_v57, %v4027_v60 }
 0x102   : > { %v8673_v58 = vcombine.low %v4041_v18, %v4051_v28  ;;  %v8675_v35 = vcombine.low %v4065_v39, %v4075_v13  ;;  %v4089_v47 = vsel %vm7428_vm2, %v8643_v43, %v8588_v17  ;;  %v4099_v34 = vsel %vm7428_vm2, %v8649_v45, %v8645_v3  ;;  %v5935_v28 = vld [vmem:[%s7396_s16 + $0x6c] sm:$0xe] }
 0x103   : > { %6770 = vmatpush3.bf16.msra.mxu0 %v7207_v0  ;;  %v8691_v1 = vrot.slane %v4117_v53, 4  ;;  %v8693_v4 = vrot.slane %v4120_v16, 5  ;;  %v4138_v0 = vshrl.u32 %v8633_v10, 16  ;;  %v9270_v44 = vcombine.low %v8420_v6, %v8429_v51  ;;  %v7216_v6 = vld [vmem:[%s9217_s1 + $0x230] sm:$0xff]   ;;  %v8715_v51 = vld [vmem:[%s7396_s16 + $0xc4] sm:$0xf] }
 0x104   : > { %6771 = vmatprep.subr.bf16.mxu0 %v7210_v31  ;;  %v8700_v59 = vrot.slane %v4125_v56, 4  ;;  %v8704_v49 = vrot.slane %v4134_v20, 5  ;;  %v4144_v12 = vshll.u32 %v8654_v27, 16  ;;  %v4113_v38 = vsel %vm7428_vm2, %v8671_v52, %v8598_v14  ;;  %v5934_v14 = vld [vmem:[%s7396_s16 + $0x60] sm:$0xe]  ;;  %v9271_v39 = vld [vmem:[#allocation3_spill] sm:$0xff] }
 0x105   : > { %6740 = vmatmul.mubr.bf16.gmra.mrb[8].mxu0 %v8471_v19  ;;  %v8702_v19 = vrot.slane %v4128_v8, 5  ;;  %v4149_v23 = vshrl.u32 %v5882_v54, 16  ;;  %v5948_v15 = vrot.slane %v5932_v41, 9  ;;  %v4612_v55 = vrot.slane %v8291_v32, 5  ;;  %v7208_v13 = vld [vmem:[%s7396_s16 + $0xc] sm:$0xff]   ;;  %v7219_v56 = vld [vmem:[%s9217_s1 + $0x238] sm:$0xff]  }
 0x106   : > { %6516 = vmatmul.mubr.bf16.gmra.mrb[24].mxu1 %v9270_v44  ;;  %6743 = vmatprep.mubr.bf16.mxu0 %v5910_v30  ;;  %v4152_v22 = vshll.u32 %v5882_v54, 16  ;;  %v4615_v57 = vrot.slane %v8339_v63, 5  ;;  %v5949_v40 = vrot.slane %v5933_v26, 9  ;;  %v4619_v60 = vrot.slane %v8303_v33, 5  ;;  %v9272_v16 = vld [vmem:[#allocation4_spill] sm:$0xff]  ;;  %v9274_v52 = vld [vmem:[#allocation6_spill] sm:$0xff] }
 0x107   : > { %6519 = vmatprep.mubr.bf16.mxu1 %v5526_v7  ;;  %6772 = vmatpush3.bf16.msra.mxu0 %v7210_v31  ;;  %v4123_v18 = vsel %vm7428_vm2, %v8691_v1, %v8693_v4  ;;  %v8725_v5 = vrot.slane %v4138_v0, 4  ;;  %v8729_v61 = vsel %vm7674_vm5, %v5948_v15, %v4612_v55  ;;  %v4614_v32 = vrot.slane %v4612_v55, 4  ;;  %v9275_v4 = vld [vmem:[#allocation7_spill] sm:$0xff] }
 0x108   : > { %6773 = vmatprep.subr.bf16.mxu0 %v7213_v2  ;;  %v4158_v31 = vshll.u32 %v8715_v51, 16  ;;  %v8735_v63 = vsel %vm7674_vm5, %v5949_v40, %v4619_v60  ;;  %v4621_v33 = vrot.slane %v4619_v60, 4  ;;  %v4622_v3 = vrot.slane %v9271_v39, 5  ;;  %v8766_v26 = vld [vmem:[%s7396_s16 + $0xc8] sm:$0x1]  ;;  %v7209_v40 = vld [vmem:[%s7396_s16 + $0x18] sm:$0xff]  }
 0x109   : > { %v8741_v45 = vsel %vm7674_vm5, %v4614_v32, %v4615_v57  ;;  %v5950_v53 = vrot.slane %v5934_v14, 9  ;;  %v4626_v46 = vrot.slane %v9272_v16, 5  ;;  %v4629_v30 = vrot.slane %v9273_v29, 5  ;;  %v7211_v39 = vld [vmem:[%s7396_s16 + $0x24] sm:$0xff]  }
 0x10a   : > { %v5980_v8 = vcombine.low %v8729_v61, %v8741_v45  ;;  %v8752_v20 = vsel %vm7674_vm5, %v4621_v33, %v4622_v3  ;;  %v5951_v7 = vrot.slane %v5935_v28, 9  ;;  %v4636_v0 = vrot.slane %v9275_v4, 5  ;;  %v9277_v28 = vld [vmem:[#allocation11_spill] sm:$0xff]  ;;  %v5641_v61 = vld [vmem:[%s7396_s16 + $0x90] sm:$0xf] }
 0x10b   : > { %6774 = vmatpush3.bf16.msra.mxu0 %v7213_v2  ;;  %v4633_v2 = vrot.slane %v9274_v52, 5  ;;  %v5981_v54 = vcombine.low %v8735_v63, %v8752_v20  ;;  %v8759_v41 = vsel %vm7674_vm5, %v5950_v53, %v4626_v46  ;;  %v4628_v1 = vrot.slane %v4626_v46, 4  ;;  %v9278_v53 = vld [vmem:[#allocation2_spill] sm:$0xff]  ;;  %v7225_v45 = vld [vmem:[%s7396_s16 + $0xa8] sm:$0xff]  }
 0x10c   : > { %6775 = vmatprep.subr.bf16.mxu0 %v7216_v6  ;;  %v8768_v44 = vrot.slane %v4149_v23, 4  ;;  %v8781_v36 = vcombine.low %v4089_v47, %v4099_v34  ;;  %v4131_v62 = vor.u32 %v8702_v19, %v8700_v59  ;;  %v5936_v23 = vld [vmem:[%s7396_s16 + $0x78] sm:$0xe]  ;;  %v8793_v57 = vrot.slane %v4144_v12, 5  ;;  %v5885_v12 = vld [vmem:[%s7396_s16 + $0xcc] sm:$0xf] }
 0x10d   : > { %6744 = vmatmul.mubr.bf16.gmra.mrb[12].mxu0 %v5911_v24  ;;  %v8770_v24 = vrot.slane %v4152_v22, 5  ;;  %v8774_v15 = vsel %vm7674_vm5, %v5951_v7, %v4633_v2  ;;  %v4635_v55 = vrot.slane %v4633_v2, 4  ;;  %v8791_v22 = vcombine.low %v4113_v38, %v4123_v18  ;;  %v5635_v47 = vld [vmem:[%s7396_s16 + $0x78] sm:$0xf]  ;;  %v9276_v18 = vld [vmem:[#allocation8_spill] sm:$0xff] }
 0x10e   : > { %6520 = vmatmul.mubr.bf16.gmra.mrb[28].mxu1 %v5527_v48  ;;  %6747 = vmatprep.mubr.bf16.mxu0 %v5912_v42  ;;  %v4162_v48 = vshrl.u32 %v8715_v51, 16  ;;  %v8788_v42 = vsel %vm7674_vm5, %v4628_v1, %v4629_v30  ;;  %v4141_v34 = vor.u32 %v8725_v5, %v8704_v49  ;;  %v8804_v59 = vrot.slane %v4158_v31, 5  ;;  %v8818_v31 = vld [vmem:[%s7396_s16 + $0xd0] sm:$0xf]  ;;  %v9279_v1 = vld [vmem:[#allocation9_spill] sm:$0xff] }
 0x10f   : > { %6539 = vmatprep.mubr.bf16.mxu1 %v7208_v13  ;;  %6776 = vmatpush3.bf16.msra.mxu0 %v7216_v6  ;;  %v5982_v17 = vcombine.low %v8759_v41, %v8788_v42  ;;  %v8799_v43 = vsel %vm7674_vm5, %v4635_v55, %v4636_v0  ;;  %v4168_v19 = vshll.u32 %v8766_v26, 16  ;;  %v5937_v6 = vld [vmem:[%s7396_s16 + $0x84] sm:$0xe]  ;;  %v4155_v60 = vor.u32 %v8770_v24, %v8768_v44  ;;  %v9280_v24 = vld [vmem:[#allocation12_spill] sm:$0xff]  ;;  %v7289_v63 = vld [vmem:[%s7396_s16 + $0x8c] sm:$0x1] }
 0x110   : > { %6777 = vmatprep.subr.bf16.mxu0 %v7219_v56  ;;  %v5983_v38 = vcombine.low %v8774_v15, %v8799_v43  ;;  %v5952_v14 = vrot.slane %v5936_v23, 9  ;;  %v4640_v32 = vrot.slane %v9276_v18, 5  ;;  %v4643_v33 = vrot.slane %v9277_v28, 5 }
 0x111   : > { %v4164_v5 = vrot.slane %v4162_v48, 4  ;;  %v2387_v3 = vshrl.u32 %v5635_v47, 16  ;;  %v2390_v13 = vshll.u32 %v5635_v47, 16  ;;  %v2409_v16 = vsel %vm7428_vm2, %v8603_v50, %v9278_v53 }
 0x112   : > { %v4173_v46 = vshrl.u32 %v5885_v12, 16  ;;  %v8826_v29 = vsel %vm7674_vm5, %v5952_v14, %v4640_v32  ;;  %v4642_v30 = vrot.slane %v4640_v32, 4  ;;  %v5953_v7 = vrot.slane %v5937_v6, 9  ;;  %v7269_v6 = vld [vmem:[%s9217_s1 + $0x108] sm:$0xff]  }
 0x113   : > { %6778 = vmatpush3.bf16.msra.mxu0 %v7219_v56  ;;  %v4176_v52 = vshll.u32 %v5885_v12, 16  ;;  %v2389_v2 = vrot.slane %v2387_v3, 4  ;;  %v2392_v56 = vrot.slane %v2390_v13, 5  ;;  %v4647_v4 = vrot.slane %v9279_v1, 5  ;;  %v5938_v12 = vld [vmem:[%s7396_s16 + $0x90] sm:$0xe] }
 0x114   : > { %v4182_v50 = vshll.u32 %v8818_v31, 16  ;;  %v4186_v0 = vshrl.u32 %v8818_v31, 16  ;;  %v8835_v44 = vsel %vm7674_vm5, %v4642_v30, %v4643_v33  ;;  %v4650_v55 = vrot.slane %v9280_v24, 5  ;;  %v7212_v3 = vld [vmem:[%s7396_s16 + $0x30] sm:$0xff]  }
 0x115   : > { %6748 = vmatmul.mubr.bf16.gmra.mrb[16].mxu0 %v8673_v58  ;;  %v9281_v58 = vld [vmem:[#allocation15_spill] sm:$0xff]  ;;  %v4165_v48 = vor.u32 %v4164_v5, %v8804_v59  ;;  %v2393_v23 = vor.u32 %v2392_v56, %v2389_v2  ;;  %v4649_v47 = vrot.slane %v4647_v4, 4  ;;  %v4142_v14 = vrot.slane %v4141_v34, 4  ;;  %v8856_v13 = vld [vmem:[%s7396_s16 + $0xd4] sm:$0x1]  ;;  %v9282_v2 = vld [vmem:[#allocation10_spill] sm:$0xff] }
 0x116   : > { %6540 = vmatmul.mubr.bf16.vlgmr.msra.gmra.mrb[0].mxu1 %v7209_v40  ;;  %6751 = vmatprep.mubr.bf16.mxu0 %v8675_v35  ;;  %v5984_v35 = vcombine.low %v8826_v29, %v8835_v44  ;;  %v4132_v40 = vrot.slane %v4131_v62, 4  ;;  %v4170_v18 = vrot.slane %v4168_v19, 5  ;;  %v8848_v32 = vsel %vm7674_vm5, %v5953_v7, %v4647_v4  ;;  %v7214_v19 = vld [vmem:[%s7396_s16 + $0x3c] sm:$0xff]   ;;  %v7270_v1 = vld [vmem:[%s9217_s1 + $0x110] sm:$0xff]  }
 0x117   : > { %6819 = vmatpush3.bf16.msra.mxu1 %v9281_v58  ;;  %6543 = vmatprep.mubr.bf16.mxu1 %v7211_v39  ;;  %v4175_v28 = vrot.slane %v4173_v46, 4  ;;  %v4178_v33 = vrot.slane %v4176_v52, 5  ;;  %v2394_v39 = vrot.slane %v2393_v23, 4  ;;  %v8852_v5 = vsel %vm7674_vm5, %v4649_v47, %v4650_v55  ;;  %v7271_v47 = vld [vmem:[%s7396_s16 + $0x1c] sm:$0xf] }
 0x118   : > { %6812 = vmatprep.subr.bf16.mxu1 %v7269_v6  ;;  %v8858_v53 = vrot.slane %v4182_v50, 5  ;;  %v4188_v30 = vrot.slane %v4186_v0, 4  ;;  %v5985_v62 = vcombine.low %v8848_v32, %v8852_v5  ;;  %v5954_v34 = vrot.slane %v5938_v12, 9 }
 0x119   : > { %v4156_v7 = vrot.slane %v4155_v60, 4  ;;  %v4166_v46 = vrot.slane %v4165_v48, 4  ;;  %v2399_v52 = vsel %vm7428_vm2, %v2394_v39, %v8004_v11  ;;  %v4654_v56 = vrot.slane %v9282_v2, 5  ;;  %v9283_v11 = vld [vmem:[#allocation14_spill] sm:$0xff]  ;;  %v7215_v39 = vld [vmem:[%s7396_s16 + $0x48] sm:$0xff]  }
 0x11a   : > { %v4137_v4 = vsel %vm7428_vm2, %v4132_v40, %v8704_v49  ;;  %v4147_v60 = vsel %vm7428_vm2, %v4142_v14, %v8793_v57  ;;  %v8876_v50 = vcombine.low %v2399_v52, %v2409_v16  ;;  %v4657_v0 = vrot.slane %v9283_v11, 5  ;;  %v5928_v57 = vld [vmem:[%s7396_s16 + $0x18] sm:$0xe]  ;;  %v5939_v16 = vld [vmem:[%s7396_s16 + $0x9c] sm:$0xe] }
 0x11b   : > { %6820 = vmatpush3.bf16.msra.mxu1 %v7269_v6  ;;  %v4179_v24 = vor.u32 %v4178_v33, %v4175_v28  ;;  %v4192_v55 = vshll.u32 %v8856_v13, 16  ;;  %v8883_v58 = vsel %vm7674_vm5, %v5954_v34, %v4654_v56  ;;  %v4656_v48 = vrot.slane %v4654_v56, 4  ;;  %v7272_v40 = vld [vmem:[%s9217_s1 + $0x118] sm:$0xff]   ;;  %v7273_v2 = vld [vmem:[%s7396_s16 + $0x20] sm:$0x1] }
 0x11c   : > { %6813 = vmatprep.subr.bf16.mxu1 %v7270_v1  ;;  %v4189_v49 = vor.u32 %v4188_v30, %v8858_v53  ;;  %v4171_v23 = vsel %vm7428_vm2, %v4166_v46, %v4170_v18  ;;  %v4584_v12 = vrot.slane %v7271_v47, 5  ;;  %v5917_v6 = vcombine.low %v4137_v4, %v4147_v60  ;;  %v9284_v34 = vld [vmem:[#allocation13_spill] sm:$0xff]  ;;  %v5940_v11 = vld [vmem:[%s7396_s16 + $0xa8] sm:$0xe] }
 0x11d   : > { %6752 = vmatmul.mubr.bf16.gmra.mrb[20].mxu0 %v8781_v36  ;;  %v4161_v36 = vsel %vm7428_vm2, %v4156_v7, %v8804_v59  ;;  %v4180_v14 = vrot.slane %v4179_v24, 4  ;;  %v4194_v28 = vrot.slane %v4192_v55, 5  ;;  %v5944_v18 = vrot.slane %v5928_v57, 9  ;;  %v7217_v46 = vld [vmem:[%s7396_s16 + $0x54] sm:$0xff]   ;;  %v5929_v55 = vld [vmem:[%s7396_s16 + $0x24] sm:$0xe] }
 0x11e   : > { %6544 = vmatmul.mubr.bf16.gmra.mrb[4].mxu1 %v7212_v3  ;;  %6755 = vmatprep.mubr.bf16.mxu0 %v8791_v22  ;;  %v8897_v22 = vsel %vm7674_vm5, %v4656_v48, %v4657_v0  ;;  %v5955_v33 = vrot.slane %v5939_v16, 9  ;;  %v5918_v3 = vcombine.low %v4161_v36, %v4171_v23  ;;  %v4190_v30 = vrot.slane %v4189_v49, 4  ;;  %v7275_v48 = vld [vmem:[%s7396_s16 + $0x28] sm:$0xf]  ;;  %v7276_v36 = vld [vmem:[%s7396_s16 + $0x34] sm:$0xf] }
 0x11f   : > { %6547 = vmatprep.mubr.bf16.mxu1 %v7214_v19  ;;  %6821 = vmatpush3.bf16.msra.mxu1 %v7270_v1  ;;  %v5986_v59 = vcombine.low %v8883_v58, %v8897_v22  ;;  %v4661_v19 = vrot.slane %v9284_v34, 5  ;;  %v4664_v7 = vrot.slane %v8586_v25, 5  ;;  %v4586_v52 = vrot.slane %v4584_v12, 4  ;;  %v7274_v1 = vld [vmem:[%s9217_s1 + $0x120] sm:$0xff]  }
 0x120   : > { %6814 = vmatprep.subr.bf16.mxu1 %v7272_v40  ;;  %v4587_v56 = vrot.slane %v7273_v2, 5  ;;  %v4585_v25 = vsel %vm7674_vm5, %v5944_v18, %v4584_v12  ;;  %v4185_v0 = vsel %vm7428_vm2, %v4180_v14, %v8858_v53  ;;  %v4195_v24 = vsel %vm7428_vm2, %v4190_v30, %v4194_v28  ;;  %v5930_v12 = vld [vmem:[%s7396_s16 + $0x30] sm:$0xe]  ;;  %v7218_v30 = vld [vmem:[%s7396_s16 + $0x60] sm:$0xff]  }
 0x121   : > { %v8914_v4 = vsel %vm7674_vm5, %v5955_v33, %v4661_v19  ;;  %v4663_v60 = vrot.slane %v4661_v19, 4  ;;  %v4591_v49 = vrot.slane %v7275_v48, 5  ;;  %v4598_v23 = vrot.slane %v7276_v36, 5  ;;  %v7278_v33 = vld [vmem:[%s7396_s16 + $0x2c] sm:$0x1] }
 0x122   : > { %v4588_v16 = vsel %vm7674_vm5, %v4586_v52, %v4587_v56  ;;  %v5956_v47 = vrot.slane %v5940_v11, 9  ;;  %v5919_v28 = vcombine.low %v4185_v0, %v4195_v24  ;;  %v5945_v18 = vrot.slane %v5929_v55, 9  ;;  %v7220_v52 = vld [vmem:[%s7396_s16 + $0x6c] sm:$0xff]   ;;  %v5941_v11 = vld [vmem:[%s7396_s16 + $0xb4] sm:$0xe] }
 0x123   : > { %6822 = vmatpush3.bf16.msra.mxu1 %v7272_v40  ;;  %v8928_v57 = vsel %vm7674_vm5, %v4663_v60, %v4664_v7  ;;  %v9285_v40 = vld [vmem:[#allocation16_spill] sm:$0xff]  ;;  %v5976_v34 = vcombine.low %v4585_v25, %v4588_v16  ;;  %v4593_v19 = vrot.slane %v4591_v49, 4  ;;  %v5946_v2 = vrot.slane %v5930_v12, 9  ;;  %v5931_v0 = vld [vmem:[%s7396_s16 + $0x3c] sm:$0xe] }
 0x124   : > { %6815 = vmatprep.subr.bf16.mxu1 %v7274_v1  ;;  %v5987_v53 = vcombine.low %v8914_v4, %v8928_v57  ;;  %v4668_v14 = vrot.slane %v9285_v40, 5  ;;  %v4600_v56 = vrot.slane %v4598_v23, 4  ;;  %v7280_v24 = vld [vmem:[%s7396_s16 + $0x40] sm:$0xf]  ;;  %v4592_v48 = vsel %vm7674_vm5, %v5945_v18, %v4591_v49  ;;  %v7282_v18 = vld [vmem:[%s7396_s16 + $0x44] sm:$0x1] }
 0x125   : > { %6756 = vmatmul.mubr.bf16.gmra.mrb[24].mxu0 %v5917_v6  ;;  %v7277_v6 = vld [vmem:[%s9217_s1 + $0x128] sm:$0xff]   ;;  %v4605_v55 = vrot.slane %v7280_v24, 5  ;;  %v4675_v12 = vrot.slane %v8633_v10, 5  ;;  %v4599_v49 = vsel %vm7674_vm5, %v5946_v2, %v4598_v23  ;;  %v7283_v10 = vld [vmem:[%s9217_s1 + $0x138] sm:$0xff]   ;;  %v5942_v23 = vld [vmem:[%s7396_s16 + $0xc0] sm:$0xe] }
 0x126   : > { %6548 = vmatmul.mubr.bf16.gmra.mrb[8].mxu1 %v7215_v39  ;;  %6759 = vmatprep.mubr.bf16.mxu0 %v5918_v3  ;;  %v4594_v39 = vrot.slane %v7278_v33, 5  ;;  %v4671_v3 = vrot.slane %v8621_v21, 5  ;;  %v8945_v7 = vsel %vm7674_vm5, %v5956_v47, %v4668_v14  ;;  %v7281_v21 = vld [vmem:[%s9217_s1 + $0x130] sm:$0xff]   ;;  %v5957_v47 = vrot.slane %v5941_v11, 9 }
 0x127   : > { %6551 = vmatprep.mubr.bf16.mxu1 %v7217_v46  ;;  %6823 = vmatpush3.bf16.msra.mxu1 %v7274_v1  ;;  %v4670_v46 = vrot.slane %v4668_v14, 4  ;;  %v7279_v1 = vld [vmem:[%s7396_s16 + $0x38] sm:$0x1]  ;;  %v5947_v14 = vrot.slane %v5931_v0, 9  ;;  %v4608_v33 = vrot.slane %v7282_v18, 5  ;;  %v4682_v11 = vrot.slane %v8715_v51, 5 }
 0x128   : > { %6816 = vmatprep.subr.bf16.mxu1 %v7277_v6  ;;  %v4601_v60 = vrot.slane %v7279_v1, 5  ;;  %v4595_v36 = vsel %vm7674_vm5, %v4593_v19, %v4594_v39  ;;  %v4677_v39 = vrot.slane %v4675_v12, 4  ;;  %v5632_v19 = vld [vmem:[%s7396_s16 + $0x6c] sm:$0xf]  ;;  %v7223_v18 = vld [vmem:[%s7396_s16 + $0x90] sm:$0xff]   ;;  %v2430_v20 = vshll.u32 %v7289_v63, 16 }
 0x129   : > { %v8957_v25 = vsel %vm7674_vm5, %v4670_v46, %v4671_v3  ;;  %v5977_v3 = vcombine.low %v4592_v48, %v4595_v36  ;;  %v4606_v1 = vsel %vm7674_vm5, %v5947_v14, %v4605_v55  ;;  %v2363_v0 = vshrl.u32 %v5632_v19, 16  ;;  %v5943_v51 = vld [vmem:[%s7396_s16 + $0xcc] sm:$0xe] }
 0x12a   : > { %v5988_v16 = vcombine.low %v8945_v7, %v8957_v25  ;;  %v4602_v40 = vsel %vm7674_vm5, %v4600_v56, %v4601_v60  ;;  %v5958_v56 = vrot.slane %v5942_v23, 9  ;;  %v2366_v24 = vshll.u32 %v5632_v19, 16 }
 0x12b   : > { %6824 = vmatpush3.bf16.msra.mxu1 %v7277_v6  ;;  %v4678_v6 = vrot.slane %v8654_v27, 5  ;;  %v8977_v27 = vsel %vm7674_vm5, %v5957_v47, %v4675_v12  ;;  %v4685_v36 = vrot.slane %v8766_v26, 5  ;;  %v4684_v12 = vrot.slane %v4682_v11, 4 }
 0x12c   : > { %6817 = vmatprep.subr.bf16.mxu1 %v7281_v21  ;;  %v2368_v26 = vrot.slane %v2366_v24, 5  ;;  %v4692_v23 = vrot.slane %v8856_v13, 5 }
 0x12d   : > { %6760 = vmatmul.mubr.bf16.gmra.mrb[28].mxu0 %v5919_v28  ;;  %v4607_v28 = vrot.slane %v4605_v55, 4  ;;  %v8984_v46 = vsel %vm7674_vm5, %v4677_v39, %v4678_v6  ;;  %v8998_v55 = vsel %vm7674_vm5, %v5958_v56, %v4682_v11  ;;  %v4689_v39 = vrot.slane %v8818_v31, 5  ;;  %v7285_v56 = vld [vmem:[%s7396_s16 + $0x74] sm:$0x1] }
 0x12e   : > { %6552 = vmatmul.mubr.bf16.gmra.mrb[12].mxu1 %v7218_v30  ;;  %6779 = vmatprep.mubr.bf16.mxu0 %v5976_v34  ;;  %v7221_v30 = vld [vmem:[%s7396_s16 + $0x78] sm:$0xff]   ;;  %v5978_v34 = vcombine.low %v4599_v49, %v4602_v40  ;;  %v5989_v2 = vcombine.low %v8977_v27, %v8984_v46  ;;  %v9003_v49 = vsel %vm7674_vm5, %v4684_v12, %v4685_v36  ;;  %v2365_v40 = vrot.slane %v2363_v0, 4  ;;  %v7286_v0 = vld [vmem:[%s7396_s16 + $0x88] sm:$0xf] }
 0x12f   : > { %6555 = vmatprep.mubr.bf16.mxu1 %v7220_v52  ;;  %6825 = vmatpush3.bf16.msra.mxu1 %v7281_v21  ;;  %v7222_v52 = vld [vmem:[%s7396_s16 + $0x84] sm:$0xff]   ;;  %v4609_v60 = vsel %vm7674_vm5, %v4607_v28, %v4608_v33  ;;  %v7284_v21 = vld [vmem:[%s7396_s16 + $0x70] sm:$0xf]  ;;  %v5990_v28 = vcombine.low %v8998_v55, %v9003_v49  ;;  %v4691_v19 = vrot.slane %v4689_v39, 4  ;;  %v2420_v24 = vshll.u32 %v7286_v0, 16 }
 0x130   : > { %6818 = vmatprep.subr.bf16.mxu1 %v7283_v10  ;;  %v2372_v48 = vshll.u32 %v7284_v21, 16  ;;  %v2376_v47 = vshrl.u32 %v7284_v21, 16  ;;  %v5979_v6 = vcombine.low %v4606_v1, %v4609_v60  ;;  %v2382_v1 = vshll.u32 %v7285_v56, 16 }
 0x131   : > { %v9025_v11 = vsel %vm7674_vm5, %v4691_v19, %v4692_v23  ;;  %v2424_v21 = vshrl.u32 %v7286_v0, 16  ;;  %v7288_v19 = vld [vmem:[%s7396_s16 + $0xa0] sm:$0xf] }
 0x132   : > { %v9005_v14 = vrot.slane %v2372_v48, 5  ;;  %v2378_v33 = vrot.slane %v2376_v47, 4  ;;  %v2472_v56 = vshrl.u32 %v7288_v19, 16 }
 0x133   : > { %6826 = vmatpush3.bf16.msra.mxu1 %v7283_v10  ;;  %v5959_v10 = vrot.slane %v5943_v51, 9 }
 0x134   : > { %v2379_v31 = vor.u32 %v2378_v33, %v9005_v14  ;;  %v2438_v33 = vshll.u32 %v5641_v61, 16 }
 0x135   : > { %6780 = vmatmul.mubr.bf16.vlgmr.msra.gmra.mrb[0].mxu0 %v5977_v3  ;;  %v7224_v3 = vld [vmem:[%s7396_s16 + $0x9c] sm:$0xff]  }
 0x136   : > { %6556 = vmatmul.mubr.bf16.gmra.mrb[16].mxu1 %v7221_v30  ;;  %6783 = vmatprep.mubr.bf16.mxu0 %v5978_v34  ;;  %v5638_v30 = vld [vmem:[%s7396_s16 + $0x84] sm:$0xf]  ;;  %v9016_v34 = vsel %vm7674_vm5, %v5959_v10, %v4689_v39  ;;  %v2380_v47 = vrot.slane %v2379_v31, 4  ;;  %v7287_v10 = vld [vmem:[%s7396_s16 + $0x94] sm:$0xf]  ;;  %v2440_v0 = vrot.slane %v2438_v33, 5 }
 0x137   : > { %6559 = vmatprep.mubr.bf16.mxu1 %v7222_v52  ;;  %v2369_v52 = vor.u32 %v2368_v26, %v2365_v40  ;;  %v2411_v13 = vshrl.u32 %v5638_v30, 16  ;;  %v2414_v60 = vshll.u32 %v5638_v30, 16  ;;  %v5991_v48 = vcombine.low %v9016_v34, %v9025_v11 }
 0x138   : > { %v9034_v40 = vrot.slane %v2420_v24, 5  ;;  %v2426_v26 = vrot.slane %v2424_v21, 4  ;;  %v2444_v39 = vshll.u32 %v7287_v10, 16  ;;  %v2448_v23 = vshrl.u32 %v7287_v10, 16  ;;  %v7291_v10 = vld [vmem:[%s7396_s16 + $0xa4] sm:$0x1] }
 0x139   : > { %v2370_v36 = vrot.slane %v2369_v52, 4  ;;  %v2413_v12 = vrot.slane %v2411_v13, 4  ;;  %v2416_v51 = vrot.slane %v2414_v60, 5  ;;  %v2468_v52 = vshll.u32 %v7288_v19, 16  ;;  %v7292_v19 = vld [vmem:[%s7396_s16 + $0xac] sm:$0xf] }
 0x13a   : > { %v2427_v13 = vor.u32 %v2426_v26, %v9034_v40  ;;  %v9051_v41 = vrot.slane %v2444_v39, 5  ;;  %v2450_v42 = vrot.slane %v2448_v23, 4  ;;  %v2474_v21 = vrot.slane %v2472_v56, 4  ;;  %v5650_v23 = vld [vmem:[%s7396_s16 + $0xb4] sm:$0xf] }
 0x13b   : > { %v2478_v39 = vshll.u32 %v7291_v10, 16  ;;  %v2496_v15 = vshrl.u32 %v7292_v19, 16  ;;  %v2510_v63 = vshll.u32 %v5650_v23, 16 }
 0x13c   : > { %v2451_v26 = vor.u32 %v2450_v42, %v9051_v41 }
 0x13d   : > { %6784 = vmatmul.mubr.bf16.gmra.mrb[4].mxu0 %v5979_v6  ;;  %v5644_v6 = vld [vmem:[%s7396_s16 + $0x9c] sm:$0xf] }
 0x13e   : > { %6560 = vmatmul.mubr.bf16.gmra.mrb[20].mxu1 %v7223_v18  ;;  %6787 = vmatprep.mubr.bf16.mxu0 %v5980_v8  ;;  %v2384_v8 = vrot.slane %v2382_v1, 5  ;;  %v2435_v18 = vshrl.u32 %v5641_v61, 16  ;;  %v2462_v30 = vshll.u32 %v5644_v6, 16  ;;  %v2375_v1 = vsel %vm7428_vm2, %v2370_v36, %v9005_v14  ;;  %v7227_v61 = vld [vmem:[%s7396_s16 + $0xc0] sm:$0xff]  }
 0x13f   : > { %6563 = vmatprep.mubr.bf16.mxu1 %v7224_v3  ;;  %v2459_v3 = vshrl.u32 %v5644_v6, 16  ;;  %v9053_v14 = vrot.slane %v2468_v52, 5  ;;  %v2492_v52 = vshll.u32 %v7292_v19, 16 }
 0x140   : > { %v2385_v31 = vsel %vm7428_vm2, %v2380_v47, %v2384_v8  ;;  %v2437_v60 = vrot.slane %v2435_v18, 4  ;;  %v2464_v24 = vrot.slane %v2462_v30, 5  ;;  %v2432_v8 = vrot.slane %v2430_v20, 5  ;;  %v7293_v20 = vld [vmem:[%s7396_s16 + $0xb8] sm:$0xf] }
 0x141   : > { %v2428_v47 = vrot.slane %v2427_v13, 4  ;;  %v2475_v33 = vor.u32 %v2474_v21, %v9053_v14  ;;  %v2516_v29 = vshll.u32 %v7293_v20, 16  ;;  %v2520_v44 = vshrl.u32 %v7293_v20, 16 }
 0x143   : > { %v2476_v13 = vrot.slane %v2475_v33, 4 }
 0x145   : > { %6788 = vmatmul.mubr.bf16.gmra.mrb[8].mxu0 %v5981_v54  ;;  %v2417_v54 = vor.u32 %v2416_v51, %v2413_v12  ;;  %v2441_v12 = vor.u32 %v2440_v0, %v2437_v60  ;;  %v7290_v51 = vld [vmem:[%s7396_s16 + $0x98] sm:$0x1]  ;;  %v2480_v60 = vrot.slane %v2478_v39, 5 }
 0x146   : > { %6564 = vmatmul.mubr.bf16.gmra.mrb[24].mxu1 %v7225_v45  ;;  %6791 = vmatprep.mubr.bf16.mxu0 %v5982_v17  ;;  %v2461_v17 = vrot.slane %v2459_v3, 4  ;;  %v5680_v45 = vcombine.low %v2375_v1, %v2385_v31  ;;  %v2454_v6 = vshll.u32 %v7290_v51, 16  ;;  %v2507_v31 = vshrl.u32 %v5650_v23, 16 }
 0x147   : > { %6567 = vmatprep.mubr.bf16.mxu1 %v7226_v9  ;;  %v2418_v36 = vrot.slane %v2417_v54, 4  ;;  %v5647_v9 = vld [vmem:[%s7396_s16 + $0xa8] sm:$0xf]  ;;  %v2442_v56 = vrot.slane %v2441_v12, 4  ;;  %v2481_v32 = vsel %vm7428_vm2, %v2476_v13, %v2480_v60 }
 0x148   : > { %v2465_v18 = vor.u32 %v2464_v24, %v2461_v17  ;;  %v2483_v3 = vshrl.u32 %v5647_v9, 16  ;;  %v2486_v30 = vshll.u32 %v5647_v9, 16  ;;  %v2456_v1 = vrot.slane %v2454_v6, 5 }
 0x149   : > { %v2423_v43 = vsel %vm7428_vm2, %v2418_v36, %v9034_v40  ;;  %v2494_v17 = vrot.slane %v2492_v52, 5  ;;  %v2498_v24 = vrot.slane %v2496_v15, 4  ;;  %v2509_v21 = vrot.slane %v2507_v31, 4  ;;  %v5653_v36 = vld [vmem:[%s7396_s16 + $0xc0] sm:$0xf] }
 0x14a   : > { %v2466_v54 = vrot.slane %v2465_v18, 4  ;;  %v2485_v0 = vrot.slane %v2483_v3, 4  ;;  %v2488_v42 = vrot.slane %v2486_v30, 5  ;;  %v2531_v9 = vshrl.u32 %v5653_v36, 16  ;;  %v7295_v18 = vld [vmem:[%s7396_s16 + $0xc4] sm:$0xf] }
 0x14b   : > { %v2540_v33 = vshll.u32 %v7295_v18, 16 }
 0x14c   : > { %v2471_v51 = vsel %vm7428_vm2, %v2466_v54, %v9053_v14  ;;  %v2489_v5 = vor.u32 %v2488_v42, %v2485_v0  ;;  %v2544_v14 = vshrl.u32 %v7295_v18, 16  ;;  %v2533_v19 = vrot.slane %v2531_v9, 4 }
 0x14d   : > { %6792 = vmatmul.mubr.bf16.gmra.mrb[12].mxu0 %v5983_v38  ;;  %v2433_v38 = vsel %vm7428_vm2, %v2428_v47, %v2432_v8  ;;  %v2522_v8 = vrot.slane %v2520_v44, 4  ;;  %v2447_v47 = vsel %vm7428_vm2, %v2442_v56, %v9051_v41  ;;  %v7294_v41 = vld [vmem:[%s7396_s16 + $0xb0] sm:$0x1]  ;;  %v5684_v58 = vcombine.low %v2471_v51, %v2481_v32  ;;  %v7297_v44 = vld [vmem:[%s7396_s16 + $0xc8] sm:$0x1] }
 0x14e   : > { %6568 = vmatmul.mubr.bf16.gmra.mrb[28].mxu1 %v7227_v61  ;;  %6795 = vmatprep.mubr.bf16.mxu0 %v5984_v35  ;;  %v2452_v35 = vrot.slane %v2451_v26, 4  ;;  %v5682_v40 = vcombine.low %v2423_v43, %v2433_v38  ;;  %v2512_v61 = vrot.slane %v2510_v63, 5  ;;  %v2502_v6 = vshll.u32 %v7294_v41, 16 }
 0x14f   : > { %6603 = vmatprep.mubr.bf16.mxu1 %v5680_v45  ;;  %v2518_v45 = vrot.slane %v2516_v29, 5  ;;  %v2534_v26 = vshll.u32 %v5653_v36, 16  ;;  %v2490_v22 = vrot.slane %v2489_v5, 4  ;;  %v2542_v15 = vrot.slane %v2540_v33, 5 }
 0x150   : > { %v2457_v12 = vsel %vm7428_vm2, %v2452_v35, %v2456_v1  ;;  %v2513_v10 = vor.u32 %v2512_v61, %v2509_v21  ;;  %v2504_v30 = vrot.slane %v2502_v6, 5  ;;  %v2546_v43 = vrot.slane %v2544_v14, 4 }
 0x151   : > { %v2523_v39 = vor.u32 %v2522_v8, %v2518_v45  ;;  %v5683_v3 = vcombine.low %v2447_v47, %v2457_v12  ;;  %v2536_v52 = vrot.slane %v2534_v26, 5  ;;  %v2495_v31 = vsel %vm7428_vm2, %v2490_v22, %v2494_v17  ;;  %v9143_v8 = vld [vmem:[%s9218_s2] ss:$0 sm:$0xff] }
 0x152   : > { %v2514_v38 = vrot.slane %v2513_v10, 4  ;;  %v2547_v29 = vor.u32 %v2546_v43, %v2542_v15  ;;  %v2550_v35 = vshll.u32 %v7297_v44, 16 }
 0x153   : > { %v2524_v56 = vrot.slane %v2523_v39, 4  ;;  %v2537_v20 = vor.u32 %v2536_v52, %v2533_v19 }
 0x154   : > { %v2519_v4 = vsel %vm7428_vm2, %v2514_v38, %v2518_v45  ;;  %v2552_v54 = vrot.slane %v2550_v35, 5 }
 0x155   : > { %6796 = vmatmul.mubr.bf16.gmra.mrb[16].mxu0 %v5985_v62  ;;  %v2499_v62 = vor.u32 %v2498_v24, %v2494_v17  ;;  %v2538_v25 = vrot.slane %v2537_v20, 4 }
 0x156   : > { %6604 = vmatmul.mubr.bf16.vlgmr.msra.gmra.mrb[16].mxu1 %v8876_v50  ;;  %6799 = vmatprep.mubr.bf16.mxu0 %v5986_v59  ;;  %v7296_v50 = vld [vmem:[%s7396_s16 + $0xbc] sm:$0x1] }
 0x157   : > { %6607 = vmatprep.mubr.bf16.mxu1 %v5682_v40  ;;  %v2526_v23 = vshll.u32 %v7296_v50, 16  ;;  %v2500_v59 = vrot.slane %v2499_v62, 4  ;;  %v2543_v13 = vsel %vm7428_vm2, %v2538_v25, %v2542_v15 }
 0x159   : > { %v2528_v1 = vrot.slane %v2526_v23, 5  ;;  %v2505_v63 = vsel %vm7428_vm2, %v2500_v59, %v2504_v30 }
 0x15b   : > { %v2529_v57 = vsel %vm7428_vm2, %v2524_v56, %v2528_v1 }
 0x15c   : > { %v5686_v7 = vcombine.low %v2519_v4, %v2529_v57 }
 0x15d   : > { %6800 = vmatmul.mubr.bf16.gmra.mrb[20].mxu0 %v5987_v53  ;;  %v5685_v53 = vcombine.low %v2495_v31, %v2505_v63 }
 0x15e   : > { %6608 = vmatmul.mubr.bf16.gmra.mrb[20].mxu1 %v5683_v3  ;;  %6803 = vmatprep.mubr.bf16.mxu0 %v5988_v16  ;;  %v2548_v16 = vrot.slane %v2547_v29, 4 }
 0x15f   : > { %6611 = vmatprep.mubr.bf16.mxu1 %v5684_v58 }
 0x160   : > { %v2553_v60 = vsel %vm7428_vm2, %v2548_v16, %v2552_v54 }
 0x161   : > { %v5687_v0 = vcombine.low %v2543_v13, %v2553_v60 }
 0x165   : > { %6804 = vmatmul.mubr.bf16.gmra.mrb[24].mxu0 %v5989_v2 }
 0x166   : > { %6612 = vmatmul.mubr.bf16.gmra.mrb[24].mxu1 %v5685_v53  ;;  %6807 = vmatprep.mubr.bf16.mxu0 %v5990_v28 }
 0x167   : > { %6615 = vmatprep.mubr.bf16.mxu1 %v5686_v7 }
 0x16d   : > { %6808 = vmatmul.mubr.bf16.gmra.mrb[28].mxu0 %v5991_v48 }
 0x16e   : > { %6616 = vmatmul.mubr.bf16.gmra.mrb[28].mxu1 %v5687_v0 }
 0x1e9   : > { %v6541_v27 = vpop.f32.mrb[0].mxu1 }
 0x1ea   : > { %v1963_v46 = vpop.f32.mrb[1].mxu1 }
 0x1eb   : > { %v6542_v2 = vpop.f32.mrb[2].mxu1 }
 0x1ec   : > { %v1966_v42 = vpop.f32.mrb[3].mxu1 }
 0x1f1   : > { %v6545_v17 = vpop.f32.mrb[4].mxu1 }
 0x1f2   : > { %v1979_v55 = vpop.f32.mrb[5].mxu1 }
 0x1f3   : > { %v6546_v49 = vpop.f32.mrb[6].mxu1 }
 0x1f4   : > { %v1982_v28 = vpop.f32.mrb[7].mxu1 }
 0x1f9   : > { %v9124_v24 = vpop.f32.mrb[8].mxu1 }
 0x1fa   : > { %v9126_v40 = vpop.f32.mrb[9].mxu1 }
 0x1fb   : > { %v9128_v37 = vpop.f32.mrb[10].mxu1 }
 0x1fc   : > { %v9130_v21 = vpop.f32.mrb[11].mxu1 }
 0x201   : > { %v9132_v61 = vpop.f32.mrb[12].mxu1 }
 0x202   : > { %v9134_v34 = vpop.f32.mrb[13].mxu1 }
 0x203   : > { %v9136_v11 = vpop.f32.mrb[14].mxu1 }
 0x204   : > { %v9138_v48 = vpop.f32.mrb[15].mxu1 }
 0x208   : > { %v6781_v45 = vpop.f32.mrb[0].mxu0 }
 0x209   : > { %v6827_v36 = vadd.f32 %v6781_v45, %v6541_v27  ;;  %v4857_v47 = vpop.f32.mrb[1].mxu0 }
 0x20a   : > { %v6828_v12 = vadd.f32 %v4857_v47, %v1963_v46  ;;  %v6782_v51 = vpop.f32.mrb[2].mxu0 }
 0x20b   : > { %v5025_v32 = vadd.f32 %v6827_v36, %v9143_v8  ;;  %v6829_v5 = vadd.f32 %v6782_v51, %v6542_v2  ;;  %v4860_v62 = vpop.f32.mrb[3].mxu0 }
 0x20c   : > { %v5023_v41 = vadd.f32 %v6828_v12, %v9143_v8  ;;  %v6830_v6 = vadd.f32 %v4860_v62, %v1966_v42 }
 0x20d   : > { %v5089_v9 = vmul.f32 0.2, %v5025_v32  ;;  %v5026_v26 = vadd.f32 %v6829_v5, %v9143_v8  ;;  %vm5057_vm6 = vcmp.ge.f32.partialorder %v5025_v32, 0.0 }
 0x20e   : > { %v5087_v18 = vmul.f32 0.2, %v5023_v41  ;;  %v5024_v33 = vadd.f32 %v6830_v6, %v9143_v8  ;;  %vm5055_vm7 = vcmp.ge.f32.partialorder %v5023_v41, 0.0 }
 0x20f   : > { %vm5058_vm8 = vcmp.ge.f32.partialorder %v5026_v26, 0.0  ;;  %v5090_v14 = vmul.f32 0.2, %v5026_v26  ;;  %v5121_v50 = vsel %vm5057_vm6, %v5025_v32, %v5089_v9 }
 0x210   : > { %vm5056_vm9 = vcmp.ge.f32.partialorder %v5024_v33, 0.0  ;;  %v5088_v10 = vmul.f32 0.2, %v5024_v33  ;;  %v6785_v39 = vpop.f32.mrb[4].mxu0  ;;  %v5119_v22 = vsel %vm5055_vm7, %v5023_v41, %v5087_v18 }
 0x211   : > { %v5122_v23 = vsel %vm5058_vm8, %v5026_v26, %v5090_v14  ;;  %v6831_v3 = vadd.f32 %v6785_v39, %v6545_v17  ;;  %v4873_v58 = vpop.f32.mrb[5].mxu0 }
 0x212   : > { %v6076_v59 = vpack.c.bf16 %v5122_v23, %v5121_v50  ;;  %v5120_v30 = vsel %vm5056_vm9, %v5024_v33, %v5088_v10  ;;  %v6832_v19 = vadd.f32 %v4873_v58, %v1979_v55  ;;  %v6786_v52 = vpop.f32.mrb[6].mxu0 }
 0x213   : > { %v6071_v15 = vpack.c.bf16 %v5120_v30, %v5119_v22  ;;  %v5029_v43 = vadd.f32 %v6831_v3, %v9143_v8  ;;  %v6833_v38 = vadd.f32 %v6786_v52, %v6546_v49  ;;  %v4876_v56 = vpop.f32.mrb[7].mxu0 }
 0x214   : > { %6148 = vst [vmem:[%s9153_s29 + $0x8] sm:$0xff] %v6076_v59   ;;  %v5027_v1 = vadd.f32 %v6832_v19, %v9143_v8  ;;  %v6834_v31 = vadd.f32 %v4876_v56, %v1982_v28 }
 0x215   : > { %6072 = vst [vmem:[%s9153_s29] sm:$0xff] %v6071_v15   ;;  %v5093_v63 = vmul.f32 0.2, %v5029_v43  ;;  %v5030_v20 = vadd.f32 %v6833_v38, %v9143_v8  ;;  %vm5061_vm10 = vcmp.ge.f32.partialorder %v5029_v43, 0.0 }
 0x216   : > { %v5091_v29 = vmul.f32 0.2, %v5027_v1  ;;  %v5028_v44 = vadd.f32 %v6834_v31, %v9143_v8  ;;  %vm5059_vm11 = vcmp.ge.f32.partialorder %v5027_v1, 0.0 }
 0x217   : > { %vm5062_vm12 = vcmp.ge.f32.partialorder %v5030_v20, 0.0  ;;  %v5094_v35 = vmul.f32 0.2, %v5030_v20  ;;  %v5125_v53 = vsel %vm5061_vm10, %v5029_v43, %v5093_v63 }
 0x218   : > { %vm5060_vm13 = vcmp.ge.f32.partialorder %v5028_v44, 0.0  ;;  %v5092_v4 = vmul.f32 0.2, %v5028_v44  ;;  %v6789_v57 = vpop.f32.mrb[8].mxu0  ;;  %v5123_v54 = vsel %vm5059_vm11, %v5027_v1, %v5091_v29 }
 0x219   : > { %v5126_v7 = vsel %vm5062_vm12, %v5030_v20, %v5094_v35  ;;  %v6835_v25 = vadd.f32 %v6789_v57, %v9124_v24  ;;  %v4889_v16 = vpop.f32.mrb[9].mxu0 }
 0x21a   : > { %v6086_v13 = vpack.c.bf16 %v5126_v7, %v5125_v53  ;;  %v5124_v60 = vsel %vm5060_vm13, %v5028_v44, %v5092_v4  ;;  %v6836_v0 = vadd.f32 %v4889_v16, %v9126_v40  ;;  %v6790_v27 = vpop.f32.mrb[10].mxu0 }
 0x21b   : > { %v6081_v46 = vpack.c.bf16 %v5124_v60, %v5123_v54  ;;  %v5033_v2 = vadd.f32 %v6835_v25, %v9143_v8  ;;  %v6837_v42 = vadd.f32 %v6790_v27, %v9128_v37  ;;  %v4892_v17 = vpop.f32.mrb[11].mxu0 }
 0x21c   : > { %6150 = vst [vmem:[%s9153_s29 + $0x18] sm:$0xff] %v6086_v13   ;;  %v5031_v55 = vadd.f32 %v6836_v0, %v9143_v8  ;;  %v6838_v49 = vadd.f32 %v4892_v17, %v9130_v21 }
 0x21d   : > { %6149 = vst [vmem:[%s9153_s29 + $0x10] sm:$0xff] %v6081_v46   ;;  %v5097_v28 = vmul.f32 0.2, %v5033_v2  ;;  %v5034_v24 = vadd.f32 %v6837_v42, %v9143_v8  ;;  %vm5065_vm14 = vcmp.ge.f32.partialorder %v5033_v2, 0.0 }
 0x21e   : > { %v5095_v45 = vmul.f32 0.2, %v5031_v55  ;;  %v5032_v40 = vadd.f32 %v6838_v49, %v9143_v8  ;;  %vm5063_vm15 = vcmp.ge.f32.partialorder %v5031_v55, 0.0 }
 0x21f   : > { %vm5066_vm0 = vcmp.ge.f32.partialorder %v5034_v24, 0.0  ;;  %v5098_v36 = vmul.f32 0.2, %v5034_v24  ;;  %v5129_v12 = vsel %vm5065_vm14, %v5033_v2, %v5097_v28 }
 0x220   : > { %vm5064_vm1 = vcmp.ge.f32.partialorder %v5032_v40, 0.0  ;;  %v5096_v37 = vmul.f32 0.2, %v5032_v40  ;;  %v6793_v47 = vpop.f32.mrb[12].mxu0  ;;  %v5127_v5 = vsel %vm5063_vm15, %v5031_v55, %v5095_v45 }
 0x221   : > { %v5130_v51 = vsel %vm5066_vm0, %v5034_v24, %v5098_v36  ;;  %v6839_v21 = vadd.f32 %v6793_v47, %v9132_v61  ;;  %v4905_v32 = vpop.f32.mrb[13].mxu0 }
 0x222   : > { %v6096_v62 = vpack.c.bf16 %v5130_v51, %v5129_v12  ;;  %v5128_v41 = vsel %vm5064_vm1, %v5032_v40, %v5096_v37  ;;  %v6840_v6 = vadd.f32 %v4905_v32, %v9134_v34  ;;  %v6794_v9 = vpop.f32.mrb[14].mxu0 }
 0x223   : > { %v6091_v26 = vpack.c.bf16 %v5128_v41, %v5127_v5  ;;  %v5037_v18 = vadd.f32 %v6839_v21, %v9143_v8  ;;  %v6841_v33 = vadd.f32 %v6794_v9, %v9136_v11  ;;  %v4908_v14 = vpop.f32.mrb[15].mxu0 }
 0x224   : > { %6152 = vst [vmem:[%s9153_s29 + $0x28] sm:$0xff] %v6096_v62   ;;  %v5035_v10 = vadd.f32 %v6840_v6, %v9143_v8  ;;  %v6842_v39 = vadd.f32 %v4908_v14, %v9138_v48 }
 0x225   : > { %6151 = vst [vmem:[%s9153_s29 + $0x20] sm:$0xff] %v6091_v26   ;;  %v5101_v61 = vmul.f32 0.2, %v5037_v18  ;;  %v5038_v50 = vadd.f32 %v6841_v33, %v9143_v8  ;;  %vm5069_vm2 = vcmp.ge.f32.partialorder %v5037_v18, 0.0 }
 0x226   : > { %v5099_v23 = vmul.f32 0.2, %v5035_v10  ;;  %v5036_v34 = vadd.f32 %v6842_v39, %v9143_v8  ;;  %vm5067_vm3 = vcmp.ge.f32.partialorder %v5035_v10, 0.0 }
 0x227   : > { %vm5070_vm4 = vcmp.ge.f32.partialorder %v5038_v50, 0.0  ;;  %v5102_v3 = vmul.f32 0.2, %v5038_v50  ;;  %v5133_v22 = vsel %vm5069_vm2, %v5037_v18, %v5101_v61 }
 0x228   : > { %vm5068_vm5 = vcmp.ge.f32.partialorder %v5036_v34, 0.0  ;;  %v5100_v58 = vmul.f32 0.2, %v5036_v34  ;;  %v6797_v11 = vpop.f32.mrb[16].mxu0  ;;  %v5131_v19 = vsel %vm5067_vm3, %v5035_v10, %v5099_v23 }
 0x229   : > { %v5134_v59 = vsel %vm5070_vm4, %v5038_v50, %v5102_v3  ;;  %v6605_v30 = vpop.f32.mrb[16].mxu1  ;;  %v4921_v48 = vpop.f32.mrb[17].mxu0 }
 0x22a   : > { %v6106_v52 = vpack.c.bf16 %v5134_v59, %v5133_v22  ;;  %v5132_v15 = vsel %vm5068_vm5, %v5036_v34, %v5100_v58  ;;  %v6843_v43 = vadd.f32 %v6797_v11, %v6605_v30  ;;  %v2781_v38 = vpop.f32.mrb[17].mxu1  ;;  %v6798_v56 = vpop.f32.mrb[18].mxu0 }
 0x22b   : > { %v6101_v1 = vpack.c.bf16 %v5132_v15, %v5131_v19  ;;  %v6844_v31 = vadd.f32 %v4921_v48, %v2781_v38  ;;  %v6606_v63 = vpop.f32.mrb[18].mxu1  ;;  %v4924_v20 = vpop.f32.mrb[19].mxu0 }
 0x22c   : > { %6154 = vst [vmem:[%s9153_s29 + $0x38] sm:$0xff] %v6106_v52   ;;  %v5041_v29 = vadd.f32 %v6843_v43, %v9143_v8  ;;  %v6845_v44 = vadd.f32 %v6798_v56, %v6606_v63  ;;  %v2784_v35 = vpop.f32.mrb[19].mxu1 }
 0x22d   : > { %6153 = vst [vmem:[%s9153_s29 + $0x30] sm:$0xff] %v6101_v1   ;;  %v5039_v4 = vadd.f32 %v6844_v31, %v9143_v8  ;;  %v6846_v57 = vadd.f32 %v4924_v20, %v2784_v35 }
 0x22e   : > { %v5105_v53 = vmul.f32 0.2, %v5041_v29  ;;  %v5042_v7 = vadd.f32 %v6845_v44, %v9143_v8  ;;  %vm5073_vm6 = vcmp.ge.f32.partialorder %v5041_v29, 0.0 }
 0x22f   : > { %v5103_v25 = vmul.f32 0.2, %v5039_v4  ;;  %v5040_v16 = vadd.f32 %v6846_v57, %v9143_v8  ;;  %vm5071_vm7 = vcmp.ge.f32.partialorder %v5039_v4, 0.0 }
 0x230   : > { %vm5074_vm8 = vcmp.ge.f32.partialorder %v5042_v7, 0.0  ;;  %v5106_v54 = vmul.f32 0.2, %v5042_v7  ;;  %v6801_v13 = vpop.f32.mrb[20].mxu0  ;;  %v5137_v46 = vsel %vm5073_vm6, %v5041_v29, %v5105_v53 }
 0x231   : > { %vm5072_vm9 = vcmp.ge.f32.partialorder %v5040_v16, 0.0  ;;  %v5104_v60 = vmul.f32 0.2, %v5040_v16  ;;  %v6609_v0 = vpop.f32.mrb[20].mxu1  ;;  %v4937_v27 = vpop.f32.mrb[21].mxu0  ;;  %v5135_v49 = vsel %vm5071_vm7, %v5039_v4, %v5103_v25 }
 0x232   : > { %v5138_v2 = vsel %vm5074_vm8, %v5042_v7, %v5106_v54  ;;  %v6847_v42 = vadd.f32 %v6801_v13, %v6609_v0  ;;  %v2797_v17 = vpop.f32.mrb[21].mxu1  ;;  %v6802_v55 = vpop.f32.mrb[22].mxu0 }
 0x233   : > { %v6116_v28 = vpack.c.bf16 %v5138_v2, %v5137_v46  ;;  %v5136_v24 = vsel %vm5072_vm9, %v5040_v16, %v5104_v60  ;;  %v6848_v45 = vadd.f32 %v4937_v27, %v2797_v17  ;;  %v6610_v40 = vpop.f32.mrb[22].mxu1  ;;  %v4940_v36 = vpop.f32.mrb[23].mxu0 }
 0x234   : > { %v6111_v37 = vpack.c.bf16 %v5136_v24, %v5135_v49  ;;  %v5045_v47 = vadd.f32 %v6847_v42, %v9143_v8  ;;  %v6849_v12 = vadd.f32 %v6802_v55, %v6610_v40  ;;  %v2800_v51 = vpop.f32.mrb[23].mxu1 }
 0x235   : > { %6156 = vst [vmem:[%s9153_s29 + $0x48] sm:$0xff] %v6116_v28   ;;  %v5043_v21 = vadd.f32 %v6848_v45, %v9143_v8  ;;  %v6850_v32 = vadd.f32 %v4940_v36, %v2800_v51 }
 0x236   : > { %6155 = vst [vmem:[%s9153_s29 + $0x40] sm:$0xff] %v6111_v37   ;;  %v5109_v5 = vmul.f32 0.2, %v5045_v47  ;;  %v5046_v62 = vadd.f32 %v6849_v12, %v9143_v8  ;;  %vm5077_vm10 = vcmp.ge.f32.partialorder %v5045_v47, 0.0 }
 0x237   : > { %v5107_v41 = vmul.f32 0.2, %v5043_v21  ;;  %v5044_v6 = vadd.f32 %v6850_v32, %v9143_v8  ;;  %vm5075_vm11 = vcmp.ge.f32.partialorder %v5043_v21, 0.0 }
 0x238   : > { %vm5078_vm12 = vcmp.ge.f32.partialorder %v5046_v62, 0.0  ;;  %v5110_v9 = vmul.f32 0.2, %v5046_v62  ;;  %v6805_v26 = vpop.f32.mrb[24].mxu0  ;;  %v5141_v10 = vsel %vm5077_vm10, %v5045_v47, %v5109_v5 }
 0x239   : > { %vm5076_vm13 = vcmp.ge.f32.partialorder %v5044_v6, 0.0  ;;  %v5108_v18 = vmul.f32 0.2, %v5044_v6  ;;  %v6613_v33 = vpop.f32.mrb[24].mxu1  ;;  %v4953_v14 = vpop.f32.mrb[25].mxu0  ;;  %v5139_v34 = vsel %vm5075_vm11, %v5043_v21, %v5107_v41 }
 0x23a   : > { %v5142_v39 = vsel %vm5078_vm12, %v5046_v62, %v5110_v9  ;;  %v6851_v61 = vadd.f32 %v6805_v26, %v6613_v33  ;;  %v2813_v50 = vpop.f32.mrb[25].mxu1  ;;  %v6806_v23 = vpop.f32.mrb[26].mxu0 }
 0x23b   : > { %v6126_v3 = vpack.c.bf16 %v5142_v39, %v5141_v10  ;;  %v5140_v58 = vsel %vm5076_vm13, %v5044_v6, %v5108_v18  ;;  %v6852_v11 = vadd.f32 %v4953_v14, %v2813_v50  ;;  %v6614_v22 = vpop.f32.mrb[26].mxu1  ;;  %v4956_v59 = vpop.f32.mrb[27].mxu0 }
 0x23c   : > { %v6121_v30 = vpack.c.bf16 %v5140_v58, %v5139_v34  ;;  %v5049_v48 = vadd.f32 %v6851_v61, %v9143_v8  ;;  %v6853_v19 = vadd.f32 %v6806_v23, %v6614_v22  ;;  %v2816_v52 = vpop.f32.mrb[27].mxu1 }
 0x23d   : > { %6158 = vst [vmem:[%s9153_s29 + $0x58] sm:$0xff] %v6126_v3   ;;  %v5047_v15 = vadd.f32 %v6852_v11, %v9143_v8  ;;  %v6854_v43 = vadd.f32 %v4956_v59, %v2816_v52 }
 0x23e   : > { %6157 = vst [vmem:[%s9153_s29 + $0x50] sm:$0xff] %v6121_v30   ;;  %v5113_v38 = vmul.f32 0.2, %v5049_v48  ;;  %v5050_v56 = vadd.f32 %v6853_v19, %v9143_v8  ;;  %vm5081_vm14 = vcmp.ge.f32.partialorder %v5049_v48, 0.0 }
 0x23f   : > { %v5111_v1 = vmul.f32 0.2, %v5047_v15  ;;  %v5048_v31 = vadd.f32 %v6854_v43, %v9143_v8  ;;  %vm5079_vm15 = vcmp.ge.f32.partialorder %v5047_v15, 0.0 }
 0x240   : > { %vm5082_vm0 = vcmp.ge.f32.partialorder %v5050_v56, 0.0  ;;  %v5114_v63 = vmul.f32 0.2, %v5050_v56  ;;  %v6809_v20 = vpop.f32.mrb[28].mxu0  ;;  %v5145_v4 = vsel %vm5081_vm14, %v5049_v48, %v5113_v38 }
 0x241   : > { %vm5080_vm1 = vcmp.ge.f32.partialorder %v5048_v31, 0.0  ;;  %v5112_v29 = vmul.f32 0.2, %v5048_v31  ;;  %v6617_v44 = vpop.f32.mrb[28].mxu1  ;;  %v4969_v35 = vpop.f32.mrb[29].mxu0  ;;  %v5143_v16 = vsel %vm5079_vm15, %v5047_v15, %v5111_v1 }
 0x242   : > { %v5146_v57 = vsel %vm5082_vm0, %v5050_v56, %v5114_v63  ;;  %v6855_v53 = vadd.f32 %v6809_v20, %v6617_v44  ;;  %v2829_v7 = vpop.f32.mrb[29].mxu1  ;;  %v6810_v25 = vpop.f32.mrb[30].mxu0 }
 0x243   : > { %v6136_v54 = vpack.c.bf16 %v5146_v57, %v5145_v4  ;;  %v5144_v13 = vsel %vm5080_vm1, %v5048_v31, %v5112_v29  ;;  %v6856_v60 = vadd.f32 %v4969_v35, %v2829_v7  ;;  %v6618_v0 = vpop.f32.mrb[30].mxu1  ;;  %v4972_v27 = vpop.f32.mrb[31].mxu0 }
 0x244   : > { %v6131_v46 = vpack.c.bf16 %v5144_v13, %v5143_v16  ;;  %v5053_v2 = vadd.f32 %v6855_v53, %v9143_v8  ;;  %v6857_v42 = vadd.f32 %v6810_v25, %v6618_v0  ;;  %v2832_v17 = vpop.f32.mrb[31].mxu1 }
 0x245   : > { %6160 = vst [vmem:[%s9153_s29 + $0x68] sm:$0xff] %v6136_v54   ;;  %v5051_v55 = vadd.f32 %v6856_v60, %v9143_v8  ;;  %v6858_v49 = vadd.f32 %v4972_v27, %v2832_v17 }
 0x246   : > { %6159 = vst [vmem:[%s9153_s29 + $0x60] sm:$0xff] %v6131_v46   ;;  %v5117_v28 = vmul.f32 0.2, %v5053_v2  ;;  %v5054_v24 = vadd.f32 %v6857_v42, %v9143_v8  ;;  %vm5085_vm2 = vcmp.ge.f32.partialorder %v5053_v2, 0.0 }
 0x247   : > { %v5115_v45 = vmul.f32 0.2, %v5051_v55  ;;  %v5052_v40 = vadd.f32 %v6858_v49, %v9143_v8  ;;  %vm5083_vm3 = vcmp.ge.f32.partialorder %v5051_v55, 0.0 }
 0x248   : > { %vm5086_vm4 = vcmp.ge.f32.partialorder %v5054_v24, 0.0  ;;  %v5118_v36 = vmul.f32 0.2, %v5054_v24  ;;  %v5149_v47 = vsel %vm5085_vm2, %v5053_v2, %v5117_v28 }
 0x249   : > { %vm5084_vm5 = vcmp.ge.f32.partialorder %v5052_v40, 0.0  ;;  %v5116_v37 = vmul.f32 0.2, %v5052_v40  ;;  %v5147_v51 = vsel %vm5083_vm3, %v5051_v55, %v5115_v45 }
 0x24a   : > { %v5150_v12 = vsel %vm5086_vm4, %v5054_v24, %v5118_v36 }
 0x24b   : > { %v6146_v21 = vpack.c.bf16 %v5150_v12, %v5149_v47  ;;  %v5148_v32 = vsel %vm5084_vm5, %v5052_v40, %v5116_v37 }
 0x24c   : > { %v6141_v5 = vpack.c.bf16 %v5148_v32, %v5147_v51 }
 0x24d   : > { %6162 = vst [vmem:[%s9153_s29 + $0x78] sm:$0xff] %v6146_v21  }
 0x24e   : > { %6161 = vst [vmem:[%s9153_s29 + $0x70] sm:$0xff] %v6141_v5  }
 0x24f PF: > { %s13_s14 = sadd.s32 1, %s7320_s14   ;;  %s9286_s12 = smov %s7316_s13 }
 0x250   : > { %p10_p5 = scmp.ge.s32.totalorder %s13_s14, 4   ;;  %s9287_s13 = smov %s9289_s15 }
 0x252   :  { %12 = sbr.rel (!%p10_p5) target bundleno = 2 (0x2), region = 73 }

// kernel: resblock_forward.3
= control target key start
LH: loop header
LB: loop body
LE: loop exit
PB: predicated region body
PF: predicated region fallthrough
CT: control target
= control target key end

     0   :  { %s17302_s21 = smov 0   ;;  %s17304_s22 = smov 0   ;;  %s20505_s0 = inlined_call_operand.vmem [shape: bf16[2,4,10,10,128], index: 0, kind: input, shape index: {}]   ;;  %s20506_s1 = inlined_call_operand.vmem [shape: bf16[2,4,9,9,128], index: 1, kind: input, shape index: {}]   ;;  %s20507_s2 = inlined_call_operand.vmem [shape: bf16[36,128,128], index: 2, kind: input, shape index: {}]   ;;  %s20508_s3 = inlined_call_operand.vmem [shape: f32[1,128], index: 3, kind: input, shape index: {}]   ;;  %s20509_s4 = inlined_call_operand.vmem [shape: bf16[16,128,128], index: 4, kind: input, shape index: {}]   ;;  %s20510_s5 = inlined_call_operand.vmem [shape: f32[1,128], index: 5, kind: input, shape index: {}]   ;;  %s20511_s6 = inlined_call_operand.vmem [shape: bf16[2,8,8,128], index: 6, kind: output, shape index: {}]  }
   0x1   :  { %s17306_s23 = smov 0  }
   0x2 LB: > { %s35_s24 = sadd.s32 1, %s17261_s22  ;;  %p12356_p0 = scmp.ge.s32.totalorder %s17265_s23, 1  ;;  %s17265_s23 = sphi %s17306_s23, %s16_s23   ;;  %s17261_s22 = sphi %s17304_s22, %s20520_s22   ;;  %s17257_s21 = sphi %s17302_s21, %s20519_s21  }
   0x3   : > { %p37_p1 = scmp.ge.s32.totalorder %s35_s24, 2  ;;  %p275_p2 = scmp.lt.s32.totalorder %s17265_s23, 3 }
   0x5   : > { %s20522_s24 = smov (%p37_p1, %s35_s24), 0  ;;  %p276_p3 = pnand %p12356_p0, %p275_p2 }
   0x6   : > { %v16727_v0 = vld [vmem:[%s20507_s2] sm:$0xff] (!%p276_p3)   ;;  %v16729_v2 = vld [vmem:[%s20507_s2 + $0x8] sm:$0xff] (!%p276_p3)   ;;  %p330_p4 = scmp.lt.s32.totalorder (!%p276_p3), %s17257_s21, 1  ;;  %v16731_v4 = vld [vmem:[%s20507_s2 + $0x10] sm:$0xff] (!%p276_p3)   ;;  %vm1334_vm0 = vcmask (!%p276_p3), 1042432   ;;  %vm1335_vm1 = vcmask (!%p276_p3), 1046532  }
   0x7   : > { %279 = sbr.rel (%p276_p3) target bundleno = 1077 (0x435), region = 44  ;;  %v16728_v1 = vld [vmem:[%s20507_s2 + $0x280] sm:$0xff] (!%p276_p3)   ;;  %15053 = vmatprep.subr.bf16.mxu1 (!%p276_p3), %v16727_v0  ;;  %v16730_v3 = vld [vmem:[%s20507_s2 + $0x288] sm:$0xff] (!%p276_p3)   ;;  %v16732_v5 = vld [vmem:[%s20507_s2 + $0x290] sm:$0xff] (!%p276_p3)   ;;  %vm759_vm3 = vsmask.f32 (!%p276_p3), 3328 }
   0x8   : > { %15293 = vmatprep.subr.bf16.mxu0 (!%p276_p3), %v16728_v1  ;;  %15054 = vmatpush3.bf16.msra.mxu1 (!%p276_p3), %v16727_v0  ;;  %v16733_v6 = vld [vmem:[%s20507_s2 + $0x18] sm:$0xff] (!%p276_p3)   ;;  %v16735_v8 = vld [vmem:[%s20507_s2 + $0x20] sm:$0xff] (!%p276_p3)   ;;  %v16737_v10 = vld [vmem:[%s20507_s2 + $0x28] sm:$0xff] (!%p276_p3)   ;;  %vm760_vm4 = vsmask.f32 (!%p276_p3), 7440 }
   0x9   : > { %15294 = vmatpush3.bf16.msra.mxu0 (!%p276_p3), %v16728_v1  ;;  %15055 = vmatprep.subr.bf16.mxu1 (!%p276_p3), %v16729_v2  ;;  %v16734_v7 = vld [vmem:[%s20507_s2 + $0x298] sm:$0xff] (!%p276_p3)   ;;  %v16736_v9 = vld [vmem:[%s20507_s2 + $0x2a0] sm:$0xff] (!%p276_p3)   ;;  %v16738_v12 = vld [vmem:[%s20507_s2 + $0x2a8] sm:$0xff] (!%p276_p3)  }
   0xa   : > { %15295 = vmatprep.subr.bf16.mxu0 (!%p276_p3), %v16730_v3  ;;  %v16739_v13 = vld [vmem:[%s20507_s2 + $0x30] sm:$0xff] (!%p276_p3)   ;;  %vm17371_vm2 = vmor (!%p276_p3), %vm1334_vm0, %vm1335_vm1  ;;  %v16741_v30 = vld [vmem:[%s20507_s2 + $0x38] sm:$0xff] (!%p276_p3)  }
   0xb   : > { %v16740_v23 = vld [vmem:[%s20507_s2 + $0x2b0] sm:$0xff] (!%p276_p3)   ;;  %v16742_v31 = vld [vmem:[%s20507_s2 + $0x2b8] sm:$0xff] (!%p276_p3)   ;;  %v16744_v37 = vld [vmem:[%s20507_s2 + $0x40] sm:$0xff] (!%p276_p3)  }
   0xc   : > { %15056 = vmatpush3.bf16.msra.mxu1 (!%p276_p3), %v16729_v2  ;;  %v16745_v40 = vld [vmem:[%s20507_s2 + $0x2c0] sm:$0xff] (!%p276_p3)   ;;  %v16747_v43 = vld [vmem:[%s20507_s2 + $0x48] sm:$0xff] (!%p276_p3)   ;;  %v16749_v45 = vld [vmem:[%s20507_s2 + $0x50] sm:$0xff] (!%p276_p3)  }
   0xd   : > { %15296 = vmatpush3.bf16.msra.mxu0 (!%p276_p3), %v16730_v3  ;;  %15057 = vmatprep.subr.bf16.mxu1 (!%p276_p3), %v16731_v4  ;;  %v16748_v44 = vld [vmem:[%s20507_s2 + $0x2c8] sm:$0xff] (!%p276_p3)   ;;  %v16750_v47 = vld [vmem:[%s20507_s2 + $0x2d0] sm:$0xff] (!%p276_p3)   ;;  %v16751_v50 = vld [vmem:[%s20507_s2 + $0x58] sm:$0xff] (!%p276_p3)  }
   0xe   : > { %s20524_s21 = smov (!%p330_p4, %s17257_s21), 1  ;;  %15297 = vmatprep.subr.bf16.mxu0 %v16732_v5  ;;  %v16752_v57 = vld [vmem:[%s20507_s2 + $0x2d8] sm:$0xff]   ;;  %vm17546_vm5 = vmor %vm759_vm3, %vm760_vm4 }
   0xf   : > { %s16701_s17 = smul.u32 320, %s20524_s21  ;;  %v17214_v16 = vld [vmem:[%s20509_s4 + $0x3d8] sm:$0xff]   ;;  %s14405_s14 = sshll.u32 %s20524_s21, 5 }
  0x10   : > { %15058 = vmatpush3.bf16.msra.mxu1 %v16731_v4  ;;  %s16702_s16 = smul.u32 288, %s20524_s21  ;;  %s20490_s21 = scalar_lea.vmem %s20511_s6, %s14405_s14 }
  0x11   : > { %15298 = vmatpush3.bf16.msra.mxu0 %v16732_v5  ;;  %15059 = vmatprep.subr.bf16.mxu1 %v16733_v6  ;;  %s17359_s30 = scalar_lea.vmem %s20505_s0, %s16701_s17 }
  0x12   : > { %15299 = vmatprep.subr.bf16.mxu0 %v16734_v7  ;;  %v16743_v11 = vld [vmem:[%s17359_s30] ss:$8 sps:$4 sm:$0xff]   ;;  %v12634_v14 = vld [vmem:[%s17359_s30 + $0xa4] sm:$0x1]  ;;  %v12636_v15 = vld [vmem:[%s17359_s30 + $0xac] sm:$0x1]  ;;  %s18378_s27 = scalar_lea.vmem %s20506_s1, %s16702_s16 }
  0x13   : > { %15069 = vmatprep.mubr.bf16.mxu1 %v16743_v11  ;;  %v12721_v17 = vld [vmem:[%s17359_s30 + $0xa0] sm:$0xe]  ;;  %v12722_v18 = vld [vmem:[%s17359_s30 + $0xa8] sm:$0xe]  ;;  %v2669_v20 = vrot.slane %v12634_v14, 5  ;;  %v2673_v22 = vrot.slane %v12636_v15, 5 }
  0x14   : > { %15060 = vmatpush3.bf16.msra.mxu1 %v16733_v6  ;;  %v12729_v19 = vrot.slane %v12721_v17, 9  ;;  %v12730_v21 = vrot.slane %v12722_v18, 9  ;;  %v12638_v27 = vld [vmem:[%s17359_s30 + $0xb4] sm:$0x1]  ;;  %v12640_v28 = vld [vmem:[%s17359_s30 + $0xbc] sm:$0x1] }
  0x15   : > { %15300 = vmatpush3.bf16.msra.mxu0 %v16734_v7  ;;  %15061 = vmatprep.subr.bf16.mxu1 %v16735_v8  ;;  %v12723_v29 = vld [vmem:[%s17359_s30 + $0xb0] sm:$0xe]  ;;  %v12724_v32 = vld [vmem:[%s17359_s30 + $0xb8] sm:$0xe]  ;;  %v2677_v34 = vrot.slane %v12638_v27, 5  ;;  %v2681_v36 = vrot.slane %v12640_v28, 5 }
  0x16   : > { %15301 = vmatprep.subr.bf16.mxu0 %v16736_v9  ;;  %v2670_v24 = vsel %vm17371_vm2, %v12729_v19, %v2669_v20  ;;  %v2674_v25 = vsel %vm17371_vm2, %v12730_v21, %v2673_v22  ;;  %v12731_v33 = vrot.slane %v12723_v29, 9  ;;  %v12732_v35 = vrot.slane %v12724_v32, 9  ;;  %v16746_v41 = vld [vmem:[%s17359_s30 + $0x10] ss:$8 sps:$4 sm:$0xff]   ;;  %v16757_v46 = vld [vmem:[%s17359_s30 + $0x20] ss:$8 sps:$4 sm:$0xff]  }
  0x17   : > { %v12753_v26 = vcombine.low %v2670_v24, %v2674_v25  ;;  %v12642_v48 = vld [vmem:[%s17359_s30 + $0xc4] sm:$0x1]  ;;  %v12644_v49 = vld [vmem:[%s17359_s30 + $0xcc] sm:$0x1]  ;;  %v12725_v51 = vld [vmem:[%s17359_s30 + $0xc0] sm:$0xe] }
  0x18   : > { %15062 = vmatpush3.bf16.msra.mxu1 %v16735_v8  ;;  %v2678_v38 = vsel %vm17371_vm2, %v12731_v33, %v2677_v34  ;;  %v2682_v39 = vsel %vm17371_vm2, %v12732_v35, %v2681_v36  ;;  %v12726_v52 = vld [vmem:[%s17359_s30 + $0xc8] sm:$0xe]  ;;  %v2685_v53 = vrot.slane %v12642_v48, 5  ;;  %v2689_v54 = vrot.slane %v12644_v49, 5  ;;  %v16760_v60 = vld [vmem:[%s17359_s30 + $0x30] ss:$8 sps:$4 sm:$0xff]  }
  0x19   : > { %15302 = vmatpush3.bf16.msra.mxu0 %v16736_v9  ;;  %15063 = vmatprep.subr.bf16.mxu1 %v16737_v10  ;;  %v12754_v42 = vcombine.low %v2678_v38, %v2682_v39  ;;  %v12733_v55 = vrot.slane %v12725_v51, 9  ;;  %v12734_v56 = vrot.slane %v12726_v52, 9  ;;  %v12646_v61 = vld [vmem:[%s17359_s30 + $0xd4] sm:$0x1]  ;;  %v12648_v62 = vld [vmem:[%s17359_s30 + $0xdc] sm:$0x1] }
  0x1a   : > { %15303 = vmatprep.subr.bf16.mxu0 %v16738_v12  ;;  %15309 = vmatprep.mubr.bf16.mxu0 %v12753_v26  ;;  %v12727_v0 = vld [vmem:[%s17359_s30 + $0xd0] sm:$0xe]  ;;  %v12728_v1 = vld [vmem:[%s17359_s30 + $0xd8] sm:$0xe]  ;;  %v2693_v2 = vrot.slane %v12646_v61, 5  ;;  %v2697_v3 = vrot.slane %v12648_v62, 5 }
  0x1b   : > { %v2686_v58 = vsel %vm17371_vm2, %v12733_v55, %v2685_v53  ;;  %v2690_v59 = vsel %vm17371_vm2, %v12734_v56, %v2689_v54  ;;  %v12735_v4 = vrot.slane %v12727_v0, 9  ;;  %v12736_v5 = vrot.slane %v12728_v1, 9  ;;  %v16753_v6 = vld [vmem:[%s20507_s2 + $0x60] sm:$0xff]   ;;  %v12678_v14 = vld [vmem:[%s17359_s30 + $0xf4] sm:$0x1]  ;;  %v16761_v32 = vld [vmem:[%s20507_s2 + $0x78] sm:$0xff]  }
  0x1c   : > { %15064 = vmatpush3.bf16.msra.mxu1 %v16737_v10  ;;  %v12755_v63 = vcombine.low %v2686_v58, %v2690_v59  ;;  %v16754_v7 = vld [vmem:[%s20507_s2 + $0x2e0] sm:$0xff]   ;;  %v16755_v10 = vld [vmem:[%s20507_s2 + $0x68] sm:$0xff]   ;;  %v12680_v15 = vld [vmem:[%s17359_s30 + $0xfc] sm:$0x1]  ;;  %v2879_v19 = vrot.slane %v12678_v14, 5 }
  0x1d   : > { %15304 = vmatpush3.bf16.msra.mxu0 %v16738_v12  ;;  %15065 = vmatprep.subr.bf16.mxu1 %v16739_v13  ;;  %v2694_v8 = vsel %vm17371_vm2, %v12735_v4, %v2693_v2  ;;  %v2698_v9 = vsel %vm17371_vm2, %v12736_v5, %v2697_v3  ;;  %v16763_v12 = vld [vmem:[%s17359_s30 + $0x50] ss:$8 sps:$4 sm:$0xff]   ;;  %v2883_v20 = vrot.slane %v12680_v15, 5  ;;  %v12682_v28 = vld [vmem:[%s17359_s30 + $0x104] sm:$0x1] }
  0x1e   : > { %15305 = vmatprep.subr.bf16.mxu0 %v16740_v23  ;;  %v12756_v11 = vcombine.low %v2694_v8, %v2698_v9  ;;  %v12765_v17 = vld [vmem:[%s17359_s30 + $0xf0] sm:$0xe]  ;;  %v12766_v18 = vld [vmem:[%s17359_s30 + $0xf8] sm:$0xe]  ;;  %v12684_v29 = vld [vmem:[%s17359_s30 + $0x10c] sm:$0x1] }
  0x1f   : > { %v12773_v21 = vrot.slane %v12765_v17, 9  ;;  %v12774_v22 = vrot.slane %v12766_v18, 9  ;;  %v16759_v24 = vld [vmem:[%s20507_s2 + $0x2f0] sm:$0xff]   ;;  %v2887_v33 = vrot.slane %v12682_v28, 5  ;;  %v2891_v34 = vrot.slane %v12684_v29, 5  ;;  %v16764_v38 = vld [vmem:[%s20507_s2 + $0x80] sm:$0xff]  }
  0x20   : > { %15066 = vmatpush3.bf16.msra.mxu1 %v16739_v13  ;;  %v16756_v13 = vld [vmem:[%s20507_s2 + $0x2e8] sm:$0xff]   ;;  %v12688_v48 = vld [vmem:[%s17359_s30 + $0x11c] sm:$0x1]  ;;  %v16769_v49 = vld [vmem:[%s20507_s2 + $0x90] sm:$0xff]  }
  0x21   : > { %15306 = vmatpush3.bf16.msra.mxu0 %v16740_v23  ;;  %15067 = vmatprep.subr.bf16.mxu1 %v16741_v30  ;;  %v16758_v23 = vld [vmem:[%s20507_s2 + $0x70] sm:$0xff]   ;;  %v2880_v25 = vsel %vm17371_vm2, %v12773_v21, %v2879_v19  ;;  %v2884_v26 = vsel %vm17371_vm2, %v12774_v22, %v2883_v20  ;;  %v12770_v51 = vld [vmem:[%s17359_s30 + $0x118] sm:$0xe]  ;;  %v2899_v53 = vrot.slane %v12688_v48, 5  ;;  %v16780_v59 = vld [vmem:[%s17359_s30 + $0x80] ss:$8 sps:$4 sm:$0xff]  }
  0x22   : > { %15307 = vmatprep.subr.bf16.mxu0 %v16742_v31  ;;  %v12797_v27 = vcombine.low %v2880_v25, %v2884_v26  ;;  %v12778_v55 = vrot.slane %v12770_v51, 9  ;;  %v16770_v56 = vld [vmem:[%s20507_s2 + $0x310] sm:$0xff]   ;;  %v12692_v61 = vld [vmem:[%s17359_s30 + $0x12c] sm:$0x1]  ;;  %v12772_v0 = vld [vmem:[%s17359_s30 + $0x128] sm:$0xe] }
  0x23   : > { %v2907_v2 = vrot.slane %v12692_v61, 5  ;;  %v12780_v4 = vrot.slane %v12772_v0, 9  ;;  %v16771_v5 = vld [vmem:[%s20507_s2 + $0x98] sm:$0xff]   ;;  %v743_v9 = vld [vmem:[%s17359_s30] sm:$0xf]  ;;  %v16779_v51 = vld [vmem:[%s20507_s2 + $0x330] sm:$0xff]  }
  0x24   : > { %15068 = vmatpush3.bf16.msra.mxu1 %v16741_v30  ;;  %v12767_v30 = vld [vmem:[%s17359_s30 + $0x100] sm:$0xe]  ;;  %v2900_v58 = vsel %vm17371_vm2, %v12778_v55, %v2899_v53  ;;  %v763_v14 = vshrl.u32 %v743_v9, 16  ;;  %v766_v15 = vshll.u32 %v743_v9, 16  ;;  %v16781_v61 = vld [vmem:[%s20507_s2 + $0xb8] sm:$0xff]  }
  0x25   : > { %15308 = vmatpush3.bf16.msra.mxu0 %v16742_v31  ;;  %15077 = vmatprep.subr.bf16.mxu1 %v16744_v37  ;;  %v12768_v31 = vld [vmem:[%s17359_s30 + $0x108] sm:$0xe]  ;;  %v12775_v35 = vrot.slane %v12767_v30, 9  ;;  %v2908_v8 = vsel %vm17371_vm2, %v12780_v4, %v2907_v2  ;;  %v16773_v19 = vld [vmem:[%s20507_s2 + $0xa0] sm:$0xff]  }
  0x26   : > { %15317 = vmatprep.subr.bf16.mxu0 %v16745_v40  ;;  %v12776_v36 = vrot.slane %v12768_v31, 9  ;;  %v16774_v20 = vld [vmem:[%s20507_s2 + $0x320] sm:$0xff]   ;;  %v16784_v31 = vld [vmem:[%s17359_s30 + $0x8] ss:$8 sps:$4 sm:$0xff]  }
  0x27   : > { %15070 = vmatmul.mubr.bf16.vlgmr.msra.gmra.mrb[0].mxu1 %v16746_v41  ;;  %v2888_v39 = vsel %vm17371_vm2, %v12775_v35, %v2887_v33  ;;  %v16765_v41 = vld [vmem:[%s20507_s2 + $0x300] sm:$0xff]   ;;  %v747_v33 = vld [vmem:[%s17359_s30 + $0x10] sm:$0xf]  ;;  %v17553_v35 = vld [vmem:[%s17359_s30 + $0x14] sm:$0x1] }
  0x28   : > { %15078 = vmatpush3.bf16.msra.mxu1 %v16744_v37  ;;  %15310 = vmatmul.mubr.bf16.vlgmr.msra.gmra.mrb[0].mxu0 %v12754_v42  ;;  %v16762_v37 = vld [vmem:[%s20507_s2 + $0x2f8] sm:$0xff]   ;;  %v16766_v42 = vld [vmem:[%s17359_s30 + $0x60] ss:$8 sps:$4 sm:$0xff]  }
  0x29   : > { %15318 = vmatpush3.bf16.msra.mxu0 %v16745_v40  ;;  %15079 = vmatprep.subr.bf16.mxu1 %v16747_v43  ;;  %v2892_v40 = vsel %vm17371_vm2, %v12776_v36, %v2891_v34  ;;  %v749_v36 = vld [vmem:[%s17359_s30 + $0x18] sm:$0xf]  ;;  %v16783_v0 = vld [vmem:[%s20507_s2 + $0xc0] sm:$0xff]   ;;  %v753_v9 = vld [vmem:[%s17359_s30 + $0x28] sm:$0xf] }
  0x2a   : > { %15319 = vmatprep.subr.bf16.mxu0 %v16748_v44  ;;  %15073 = vmatprep.mubr.bf16.mxu1 %v16757_v46  ;;  %v16777_v46 = vld [vmem:[%s17359_s30 + $0x70] ss:$8 sps:$4 sm:$0xff]  }
  0x2b   : > { %15313 = vmatprep.mubr.bf16.mxu0 %v12755_v63  ;;  %v12771_v63 = vld [vmem:[%s17359_s30 + $0x120] sm:$0xe] }
  0x2c   : > { %15080 = vmatpush3.bf16.msra.mxu1 %v16747_v43  ;;  %v12798_v43 = vcombine.low %v2888_v39, %v2892_v40  ;;  %v12779_v3 = vrot.slane %v12771_v63, 9  ;;  %v791_v40 = vshrl.u32 %v747_v33, 16  ;;  %v16782_v63 = vld [vmem:[%s20507_s2 + $0x338] sm:$0xff]  }
  0x2d   : > { %15320 = vmatpush3.bf16.msra.mxu0 %v16748_v44  ;;  %15081 = vmatprep.subr.bf16.mxu1 %v16749_v45  ;;  %v16767_v44 = vld [vmem:[%s20507_s2 + $0x88] sm:$0xff]   ;;  %v16786_v4 = vld [vmem:[%s17359_s30 + $0x18] ss:$8 sps:$4 sm:$0xff]  }
  0x2e   : > { %15321 = vmatprep.subr.bf16.mxu0 %v16750_v47 }
  0x2f   : > { %15074 = vmatmul.mubr.bf16.gmra.mrb[4].mxu1 %v16760_v60  ;;  %v12690_v60 = vld [vmem:[%s17359_s30 + $0x124] sm:$0x1] }
  0x30   : > { %15082 = vmatpush3.bf16.msra.mxu1 %v16749_v45  ;;  %15314 = vmatmul.mubr.bf16.gmra.mrb[4].mxu0 %v12756_v11  ;;  %v16768_v45 = vld [vmem:[%s20507_s2 + $0x308] sm:$0xff]   ;;  %v2903_v1 = vrot.slane %v12690_v60, 5 }
  0x31   : > { %15322 = vmatpush3.bf16.msra.mxu0 %v16750_v47  ;;  %15083 = vmatprep.subr.bf16.mxu1 %v16751_v50  ;;  %v12686_v47 = vld [vmem:[%s17359_s30 + $0x114] sm:$0x1] }
  0x32   : > { %15323 = vmatprep.subr.bf16.mxu0 %v16752_v57  ;;  %15093 = vmatprep.mubr.bf16.mxu1 %v16763_v12  ;;  %v2895_v52 = vrot.slane %v12686_v47, 5  ;;  %v745_v12 = vld [vmem:[%s17359_s30 + $0x8] sm:$0xf]  ;;  %v793_v47 = vrot.slane %v791_v40, 4 }
  0x33   : > { %15333 = vmatprep.mubr.bf16.mxu0 %v12797_v27  ;;  %v777_v18 = vshrl.u32 %v745_v12, 16  ;;  %v780_v21 = vshll.u32 %v745_v12, 16  ;;  %v16775_v27 = vld [vmem:[%s20507_s2 + $0xa8] sm:$0xff]  }
  0x34   : > { %15084 = vmatpush3.bf16.msra.mxu1 %v16751_v50  ;;  %v12769_v50 = vld [vmem:[%s17359_s30 + $0x110] sm:$0xe] }
  0x35   : > { %15324 = vmatpush3.bf16.msra.mxu0 %v16752_v57  ;;  %15085 = vmatprep.subr.bf16.mxu1 %v16753_v6  ;;  %v12777_v54 = vrot.slane %v12769_v50, 9  ;;  %v779_v26 = vrot.slane %v777_v18, 4  ;;  %v782_v29 = vrot.slane %v780_v21, 5  ;;  %v16778_v50 = vld [vmem:[%s20507_s2 + $0xb0] sm:$0xff]   ;;  %v836_v18 = vshll.u32 %v753_v9, 16 }
  0x36   : > { %15325 = vmatprep.subr.bf16.mxu0 %v16754_v7 }
  0x37   : > { %v2896_v57 = vsel %vm17371_vm2, %v12777_v54, %v2895_v52  ;;  %v783_v34 = vor.u32 %v782_v29, %v779_v26  ;;  %v838_v26 = vrot.slane %v836_v18, 5  ;;  %v16790_v29 = vld [vmem:[%s20507_s2 + $0x350] sm:$0xff]   ;;  %v16795_v18 = vld [vmem:[%s20507_s2 + $0xe8] sm:$0xff]  }
  0x38   : > { %15086 = vmatpush3.bf16.msra.mxu1 %v16753_v6  ;;  %v12799_v62 = vcombine.low %v2896_v57, %v2900_v58  ;;  %v16772_v6 = vld [vmem:[%s20507_s2 + $0x318] sm:$0xff]  }
  0x39   : > { %15326 = vmatpush3.bf16.msra.mxu0 %v16754_v7  ;;  %15087 = vmatprep.subr.bf16.mxu1 %v16755_v10  ;;  %v2904_v7 = vsel %vm17371_vm2, %v12779_v3, %v2903_v1  ;;  %v16785_v3 = vld [vmem:[%s20507_s2 + $0x340] sm:$0xff]  }
  0x3a   : > { %15327 = vmatprep.subr.bf16.mxu0 %v16756_v13  ;;  %v12800_v11 = vcombine.low %v2904_v7, %v2908_v8  ;;  %v751_v7 = vld [vmem:[%s17359_s30 + $0x20] sm:$0xf]  ;;  %v17596_v8 = vld [vmem:[%s17359_s30 + $0x24] sm:$0x1] }
  0x3b   : > { %v819_v12 = vshrl.u32 %v751_v7, 16 }
  0x3c   : > { %15088 = vmatpush3.bf16.msra.mxu1 %v16755_v10  ;;  %v17527_v10 = vld [vmem:[%s17359_s30 + $0x4] sm:$0x1] }
  0x3d   : > { %15328 = vmatpush3.bf16.msra.mxu0 %v16756_v13  ;;  %15089 = vmatprep.subr.bf16.mxu1 %v16758_v23  ;;  %v17531_v13 = vld [vmem:[%s17359_s30 + $0xc] sm:$0x1]  ;;  %v772_v17 = vshll.u32 %v17527_v10, 16  ;;  %v821_v21 = vrot.slane %v819_v12, 4 }
  0x3e   : > { %15329 = vmatprep.subr.bf16.mxu0 %v16759_v24  ;;  %v786_v22 = vshll.u32 %v17531_v13, 16 }
  0x3f   : > { %v774_v25 = vrot.slane %v772_v17, 5  ;;  %v833_v17 = vshrl.u32 %v753_v9, 16  ;;  %v16794_v9 = vld [vmem:[%s20507_s2 + $0x360] sm:$0xff]  }
  0x40   : > { %15090 = vmatpush3.bf16.msra.mxu1 %v16758_v23  ;;  %v765_v23 = vrot.slane %v763_v14, 4  ;;  %v788_v30 = vrot.slane %v786_v22, 5  ;;  %v822_v14 = vshll.u32 %v751_v7, 16 }
  0x41   : > { %15330 = vmatpush3.bf16.msra.mxu0 %v16759_v24  ;;  %15091 = vmatprep.subr.bf16.mxu1 %v16761_v32  ;;  %v768_v24 = vrot.slane %v766_v15, 5  ;;  %v828_v15 = vshll.u32 %v17596_v8, 16 }
  0x42   : > { %15331 = vmatprep.subr.bf16.mxu0 %v16762_v37  ;;  %v824_v22 = vrot.slane %v822_v14, 5 }
  0x44   : > { %15092 = vmatpush3.bf16.msra.mxu1 %v16761_v32  ;;  %v769_v32 = vor.u32 %v768_v24, %v765_v23  ;;  %v830_v23 = vrot.slane %v828_v15, 5  ;;  %v835_v24 = vrot.slane %v833_v17, 4 }
  0x45   : > { %15332 = vmatpush3.bf16.msra.mxu0 %v16762_v37  ;;  %15101 = vmatprep.subr.bf16.mxu1 %v16764_v38  ;;  %v17557_v37 = vld [vmem:[%s17359_s30 + $0x1c] sm:$0x1] }
  0x46   : > { %15341 = vmatprep.subr.bf16.mxu0 %v16765_v41  ;;  %v770_v39 = vrot.slane %v769_v32, 4  ;;  %v839_v32 = vor.u32 %v838_v26, %v835_v24 }
  0x47   : > { %15094 = vmatmul.mubr.bf16.vlgmr.msra.gmra.mrb[0].mxu1 %v16766_v42  ;;  %v784_v42 = vrot.slane %v783_v34, 4  ;;  %v17616_v34 = vld [vmem:[%s17359_s30 + $0x34] sm:$0x1] }
  0x48   : > { %15102 = vmatpush3.bf16.msra.mxu1 %v16764_v38  ;;  %15334 = vmatmul.mubr.bf16.vlgmr.msra.gmra.mrb[0].mxu0 %v12798_v43  ;;  %v16776_v38 = vld [vmem:[%s20507_s2 + $0x328] sm:$0xff]   ;;  %v800_v43 = vshll.u32 %v17553_v35, 16 }
  0x49   : > { %15342 = vmatpush3.bf16.msra.mxu0 %v16765_v41  ;;  %15103 = vmatprep.subr.bf16.mxu1 %v16767_v44  ;;  %v794_v41 = vshll.u32 %v747_v33, 16  ;;  %v789_v52 = vsel %vm17546_vm5, %v784_v42, %v788_v30  ;;  %v825_v30 = vor.u32 %v824_v22, %v821_v21  ;;  %v755_v33 = vld [vmem:[%s17359_s30 + $0x30] sm:$0xf]  ;;  %v856_v42 = vshll.u32 %v17616_v34, 16 }
  0x4a   : > { %15343 = vmatprep.subr.bf16.mxu0 %v16768_v45  ;;  %15097 = vmatprep.mubr.bf16.mxu1 %v16777_v46  ;;  %v775_v46 = vsel %vm17546_vm5, %v770_v39, %v774_v25  ;;  %v802_v57 = vrot.slane %v800_v43, 5  ;;  %v16789_v25 = vld [vmem:[%s20507_s2 + $0xd0] sm:$0xff]   ;;  %v17620_v39 = vld [vmem:[%s17359_s30 + $0x3c] sm:$0x1]  ;;  %v847_v40 = vshrl.u32 %v755_v33, 16  ;;  %v840_v43 = vrot.slane %v839_v32, 4 }
  0x4b   : > { %15337 = vmatprep.mubr.bf16.mxu0 %v12799_v62  ;;  %v796_v48 = vrot.slane %v794_v41, 5  ;;  %v12425_v55 = vcombine.low %v775_v46, %v789_v52  ;;  %v850_v41 = vshll.u32 %v755_v33, 16  ;;  %v870_v46 = vshll.u32 %v17620_v39, 16  ;;  %v16792_v52 = vld [vmem:[%s20507_s2 + $0x358] sm:$0xff]   ;;  %v17664_v32 = vld [vmem:[%s17359_s30 + $0x64] sm:$0x1] }
  0x4c   : > { %15104 = vmatpush3.bf16.msra.mxu1 %v16767_v44  ;;  %v805_v44 = vshrl.u32 %v749_v36, 16  ;;  %v12443_v33 = vld [vmem:[%s17359_s30 + $0x68] sm:$0xf] }
  0x4d   : > { %15344 = vmatpush3.bf16.msra.mxu0 %v16768_v45  ;;  %15105 = vmatprep.subr.bf16.mxu1 %v16769_v49  ;;  %v808_v45 = vshll.u32 %v749_v36, 16  ;;  %v757_v36 = vld [vmem:[%s17359_s30 + $0x38] sm:$0xf] }
  0x4e   : > { %15345 = vmatprep.subr.bf16.mxu0 %v16770_v56  ;;  %v807_v53 = vrot.slane %v805_v44, 4  ;;  %v861_v44 = vshrl.u32 %v757_v36, 16 }
  0x4f   : > { %15098 = vmatmul.mubr.bf16.gmra.mrb[4].mxu1 %v16780_v59  ;;  %v810_v54 = vrot.slane %v808_v45, 5  ;;  %v864_v45 = vshll.u32 %v757_v36, 16  ;;  %v17668_v36 = vld [vmem:[%s17359_s30 + $0x6c] sm:$0x1] }
  0x50   : > { %15106 = vmatpush3.bf16.msra.mxu1 %v16769_v49  ;;  %15338 = vmatmul.mubr.bf16.gmra.mrb[4].mxu0 %v12800_v11  ;;  %v814_v49 = vshll.u32 %v17557_v37, 16  ;;  %v17600_v11 = vld [vmem:[%s17359_s30 + $0x2c] sm:$0x1] }
  0x51   : > { %15346 = vmatpush3.bf16.msra.mxu0 %v16770_v56  ;;  %15107 = vmatprep.subr.bf16.mxu1 %v16771_v5  ;;  %v797_v56 = vor.u32 %v796_v48, %v793_v47  ;;  %v811_v58 = vor.u32 %v810_v54, %v807_v53  ;;  %v16791_v47 = vld [vmem:[%s20507_s2 + $0xd8] sm:$0xff]   ;;  %v863_v54 = vrot.slane %v861_v44, 4  ;;  %v1087_v44 = vshrl.u32 %v12443_v33, 16 }
  0x52   : > { %15347 = vmatprep.subr.bf16.mxu0 %v16772_v6  ;;  %15357 = vmatprep.mubr.bf16.mxu0 %v16784_v31  ;;  %v816_v60 = vrot.slane %v814_v49, 5  ;;  %v16798_v31 = vld [vmem:[%s17359_s30 + $0x28] ss:$8 sps:$4 sm:$0xff]   ;;  %v849_v49 = vrot.slane %v847_v40, 4 }
  0x53   : > { %15117 = vmatprep.mubr.bf16.mxu1 %v12425_v55  ;;  %v798_v59 = vrot.slane %v797_v56, 4  ;;  %v812_v62 = vrot.slane %v811_v58, 4  ;;  %v866_v55 = vrot.slane %v864_v45, 5  ;;  %v872_v56 = vrot.slane %v870_v46, 5 }
  0x54   : > { %15108 = vmatpush3.bf16.msra.mxu1 %v16771_v5  ;;  %v1090_v45 = vshll.u32 %v12443_v33, 16  ;;  %v1096_v46 = vshll.u32 %v17668_v36, 16 }
  0x55   : > { %15348 = vmatpush3.bf16.msra.mxu0 %v16772_v6  ;;  %15109 = vmatprep.subr.bf16.mxu1 %v16773_v19  ;;  %v803_v1 = vsel %vm17546_vm5, %v798_v59, %v802_v57  ;;  %v817_v2 = vsel %vm17546_vm5, %v812_v62, %v816_v60  ;;  %v16787_v6 = vld [vmem:[%s20507_s2 + $0xc8] sm:$0xff]   ;;  %v16800_v57 = vld [vmem:[%s17359_s30 + $0x38] ss:$8 sps:$4 sm:$0xff]   ;;  %v12437_v62 = vld [vmem:[%s17359_s30 + $0x50] sm:$0xf] }
  0x56   : > { %15349 = vmatprep.subr.bf16.mxu0 %v16774_v20  ;;  %v12426_v5 = vcombine.low %v803_v1, %v817_v2  ;;  %v16793_v60 = vld [vmem:[%s20507_s2 + $0xe0] sm:$0xff]   ;;  %v12439_v1 = vld [vmem:[%s17359_s30 + $0x58] sm:$0xf]  ;;  %v17644_v2 = vld [vmem:[%s17359_s30 + $0x5c] sm:$0x1] }
  0x57   : > { %v1059_v7 = vshrl.u32 %v12439_v1, 16  ;;  %v1062_v15 = vshll.u32 %v12439_v1, 16  ;;  %v1068_v17 = vshll.u32 %v17644_v2, 16  ;;  %v1339_v1 = vrot.slane %v17527_v10, 5 }
  0x58   : > { %15110 = vmatpush3.bf16.msra.mxu1 %v16773_v19  ;;  %v842_v19 = vshll.u32 %v17600_v11, 16 }
  0x59   : > { %15350 = vmatpush3.bf16.msra.mxu0 %v16774_v20  ;;  %15111 = vmatprep.subr.bf16.mxu1 %v16775_v27  ;;  %v16788_v20 = vld [vmem:[%s20507_s2 + $0x348] sm:$0xff]   ;;  %v1061_v22 = vrot.slane %v1059_v7, 4  ;;  %v1070_v26 = vrot.slane %v1068_v17, 5  ;;  %v16805_v7 = vld [vmem:[%s20507_s2 + $0x380] sm:$0xff]   ;;  %v1351_v17 = vrot.slane %v17557_v37, 5  ;;  %v16821_v37 = vld [vmem:[%s20507_s2 + $0x138] sm:$0xff]  }
  0x5a   : > { %15351 = vmatprep.subr.bf16.mxu0 %v16776_v38 }
  0x5c   : > { %15112 = vmatpush3.bf16.msra.mxu1 %v16775_v27  ;;  %v844_v27 = vrot.slane %v842_v19, 5 }
  0x5d   : > { %15352 = vmatpush3.bf16.msra.mxu0 %v16776_v38  ;;  %15113 = vmatprep.subr.bf16.mxu1 %v16778_v50  ;;  %v826_v38 = vrot.slane %v825_v30, 4  ;;  %v12441_v30 = vld [vmem:[%s17359_s30 + $0x60] sm:$0xf] }
  0x5e   : > { %15353 = vmatprep.subr.bf16.mxu0 %v16779_v51  ;;  %v845_v53 = vsel %vm17546_vm5, %v840_v43, %v844_v27  ;;  %v16804_v27 = vld [vmem:[%s17359_s30 + $0x58] ss:$8 sps:$4 sm:$0xff]   ;;  %v1073_v40 = vshrl.u32 %v12441_v30, 16 }
  0x5f   : > { %v831_v48 = vsel %vm17546_vm5, %v826_v38, %v830_v23  ;;  %v16796_v23 = vld [vmem:[%s20507_s2 + $0x368] sm:$0xff]  }
  0x60   : > { %15114 = vmatpush3.bf16.msra.mxu1 %v16778_v50  ;;  %v852_v50 = vrot.slane %v850_v41, 5  ;;  %v12427_v58 = vcombine.low %v831_v48, %v845_v53  ;;  %v1076_v41 = vshll.u32 %v12441_v30, 16  ;;  %v1089_v53 = vrot.slane %v1087_v44, 4  ;;  %v16809_v30 = vld [vmem:[%s20507_s2 + $0x110] sm:$0xff]  }
  0x61   : > { %15354 = vmatpush3.bf16.msra.mxu0 %v16779_v51  ;;  %15115 = vmatprep.subr.bf16.mxu1 %v16781_v61  ;;  %v858_v51 = vrot.slane %v856_v42, 5  ;;  %v1082_v42 = vshll.u32 %v17664_v32, 16 }
  0x62   : > { %15355 = vmatprep.subr.bf16.mxu0 %v16782_v63  ;;  %v853_v59 = vor.u32 %v852_v50, %v849_v49  ;;  %v1075_v49 = vrot.slane %v1073_v40, 4  ;;  %v1078_v50 = vrot.slane %v1076_v41, 5  ;;  %v16810_v41 = vld [vmem:[%s20507_s2 + $0x390] sm:$0xff]  }
  0x64   : > { %15116 = vmatpush3.bf16.msra.mxu1 %v16781_v61  ;;  %v867_v61 = vor.u32 %v866_v55, %v863_v54  ;;  %v1092_v54 = vrot.slane %v1090_v45, 5  ;;  %v16818_v45 = vld [vmem:[%s17359_s30 + $0x78] ss:$8 sps:$4 sm:$0xff]  }
  0x65   : > { %15356 = vmatpush3.bf16.msra.mxu0 %v16782_v63  ;;  %15125 = vmatprep.subr.bf16.mxu1 %v16783_v0  ;;  %v17640_v63 = vld [vmem:[%s17359_s30 + $0x54] sm:$0x1] }
  0x66   : > { %15365 = vmatprep.subr.bf16.mxu0 %v16785_v3 }
  0x67   : > { %15118 = vmatmul.mubr.bf16.vlgmr.msra.gmra.mrb[0].mxu1 %v12426_v5  ;;  %v1048_v5 = vshll.u32 %v12437_v62, 16 }
  0x68   : > { %15126 = vmatpush3.bf16.msra.mxu1 %v16783_v0  ;;  %15358 = vmatmul.mubr.bf16.vlgmr.msra.gmra.mrb[0].mxu0 %v16786_v4  ;;  %v854_v0 = vrot.slane %v853_v59, 4  ;;  %v868_v4 = vrot.slane %v867_v61, 4  ;;  %v1098_v59 = vrot.slane %v1096_v46, 5 }
  0x69   : > { %15366 = vmatpush3.bf16.msra.mxu0 %v16785_v3  ;;  %15127 = vmatprep.subr.bf16.mxu1 %v16787_v6  ;;  %v1045_v3 = vshrl.u32 %v12437_v62, 16  ;;  %v16802_v62 = vld [vmem:[%s20507_s2 + $0x378] sm:$0xff]  }
  0x6a   : > { %15367 = vmatprep.subr.bf16.mxu0 %v16788_v20  ;;  %15361 = vmatprep.mubr.bf16.mxu0 %v16798_v31  ;;  %v859_v12 = vsel %vm17546_vm5, %v854_v0, %v858_v51  ;;  %v873_v19 = vsel %vm17546_vm5, %v868_v4, %v872_v56  ;;  %v16799_v51 = vld [vmem:[%s20507_s2 + $0x370] sm:$0xff]   ;;  %v1079_v56 = vor.u32 %v1078_v50, %v1075_v49  ;;  %v12451_v49 = vld [vmem:[%s17359_s30 + $0x88] sm:$0xf] }
  0x6b   : > { %15121 = vmatprep.mubr.bf16.mxu1 %v12427_v58  ;;  %v1047_v14 = vrot.slane %v1045_v3, 4  ;;  %v12428_v24 = vcombine.low %v859_v12, %v873_v19  ;;  %v1093_v58 = vor.u32 %v1092_v54, %v1089_v53  ;;  %v16803_v3 = vld [vmem:[%s20507_s2 + $0x100] sm:$0xff]   ;;  %v16806_v12 = vld [vmem:[%s17359_s30 + $0x68] ss:$8 sps:$4 sm:$0xff]  }
  0x6c   : > { %15128 = vmatpush3.bf16.msra.mxu1 %v16787_v6  ;;  %v1054_v6 = vshll.u32 %v17640_v63, 16  ;;  %v1080_v61 = vrot.slane %v1079_v56, 4  ;;  %v12445_v19 = vld [vmem:[%s17359_s30 + $0x70] sm:$0xf]  ;;  %v1143_v56 = vshrl.u32 %v12451_v49, 16 }
  0x6d   : > { %15368 = vmatpush3.bf16.msra.mxu0 %v16788_v20  ;;  %15129 = vmatprep.subr.bf16.mxu1 %v16789_v25  ;;  %v1050_v20 = vrot.slane %v1048_v5, 5  ;;  %v1094_v0 = vrot.slane %v1093_v58, 4 }
  0x6e   : > { %15369 = vmatprep.subr.bf16.mxu0 %v16790_v29  ;;  %v1056_v21 = vrot.slane %v1054_v6, 5  ;;  %v1343_v6 = vrot.slane %v17531_v13, 5  ;;  %v16816_v13 = vld [vmem:[%s20507_s2 + $0x3a8] sm:$0xff]  }
  0x6f   : > { %15122 = vmatmul.mubr.bf16.gmra.mrb[4].mxu1 %v12428_v24  ;;  %v1099_v5 = vsel %vm17546_vm5, %v1094_v0, %v1098_v59  ;;  %v1104_v24 = vshll.u32 %v12445_v19, 16  ;;  %v16811_v59 = vld [vmem:[%s20507_s2 + $0x118] sm:$0xff]  }
  0x70   : > { %15130 = vmatpush3.bf16.msra.mxu1 %v16789_v25  ;;  %15362 = vmatmul.mubr.bf16.gmra.mrb[4].mxu0 %v16800_v57  ;;  %v1064_v25 = vrot.slane %v1062_v15, 5  ;;  %v1084_v57 = vrot.slane %v1082_v42, 5  ;;  %v16807_v15 = vld [vmem:[%s20507_s2 + $0x108] sm:$0xff]  }
  0x71   : > { %15370 = vmatpush3.bf16.msra.mxu0 %v16790_v29  ;;  %15131 = vmatprep.subr.bf16.mxu1 %v16791_v47  ;;  %v1051_v29 = vor.u32 %v1050_v20, %v1047_v14  ;;  %v17711_v20 = vld [vmem:[%s17359_s30 + $0x74] sm:$0x1]  ;;  %v1106_v33 = vrot.slane %v1104_v24, 5  ;;  %v16813_v24 = vld [vmem:[%s20507_s2 + $0x120] sm:$0xff]  }
  0x72   : > { %15371 = vmatprep.subr.bf16.mxu0 %v16792_v52  ;;  %v1065_v31 = vor.u32 %v1064_v25, %v1061_v22  ;;  %15381 = vmatprep.mubr.bf16.mxu0 %v16804_v27  ;;  %v1085_v4 = vsel %vm17546_vm5, %v1080_v61, %v1084_v57  ;;  %v17715_v22 = vld [vmem:[%s17359_s30 + $0x7c] sm:$0x1]  ;;  %v1110_v25 = vshll.u32 %v17711_v20, 16  ;;  %v1146_v57 = vshll.u32 %v12451_v49, 16 }
  0x73   : > { %v1052_v38 = vrot.slane %v1051_v29, 4  ;;  %v12470_v14 = vcombine.low %v1085_v4, %v1099_v5  ;;  %v1124_v29 = vshll.u32 %v17715_v22, 16  ;;  %v1145_v5 = vrot.slane %v1143_v56, 4  ;;  %v1313_v56 = vld [vmem:[%s17359_s30 + $0x18] sm:$0xe] }
  0x74   : > { %15132 = vmatpush3.bf16.msra.mxu1 %v16791_v47  ;;  %v1066_v43 = vrot.slane %v1065_v31, 4  ;;  %v16797_v47 = vld [vmem:[%s20507_s2 + $0xf0] sm:$0xff]  }
  0x75   : > { %15372 = vmatpush3.bf16.msra.mxu0 %v16792_v52  ;;  %15133 = vmatprep.subr.bf16.mxu1 %v16793_v60  ;;  %v1057_v48 = vsel %vm17546_vm5, %v1052_v38, %v1056_v21  ;;  %v12447_v21 = vld [vmem:[%s17359_s30 + $0x78] sm:$0xf]  ;;  %v1112_v38 = vrot.slane %v1110_v25, 5 }
  0x76   : > { %15373 = vmatprep.subr.bf16.mxu0 %v16794_v9  ;;  %v1071_v52 = vsel %vm17546_vm5, %v1066_v43, %v1070_v26  ;;  %v1115_v26 = vshrl.u32 %v12447_v21, 16  ;;  %v1118_v27 = vshll.u32 %v12447_v21, 16  ;;  %v1126_v43 = vrot.slane %v1124_v29, 5  ;;  %v1310_v21 = vld [vmem:[%s17359_s30] sm:$0xe] }
  0x77   : > { %v12469_v55 = vcombine.low %v1057_v48, %v1071_v52  ;;  %v17728_v48 = vld [vmem:[%s17359_s30 + $0x84] sm:$0x1] }
  0x78   : > { %15134 = vmatpush3.bf16.msra.mxu1 %v16793_v60  ;;  %v16801_v60 = vld [vmem:[%s20507_s2 + $0xf8] sm:$0xff]   ;;  %v1117_v40 = vrot.slane %v1115_v26, 4  ;;  %v1120_v42 = vrot.slane %v1118_v27, 5  ;;  %v1138_v54 = vshll.u32 %v17728_v48, 16  ;;  %v12481_v26 = vrot.slane %v1310_v21, 9  ;;  %v16814_v29 = vld [vmem:[%s20507_s2 + $0x3a0] sm:$0xff]  }
  0x79   : > { %15374 = vmatpush3.bf16.msra.mxu0 %v16794_v9  ;;  %15135 = vmatprep.subr.bf16.mxu1 %v16795_v18  ;;  %v1347_v9 = vrot.slane %v17553_v35, 5 }
  0x7a   : > { %15375 = vmatprep.subr.bf16.mxu0 %v16796_v23  ;;  %15141 = vmatprep.mubr.bf16.mxu1 %v12469_v55  ;;  %v1121_v46 = vor.u32 %v1120_v42, %v1117_v40  ;;  %v1140_v0 = vrot.slane %v1138_v54, 5  ;;  %v1340_v40 = vsel %vm17371_vm2, %v12481_v26, %v1339_v1  ;;  %v17770_v42 = vld [vmem:[%s17359_s30 + $0xc] sm:$0x1] }
  0x7c   : > { %15136 = vmatpush3.bf16.msra.mxu1 %v16795_v18  ;;  %v16808_v18 = vld [vmem:[%s20507_s2 + $0x388] sm:$0xff]   ;;  %v1122_v55 = vrot.slane %v1121_v46, 4 }
  0x7d   : > { %15376 = vmatpush3.bf16.msra.mxu0 %v16796_v23  ;;  %15137 = vmatprep.subr.bf16.mxu1 %v16797_v47  ;;  %v1101_v23 = vshrl.u32 %v12445_v19, 16 }
  0x7e   : > { %15377 = vmatprep.subr.bf16.mxu0 %v16799_v51  ;;  %v1127_v4 = vsel %vm17546_vm5, %v1122_v55, %v1126_v43  ;;  %v12883_v43 = vld [vmem:[%s17359_s30 + $0x10] sm:$0xf] }
  0x7f   : > { %v1103_v31 = vrot.slane %v1101_v23, 4  ;;  %v1311_v23 = vld [vmem:[%s17359_s30 + $0x8] sm:$0xe]  ;;  %v3441_v49 = vshrl.u32 %v12883_v43, 16 }
  0x80   : > { %15138 = vmatpush3.bf16.msra.mxu1 %v16797_v47  ;;  %v12449_v47 = vld [vmem:[%s17359_s30 + $0x80] sm:$0xf]  ;;  %v12482_v27 = vrot.slane %v1311_v23, 9 }
  0x81   : > { %15378 = vmatpush3.bf16.msra.mxu0 %v16799_v51  ;;  %15139 = vmatprep.subr.bf16.mxu1 %v16801_v60  ;;  %v1107_v44 = vor.u32 %v1106_v33, %v1103_v31  ;;  %v17732_v51 = vld [vmem:[%s17359_s30 + $0x8c] sm:$0x1]  ;;  %v1129_v52 = vshrl.u32 %v12449_v47, 16  ;;  %v1132_v53 = vshll.u32 %v12449_v47, 16  ;;  %v12881_v31 = vld [vmem:[%s17359_s30 + $0x8] sm:$0xf] }
  0x82   : > { %15379 = vmatprep.subr.bf16.mxu0 %v16802_v62  ;;  %v1152_v58 = vshll.u32 %v17732_v51, 16  ;;  %v16815_v33 = vld [vmem:[%s20507_s2 + $0x128] sm:$0xff]   ;;  %v3427_v46 = vshrl.u32 %v12881_v31, 16  ;;  %v3430_v47 = vshll.u32 %v12881_v31, 16 }
  0x83   : > { %v1108_v50 = vrot.slane %v1107_v44, 4  ;;  %v1131_v61 = vrot.slane %v1129_v52, 4  ;;  %v17774_v44 = vld [vmem:[%s17359_s30 + $0x14] sm:$0x1]  ;;  %v1312_v52 = vld [vmem:[%s17359_s30 + $0x10] sm:$0xe] }
  0x84   : > { %15140 = vmatpush3.bf16.msra.mxu1 %v16801_v60  ;;  %v3432_v54 = vrot.slane %v3430_v47, 5  ;;  %v3450_v55 = vshll.u32 %v17774_v44, 16 }
  0x85   : > { %15380 = vmatpush3.bf16.msra.mxu0 %v16802_v62  ;;  %15149 = vmatprep.subr.bf16.mxu1 %v16803_v3  ;;  %v1113_v60 = vsel %vm17546_vm5, %v1108_v50, %v1112_v38  ;;  %v1134_v62 = vrot.slane %v1132_v53, 5  ;;  %v3444_v50 = vshll.u32 %v12883_v43, 16  ;;  %v3429_v53 = vrot.slane %v3427_v46, 4 }
  0x86   : > { %15389 = vmatprep.subr.bf16.mxu0 %v16805_v7 }
  0x87   : > { %15142 = vmatmul.mubr.bf16.vlgmr.msra.gmra.mrb[0].mxu1 %v12470_v14  ;;  %v16820_v14 = vld [vmem:[%s17359_s30 + $0x88] ss:$8 sps:$4 sm:$0xff]  }
  0x88   : > { %15150 = vmatpush3.bf16.msra.mxu1 %v16803_v3  ;;  %15382 = vmatmul.mubr.bf16.vlgmr.msra.gmra.mrb[0].mxu0 %v16806_v12  ;;  %v16812_v3 = vld [vmem:[%s20507_s2 + $0x398] sm:$0xff]   ;;  %v1154_v12 = vrot.slane %v1152_v58, 5  ;;  %v16817_v58 = vld [vmem:[%s20507_s2 + $0x130] sm:$0xff]  }
  0x89   : > { %15390 = vmatpush3.bf16.msra.mxu0 %v16805_v7  ;;  %15151 = vmatprep.subr.bf16.mxu1 %v16807_v15  ;;  %v1148_v7 = vrot.slane %v1146_v57, 5  ;;  %v12483_v57 = vrot.slane %v1312_v52, 9  ;;  %v16824_v52 = vld [vmem:[%s20507_s2 + $0x3c0] sm:$0xff]  }
  0x8a   : > { %15391 = vmatprep.subr.bf16.mxu0 %v16808_v18  ;;  %15385 = vmatprep.mubr.bf16.mxu0 %v16818_v45 }
  0x8b   : > { %v1149_v19 = vor.u32 %v1148_v7, %v1145_v5  ;;  %v17793_v5 = vsel %vm17371_vm2, %v12483_v57, %v1347_v9  ;;  %v17796_v7 = vld [vmem:[%s17359_s30 + $0x1c] sm:$0x1]  ;;  %v16819_v9 = vld [vmem:[%s20507_s2 + $0x3b0] sm:$0xff]   ;;  %v1314_v57 = vld [vmem:[%s17359_s30 + $0x20] sm:$0xe] }
  0x8c   : > { %15152 = vmatpush3.bf16.msra.mxu1 %v16807_v15  ;;  %v12471_v15 = vcombine.low %v1113_v60, %v1127_v4  ;;  %v3443_v60 = vrot.slane %v3441_v49, 4  ;;  %v3452_v4 = vrot.slane %v3450_v55, 5  ;;  %v3464_v35 = vshll.u32 %v17796_v7, 16 }
  0x8d   : > { %15392 = vmatpush3.bf16.msra.mxu0 %v16808_v18  ;;  %15153 = vmatprep.subr.bf16.mxu1 %v16809_v30  ;;  %v1135_v18 = vor.u32 %v1134_v62, %v1131_v61  ;;  %v3446_v61 = vrot.slane %v3444_v50, 5  ;;  %v12484_v62 = vrot.slane %v1313_v56, 9  ;;  %v1367_v55 = vrot.slane %v17620_v39, 5  ;;  %v16832_v39 = vld [vmem:[%s20507_s2 + $0x3e0] sm:$0xff]  }
  0x8e   : > { %15393 = vmatprep.subr.bf16.mxu0 %v16810_v41  ;;  %15145 = vmatprep.mubr.bf16.mxu1 %v12471_v15  ;;  %v3466_v43 = vrot.slane %v3464_v35, 5  ;;  %v16827_v35 = vld [vmem:[%s20507_s2 + $0x150] sm:$0xff]  }
  0x8f   : > { %v1136_v25 = vrot.slane %v1135_v18, 4  ;;  %v3447_v15 = vor.u32 %v3446_v61, %v3443_v60  ;;  %v1352_v18 = vsel %vm17371_vm2, %v12484_v62, %v1351_v17  ;;  %v1315_v60 = vld [vmem:[%s17359_s30 + $0x28] sm:$0xe] }
  0x90   : > { %15154 = vmatpush3.bf16.msra.mxu1 %v16809_v30  ;;  %15386 = vmatmul.mubr.bf16.gmra.mrb[4].mxu0 %v16820_v14  ;;  %v1150_v30 = vrot.slane %v1149_v19, 4  ;;  %v17804_v19 = vld [vmem:[%s17359_s30 + $0x24] sm:$0x1]  ;;  %v16826_v61 = vld [vmem:[%s20507_s2 + $0x3c8] sm:$0xff]   ;;  %v12486_v62 = vrot.slane %v1315_v60, 9 }
  0x91   : > { %15394 = vmatpush3.bf16.msra.mxu0 %v16810_v41  ;;  %15155 = vmatprep.subr.bf16.mxu1 %v16811_v59  ;;  %v1141_v38 = vsel %vm17546_vm5, %v1136_v25, %v1140_v0  ;;  %v1344_v41 = vsel %vm17371_vm2, %v12482_v27, %v1343_v6  ;;  %v3436_v6 = vshll.u32 %v17770_v42, 16  ;;  %v12885_v0 = vld [vmem:[%s17359_s30 + $0x18] sm:$0xf]  ;;  %v3448_v17 = vrot.slane %v3447_v15, 4 }
  0x92   : > { %15395 = vmatprep.subr.bf16.mxu0 %v16812_v3  ;;  %v1155_v45 = vsel %vm17546_vm5, %v1150_v30, %v1154_v12  ;;  %v12505_v10 = vcombine.low %v1340_v40, %v1344_v41  ;;  %v12887_v12 = vld [vmem:[%s17359_s30 + $0x20] sm:$0xf]  ;;  %v3455_v14 = vshrl.u32 %v12885_v0, 16  ;;  %v3458_v21 = vshll.u32 %v12885_v0, 16  ;;  %v12889_v0 = vld [vmem:[%s17359_s30 + $0x28] sm:$0xf] }
  0x93   : > { %v12472_v1 = vcombine.low %v1141_v38, %v1155_v45  ;;  %v3469_v26 = vshrl.u32 %v12887_v12, 16  ;;  %v3478_v38 = vshll.u32 %v17804_v19, 16  ;;  %v3453_v40 = vsel %vm17546_vm5, %v3448_v17, %v3452_v4  ;;  %v17850_v4 = vld [vmem:[%s17359_s30 + $0x2c] sm:$0x1] }
  0x94   : > { %15156 = vmatpush3.bf16.msra.mxu1 %v16811_v59  ;;  %v3438_v59 = vrot.slane %v3436_v6, 5  ;;  %v3457_v25 = vrot.slane %v3455_v14, 4  ;;  %v3460_v27 = vrot.slane %v3458_v21, 5  ;;  %v16823_v6 = vld [vmem:[%s20507_s2 + $0x140] sm:$0xff]   ;;  %v3483_v15 = vshrl.u32 %v12889_v0, 16 }
  0x95   : > { %15396 = vmatpush3.bf16.msra.mxu0 %v16812_v3  ;;  %15157 = vmatprep.subr.bf16.mxu1 %v16813_v24  ;;  %v3433_v3 = vor.u32 %v3432_v54, %v3429_v53  ;;  %v3471_v31 = vrot.slane %v3469_v26, 4  ;;  %v1359_v53 = vrot.slane %v17600_v11, 5  ;;  %v1363_v54 = vrot.slane %v17616_v34, 5  ;;  %v16825_v11 = vld [vmem:[%s20507_s2 + $0x148] sm:$0xff]   ;;  %v16828_v26 = vld [vmem:[%s20507_s2 + $0x3d0] sm:$0xff]  }
  0x96   : > { %15397 = vmatprep.subr.bf16.mxu0 %v16814_v29  ;;  %15146 = vmatmul.mubr.bf16.gmra.mrb[4].mxu1 %v12472_v1  ;;  %v3461_v41 = vor.u32 %v3460_v27, %v3457_v25  ;;  %v3480_v1 = vrot.slane %v3478_v38, 5  ;;  %v12485_v34 = vrot.slane %v1314_v57, 9  ;;  %v3492_v21 = vshll.u32 %v17850_v4, 16  ;;  %v1316_v27 = vld [vmem:[%s17359_s30 + $0x30] sm:$0xe] }
  0x97   : > { %15165 = vmatprep.mubr.bf16.mxu1 %v12505_v10  ;;  %v3434_v23 = vrot.slane %v3433_v3, 4  ;;  %v16822_v10 = vld [vmem:[%s20507_s2 + $0x3b8] sm:$0xff]   ;;  %v1360_v14 = vsel %vm17371_vm2, %v12486_v62, %v1359_v53 }
  0x98   : > { %15158 = vmatpush3.bf16.msra.mxu1 %v16813_v24  ;;  %v12506_v24 = vcombine.low %v17793_v5, %v1352_v18  ;;  %v3462_v46 = vrot.slane %v3461_v41, 4  ;;  %v12891_v5 = vld [vmem:[%s17359_s30 + $0x30] sm:$0xf]  ;;  %v3486_v18 = vshll.u32 %v12889_v0, 16  ;;  %v1317_v41 = vld [vmem:[%s17359_s30 + $0x38] sm:$0xe] }
  0x99   : > { %15398 = vmatpush3.bf16.msra.mxu0 %v16814_v29  ;;  %15159 = vmatprep.subr.bf16.mxu1 %v16815_v33  ;;  %v3472_v29 = vshll.u32 %v12887_v12, 16  ;;  %v3439_v30 = vsel %vm17546_vm5, %v3434_v23, %v3438_v59  ;;  %v1553_v59 = vrot.slane %v17644_v2, 5  ;;  %v17854_v12 = vld [vmem:[%s17359_s30 + $0x34] sm:$0x1]  ;;  %v3497_v23 = vshrl.u32 %v12891_v5, 16  ;;  %v16830_v53 = vld [vmem:[%s20507_s2 + $0x3d8] sm:$0xff]  }
  0x9a   : > { %15399 = vmatprep.subr.bf16.mxu0 %v16816_v13  ;;  %v3467_v49 = vsel %vm17546_vm5, %v3462_v46, %v3466_v43  ;;  %v3506_v25 = vshll.u32 %v17854_v12, 16  ;;  %v3488_v17 = vrot.slane %v3486_v18, 5  ;;  %v12487_v43 = vrot.slane %v1316_v27, 9  ;;  %v12893_v46 = vld [vmem:[%s17359_s30 + $0x38] sm:$0xf]  ;;  %v16835_v2 = vld [vmem:[%s20507_s2 + $0x170] sm:$0xff]  }
  0x9b   : > { %v3474_v45 = vrot.slane %v3472_v29, 5  ;;  %v1557_v29 = vrot.slane %v17664_v32, 5  ;;  %v3499_v38 = vrot.slane %v3497_v23, 4  ;;  %v16838_v32 = vld [vmem:[%s20507_s2 + $0x3f8] sm:$0xff]  }
  0x9c   : > { %15160 = vmatpush3.bf16.msra.mxu1 %v16815_v33  ;;  %v12913_v33 = vcombine.low %v3439_v30, %v3453_v40  ;;  %v16829_v30 = vld [vmem:[%s20507_s2 + $0x158] sm:$0xff]  }
  0x9d   : > { %15400 = vmatpush3.bf16.msra.mxu0 %v16816_v13  ;;  %15161 = vmatprep.subr.bf16.mxu1 %v16817_v58  ;;  %v3475_v47 = vor.u32 %v3474_v45, %v3471_v31  ;;  %v1355_v13 = vrot.slane %v17596_v8, 5  ;;  %v3494_v31 = vrot.slane %v3492_v21, 5 }
  0x9e   : > { %15401 = vmatprep.subr.bf16.mxu0 %v16819_v9  ;;  %15405 = vmatprep.mubr.bf16.mxu0 %v12913_v33  ;;  %v12488_v33 = vrot.slane %v1317_v41, 9  ;;  %v12925_v41 = vld [vmem:[%s17359_s30 + $0x58] sm:$0xf] }
  0x9f   : > { %v3476_v50 = vrot.slane %v3475_v47, 4  ;;  %v1356_v3 = vsel %vm17371_vm2, %v12485_v34, %v1355_v13  ;;  %v17874_v47 = vld [vmem:[%s17359_s30 + $0x3c] sm:$0x1]  ;;  %v1364_v13 = vsel %vm17371_vm2, %v12487_v43, %v1363_v54  ;;  %v16831_v54 = vld [vmem:[%s20507_s2 + $0x160] sm:$0xff]  }
  0xa0   : > { %15162 = vmatpush3.bf16.msra.mxu1 %v16817_v58  ;;  %v1549_v58 = vrot.slane %v17640_v63, 5  ;;  %v3520_v57 = vshll.u32 %v17874_v47, 16  ;;  %v17914_v43 = vld [vmem:[%s17359_s30 + $0x5c] sm:$0x1]  ;;  %v3709_v63 = vshrl.u32 %v12925_v41, 16 }
  0xa1   : > { %15402 = vmatpush3.bf16.msra.mxu0 %v16819_v9  ;;  %15163 = vmatprep.subr.bf16.mxu1 %v16821_v37  ;;  %v3481_v8 = vsel %vm17546_vm5, %v3476_v50, %v3480_v1  ;;  %v12507_v9 = vcombine.low %v1356_v3, %v1360_v14  ;;  %v3511_v50 = vshrl.u32 %v12893_v46, 16 }
  0xa2   : > { %15403 = vmatprep.subr.bf16.mxu0 %v16822_v10  ;;  %v12914_v56 = vcombine.low %v3467_v49, %v3481_v8  ;;  %v17880_v49 = vld [vmem:[%s17359_s30 + $0x44] sm:$0x1]  ;;  %v3522_v18 = vrot.slane %v3520_v57, 5  ;;  %v16836_v57 = vld [vmem:[%s20507_s2 + $0x3f0] sm:$0xff]  }
  0xa3   : > { %v3534_v21 = vshll.u32 %v17880_v49, 16 }
  0xa4   : > { %15164 = vmatpush3.bf16.msra.mxu1 %v16821_v37  ;;  %v3485_v37 = vrot.slane %v3483_v15, 4 }
  0xa5   : > { %15404 = vmatpush3.bf16.msra.mxu0 %v16822_v10  ;;  %15173 = vmatprep.subr.bf16.mxu1 %v16823_v6  ;;  %v3508_v10 = vrot.slane %v3506_v25, 5 }
  0xa6   : > { %15413 = vmatprep.subr.bf16.mxu0 %v16824_v52  ;;  %v3489_v45 = vor.u32 %v3488_v17, %v3485_v37  ;;  %v3536_v17 = vrot.slane %v3534_v21, 5 }
  0xa7   : > { %15166 = vmatmul.mubr.bf16.vlgmr.msra.gmra.mrb[0].mxu1 %v12506_v24  ;;  %v3500_v24 = vshll.u32 %v12891_v5, 16  ;;  %v1561_v5 = vrot.slane %v17668_v36, 5 }
  0xa8   : > { %15174 = vmatpush3.bf16.msra.mxu1 %v16823_v6  ;;  %15406 = vmatmul.mubr.bf16.vlgmr.msra.gmra.mrb[0].mxu0 %v12914_v56  ;;  %v12895_v6 = vld [vmem:[%s17359_s30 + $0x40] sm:$0xf]  ;;  %v3490_v8 = vrot.slane %v3489_v45, 4  ;;  %v1368_v56 = vsel %vm17371_vm2, %v12488_v33, %v1367_v55  ;;  %v17924_v33 = vld [vmem:[%s17359_s30 + $0x64] sm:$0x1] }
  0xa9   : > { %15414 = vmatpush3.bf16.msra.mxu0 %v16824_v52  ;;  %15175 = vmatprep.subr.bf16.mxu1 %v16825_v11  ;;  %v3502_v40 = vrot.slane %v3500_v24, 5  ;;  %v3514_v52 = vshll.u32 %v12893_v46, 16  ;;  %v12508_v34 = vcombine.low %v1364_v13, %v1368_v56  ;;  %v3528_v3 = vshll.u32 %v12895_v6, 16  ;;  %v12518_v24 = vld [vmem:[%s17359_s30 + $0x58] sm:$0xe] }
  0xaa   : > { %15415 = vmatprep.subr.bf16.mxu0 %v16826_v61  ;;  %15169 = vmatprep.mubr.bf16.mxu1 %v12507_v9  ;;  %v3495_v55 = vsel %vm17546_vm5, %v3490_v8, %v3494_v31  ;;  %v12526_v27 = vrot.slane %v12518_v24, 9  ;;  %v1565_v31 = vrot.slane %v17711_v20, 5  ;;  %v12927_v45 = vld [vmem:[%s17359_s30 + $0x60] sm:$0xf]  ;;  %v3712_v46 = vshll.u32 %v12925_v41, 16 }
  0xab   : > { %v3503_v1 = vor.u32 %v3502_v40, %v3499_v38  ;;  %v3516_v62 = vrot.slane %v3514_v52, 5  ;;  %v3530_v23 = vrot.slane %v3528_v3, 5  ;;  %v3732_v8 = vshll.u32 %v17924_v33, 16  ;;  %v12519_v56 = vld [vmem:[%s17359_s30 + $0x60] sm:$0xe] }
  0xac   : > { %15176 = vmatpush3.bf16.msra.mxu1 %v16825_v11  ;;  %v3525_v11 = vshrl.u32 %v12895_v6, 16  ;;  %v3718_v6 = vshll.u32 %v17914_v43, 16  ;;  %v3714_v52 = vrot.slane %v3712_v46, 5 }
  0xad   : > { %15416 = vmatpush3.bf16.msra.mxu0 %v16826_v61  ;;  %15177 = vmatprep.subr.bf16.mxu1 %v16827_v35  ;;  %v3504_v60 = vrot.slane %v3503_v1, 4  ;;  %v3513_v61 = vrot.slane %v3511_v50, 4  ;;  %v3723_v50 = vshrl.u32 %v12927_v45, 16 }
  0xae   : > { %15417 = vmatprep.subr.bf16.mxu0 %v16828_v26  ;;  %v3527_v0 = vrot.slane %v3525_v11, 4 }
  0xaf   : > { %v3509_v14 = vsel %vm17546_vm5, %v3504_v60, %v3508_v10  ;;  %v3517_v15 = vor.u32 %v3516_v62, %v3513_v61  ;;  %15170 = vmatmul.mubr.bf16.gmra.mrb[4].mxu1 %v12508_v34  ;;  %v3720_v60 = vrot.slane %v3718_v6, 5  ;;  %v3725_v34 = vrot.slane %v3723_v50, 4  ;;  %v12520_v61 = vld [vmem:[%s17359_s30 + $0x68] sm:$0xe] }
  0xb0   : > { %15178 = vmatpush3.bf16.msra.mxu1 %v16827_v35  ;;  %v12517_v35 = vld [vmem:[%s17359_s30 + $0x50] sm:$0xe]  ;;  %v12915_v9 = vcombine.low %v3495_v55, %v3509_v14  ;;  %v3531_v38 = vor.u32 %v3530_v23, %v3527_v0  ;;  %v12527_v62 = vrot.slane %v12519_v56, 9  ;;  %v12929_v14 = vld [vmem:[%s17359_s30 + $0x68] sm:$0xf]  ;;  %v12528_v21 = vrot.slane %v12520_v61, 9 }
  0xb1   : > { %15418 = vmatpush3.bf16.msra.mxu0 %v16828_v26  ;;  %15179 = vmatprep.subr.bf16.mxu1 %v16829_v30  ;;  %v12525_v25 = vrot.slane %v12517_v35, 9  ;;  %v16833_v26 = vld [vmem:[%s20507_s2 + $0x168] sm:$0xff]   ;;  %v3518_v37 = vrot.slane %v3517_v15, 4  ;;  %v12931_v35 = vld [vmem:[%s17359_s30 + $0x70] sm:$0xf]  ;;  %v3737_v23 = vshrl.u32 %v12929_v14, 16 }
  0xb2   : > { %15419 = vmatprep.subr.bf16.mxu0 %v16830_v53  ;;  %15409 = vmatprep.mubr.bf16.mxu0 %v12915_v9  ;;  %v3532_v1 = vrot.slane %v3531_v38, 4  ;;  %v17943_v15 = vld [vmem:[%s17359_s30 + $0x6c] sm:$0x1]  ;;  %v17951_v9 = vld [vmem:[%s17359_s30 + $0x74] sm:$0x1]  ;;  %v3751_v38 = vshrl.u32 %v12931_v35, 16 }
  0xb3   : > { %v1550_v40 = vsel %vm17371_vm2, %v12525_v25, %v1549_v58  ;;  %v3523_v10 = vsel %vm17546_vm5, %v3518_v37, %v3522_v18  ;;  %v16834_v58 = vld [vmem:[%s20507_s2 + $0x3e8] sm:$0xff]   ;;  %v1558_v18 = vsel %vm17371_vm2, %v12527_v62, %v1557_v29  ;;  %v3740_v37 = vshll.u32 %v12929_v14, 16  ;;  %v17997_v14 = vld [vmem:[%s17359_s30 + $0x84] sm:$0x1] }
  0xb4   : > { %15180 = vmatpush3.bf16.msra.mxu1 %v16829_v30  ;;  %v1554_v30 = vsel %vm17371_vm2, %v12526_v27, %v1553_v59  ;;  %v3711_v59 = vrot.slane %v3709_v63, 4  ;;  %v3537_v11 = vsel %vm17546_vm5, %v3532_v1, %v3536_v17  ;;  %v3746_v17 = vshll.u32 %v17943_v15, 16 }
  0xb5   : > { %15420 = vmatpush3.bf16.msra.mxu0 %v16830_v53  ;;  %15181 = vmatprep.subr.bf16.mxu1 %v16831_v54  ;;  %v12549_v13 = vcombine.low %v1550_v40, %v1554_v30  ;;  %v3726_v53 = vshll.u32 %v12927_v45, 16  ;;  %v12916_v55 = vcombine.low %v3523_v10, %v3537_v11  ;;  %v1562_v29 = vsel %vm17371_vm2, %v12528_v21, %v1561_v5 }
  0xb6   : > { %15421 = vmatprep.subr.bf16.mxu0 %v16832_v39  ;;  %v3715_v0 = vor.u32 %v3714_v52, %v3711_v59  ;;  %v3739_v27 = vrot.slane %v3737_v23, 4  ;;  %v3754_v40 = vshll.u32 %v12931_v35, 16  ;;  %v12550_v10 = vcombine.low %v1558_v18, %v1562_v29  ;;  %v16839_v59 = vld [vmem:[%s20507_s2 + $0x180] sm:$0xff]  }
  0xb7   : > { %15189 = vmatprep.mubr.bf16.mxu1 %v12549_v13  ;;  %v3728_v3 = vrot.slane %v3726_v53, 5  ;;  %15410 = vmatmul.mubr.bf16.gmra.mrb[4].mxu0 %v12916_v55  ;;  %v3748_v30 = vrot.slane %v3746_v17, 5  ;;  %v3753_v63 = vrot.slane %v3751_v38, 4  ;;  %v3760_v36 = vshll.u32 %v17951_v9, 16  ;;  %v12933_v55 = vld [vmem:[%s17359_s30 + $0x78] sm:$0xf] }
  0xb8   : > { %15182 = vmatpush3.bf16.msra.mxu1 %v16831_v54  ;;  %v3734_v54 = vrot.slane %v3732_v8, 5  ;;  %v3716_v24 = vrot.slane %v3715_v0, 4  ;;  %v3756_v46 = vrot.slane %v3754_v40, 5  ;;  %v1569_v50 = vrot.slane %v17715_v22, 5  ;;  %v16841_v8 = vld [vmem:[%s20507_s2 + $0x188] sm:$0xff]   ;;  %v16843_v0 = vld [vmem:[%s20507_s2 + $0x190] sm:$0xff]  }
  0xb9   : > { %15422 = vmatpush3.bf16.msra.mxu0 %v16832_v39  ;;  %15183 = vmatprep.subr.bf16.mxu1 %v16833_v26  ;;  %v16837_v39 = vld [vmem:[%s20507_s2 + $0x178] sm:$0xff]   ;;  %v3729_v25 = vor.u32 %v3728_v3, %v3725_v34  ;;  %v3762_v6 = vrot.slane %v3760_v36, 5  ;;  %v3765_v35 = vshrl.u32 %v12933_v55, 16  ;;  %v3768_v23 = vshll.u32 %v12933_v55, 16  ;;  %v12523_v17 = vld [vmem:[%s17359_s30 + $0x80] sm:$0xe] }
  0xba   : > { %15423 = vmatprep.subr.bf16.mxu0 %v16834_v58  ;;  %v3721_v41 = vsel %vm17546_vm5, %v3716_v24, %v3720_v60  ;;  %v12521_v60 = vld [vmem:[%s17359_s30 + $0x70] sm:$0xe]  ;;  %v12522_v34 = vld [vmem:[%s17359_s30 + $0x78] sm:$0xe]  ;;  %v17993_v3 = vld [vmem:[%s17359_s30 + $0x7c] sm:$0x1] }
  0xbb   : > { %v3730_v45 = vrot.slane %v3729_v25, 4  ;;  %v12529_v61 = vrot.slane %v12521_v60, 9  ;;  %v12530_v62 = vrot.slane %v12522_v34, 9  ;;  %v3774_v25 = vshll.u32 %v17993_v3, 16  ;;  %v16848_v34 = vld [vmem:[%s20507_s2 + $0x420] sm:$0xff]  }
  0xbc   : > { %15184 = vmatpush3.bf16.msra.mxu1 %v16833_v26  ;;  %v3742_v26 = vrot.slane %v3740_v37, 5  ;;  %v3788_v29 = vshll.u32 %v17997_v14, 16  ;;  %v12531_v38 = vrot.slane %v12523_v17, 9 }
  0xbd   : > { %15424 = vmatpush3.bf16.msra.mxu0 %v16834_v58  ;;  %15185 = vmatprep.subr.bf16.mxu1 %v16835_v2  ;;  %v3735_v5 = vsel %vm17546_vm5, %v3730_v45, %v3734_v54  ;;  %v3757_v58 = vor.u32 %v3756_v46, %v3753_v63  ;;  %v12935_v54 = vld [vmem:[%s17359_s30 + $0x80] sm:$0xf]  ;;  %v1566_v18 = vsel %vm17371_vm2, %v12529_v61, %v1565_v31  ;;  %v3767_v31 = vrot.slane %v3765_v35, 4 }
  0xbe   : > { %15425 = vmatprep.subr.bf16.mxu0 %v16836_v57  ;;  %v3743_v1 = vor.u32 %v3742_v26, %v3739_v27  ;;  %v12957_v13 = vcombine.low %v3721_v41, %v3735_v5  ;;  %v1570_v21 = vsel %vm17371_vm2, %v12530_v62, %v1569_v50  ;;  %v3779_v20 = vshrl.u32 %v12935_v54, 16  ;;  %v12524_v27 = vld [vmem:[%s17359_s30 + $0x88] sm:$0xe] }
  0xbf   : > { %v3758_v53 = vrot.slane %v3757_v58, 4  ;;  %v12551_v24 = vcombine.low %v1566_v18, %v1570_v21  ;;  %v3782_v37 = vshll.u32 %v12935_v54, 16  ;;  %v3776_v40 = vrot.slane %v3774_v25, 5  ;;  %v12937_v26 = vld [vmem:[%s17359_s30 + $0x88] sm:$0xf] }
  0xc0   : > { %15186 = vmatpush3.bf16.msra.mxu1 %v16835_v2  ;;  %v3744_v52 = vrot.slane %v3743_v1, 4  ;;  %15429 = vmatprep.mubr.bf16.mxu0 %v12957_v13  ;;  %v16840_v2 = vld [vmem:[%s20507_s2 + $0x400] sm:$0xff]   ;;  %v3781_v41 = vrot.slane %v3779_v20, 4  ;;  %v3790_v46 = vrot.slane %v3788_v29, 5  ;;  %v12532_v36 = vrot.slane %v12524_v27, 9 }
  0xc1   : > { %15426 = vmatpush3.bf16.msra.mxu0 %v16836_v57  ;;  %15187 = vmatprep.subr.bf16.mxu1 %v16837_v39  ;;  %v3763_v56 = vsel %vm17546_vm5, %v3758_v53, %v3762_v6  ;;  %v16842_v57 = vld [vmem:[%s20507_s2 + $0x408] sm:$0xff]   ;;  %v3784_v45 = vrot.slane %v3782_v37, 5  ;;  %v1577_v5 = vrot.slane %v17732_v51, 5  ;;  %v18025_v6 = vld [vmem:[%s17359_s30 + $0x94] sm:$0x1]  ;;  %v3793_v50 = vshrl.u32 %v12937_v26, 16 }
  0xc2   : > { %15427 = vmatprep.subr.bf16.mxu0 %v16838_v32  ;;  %v3749_v22 = vsel %vm17546_vm5, %v3744_v52, %v3748_v30  ;;  %v16845_v30 = vld [vmem:[%s20507_s2 + $0x198] sm:$0xff]   ;;  %v18019_v1 = vld [vmem:[%s17359_s30 + $0x8c] sm:$0x1]  ;;  %v4000_v35 = vrot.slane %v17770_v42, 5  ;;  %v16855_v25 = vld [vmem:[%s17359_s30 + $0xa0] ss:$8 sps:$4 sm:$0xff]  }
  0xc3   : > { %v12958_v11 = vcombine.low %v3749_v22, %v3763_v56  ;;  %v3785_v13 = vor.u32 %v3784_v45, %v3781_v41  ;;  %v16846_v52 = vld [vmem:[%s20507_s2 + $0x418] sm:$0xff]   ;;  %v1578_v51 = vsel %vm17371_vm2, %v12532_v36, %v1577_v5  ;;  %v3802_v53 = vshll.u32 %v18019_v1, 16  ;;  %v12970_v42 = vld [vmem:[%s17359_s30 + $0x10] sm:$0xe] }
  0xc4   : > { %15188 = vmatpush3.bf16.msra.mxu1 %v16837_v39  ;;  %v16844_v39 = vld [vmem:[%s20507_s2 + $0x410] sm:$0xff]   ;;  %v4004_v20 = vrot.slane %v17774_v44, 5  ;;  %v12978_v27 = vrot.slane %v12970_v42, 9  ;;  %v16850_v44 = vld [vmem:[%s20507_s2 + $0x428] sm:$0xff]   ;;  %v4008_v41 = vrot.slane %v17796_v7, 5 }
  0xc5   : > { %15428 = vmatpush3.bf16.msra.mxu0 %v16838_v32  ;;  %15197 = vmatprep.subr.bf16.mxu1 %v16839_v59  ;;  %v3770_v32 = vrot.slane %v3768_v23, 5  ;;  %v3786_v56 = vrot.slane %v3785_v13, 4  ;;  %v3804_v62 = vrot.slane %v3802_v53, 5  ;;  %v16851_v45 = vld [vmem:[%s20507_s2 + $0x1b0] sm:$0xff]  }
  0xc6   : > { %15437 = vmatprep.subr.bf16.mxu0 %v16840_v2  ;;  %v16858_v53 = vld [vmem:[%s17359_s30 + $0xb0] ss:$8 sps:$4 sm:$0xff]  }
  0xc7   : > { %15190 = vmatmul.mubr.bf16.vlgmr.msra.gmra.mrb[0].mxu1 %v12550_v10  ;;  %v1573_v10 = vrot.slane %v17728_v48, 5  ;;  %v3771_v63 = vor.u32 %v3770_v32, %v3767_v31  ;;  %v12939_v48 = vld [vmem:[%s17359_s30 + $0x90] sm:$0xf]  ;;  %v3791_v18 = vsel %vm17546_vm5, %v3786_v56, %v3790_v46  ;;  %v12969_v32 = vld [vmem:[%s17359_s30 + $0x8] sm:$0xe]  ;;  %v4012_v46 = vrot.slane %v17804_v19, 5 }
  0xc8   : > { %15198 = vmatpush3.bf16.msra.mxu1 %v16839_v59  ;;  %15430 = vmatmul.mubr.bf16.vlgmr.msra.gmra.mrb[0].mxu0 %v12958_v11  ;;  %v3796_v59 = vshll.u32 %v12937_v26, 16  ;;  %v3807_v22 = vshrl.u32 %v12939_v48, 16  ;;  %v3795_v11 = vrot.slane %v3793_v50, 4  ;;  %v3810_v54 = vshll.u32 %v12939_v48, 16  ;;  %v16852_v48 = vld [vmem:[%s20507_s2 + $0x430] sm:$0xff]   ;;  %v16859_v56 = vld [vmem:[%s20507_s2 + $0x1c8] sm:$0xff]  }
  0xc9   : > { %15438 = vmatpush3.bf16.msra.mxu0 %v16840_v2  ;;  %15199 = vmatprep.subr.bf16.mxu1 %v16841_v8  ;;  %v1574_v58 = vsel %vm17371_vm2, %v12531_v38, %v1573_v10  ;;  %v3772_v2 = vrot.slane %v3771_v63, 4  ;;  %v12977_v29 = vrot.slane %v12969_v32, 9  ;;  %v4005_v26 = vsel %vm17371_vm2, %v12978_v27, %v4004_v20  ;;  %v12972_v63 = vld [vmem:[%s17359_s30 + $0x20] sm:$0xe]  ;;  %v16864_v32 = vld [vmem:[%s20507_s2 + $0x458] sm:$0xff]  }
  0xca   : > { %15439 = vmatprep.subr.bf16.mxu0 %v16842_v57  ;;  %15193 = vmatprep.mubr.bf16.mxu1 %v12551_v24  ;;  %v3798_v60 = vrot.slane %v3796_v59, 5  ;;  %v3809_v55 = vrot.slane %v3807_v22, 4  ;;  %v3812_v24 = vrot.slane %v3810_v54, 5  ;;  %v12980_v13 = vrot.slane %v12972_v63, 9  ;;  %v16857_v22 = vld [vmem:[%s20507_s2 + $0x440] sm:$0xff]  }
  0xcb   : > { %v3777_v61 = vsel %vm17546_vm5, %v3772_v2, %v3776_v40  ;;  %v4001_v10 = vsel %vm17371_vm2, %v12977_v29, %v4000_v35  ;;  %v16854_v2 = vld [vmem:[%s20507_s2 + $0x438] sm:$0xff]   ;;  %v4210_v54 = vrot.slane %v17914_v43, 5  ;;  %v16862_v43 = vld [vmem:[%s20507_s2 + $0x450] sm:$0xff]   ;;  %v4218_v20 = vrot.slane %v17943_v15, 5 }
  0xcc   : > { %15200 = vmatpush3.bf16.msra.mxu1 %v16841_v8  ;;  %v16847_v8 = vld [vmem:[%s20507_s2 + $0x1a0] sm:$0xff]   ;;  %v3799_v21 = vor.u32 %v3798_v60, %v3795_v11  ;;  %v12959_v23 = vcombine.low %v3777_v61, %v3791_v18  ;;  %v3813_v31 = vor.u32 %v3812_v24, %v3809_v55  ;;  %v13001_v5 = vcombine.low %v4001_v10, %v4005_v26  ;;  %v12974_v61 = vld [vmem:[%s17359_s30 + $0x30] sm:$0xe]  ;;  %v13013_v15 = vld [vmem:[%s17359_s30 + $0x58] sm:$0xe] }
  0xcd   : > { %15440 = vmatpush3.bf16.msra.mxu0 %v16842_v57  ;;  %15201 = vmatprep.subr.bf16.mxu1 %v16843_v0  ;;  %v12552_v57 = vcombine.low %v1574_v58, %v1578_v51  ;;  %v4013_v19 = vsel %vm17371_vm2, %v12980_v13, %v4012_v46  ;;  %v16856_v51 = vld [vmem:[%s20507_s2 + $0x1c0] sm:$0xff]   ;;  %v4020_v11 = vrot.slane %v17854_v12, 5  ;;  %v4024_v60 = vrot.slane %v17874_v47, 5  ;;  %v12975_v47 = vld [vmem:[%s17359_s30 + $0x38] sm:$0xe]  ;;  %v16867_v13 = vld [vmem:[%s20507_s2 + $0x1e8] sm:$0xff]  }
  0xce   : > { %15441 = vmatprep.subr.bf16.mxu0 %v16844_v39  ;;  %v3800_v37 = vrot.slane %v3799_v21, 4  ;;  %15433 = vmatprep.mubr.bf16.mxu0 %v12959_v23  ;;  %v3814_v40 = vrot.slane %v3813_v31, 4  ;;  %v12982_v55 = vrot.slane %v12974_v61, 9  ;;  %v16869_v18 = vld [vmem:[%s17359_s30 + $0xc0] ss:$8 sps:$4 sm:$0xff]   ;;  %v16861_v21 = vld [vmem:[%s20507_s2 + $0x1d0] sm:$0xff]  }
  0xcf   : > { %15194 = vmatmul.mubr.bf16.gmra.mrb[4].mxu1 %v12552_v57  ;;  %v12973_v57 = vld [vmem:[%s17359_s30 + $0x28] sm:$0xe]  ;;  %v12983_v35 = vrot.slane %v12975_v47, 9  ;;  %v4214_v23 = vrot.slane %v17924_v33, 5  ;;  %v16872_v33 = vld [vmem:[%s17359_s30 + $0xd0] ss:$8 sps:$4 sm:$0xff]  }
  0xd0   : > { %15202 = vmatpush3.bf16.msra.mxu1 %v16843_v0  ;;  %v3816_v0 = vshll.u32 %v18025_v6, 16  ;;  %v3805_v38 = vsel %vm17546_vm5, %v3800_v37, %v3804_v62  ;;  %15213 = vmatprep.mubr.bf16.mxu1 %v16855_v25  ;;  %v12981_v62 = vrot.slane %v12973_v57, 9  ;;  %v13014_v31 = vld [vmem:[%s17359_s30 + $0x60] sm:$0xe]  ;;  %v13021_v29 = vrot.slane %v13013_v15, 9  ;;  %v16873_v61 = vld [vmem:[%s20507_s2 + $0x1f8] sm:$0xff]  }
  0xd1   : > { %15442 = vmatpush3.bf16.msra.mxu0 %v16844_v39  ;;  %15203 = vmatprep.subr.bf16.mxu1 %v16845_v30  ;;  %v16849_v39 = vld [vmem:[%s20507_s2 + $0x1a8] sm:$0xff]   ;;  %v13022_v27 = vrot.slane %v13014_v31, 9  ;;  %v13016_v10 = vld [vmem:[%s17359_s30 + $0x70] sm:$0xe] }
  0xd2   : > { %15443 = vmatprep.subr.bf16.mxu0 %v16846_v52  ;;  %v3818_v17 = vrot.slane %v3816_v0, 5  ;;  %v12976_v0 = vld [vmem:[%s17359_s30 + $0x40] sm:$0xe]  ;;  %v13024_v63 = vrot.slane %v13016_v10, 9  ;;  %v13019_v47 = vld [vmem:[%s17359_s30 + $0x88] sm:$0xe] }
  0xd3   : > { %v12984_v25 = vrot.slane %v12976_v0, 9  ;;  %v12635_v0 = vld [vmem:[%s17359_s30 + $0xa8] sm:$0xf]  ;;  %v16889_v15 = vld [vmem:[%s17359_s30 + $0x110] ss:$8 sps:$4 sm:$0xff]  }
  0xd4   : > { %15204 = vmatpush3.bf16.msra.mxu1 %v16845_v30  ;;  %v12971_v30 = vld [vmem:[%s17359_s30 + $0x18] sm:$0xe]  ;;  %v3819_v36 = vsel %vm17546_vm5, %v3814_v40, %v3818_v17  ;;  %v4211_v40 = vsel %vm17371_vm2, %v13021_v29, %v4210_v54 }
  0xd5   : > { %15444 = vmatpush3.bf16.msra.mxu0 %v16846_v52  ;;  %15205 = vmatprep.subr.bf16.mxu1 %v16847_v8  ;;  %v12979_v7 = vrot.slane %v12971_v30, 9  ;;  %v12960_v58 = vcombine.low %v3805_v38, %v3819_v36  ;;  %v16853_v52 = vld [vmem:[%s20507_s2 + $0x1b8] sm:$0xff]  }
  0xd6   : > { %15445 = vmatprep.subr.bf16.mxu0 %v16848_v34  ;;  %v16863_v17 = vld [vmem:[%s20507_s2 + $0x1d8] sm:$0xff]  }
  0xd7   : > { %v4009_v50 = vsel %vm17371_vm2, %v12979_v7, %v4008_v41  ;;  %15434 = vmatmul.mubr.bf16.gmra.mrb[4].mxu0 %v12960_v58  ;;  %v16875_v38 = vld [vmem:[%s17359_s30 + $0xf0] ss:$8 sps:$4 sm:$0xff]   ;;  %v4215_v41 = vsel %vm17371_vm2, %v13022_v27, %v4214_v23  ;;  %v16868_v58 = vld [vmem:[%s20507_s2 + $0x468] sm:$0xff]   ;;  %v4234_v23 = vrot.slane %v18019_v1, 5 }
  0xd8   : > { %15206 = vmatpush3.bf16.msra.mxu1 %v16847_v8  ;;  %v13002_v59 = vcombine.low %v4009_v50, %v4013_v19  ;;  %15453 = vmatprep.mubr.bf16.mxu0 %v13001_v5  ;;  %v4016_v8 = vrot.slane %v17850_v4, 5  ;;  %v4028_v4 = vrot.slane %v17880_v49, 5  ;;  %v4021_v49 = vsel %vm17371_vm2, %v12982_v55, %v4020_v11  ;;  %v16866_v5 = vld [vmem:[%s20507_s2 + $0x460] sm:$0xff]   ;;  %v17224_v19 = vld [vmem:[%s17359_s30 + $0xac] sm:$0x1] }
  0xd9   : > { %15446 = vmatpush3.bf16.msra.mxu0 %v16848_v34  ;;  %15207 = vmatprep.subr.bf16.mxu1 %v16849_v39  ;;  %v16860_v34 = vld [vmem:[%s20507_s2 + $0x448] sm:$0xff]   ;;  %v13045_v26 = vcombine.low %v4211_v40, %v4215_v41  ;;  %v12637_v27 = vld [vmem:[%s17359_s30 + $0xb0] sm:$0xf] }
  0xda   : > { %15447 = vmatprep.subr.bf16.mxu0 %v16850_v44  ;;  %v4017_v12 = vsel %vm17371_vm2, %v12981_v62, %v4016_v8  ;;  %v4029_v37 = vsel %vm17371_vm2, %v12984_v25, %v4028_v4  ;;  %v13018_v8 = vld [vmem:[%s17359_s30 + $0x80] sm:$0xe]  ;;  %v4226_v62 = vrot.slane %v17993_v3, 5  ;;  %v16874_v4 = vld [vmem:[%s20507_s2 + $0x478] sm:$0xff]   ;;  %v4238_v25 = vrot.slane %v18025_v6, 5  ;;  %v16879_v1 = vld [vmem:[%s20507_s2 + $0x208] sm:$0xff]  }
  0xdb   : > { %v13003_v24 = vcombine.low %v4017_v12, %v4021_v49  ;;  %v13026_v54 = vrot.slane %v13018_v8, 9  ;;  %v16876_v12 = vld [vmem:[%s20507_s2 + $0x200] sm:$0xff]   ;;  %v2124_v41 = vshrl.u32 %v12637_v27, 16  ;;  %v16883_v8 = vld [vmem:[%s20507_s2 + $0x218] sm:$0xff]  }
  0xdc   : > { %15208 = vmatpush3.bf16.msra.mxu1 %v16849_v39  ;;  %v4025_v39 = vsel %vm17371_vm2, %v12983_v35, %v4024_v60  ;;  %v17226_v60 = vld [vmem:[%s17359_s30 + $0xbc] sm:$0x1]  ;;  %v16877_v3 = vld [vmem:[%s20507_s2 + $0x480] sm:$0xff]  }
  0xdd   : > { %15448 = vmatpush3.bf16.msra.mxu0 %v16850_v44  ;;  %15209 = vmatprep.subr.bf16.mxu1 %v16851_v45  ;;  %v13004_v42 = vcombine.low %v4025_v39, %v4029_v37  ;;  %v4222_v44 = vrot.slane %v17951_v9, 5  ;;  %v16865_v9 = vld [vmem:[%s20507_s2 + $0x1e0] sm:$0xff]  }
  0xde   : > { %15449 = vmatprep.subr.bf16.mxu0 %v16852_v48  ;;  %v12633_v49 = vld [vmem:[%s17359_s30 + $0xa0] sm:$0xf] }
  0xdf   : > { %v18148_v36 = vsel %vm17371_vm2, %v13024_v63, %v4222_v44  ;;  %v16878_v35 = vld [vmem:[%s17359_s30 + $0x100] ss:$8 sps:$4 sm:$0xff]   ;;  %v12639_v44 = vld [vmem:[%s17359_s30 + $0xb8] sm:$0xf] }
  0xe0   : > { %15210 = vmatpush3.bf16.msra.mxu1 %v16851_v45  ;;  %v13015_v45 = vld [vmem:[%s17359_s30 + $0x68] sm:$0xe]  ;;  %v2138_v10 = vshrl.u32 %v12639_v44, 16 }
  0xe1   : > { %15450 = vmatpush3.bf16.msra.mxu0 %v16852_v48  ;;  %15211 = vmatprep.subr.bf16.mxu1 %v16853_v52  ;;  %v13023_v30 = vrot.slane %v13015_v45, 9  ;;  %v17223_v48 = vld [vmem:[%s17359_s30 + $0xa4] sm:$0x1]  ;;  %v2127_v45 = vshll.u32 %v12637_v27, 16 }
  0xe2   : > { %15451 = vmatprep.subr.bf16.mxu0 %v16854_v2  ;;  %v2105_v50 = vshll.u32 %v17223_v48, 16 }
  0xe3   : > { %v18144_v46 = vsel %vm17371_vm2, %v13023_v30, %v4218_v20  ;;  %v2113_v20 = vshll.u32 %v12635_v0, 16  ;;  %v16881_v30 = vld [vmem:[%s20507_s2 + $0x210] sm:$0xff]   ;;  %v2129_v48 = vrot.slane %v2127_v45, 5 }
  0xe4   : > { %15212 = vmatpush3.bf16.msra.mxu1 %v16853_v52  ;;  %v13046_v7 = vcombine.low %v18144_v46, %v18148_v36  ;;  %v17225_v52 = vld [vmem:[%s17359_s30 + $0xb4] sm:$0x1] }
  0xe5   : > { %15452 = vmatpush3.bf16.msra.mxu0 %v16854_v2  ;;  %15221 = vmatprep.subr.bf16.mxu1 %v16856_v51  ;;  %v2133_v2 = vshll.u32 %v17225_v52, 16  ;;  %v17229_v45 = vld [vmem:[%s17359_s30 + $0xd4] sm:$0x1] }
  0xe6   : > { %15461 = vmatprep.subr.bf16.mxu0 %v16857_v22 }
  0xe7   : > { %15214 = vmatmul.mubr.bf16.vlgmr.msra.gmra.mrb[0].mxu1 %v16858_v53  ;;  %v16871_v53 = vld [vmem:[%s20507_s2 + $0x470] sm:$0xff]   ;;  %v18176_v11 = vrot.slane %v2133_v2, 5 }
  0xe8   : > { %15222 = vmatpush3.bf16.msra.mxu1 %v16856_v51  ;;  %15454 = vmatmul.mubr.bf16.vlgmr.msra.gmra.mrb[0].mxu0 %v13002_v59  ;;  %v2119_v59 = vshll.u32 %v17224_v19, 16  ;;  %v16870_v51 = vld [vmem:[%s20507_s2 + $0x1f0] sm:$0xff]  }
  0xe9   : > { %15462 = vmatpush3.bf16.msra.mxu0 %v16857_v22  ;;  %15223 = vmatprep.subr.bf16.mxu1 %v16859_v56  ;;  %v13017_v22 = vld [vmem:[%s17359_s30 + $0x78] sm:$0xe]  ;;  %v16882_v19 = vld [vmem:[%s20507_s2 + $0x490] sm:$0xff]  }
  0xea   : > { %15463 = vmatprep.subr.bf16.mxu0 %v16860_v34  ;;  %15217 = vmatprep.mubr.bf16.mxu1 %v16869_v18  ;;  %v18174_v57 = vrot.slane %v2119_v59, 5  ;;  %v13025_v55 = vrot.slane %v13017_v22, 9  ;;  %v4230_v18 = vrot.slane %v17997_v14, 5  ;;  %v2096_v14 = vshrl.u32 %v12633_v49, 16  ;;  %v16892_v59 = vld [vmem:[%s17359_s30 + $0x120] ss:$8 sps:$4 sm:$0xff]  }
  0xeb   : > { %15457 = vmatprep.mubr.bf16.mxu0 %v13003_v24  ;;  %v2110_v24 = vshrl.u32 %v12635_v0, 16  ;;  %v12645_v0 = vld [vmem:[%s17359_s30 + $0xd0] sm:$0xf] }
  0xec   : > { %15224 = vmatpush3.bf16.msra.mxu1 %v16859_v56  ;;  %v18172_v56 = vrot.slane %v2105_v50, 5  ;;  %v4227_v39 = vsel %vm17371_vm2, %v13025_v55, %v4226_v62  ;;  %v4231_v31 = vsel %vm17371_vm2, %v13026_v54, %v4230_v18  ;;  %v2140_v50 = vrot.slane %v2138_v10, 4  ;;  %v16896_v62 = vld [vmem:[%s17359_s30 + $0xa8] ss:$8 sps:$4 sm:$0xff]   ;;  %v16885_v55 = vld [vmem:[%s20507_s2 + $0x220] sm:$0xff]  }
  0xed   : > { %15464 = vmatpush3.bf16.msra.mxu0 %v16860_v34  ;;  %15225 = vmatprep.subr.bf16.mxu1 %v16861_v21  ;;  %v2147_v34 = vshll.u32 %v17226_v60, 16  ;;  %v13047_v63 = vcombine.low %v4227_v39, %v4231_v31  ;;  %v12641_v18 = vld [vmem:[%s17359_s30 + $0xc0] sm:$0xf]  ;;  %v2189_v10 = vshll.u32 %v17229_v45, 16  ;;  %v16902_v45 = vld [vmem:[%s20507_s2 + $0x4d0] sm:$0xff]  }
  0xee   : > { %15465 = vmatprep.subr.bf16.mxu0 %v16862_v43 }
  0xef   : > { %15218 = vmatmul.mubr.bf16.gmra.mrb[4].mxu1 %v16872_v33  ;;  %v2098_v33 = vrot.slane %v2096_v14, 4  ;;  %v2183_v14 = vshll.u32 %v12645_v0, 16 }
  0xf0   : > { %15226 = vmatpush3.bf16.msra.mxu1 %v16861_v21  ;;  %15458 = vmatmul.mubr.bf16.gmra.mrb[4].mxu0 %v13004_v42  ;;  %v13020_v21 = vld [vmem:[%s17359_s30 + $0x90] sm:$0xe]  ;;  %v2115_v42 = vrot.slane %v2113_v20, 5 }
  0xf1   : > { %15466 = vmatpush3.bf16.msra.mxu0 %v16862_v43  ;;  %15227 = vmatprep.subr.bf16.mxu1 %v16863_v17  ;;  %v2099_v43 = vshll.u32 %v12633_v49, 16  ;;  %v13028_v6 = vrot.slane %v13020_v21, 9  ;;  %v2155_v21 = vshll.u32 %v12641_v18, 16  ;;  %v2185_v27 = vrot.slane %v2183_v14, 5 }
  0xf2   : > { %15467 = vmatprep.subr.bf16.mxu0 %v16864_v32  ;;  %15237 = vmatprep.mubr.bf16.mxu1 %v16875_v38  ;;  %v16880_v38 = vld [vmem:[%s20507_s2 + $0x488] sm:$0xff]  }
  0xf3   : > { %15477 = vmatprep.mubr.bf16.mxu0 %v13045_v26  ;;  %v2101_v37 = vrot.slane %v2099_v43, 5  ;;  %v2149_v26 = vrot.slane %v2147_v34, 5  ;;  %v4239_v2 = vsel %vm17371_vm2, %v13028_v6, %v4238_v25  ;;  %v16887_v43 = vld [vmem:[%s20507_s2 + $0x228] sm:$0xff]   ;;  %v2157_v20 = vrot.slane %v2155_v21, 5  ;;  %v17232_v21 = vld [vmem:[%s17359_s30 + $0xfc] sm:$0x1] }
  0xf4   : > { %15228 = vmatpush3.bf16.msra.mxu1 %v16863_v17  ;;  %v2112_v17 = vrot.slane %v2110_v24, 4  ;;  %v16888_v24 = vld [vmem:[%s20507_s2 + $0x4a8] sm:$0xff]  }
  0xf5   : > { %15468 = vmatpush3.bf16.msra.mxu0 %v16864_v32  ;;  %15229 = vmatprep.subr.bf16.mxu1 %v16865_v9  ;;  %v13027_v32 = vrot.slane %v13019_v47, 9  ;;  %v2102_v29 = vor.u32 %v2101_v37, %v2098_v33  ;;  %v2152_v47 = vshrl.u32 %v12641_v18, 16  ;;  %v17228_v6 = vld [vmem:[%s17359_s30 + $0xcc] sm:$0x1] }
  0xf6   : > { %15469 = vmatprep.subr.bf16.mxu0 %v16866_v5  ;;  %v2116_v40 = vor.u32 %v2115_v42, %v2112_v17  ;;  %v2175_v42 = vshll.u32 %v17228_v6, 16 }
  0xf7   : > { %v4235_v52 = vsel %vm17371_vm2, %v13027_v32, %v4234_v23  ;;  %v2180_v23 = vshrl.u32 %v12645_v0, 16  ;;  %v2154_v25 = vrot.slane %v2152_v47, 4  ;;  %v16891_v32 = vld [vmem:[%s20507_s2 + $0x4b0] sm:$0xff]  }
  0xf8   : > { %15230 = vmatpush3.bf16.msra.mxu1 %v16865_v9  ;;  %v2103_v9 = vrot.slane %v2102_v29, 4  ;;  %v13048_v60 = vcombine.low %v4235_v52, %v4239_v2 }
  0xf9   : > { %15470 = vmatpush3.bf16.msra.mxu0 %v16866_v5  ;;  %15231 = vmatprep.subr.bf16.mxu1 %v16867_v13  ;;  %v2141_v5 = vshll.u32 %v12639_v44, 16  ;;  %v2182_v29 = vrot.slane %v2180_v23, 4 }
  0xfa   : > { %15471 = vmatprep.subr.bf16.mxu0 %v16868_v58  ;;  %v2108_v46 = vsel %vm17546_vm5, %v2103_v9, %v18172_v56  ;;  %v16884_v56 = vld [vmem:[%s20507_s2 + $0x498] sm:$0xff]  }
  0xfb   : > { %v2143_v36 = vrot.slane %v2141_v5, 5 }
  0xfc   : > { %15232 = vmatpush3.bf16.msra.mxu1 %v16867_v13  ;;  %v2117_v13 = vrot.slane %v2116_v40, 4  ;;  %v2158_v40 = vor.u32 %v2157_v20, %v2154_v25  ;;  %v16900_v20 = vld [vmem:[%s20507_s2 + $0x4c8] sm:$0xff]  }
  0xfd   : > { %15472 = vmatpush3.bf16.msra.mxu0 %v16868_v58  ;;  %15233 = vmatprep.subr.bf16.mxu1 %v16870_v51  ;;  %v2126_v58 = vrot.slane %v2124_v41, 4  ;;  %v2144_v22 = vor.u32 %v2143_v36, %v2140_v50  ;;  %v16894_v50 = vld [vmem:[%s20507_s2 + $0x4b8] sm:$0xff]   ;;  %v2186_v36 = vor.u32 %v2185_v27, %v2182_v29  ;;  %v16901_v27 = vld [vmem:[%s20507_s2 + $0x250] sm:$0xff]  }
  0xfe   : > { %15473 = vmatprep.subr.bf16.mxu0 %v16871_v53  ;;  %v2159_v2 = vrot.slane %v2158_v40, 4 }
  0xff   : > { %v2187_v18 = vrot.slane %v2186_v36, 4 }
 0x100   : > { %15234 = vmatpush3.bf16.msra.mxu1 %v16870_v51  ;;  %v2130_v51 = vor.u32 %v2129_v48, %v2126_v58  ;;  %v16893_v48 = vld [vmem:[%s20507_s2 + $0x238] sm:$0xff]  }
 0x101   : > { %15474 = vmatpush3.bf16.msra.mxu0 %v16871_v53  ;;  %15235 = vmatprep.subr.bf16.mxu1 %v16873_v61 }
 0x102   : > { %15475 = vmatprep.subr.bf16.mxu0 %v16874_v4  ;;  %v2131_v34 = vrot.slane %v2130_v51, 4  ;;  %v12681_v51 = vld [vmem:[%s17359_s30 + $0x100] sm:$0xf] }
 0x104   : > { %15236 = vmatpush3.bf16.msra.mxu1 %v16873_v61  ;;  %v2136_v61 = vsel %vm17546_vm5, %v2131_v34, %v18176_v11  ;;  %v16886_v11 = vld [vmem:[%s20507_s2 + $0x4a0] sm:$0xff]  }
 0x105   : > { %15476 = vmatpush3.bf16.msra.mxu0 %v16874_v4  ;;  %15245 = vmatprep.subr.bf16.mxu1 %v16876_v12  ;;  %v16895_v34 = vld [vmem:[%s20507_s2 + $0x240] sm:$0xff]  }
 0x106   : > { %15485 = vmatprep.subr.bf16.mxu0 %v16877_v3 }
 0x107   : > { %15238 = vmatmul.mubr.bf16.vlgmr.msra.gmra.mrb[0].mxu1 %v16878_v35  ;;  %v12647_v35 = vld [vmem:[%s17359_s30 + $0xd8] sm:$0xf] }
 0x108   : > { %15246 = vmatpush3.bf16.msra.mxu1 %v16876_v12  ;;  %15478 = vmatmul.mubr.bf16.vlgmr.msra.gmra.mrb[0].mxu0 %v13046_v7  ;;  %v2122_v7 = vsel %vm17546_vm5, %v2117_v13, %v18174_v57  ;;  %v2145_v57 = vrot.slane %v2144_v22, 4  ;;  %v12643_v12 = vld [vmem:[%s17359_s30 + $0xc8] sm:$0xf]  ;;  %v2194_v39 = vshrl.u32 %v12647_v35, 16  ;;  %v2197_v33 = vshll.u32 %v12647_v35, 16 }
 0x109   : > { %15486 = vmatpush3.bf16.msra.mxu0 %v16877_v3  ;;  %15247 = vmatprep.subr.bf16.mxu1 %v16879_v1  ;;  %v12665_v53 = vcombine.low %v2108_v46, %v2122_v7  ;;  %v2166_v3 = vshrl.u32 %v12643_v12, 16  ;;  %v2169_v49 = vshll.u32 %v12643_v12, 16  ;;  %v17231_v12 = vld [vmem:[%s17359_s30 + $0xf4] sm:$0x1] }
 0x10a   : > { %15487 = vmatprep.subr.bf16.mxu0 %v16880_v38  ;;  %15241 = vmatprep.mubr.bf16.mxu1 %v16889_v15  ;;  %v2150_v4 = vsel %vm17546_vm5, %v2145_v57, %v2149_v26  ;;  %v17227_v15 = vld [vmem:[%s17359_s30 + $0xc4] sm:$0x1]  ;;  %v2196_v44 = vrot.slane %v2194_v39, 4  ;;  %v12677_v26 = vld [vmem:[%s17359_s30 + $0xf0] sm:$0xf]  ;;  %v2387_v47 = vshll.u32 %v17231_v12, 16 }
 0x10b   : > { %15481 = vmatprep.mubr.bf16.mxu0 %v13047_v63  ;;  %v18248_v54 = vcombine.low %v2136_v61, %v2150_v4  ;;  %v2168_v37 = vrot.slane %v2166_v3, 4  ;;  %v2171_v17 = vrot.slane %v2169_v49, 5  ;;  %v2161_v31 = vshll.u32 %v17227_v15, 16  ;;  %v17230_v63 = vld [vmem:[%s17359_s30 + $0xdc] sm:$0x1]  ;;  %v16897_v4 = vld [vmem:[%s20507_s2 + $0x4c0] sm:$0xff]  }
 0x10c   : > { %15248 = vmatpush3.bf16.msra.mxu1 %v16879_v1  ;;  %v16890_v1 = vld [vmem:[%s20507_s2 + $0x230] sm:$0xff]   ;;  %v2203_v9 = vshll.u32 %v17230_v63, 16  ;;  %v2378_v5 = vshrl.u32 %v12677_v26, 16  ;;  %v2381_v13 = vshll.u32 %v12677_v26, 16  ;;  %v2406_v61 = vshrl.u32 %v12681_v51, 16  ;;  %v16899_v49 = vld [vmem:[%s20507_s2 + $0x248] sm:$0xff]  }
 0x10d   : > { %15488 = vmatpush3.bf16.msra.mxu0 %v16880_v38  ;;  %15249 = vmatprep.subr.bf16.mxu1 %v16881_v30  ;;  %v2199_v38 = vrot.slane %v2197_v33, 5  ;;  %v2172_v41 = vor.u32 %v2171_v17, %v2168_v37  ;;  %v2401_v3 = vshll.u32 %v17232_v21, 16  ;;  %v2389_v33 = vrot.slane %v2387_v47, 5  ;;  %v16910_v37 = vld [vmem:[%s17359_s30 + $0xc8] ss:$8 sps:$4 sm:$0xff]   ;;  %v16903_v26 = vld [vmem:[%s20507_s2 + $0x258] sm:$0xff]  }
 0x10e   : > { %15489 = vmatprep.subr.bf16.mxu0 %v16882_v19  ;;  %v2383_v22 = vrot.slane %v2381_v13, 5  ;;  %v2205_v57 = vrot.slane %v2203_v9, 5  ;;  %v16912_v63 = vld [vmem:[%s17359_s30 + $0xd8] ss:$8 sps:$4 sm:$0xff]  }
 0x10f   : > { %15242 = vmatmul.mubr.bf16.gmra.mrb[4].mxu1 %v16892_v59  ;;  %v2177_v59 = vrot.slane %v2175_v42, 5  ;;  %v2173_v46 = vrot.slane %v2172_v41, 4  ;;  %v2200_v7 = vor.u32 %v2199_v38, %v2196_v44  ;;  %v2403_v15 = vrot.slane %v2401_v3, 5  ;;  %v17234_v38 = vld [vmem:[%s17359_s30 + $0x10c] sm:$0x1] }
 0x110   : > { %15250 = vmatpush3.bf16.msra.mxu1 %v16881_v30  ;;  %15482 = vmatmul.mubr.bf16.gmra.mrb[4].mxu0 %v13048_v60  ;;  %v12679_v30 = vld [vmem:[%s17359_s30 + $0xf8] sm:$0xf]  ;;  %v2429_v40 = vshll.u32 %v17234_v38, 16  ;;  %v12685_v41 = vld [vmem:[%s17359_s30 + $0x110] sm:$0xf] }
 0x111   : > { %15490 = vmatpush3.bf16.msra.mxu0 %v16882_v19  ;;  %15251 = vmatprep.subr.bf16.mxu1 %v16883_v8  ;;  %v2392_v58 = vshrl.u32 %v12679_v30, 16  ;;  %v2163_v19 = vrot.slane %v2161_v31, 5  ;;  %v2395_v52 = vshll.u32 %v12679_v30, 16  ;;  %v2178_v0 = vsel %vm17546_vm5, %v2173_v46, %v2177_v59  ;;  %v17233_v31 = vld [vmem:[%s17359_s30 + $0x104] sm:$0x1] }
 0x112   : > { %15491 = vmatprep.subr.bf16.mxu0 %v16884_v56  ;;  %15261 = vmatprep.mubr.bf16.mxu1 %v12665_v53  ;;  %v2380_v53 = vrot.slane %v2378_v5, 4  ;;  %v2201_v35 = vrot.slane %v2200_v7, 4  ;;  %v2437_v59 = vshll.u32 %v12685_v41, 16  ;;  %v16915_v46 = vld [vmem:[%s17359_s30 + $0xf8] ss:$8 sps:$4 sm:$0xff]  }
 0x113   : > { %15501 = vmatprep.mubr.bf16.mxu0 %v16896_v62  ;;  %v2397_v60 = vrot.slane %v2395_v52, 5  ;;  %v2409_v62 = vshll.u32 %v12681_v51, 16  ;;  %v17235_v3 = vld [vmem:[%s17359_s30 + $0x114] sm:$0x1]  ;;  %v17237_v38 = vld [vmem:[%s17359_s30 + $0x124] sm:$0x1] }
 0x114   : > { %15252 = vmatpush3.bf16.msra.mxu1 %v16883_v8  ;;  %v2394_v8 = vrot.slane %v2392_v58, 4  ;;  %v2384_v23 = vor.u32 %v2383_v22, %v2380_v53  ;;  %v2206_v42 = vsel %vm17546_vm5, %v2201_v35, %v2205_v57  ;;  %v16904_v58 = vld [vmem:[%s20507_s2 + $0x4d8] sm:$0xff]   ;;  %v12689_v53 = vld [vmem:[%s17359_s30 + $0x120] sm:$0xf] }
 0x115   : > { %15492 = vmatpush3.bf16.msra.mxu0 %v16884_v56  ;;  %15253 = vmatprep.subr.bf16.mxu1 %v16885_v55  ;;  %v2191_v56 = vrot.slane %v2189_v10, 5  ;;  %v2411_v25 = vrot.slane %v2409_v62, 5  ;;  %v12687_v10 = vld [vmem:[%s17359_s30 + $0x118] sm:$0xf]  ;;  %v16905_v22 = vld [vmem:[%s20507_s2 + $0x260] sm:$0xff]  }
 0x116   : > { %15493 = vmatprep.subr.bf16.mxu0 %v16886_v11  ;;  %v2398_v14 = vor.u32 %v2397_v60, %v2394_v8  ;;  %v2385_v17 = vrot.slane %v2384_v23, 4  ;;  %v2448_v36 = vshrl.u32 %v12687_v10, 16  ;;  %v2451_v7 = vshll.u32 %v12687_v10, 16  ;;  %v16906_v8 = vld [vmem:[%s20507_s2 + $0x4e0] sm:$0xff]   ;;  %v17236_v35 = vld [vmem:[%s17359_s30 + $0x11c] sm:$0x1] }
 0x117   : > { %v2192_v6 = vsel %vm17546_vm5, %v2187_v18, %v2191_v56  ;;  %v12691_v56 = vld [vmem:[%s17359_s30 + $0x128] sm:$0xf]  ;;  %v2465_v18 = vshll.u32 %v12689_v53, 16  ;;  %v2457_v23 = vshll.u32 %v17236_v35, 16 }
 0x118   : > { %15254 = vmatpush3.bf16.msra.mxu1 %v16885_v55  ;;  %v16898_v55 = vld [vmem:[%s17359_s30 + $0xb8] ss:$8 sps:$4 sm:$0xff]   ;;  %v12668_v30 = vcombine.low %v2192_v6, %v2206_v42  ;;  %v2390_v9 = vsel %vm17546_vm5, %v2385_v17, %v2389_v33  ;;  %v2450_v62 = vrot.slane %v2448_v36, 4  ;;  %v2476_v12 = vshrl.u32 %v12691_v56, 16  ;;  %v13131_v17 = vld [vmem:[%s17359_s30 + $0xb0] sm:$0xf] }
 0x119   : > { %15494 = vmatpush3.bf16.msra.mxu0 %v16886_v11  ;;  %15255 = vmatprep.subr.bf16.mxu1 %v16887_v43  ;;  %v2164_v11 = vsel %vm17546_vm5, %v2159_v2, %v2163_v19  ;;  %v2434_v19 = vshrl.u32 %v12685_v41, 16  ;;  %v18333_v2 = vrot.slane %v2429_v40, 5  ;;  %v2479_v47 = vshll.u32 %v12691_v56, 16  ;;  %v17238_v41 = vld [vmem:[%s17359_s30 + $0x12c] sm:$0x1] }
 0x11a   : > { %15495 = vmatprep.subr.bf16.mxu0 %v16888_v24  ;;  %v12667_v39 = vcombine.low %v2164_v11, %v2178_v0  ;;  %v2453_v11 = vrot.slane %v2451_v7, 5  ;;  %v16909_v0 = vld [vmem:[%s20507_s2 + $0x270] sm:$0xff]   ;;  %v4771_v6 = vshrl.u32 %v13131_v17, 16  ;;  %v4774_v42 = vshll.u32 %v13131_v17, 16  ;;  %v16916_v7 = vld [vmem:[%s20507_s2 + $0x500] sm:$0xff]  }
 0x11b   : > { %v2436_v60 = vrot.slane %v2434_v19, 4  ;;  %v2481_v33 = vrot.slane %v2479_v47, 5  ;;  %v2471_v40 = vshll.u32 %v17237_v38, 16  ;;  %v18428_v17 = vld [vmem:[%s17359_s30 + $0xc4] sm:$0x1] }
 0x11c   : > { %15256 = vmatpush3.bf16.msra.mxu1 %v16887_v43  ;;  %v12683_v43 = vld [vmem:[%s17359_s30 + $0x108] sm:$0xf]  ;;  %v13139_v38 = vld [vmem:[%s17359_s30 + $0xd0] sm:$0xf] }
 0x11d   : > { %15496 = vmatpush3.bf16.msra.mxu0 %v16888_v24  ;;  %15257 = vmatprep.subr.bf16.mxu1 %v16890_v1  ;;  %v2408_v24 = vrot.slane %v2406_v61, 4  ;;  %v2420_v29 = vshrl.u32 %v12683_v43, 16  ;;  %v16907_v61 = vld [vmem:[%s20507_s2 + $0x268] sm:$0xff]  }
 0x11e   : > { %15497 = vmatprep.subr.bf16.mxu0 %v16891_v32 }
 0x11f   : > { %v2412_v44 = vor.u32 %v2411_v25, %v2408_v24  ;;  %v2467_v24 = vrot.slane %v2465_v18, 5 }
 0x120   : > { %15258 = vmatpush3.bf16.msra.mxu1 %v16890_v1  ;;  %v2399_v1 = vrot.slane %v2398_v14, 4 }
 0x121   : > { %15498 = vmatpush3.bf16.msra.mxu0 %v16891_v32  ;;  %15259 = vmatprep.subr.bf16.mxu1 %v16893_v48  ;;  %v2415_v32 = vshll.u32 %v17233_v31, 16  ;;  %v18331_v52 = vrot.slane %v2412_v44, 4  ;;  %v2459_v44 = vrot.slane %v2457_v23, 5 }
 0x122   : > { %15499 = vmatprep.subr.bf16.mxu0 %v16894_v50  ;;  %v2404_v5 = vsel %vm17546_vm5, %v2399_v1, %v2403_v15  ;;  %v18362_v1 = vld [vmem:[%s17359_s30 + $0xac] sm:$0x1]  ;;  %v18365_v15 = vld [vmem:[%s17359_s30 + $0xb4] sm:$0x1] }
 0x123   : > { %v18326_v13 = vrot.slane %v2415_v32, 5  ;;  %v12709_v51 = vcombine.low %v2390_v9, %v2404_v5 }
 0x124   : > { %15260 = vmatpush3.bf16.msra.mxu1 %v16893_v48  ;;  %v2422_v48 = vrot.slane %v2420_v29, 4  ;;  %v16913_v29 = vld [vmem:[%s20507_s2 + $0x278] sm:$0xff]  }
 0x125   : > { %15500 = vmatpush3.bf16.msra.mxu0 %v16894_v50  ;;  %15269 = vmatprep.subr.bf16.mxu1 %v16895_v34  ;;  %v2418_v10 = vsel %vm17546_vm5, %v18331_v52, %v18326_v13  ;;  %v16917_v52 = vld [vmem:[%s20509_s4] sm:$0xff]  }
 0x126   : > { %15509 = vmatprep.subr.bf16.mxu0 %v16897_v4 }
 0x127   : > { %15262 = vmatmul.mubr.bf16.vlgmr.msra.gmra.mrb[0].mxu1 %v18248_v54  ;;  %v2423_v54 = vshll.u32 %v12683_v43, 16  ;;  %v16911_v43 = vld [vmem:[%s20507_s2 + $0x4f0] sm:$0xff]  }
 0x128   : > { %15270 = vmatpush3.bf16.msra.mxu1 %v16895_v34  ;;  %15502 = vmatmul.mubr.bf16.vlgmr.msra.gmra.mrb[0].mxu0 %v16898_v55  ;;  %v2439_v34 = vrot.slane %v2437_v59, 5  ;;  %v16908_v55 = vld [vmem:[%s20507_s2 + $0x4e8] sm:$0xff]   ;;  %v4773_v59 = vrot.slane %v4771_v6, 4 }
 0x129   : > { %15510 = vmatpush3.bf16.msra.mxu0 %v16897_v4  ;;  %15271 = vmatprep.subr.bf16.mxu1 %v16899_v49  ;;  %v2425_v50 = vrot.slane %v2423_v54, 5  ;;  %v2462_v4 = vshrl.u32 %v12689_v53, 16  ;;  %v16914_v54 = vld [vmem:[%s20507_s2 + $0x4f8] sm:$0xff]  }
 0x12a   : > { %15511 = vmatprep.subr.bf16.mxu0 %v16900_v20  ;;  %15265 = vmatprep.mubr.bf16.mxu1 %v12667_v39  ;;  %v2440_v25 = vor.u32 %v2439_v34, %v2436_v60  ;;  %v2478_v39 = vrot.slane %v2476_v12, 4  ;;  %v16918_v60 = vld [vmem:[%s17359_s30 + $0x108] ss:$8 sps:$4 sm:$0xff]   ;;  %v13135_v12 = vld [vmem:[%s17359_s30 + $0xc0] sm:$0xf] }
 0x12b   : > { %15505 = vmatprep.mubr.bf16.mxu0 %v16910_v37  ;;  %v2426_v57 = vor.u32 %v2425_v50, %v2422_v48  ;;  %v2464_v14 = vrot.slane %v2462_v4, 4  ;;  %v13129_v37 = vld [vmem:[%s17359_s30 + $0xa8] sm:$0xf]  ;;  %v4780_v48 = vshll.u32 %v18365_v15, 16  ;;  %v13133_v4 = vld [vmem:[%s17359_s30 + $0xb8] sm:$0xf] }
 0x12c   : > { %15272 = vmatpush3.bf16.msra.mxu1 %v16899_v49  ;;  %v2443_v49 = vshll.u32 %v17235_v3, 16  ;;  %v4757_v31 = vshrl.u32 %v13129_v37, 16  ;;  %v4760_v32 = vshll.u32 %v13129_v37, 16  ;;  %v2482_v5 = vor.u32 %v2481_v33, %v2478_v39  ;;  %v16920_v34 = vld [vmem:[%s20509_s4 + $0x8] sm:$0xff]   ;;  %v18425_v37 = vld [vmem:[%s17359_s30 + $0xbc] sm:$0x1] }
 0x12d   : > { %15512 = vmatpush3.bf16.msra.mxu0 %v16900_v20  ;;  %15273 = vmatprep.subr.bf16.mxu1 %v16901_v27  ;;  %v2427_v21 = vrot.slane %v2426_v57, 4  ;;  %v2454_v20 = vor.u32 %v2453_v11, %v2450_v62  ;;  %v2468_v9 = vor.u32 %v2467_v24, %v2464_v14  ;;  %v4782_v62 = vrot.slane %v4780_v48, 5  ;;  %v16929_v11 = vld [vmem:[%s17359_s30 + $0x118] ss:$8 sps:$4 sm:$0xff]  }
 0x12e   : > { %15513 = vmatprep.subr.bf16.mxu0 %v16902_v45  ;;  %v4759_v50 = vrot.slane %v4757_v31, 4  ;;  %v4762_v19 = vrot.slane %v4760_v32, 5  ;;  %v4785_v35 = vshrl.u32 %v13133_v4, 16  ;;  %v4788_v23 = vshll.u32 %v13133_v4, 16  ;;  %v16924_v31 = vld [vmem:[%s20509_s4 + $0x18] sm:$0xff]  }
 0x12f   : > { %15266 = vmatmul.mubr.bf16.gmra.mrb[4].mxu1 %v12668_v30  ;;  %v2441_v30 = vrot.slane %v2440_v25, 4  ;;  %v4799_v14 = vshrl.u32 %v13135_v12, 16  ;;  %v4802_v24 = vshll.u32 %v13135_v12, 16  ;;  %v4808_v48 = vshll.u32 %v18428_v17, 16  ;;  %v16930_v12 = vld [vmem:[%s20507_s2 + $0x530] sm:$0xff]  }
 0x130   : > { %15274 = vmatpush3.bf16.msra.mxu1 %v16901_v27  ;;  %15506 = vmatmul.mubr.bf16.gmra.mrb[4].mxu0 %v16912_v63  ;;  %v2445_v27 = vrot.slane %v2443_v49, 5  ;;  %v2455_v63 = vrot.slane %v2454_v20, 4  ;;  %v4763_v56 = vor.u32 %v4762_v19, %v4759_v50  ;;  %v16932_v20 = vld [vmem:[%s17359_s30 + $0x128] ss:$8 sps:$4 sm:$0xff]   ;;  %v4787_v32 = vrot.slane %v4785_v35, 4 }
 0x131   : > { %15514 = vmatpush3.bf16.msra.mxu0 %v16902_v45  ;;  %15275 = vmatprep.subr.bf16.mxu1 %v16903_v26  ;;  %v2485_v45 = vshll.u32 %v17238_v41, 16  ;;  %v4790_v6 = vrot.slane %v4788_v23, 5  ;;  %v18478_v23 = vld [vmem:[%s17359_s30 + $0xe4] sm:$0x1] }
 0x132   : > { %15515 = vmatprep.subr.bf16.mxu0 %v16904_v58  ;;  %15285 = vmatprep.mubr.bf16.mxu1 %v12709_v51  ;;  %v2446_v51 = vsel %vm17546_vm5, %v2441_v30, %v2445_v27  ;;  %v2460_v53 = vsel %vm17546_vm5, %v2455_v63, %v2459_v44  ;;  %v4764_v47 = vrot.slane %v4763_v56, 4  ;;  %v4804_v44 = vrot.slane %v4802_v24, 5  ;;  %v16925_v63 = vld [vmem:[%s20507_s2 + $0x520] sm:$0xff]  }
 0x133   : > { %15525 = vmatprep.mubr.bf16.mxu0 %v16915_v46  ;;  %v4776_v46 = vrot.slane %v4774_v42, 5  ;;  %v2487_v36 = vrot.slane %v2485_v45, 5  ;;  %v12711_v18 = vcombine.low %v2446_v51, %v2460_v53  ;;  %v4801_v42 = vrot.slane %v4799_v14, 4  ;;  %v16926_v45 = vld [vmem:[%s20509_s4 + $0x20] sm:$0xff]   ;;  %v13141_v51 = vld [vmem:[%s17359_s30 + $0xd8] sm:$0xf] }
 0x134   : > { %15276 = vmatpush3.bf16.msra.mxu1 %v16903_v26  ;;  %v2432_v26 = vsel %vm17546_vm5, %v2427_v21, %v18333_v2  ;;  %v2473_v2 = vrot.slane %v2471_v40, 5  ;;  %v4830_v30 = vshll.u32 %v13139_v38, 16  ;;  %v13175_v14 = vld [vmem:[%s17359_s30 + $0x100] sm:$0xf] }
 0x135   : > { %15516 = vmatpush3.bf16.msra.mxu0 %v16904_v58  ;;  %15277 = vmatprep.subr.bf16.mxu1 %v16905_v22  ;;  %v4766_v58 = vshll.u32 %v18362_v1, 16  ;;  %v12710_v13 = vcombine.low %v2418_v10, %v2432_v26  ;;  %v16936_v10 = vld [vmem:[%s18378_s27] ss:$8 sps:$4 sm:$0xff]   ;;  %v4827_v26 = vshrl.u32 %v13139_v38, 16 }
 0x136   : > { %15517 = vmatprep.subr.bf16.mxu0 %v16906_v8 }
 0x137   : > { %v4768_v57 = vrot.slane %v4766_v58, 5  ;;  %v4794_v58 = vshll.u32 %v18425_v37, 16 }
 0x138   : > { %15278 = vmatpush3.bf16.msra.mxu1 %v16905_v22  ;;  %v2469_v22 = vrot.slane %v2468_v9, 4  ;;  %v18446_v9 = vld [vmem:[%s17359_s30 + $0xcc] sm:$0x1] }
 0x139   : > { %15518 = vmatpush3.bf16.msra.mxu0 %v16906_v8  ;;  %15279 = vmatprep.subr.bf16.mxu1 %v16907_v61  ;;  %v2483_v8 = vrot.slane %v2482_v5, 4  ;;  %v4769_v39 = vsel %vm17546_vm5, %v4764_v47, %v4768_v57  ;;  %v18449_v5 = vld [vmem:[%s17359_s30 + $0xd4] sm:$0x1]  ;;  %v4796_v53 = vrot.slane %v4794_v58, 5 }
 0x13a   : > { %15519 = vmatprep.subr.bf16.mxu0 %v16908_v55  ;;  %v2474_v3 = vsel %vm17546_vm5, %v2469_v22, %v2473_v2  ;;  %v4822_v2 = vshll.u32 %v18446_v9, 16  ;;  %v4810_v22 = vrot.slane %v4808_v48, 5 }
 0x13b   : > { %v2488_v49 = vsel %vm17546_vm5, %v2483_v8, %v2487_v36  ;;  %v4836_v36 = vshll.u32 %v18449_v5, 16  ;;  %v13143_v8 = vld [vmem:[%s17359_s30 + $0xe0] sm:$0xf] }
 0x13c   : > { %15280 = vmatpush3.bf16.msra.mxu1 %v16907_v61  ;;  %v4777_v61 = vor.u32 %v4776_v46, %v4773_v59  ;;  %v12712_v25 = vcombine.low %v2474_v3, %v2488_v49  ;;  %v4791_v59 = vor.u32 %v4790_v6, %v4787_v32  ;;  %v4805_v46 = vor.u32 %v4804_v44, %v4801_v42  ;;  %v18474_v3 = vld [vmem:[%s17359_s30 + $0xdc] sm:$0x1]  ;;  %v13173_v49 = vld [vmem:[%s17359_s30 + $0xf8] sm:$0xf] }
 0x13d   : > { %15520 = vmatpush3.bf16.msra.mxu0 %v16908_v55  ;;  %15281 = vmatprep.subr.bf16.mxu1 %v16909_v0  ;;  %v16919_v55 = vld [vmem:[%s20507_s2 + $0x508] sm:$0xff]   ;;  %v18466_v4 = vrot.slane %v4822_v2, 5  ;;  %v4855_v47 = vshrl.u32 %v13143_v8, 16  ;;  %v5053_v6 = vshrl.u32 %v13175_v14, 16  ;;  %v5056_v42 = vshll.u32 %v13175_v14, 16 }
 0x13e   : > { %15521 = vmatprep.subr.bf16.mxu0 %v16911_v43  ;;  %v4778_v21 = vrot.slane %v4777_v61, 4  ;;  %v4806_v56 = vrot.slane %v4805_v46, 4  ;;  %v4864_v44 = vshll.u32 %v18478_v23, 16  ;;  %v16938_v46 = vld [vmem:[%s18378_s27 + $0x10] ss:$8 sps:$4 sm:$0xff]   ;;  %v16940_v2 = vld [vmem:[%s20509_s4 + $0x48] sm:$0xff]  }
 0x140   : > { %15282 = vmatpush3.bf16.msra.mxu1 %v16909_v0  ;;  %v16922_v0 = vld [vmem:[%s20509_s4 + $0x10] sm:$0xff]   ;;  %v4783_v33 = vsel %vm17546_vm5, %v4778_v21, %v4782_v62  ;;  %v4858_v21 = vshll.u32 %v13143_v8, 16 }
 0x141   : > { %15522 = vmatpush3.bf16.msra.mxu0 %v16911_v43  ;;  %15283 = vmatprep.subr.bf16.mxu1 %v16913_v29  ;;  %v16921_v43 = vld [vmem:[%s20507_s2 + $0x510] sm:$0xff]   ;;  %v13161_v27 = vcombine.low %v4769_v39, %v4783_v33  ;;  %v5042_v39 = vshll.u32 %v13173_v49, 16  ;;  %v16933_v33 = vld [vmem:[%s20507_s2 + $0x538] sm:$0xff]  }
 0x142   : > { %15523 = vmatprep.subr.bf16.mxu0 %v16914_v54  ;;  %v16931_v62 = vld [vmem:[%s20509_s4 + $0x30] sm:$0xff]   ;;  %v4860_v32 = vrot.slane %v4858_v21, 5 }
 0x144   : > { %15284 = vmatpush3.bf16.msra.mxu1 %v16913_v29  ;;  %v13137_v29 = vld [vmem:[%s17359_s30 + $0xc8] sm:$0xf] }
 0x145   : > { %15524 = vmatpush3.bf16.msra.mxu0 %v16914_v54  ;;  %15917 = vmatprep.subr.bf16.mxu1 %v16917_v52  ;;  %v16923_v54 = vld [vmem:[%s20507_s2 + $0x518] sm:$0xff]   ;;  %v4813_v40 = vshrl.u32 %v13137_v29, 16  ;;  %v4816_v41 = vshll.u32 %v13137_v29, 16 }
 0x146   : > { %15533 = vmatprep.subr.bf16.mxu0 %v16916_v7  ;;  %v18488_v29 = vld [vmem:[%s17359_s30 + $0xfc] sm:$0x1] }
 0x147   : > { %15286 = vmatmul.mubr.bf16.vlgmr.msra.gmra.mrb[0].mxu1 %v12710_v13  ;;  %v4815_v50 = vrot.slane %v4813_v40, 4  ;;  %v4818_v19 = vrot.slane %v4816_v41, 5  ;;  %v4829_v13 = vrot.slane %v4827_v26, 4  ;;  %v5044_v40 = vrot.slane %v5042_v39, 5 }
 0x148   : > { %15526 = vmatmul.mubr.bf16.vlgmr.msra.gmra.mrb[0].mxu0 %v16918_v60  ;;  %15918 = vmatpush3.bf16.msra.mxu1 %v16917_v52  ;;  %v4832_v52 = vrot.slane %v4830_v30, 5  ;;  %v16927_v60 = vld [vmem:[%s20507_s2 + $0x528] sm:$0xff]   ;;  %v5058_v26 = vrot.slane %v5056_v42, 5  ;;  %v5048_v58 = vshll.u32 %v18488_v29, 16 }
 0x149   : > { %15534 = vmatpush3.bf16.msra.mxu0 %v16916_v7  ;;  %15919 = vmatprep.subr.bf16.mxu1 %v16920_v34  ;;  %v16928_v7 = vld [vmem:[%s20509_s4 + $0x28] sm:$0xff]   ;;  %v4819_v57 = vor.u32 %v4818_v19, %v4815_v50  ;;  %v16937_v50 = vld [vmem:[%s20509_s4 + $0x40] sm:$0xff]  }
 0x14a   : > { %15535 = vmatprep.subr.bf16.mxu0 %v16919_v55  ;;  %15289 = vmatprep.mubr.bf16.mxu1 %v12711_v18  ;;  %v4833_v61 = vor.u32 %v4832_v52, %v4829_v13  ;;  %v4844_v18 = vshll.u32 %v13141_v51, 16  ;;  %v16935_v19 = vld [vmem:[%s20507_s2 + $0x540] sm:$0xff]  }
 0x14b   : > { %15529 = vmatprep.mubr.bf16.mxu0 %v16929_v11  ;;  %v4841_v11 = vshrl.u32 %v13141_v51, 16 }
 0x14c   : > { %15920 = vmatpush3.bf16.msra.mxu1 %v16920_v34  ;;  %v4792_v34 = vrot.slane %v4791_v59, 4  ;;  %v4834_v35 = vrot.slane %v4833_v61, 4  ;;  %v16950_v61 = vld [vmem:[%s18378_s27 + $0x20] ss:$8 sps:$4 sm:$0xff]  }
 0x14d   : > { %15536 = vmatpush3.bf16.msra.mxu0 %v16919_v55  ;;  %15921 = vmatprep.subr.bf16.mxu1 %v16922_v0  ;;  %v18468_v55 = vrot.slane %v4836_v36, 5  ;;  %v4843_v24 = vrot.slane %v4841_v11, 4 }
 0x14e   : > { %15537 = vmatprep.subr.bf16.mxu0 %v16921_v43  ;;  %v4797_v41 = vsel %vm17546_vm5, %v4792_v34, %v4796_v53  ;;  %v5050_v34 = vrot.slane %v5048_v58, 5  ;;  %v18560_v58 = vld [vmem:[%s17359_s30 + $0x124] sm:$0x1] }
 0x14f   : > { %15290 = vmatmul.mubr.bf16.gmra.mrb[4].mxu1 %v12712_v25  ;;  %v4846_v25 = vrot.slane %v4844_v18, 5  ;;  %v4839_v52 = vsel %vm17546_vm5, %v4834_v35, %v18468_v55  ;;  %v16941_v18 = vld [vmem:[%s20507_s2 + $0x550] sm:$0xff]  }
 0x150   : > { %15922 = vmatpush3.bf16.msra.mxu1 %v16922_v0  ;;  %15530 = vmatmul.mubr.bf16.gmra.mrb[4].mxu0 %v16932_v20  ;;  %v4820_v0 = vrot.slane %v4819_v57, 4  ;;  %v5039_v20 = vshrl.u32 %v13173_v49, 16  ;;  %v13177_v57 = vld [vmem:[%s17359_s30 + $0x108] sm:$0xf] }
 0x151   : > { %15538 = vmatpush3.bf16.msra.mxu0 %v16921_v43  ;;  %15923 = vmatprep.subr.bf16.mxu1 %v16924_v31  ;;  %v16934_v43 = vld [vmem:[%s20509_s4 + $0x38] sm:$0xff]   ;;  %v4847_v30 = vor.u32 %v4846_v25, %v4843_v24  ;;  %v5070_v35 = vshll.u32 %v13177_v57, 16 }
 0x152   : > { %15539 = vmatprep.subr.bf16.mxu0 %v16923_v54  ;;  %15549 = vmatprep.mubr.bf16.mxu0 %v13161_v27  ;;  %v4850_v27 = vshll.u32 %v18474_v3, 16  ;;  %v5041_v38 = vrot.slane %v5039_v20, 4  ;;  %v4825_v13 = vsel %vm17546_vm5, %v4820_v0, %v18466_v4  ;;  %v5067_v0 = vshrl.u32 %v13177_v57, 16  ;;  %v16952_v24 = vld [vmem:[%s18378_s27 + $0x30] ss:$8 sps:$4 sm:$0xff]  }
 0x153   : > { %15933 = vmatprep.mubr.bf16.mxu1 %v16936_v10  ;;  %v5055_v10 = vrot.slane %v5053_v6, 4  ;;  %v4848_v8 = vrot.slane %v4847_v30, 4  ;;  %v13163_v4 = vcombine.low %v4825_v13, %v4839_v52  ;;  %v18547_v6 = vld [vmem:[%s17359_s30 + $0x114] sm:$0x1]  ;;  %v13183_v30 = vld [vmem:[%s17359_s30 + $0x120] sm:$0xf] }
 0x154   : > { %15924 = vmatpush3.bf16.msra.mxu1 %v16924_v31  ;;  %v4857_v31 = vrot.slane %v4855_v47, 4  ;;  %v4852_v36 = vrot.slane %v4850_v27, 5  ;;  %v5045_v51 = vor.u32 %v5044_v40, %v5041_v38  ;;  %v5330_v47 = vrot.slane %v18362_v1, 5  ;;  %v16943_v27 = vld [vmem:[%s20507_s2 + $0x558] sm:$0xff]   ;;  %v16945_v52 = vld [vmem:[%s20507_s2 + $0x560] sm:$0xff]  }
 0x155   : > { %15540 = vmatpush3.bf16.msra.mxu0 %v16923_v54  ;;  %15925 = vmatprep.subr.bf16.mxu1 %v16926_v45  ;;  %v18491_v54 = vld [vmem:[%s17359_s30 + $0x104] sm:$0x1]  ;;  %v5059_v53 = vor.u32 %v5058_v26, %v5055_v10  ;;  %v5069_v42 = vrot.slane %v5067_v0, 4  ;;  %v5072_v38 = vrot.slane %v5070_v35, 5  ;;  %v18555_v26 = vld [vmem:[%s17359_s30 + $0x11c] sm:$0x1] }
 0x156   : > { %15541 = vmatprep.subr.bf16.mxu0 %v16925_v63  ;;  %v5062_v48 = vshll.u32 %v18491_v54, 16  ;;  %v5046_v55 = vrot.slane %v5045_v51, 4  ;;  %v4853_v21 = vsel %vm17546_vm5, %v4848_v8, %v4852_v36  ;;  %v5112_v13 = vshll.u32 %v13183_v30, 16  ;;  %v13185_v57 = vld [vmem:[%s17359_s30 + $0x128] sm:$0xf] }
 0x157   : > { %v5060_v11 = vrot.slane %v5059_v53, 4  ;;  %v5342_v51 = vrot.slane %v18428_v17, 5  ;;  %v16948_v53 = vld [vmem:[%s20509_s4 + $0x68] sm:$0xff]   ;;  %v5104_v8 = vshll.u32 %v18555_v26, 16  ;;  %v5346_v35 = vrot.slane %v18446_v9, 5  ;;  %v16962_v17 = vld [vmem:[%s20509_s4 + $0x90] sm:$0xff]  }
 0x158   : > { %15926 = vmatpush3.bf16.msra.mxu1 %v16926_v45  ;;  %v4811_v45 = vsel %vm17546_vm5, %v4806_v56, %v4810_v22  ;;  %v16939_v22 = vld [vmem:[%s20507_s2 + $0x548] sm:$0xff]   ;;  %v5064_v56 = vrot.slane %v5062_v48, 5  ;;  %v5051_v25 = vsel %vm17546_vm5, %v5046_v55, %v5050_v34  ;;  %v13187_v55 = vld [vmem:[%s17359_s30 + $0x130] sm:$0xf] }
 0x159   : > { %15542 = vmatpush3.bf16.msra.mxu0 %v16925_v63  ;;  %15927 = vmatprep.subr.bf16.mxu1 %v16928_v7  ;;  %v4861_v63 = vor.u32 %v4860_v32, %v4857_v31  ;;  %v13162_v59 = vcombine.low %v4797_v41, %v4811_v45  ;;  %v16944_v31 = vld [vmem:[%s20509_s4 + $0x58] sm:$0xff]   ;;  %v16956_v32 = vld [vmem:[%s18378_s27 + $0x48] ss:$8 sps:$4 sm:$0xff]   ;;  %v5137_v0 = vshrl.u32 %v13187_v55, 16 }
 0x15a   : > { %15543 = vmatprep.subr.bf16.mxu0 %v16927_v60  ;;  %v5065_v20 = vsel %vm17546_vm5, %v5060_v11, %v5064_v56  ;;  %v13181_v45 = vld [vmem:[%s17359_s30 + $0x118] sm:$0xf]  ;;  %v5118_v56 = vshll.u32 %v18560_v58, 16  ;;  %v5123_v11 = vshrl.u32 %v13185_v57, 16 }
 0x15b   : > { %v5095_v48 = vshrl.u32 %v13181_v45, 16 }
 0x15c   : > { %15928 = vmatpush3.bf16.msra.mxu1 %v16928_v7  ;;  %v4866_v7 = vrot.slane %v4864_v44, 5  ;;  %v13205_v44 = vcombine.low %v5051_v25, %v5065_v20  ;;  %v16951_v25 = vld [vmem:[%s20509_s4 + $0x70] sm:$0xff]   ;;  %v18590_v20 = vrot.slane %v5104_v8, 5  ;;  %v8747_v8 = vld [vmem:[%s18378_s27 + $0x8] sm:$0xf] }
 0x15d   : > { %15544 = vmatpush3.bf16.msra.mxu0 %v16927_v60  ;;  %15929 = vmatprep.subr.bf16.mxu1 %v16931_v62  ;;  %v4862_v60 = vrot.slane %v4861_v63, 4  ;;  %v5334_v63 = vrot.slane %v18365_v15, 5  ;;  %v5097_v34 = vrot.slane %v5095_v48, 4  ;;  %v5139_v48 = vrot.slane %v5137_v0, 4  ;;  %v16958_v0 = vld [vmem:[%s18378_s27 + $0x58] ss:$8 sps:$4 sm:$0xff]  }
 0x15e   : > { %15545 = vmatprep.subr.bf16.mxu0 %v16930_v12 }
 0x15f   : > { %v4867_v49 = vsel %vm17546_vm5, %v4862_v60, %v4866_v7  ;;  %v5090_v7 = vshll.u32 %v18547_v6, 16  ;;  %v16947_v60 = vld [vmem:[%s20507_s2 + $0x568] sm:$0xff]  }
 0x160   : > { %15930 = vmatpush3.bf16.msra.mxu1 %v16931_v62  ;;  %v13179_v62 = vld [vmem:[%s17359_s30 + $0x110] sm:$0xf]  ;;  %v13164_v39 = vcombine.low %v4853_v21, %v4867_v49  ;;  %v5126_v49 = vshll.u32 %v13185_v57, 16 }
 0x161   : > { %15546 = vmatpush3.bf16.msra.mxu0 %v16930_v12  ;;  %15931 = vmatprep.subr.bf16.mxu1 %v16934_v43  ;;  %v16942_v12 = vld [vmem:[%s20509_s4 + $0x50] sm:$0xff]   ;;  %v5081_v14 = vshrl.u32 %v13179_v62, 16  ;;  %v5092_v21 = vrot.slane %v5090_v7, 5 }
 0x162   : > { %15547 = vmatprep.subr.bf16.mxu0 %v16933_v33 }
 0x163   : > { %v5083_v40 = vrot.slane %v5081_v14, 4  ;;  %v5350_v14 = vrot.slane %v18449_v5, 5 }
 0x164   : > { %15932 = vmatpush3.bf16.msra.mxu1 %v16934_v43  ;;  %v5084_v43 = vshll.u32 %v13179_v62, 16 }
 0x165   : > { %15548 = vmatpush3.bf16.msra.mxu0 %v16933_v33  ;;  %15941 = vmatprep.subr.bf16.mxu1 %v16937_v50  ;;  %v18540_v33 = vld [vmem:[%s17359_s30 + $0x10c] sm:$0x1] }
 0x166   : > { %15557 = vmatprep.subr.bf16.mxu0 %v16935_v19  ;;  %v5086_v41 = vrot.slane %v5084_v43, 5  ;;  %v5076_v10 = vshll.u32 %v18540_v33, 16  ;;  %v5354_v43 = vrot.slane %v18474_v3, 5 }
 0x167   : > { %15934 = vmatmul.mubr.bf16.vlgmr.msra.gmra.mrb[8].mxu1 %v16938_v46  ;;  %v5109_v46 = vshrl.u32 %v13183_v30, 16 }
 0x168   : > { %15550 = vmatmul.mubr.bf16.vlgmr.msra.gmra.mrb[0].mxu0 %v13162_v59  ;;  %15942 = vmatpush3.bf16.msra.mxu1 %v16937_v50  ;;  %v5338_v50 = vrot.slane %v18425_v37, 5  ;;  %v5098_v59 = vshll.u32 %v13181_v45, 16  ;;  %v5087_v36 = vor.u32 %v5086_v41, %v5083_v40  ;;  %v18600_v40 = vrot.slane %v5126_v49, 5  ;;  %v18603_v41 = vld [vmem:[%s17359_s30 + $0x134] sm:$0x1]  ;;  %v16957_v49 = vld [vmem:[%s20509_s4 + $0x80] sm:$0xff]  }
 0x169   : > { %15558 = vmatpush3.bf16.msra.mxu0 %v16935_v19  ;;  %15943 = vmatprep.subr.bf16.mxu1 %v16940_v2  ;;  %v16946_v19 = vld [vmem:[%s20509_s4 + $0x60] sm:$0xff]   ;;  %v5111_v62 = vrot.slane %v5109_v46, 4  ;;  %v13217_v45 = vld [vmem:[%s17359_s30 + $0xa8] sm:$0xe]  ;;  %v16953_v46 = vld [vmem:[%s20507_s2 + $0x578] sm:$0xff]  }
 0x16a   : > { %15559 = vmatprep.subr.bf16.mxu0 %v16939_v22  ;;  %15553 = vmatprep.mubr.bf16.mxu0 %v13163_v4  ;;  %v5114_v4 = vrot.slane %v5112_v13, 5  ;;  %v16970_v37 = vld [vmem:[%s18378_s27 + $0x68] ss:$8 sps:$4 sm:$0xff]  }
 0x16b   : > { %15937 = vmatprep.mubr.bf16.mxu1 %v16950_v61  ;;  %v5100_v61 = vrot.slane %v5098_v59, 5  ;;  %v13225_v59 = vrot.slane %v13217_v45, 9 }
 0x16c   : > { %15944 = vmatpush3.bf16.msra.mxu1 %v16940_v2  ;;  %v5073_v2 = vor.u32 %v5072_v38, %v5069_v42  ;;  %v18598_v38 = vrot.slane %v5123_v11, 4 }
 0x16d   : > { %15560 = vmatpush3.bf16.msra.mxu0 %v16939_v22  ;;  %15945 = vmatprep.subr.bf16.mxu1 %v16942_v12  ;;  %v5078_v22 = vrot.slane %v5076_v10, 5  ;;  %v5101_v42 = vor.u32 %v5100_v61, %v5097_v34  ;;  %v8746_v61 = vld [vmem:[%s18378_s27 + $0x4] sm:$0x1] }
 0x16e   : > { %15561 = vmatprep.subr.bf16.mxu0 %v16941_v18  ;;  %v5129_v11 = vor.u32 %v18600_v40, %v18598_v38 }
 0x16f   : > { %15938 = vmatmul.mubr.bf16.gmra.mrb[12].mxu1 %v16952_v24  ;;  %v16949_v24 = vld [vmem:[%s20507_s2 + $0x570] sm:$0xff]   ;;  %v5102_v7 = vrot.slane %v5101_v42, 4 }
 0x170   : > { %15946 = vmatpush3.bf16.msra.mxu1 %v16942_v12  ;;  %15554 = vmatmul.mubr.bf16.gmra.mrb[4].mxu0 %v13164_v39  ;;  %v5088_v12 = vrot.slane %v5087_v36, 4  ;;  %v18592_v39 = vrot.slane %v5118_v56, 5  ;;  %v16954_v36 = vld [vmem:[%s20509_s4 + $0x78] sm:$0xff]  }
 0x171   : > { %15562 = vmatpush3.bf16.msra.mxu0 %v16941_v18  ;;  %15947 = vmatprep.subr.bf16.mxu1 %v16944_v31  ;;  %v5074_v18 = vrot.slane %v5073_v2, 4  ;;  %v8745_v2 = vld [vmem:[%s18378_s27] sm:$0xf] }
 0x172   : > { %15563 = vmatprep.subr.bf16.mxu0 %v16943_v27  ;;  %15573 = vmatprep.mubr.bf16.mxu0 %v13205_v44  ;;  %v18596_v44 = vld [vmem:[%s17359_s30 + $0x12c] sm:$0x1]  ;;  %v5093_v30 = vsel %vm17546_vm5, %v5088_v12, %v5092_v21  ;;  %v8762_v34 = vshrl.u32 %v8745_v2, 16  ;;  %v8765_v1 = vshll.u32 %v8745_v2, 16  ;;  %v13219_v21 = vld [vmem:[%s17359_s30 + $0xb8] sm:$0xe] }
 0x173   : > { %15957 = vmatprep.mubr.bf16.mxu1 %v16956_v32  ;;  %v5358_v32 = vrot.slane %v18478_v23, 5  ;;  %v5079_v10 = vsel %vm17546_vm5, %v5074_v18, %v5078_v22  ;;  %v8748_v18 = vld [vmem:[%s18378_s27 + $0xc] sm:$0x1]  ;;  %v13227_v38 = vrot.slane %v13219_v21, 9  ;;  %v16972_v21 = vld [vmem:[%s18378_s27 + $0x78] ss:$8 sps:$4 sm:$0xff]  }
 0x174   : > { %15948 = vmatpush3.bf16.msra.mxu1 %v16944_v31  ;;  %v5140_v31 = vshll.u32 %v13187_v55, 16  ;;  %v13206_v56 = vcombine.low %v5079_v10, %v5093_v30  ;;  %v8776_v55 = vshrl.u32 %v8747_v8, 16  ;;  %v8767_v12 = vrot.slane %v8765_v1, 5  ;;  %v16959_v2 = vld [vmem:[%s20507_s2 + $0x588] sm:$0xff]   ;;  %v8750_v1 = vld [vmem:[%s18378_s27 + $0x14] sm:$0x1] }
 0x175   : > { %15564 = vmatpush3.bf16.msra.mxu0 %v16943_v27  ;;  %15949 = vmatprep.subr.bf16.mxu1 %v16946_v19  ;;  %v5115_v27 = vor.u32 %v5114_v4, %v5111_v62  ;;  %v8764_v4 = vrot.slane %v8762_v34, 4  ;;  %v5548_v23 = vrot.slane %v18540_v33, 5  ;;  %v16974_v33 = vld [vmem:[%s20509_s4 + $0xb8] sm:$0xff]  }
 0x176   : > { %15565 = vmatprep.subr.bf16.mxu0 %v16945_v52  ;;  %v5142_v13 = vrot.slane %v5140_v31, 5  ;;  %v8771_v31 = vshll.u32 %v8746_v61, 16  ;;  %v8778_v42 = vrot.slane %v8776_v55, 4  ;;  %v8752_v55 = vld [vmem:[%s18378_s27 + $0x1c] sm:$0x1] }
 0x177   : > { %v5116_v22 = vrot.slane %v5115_v27, 4  ;;  %v13220_v27 = vld [vmem:[%s17359_s30 + $0xc0] sm:$0xe] }
 0x178   : > { %15950 = vmatpush3.bf16.msra.mxu1 %v16946_v19  ;;  %v13218_v19 = vld [vmem:[%s17359_s30 + $0xb0] sm:$0xe]  ;;  %v5143_v15 = vor.u32 %v5142_v13, %v5139_v48  ;;  %v13228_v30 = vrot.slane %v13220_v27, 9  ;;  %v8785_v13 = vshll.u32 %v8748_v18, 16  ;;  %v16963_v27 = vld [vmem:[%s20507_s2 + $0x598] sm:$0xff]  }
 0x179   : > { %15566 = vmatpush3.bf16.msra.mxu0 %v16945_v52  ;;  %15951 = vmatprep.subr.bf16.mxu1 %v16948_v53  ;;  %v13226_v52 = vrot.slane %v13218_v19, 9  ;;  %v5121_v40 = vsel %vm17546_vm5, %v5116_v22, %v18592_v39  ;;  %v8749_v48 = vld [vmem:[%s18378_s27 + $0x10] sm:$0xf]  ;;  %v8751_v39 = vld [vmem:[%s18378_s27 + $0x18] sm:$0xf] }
 0x17a   : > { %15567 = vmatprep.subr.bf16.mxu0 %v16947_v60  ;;  %v5144_v22 = vrot.slane %v5143_v15, 4  ;;  %v18672_v34 = vsel %vm17371_vm2, %v13228_v30, %v5342_v51  ;;  %v13221_v30 = vld [vmem:[%s17359_s30 + $0xc8] sm:$0xe] }
 0x17b   : > { %v18630_v57 = vsel %vm17371_vm2, %v13226_v52, %v5334_v63  ;;  %v8779_v63 = vshll.u32 %v8747_v8, 16  ;;  %v18662_v52 = vsel %vm17371_vm2, %v13227_v38, %v5338_v50  ;;  %v8773_v50 = vrot.slane %v8771_v31, 5  ;;  %v16964_v31 = vld [vmem:[%s20509_s4 + $0x98] sm:$0xff]  }
 0x17c   : > { %15952 = vmatpush3.bf16.msra.mxu1 %v16948_v53  ;;  %v18622_v53 = vsel %vm17371_vm2, %v13225_v59, %v5330_v47  ;;  %v5146_v47 = vshll.u32 %v18603_v41, 16  ;;  %v8768_v59 = vor.u32 %v8767_v12, %v8764_v4  ;;  %v8804_v4 = vshrl.u32 %v8751_v39, 16 }
 0x17d   : > { %15568 = vmatpush3.bf16.msra.mxu0 %v16947_v60  ;;  %15953 = vmatprep.subr.bf16.mxu1 %v16951_v25  ;;  %v5132_v60 = vshll.u32 %v18596_v44, 16  ;;  %v13249_v62 = vcombine.low %v18622_v53, %v18630_v57  ;;  %v8781_v10 = vrot.slane %v8779_v63, 5  ;;  %v8807_v63 = vshll.u32 %v8751_v39, 16  ;;  %v8756_v57 = vld [vmem:[%s18378_s27 + $0x2c] sm:$0x1] }
 0x17e   : > { %15569 = vmatprep.subr.bf16.mxu0 %v16949_v24  ;;  %v5148_v19 = vrot.slane %v5146_v47, 5  ;;  %v8793_v47 = vshll.u32 %v8749_v48, 16  ;;  %v8769_v51 = vrot.slane %v8768_v59, 4 }
 0x17f   : > { %v5134_v45 = vrot.slane %v5132_v60, 5  ;;  %v8782_v8 = vor.u32 %v8781_v10, %v8778_v42  ;;  %v8790_v60 = vshrl.u32 %v8749_v48, 16  ;;  %v13222_v48 = vld [vmem:[%s17359_s30 + $0xd0] sm:$0xe] }
 0x180   : > { %15954 = vmatpush3.bf16.msra.mxu1 %v16951_v25  ;;  %v5107_v25 = vsel %vm17546_vm5, %v5102_v7, %v18590_v20  ;;  %v16960_v20 = vld [vmem:[%s20509_s4 + $0x88] sm:$0xff]   ;;  %v5130_v7 = vrot.slane %v5129_v11, 4  ;;  %v16961_v11 = vld [vmem:[%s20507_s2 + $0x590] sm:$0xff]   ;;  %v5149_v18 = vsel %vm17546_vm5, %v5144_v22, %v5148_v19  ;;  %v8774_v38 = vsel %vm17546_vm5, %v8769_v51, %v8773_v50  ;;  %v8754_v22 = vld [vmem:[%s18378_s27 + $0x24] sm:$0x1] }
 0x181   : > { %15570 = vmatpush3.bf16.msra.mxu0 %v16949_v24  ;;  %15955 = vmatprep.subr.bf16.mxu1 %v16954_v36  ;;  %v16955_v24 = vld [vmem:[%s20507_s2 + $0x580] sm:$0xff]   ;;  %v13207_v61 = vcombine.low %v5107_v25, %v5121_v40  ;;  %v8783_v12 = vrot.slane %v8782_v8, 4  ;;  %v8799_v25 = vshll.u32 %v8750_v1, 16  ;;  %v8809_v40 = vrot.slane %v8807_v63, 5 }
 0x182   : > { %15571 = vmatprep.subr.bf16.mxu0 %v16953_v46  ;;  %v5135_v15 = vsel %vm17546_vm5, %v5130_v7, %v5134_v45  ;;  %v8813_v45 = vshll.u32 %v8752_v55, 16  ;;  %v13229_v19 = vrot.slane %v13221_v30, 9  ;;  %v13230_v59 = vrot.slane %v13222_v48, 9  ;;  %v8753_v7 = vld [vmem:[%s18378_s27 + $0x20] sm:$0xf] }
 0x183   : > { %v13208_v42 = vcombine.low %v5135_v15, %v5149_v18  ;;  %v5540_v8 = vrot.slane %v18488_v29, 5  ;;  %v8821_v1 = vshll.u32 %v8753_v7, 16  ;;  %v8827_v55 = vshll.u32 %v8754_v22, 16 }
 0x184   : > { %15956 = vmatpush3.bf16.msra.mxu1 %v16954_v36  ;;  %v13250_v36 = vcombine.low %v18662_v52, %v18672_v34  ;;  %v18720_v50 = vsel %vm17371_vm2, %v13230_v59, %v5350_v14  ;;  %v8760_v59 = vld [vmem:[%s18378_s27 + $0x3c] sm:$0x1]  ;;  %v5552_v29 = vrot.slane %v18547_v6, 5  ;;  %v16975_v6 = vld [vmem:[%s20507_s2 + $0x5c0] sm:$0xff]  }
 0x185   : > { %15572 = vmatpush3.bf16.msra.mxu0 %v16953_v46  ;;  %15965 = vmatprep.subr.bf16.mxu1 %v16957_v49  ;;  %v8787_v46 = vrot.slane %v8785_v13, 5  ;;  %v18702_v13 = vrot.slane %v8799_v25, 5 }
 0x186   : > { %15581 = vmatprep.subr.bf16.mxu0 %v16955_v24 }
 0x187   : > { %15958 = vmatmul.mubr.bf16.vlgmr.msra.gmra.mrb[8].mxu1 %v16958_v0  ;;  %v8792_v0 = vrot.slane %v8790_v60, 4  ;;  %v8755_v60 = vld [vmem:[%s18378_s27 + $0x28] sm:$0xf] }
 0x188   : > { %15574 = vmatmul.mubr.bf16.vlgmr.msra.gmra.mrb[0].mxu0 %v13206_v56  ;;  %15966 = vmatpush3.bf16.msra.mxu1 %v16957_v49  ;;  %v8795_v56 = vrot.slane %v8793_v47, 5  ;;  %v8806_v49 = vrot.slane %v8804_v4, 4  ;;  %v16965_v47 = vld [vmem:[%s20507_s2 + $0x5a0] sm:$0xff]   ;;  %v8835_v14 = vshll.u32 %v8755_v60, 16  ;;  %v16968_v4 = vld [vmem:[%s20509_s4 + $0xa8] sm:$0xff]  }
 0x189   : > { %15582 = vmatpush3.bf16.msra.mxu0 %v16955_v24  ;;  %15967 = vmatprep.subr.bf16.mxu1 %v16960_v20  ;;  %v8788_v24 = vsel %vm17546_vm5, %v8783_v12, %v8787_v46  ;;  %v8823_v46 = vrot.slane %v8821_v1, 5  ;;  %v13224_v12 = vld [vmem:[%s17359_s30 + $0xe0] sm:$0xe] }
 0x18a   : > { %15583 = vmatprep.subr.bf16.mxu0 %v16959_v2  ;;  %15577 = vmatprep.mubr.bf16.mxu0 %v13207_v61  ;;  %v8796_v10 = vor.u32 %v8795_v56, %v8792_v0  ;;  %v8810_v39 = vor.u32 %v8809_v40, %v8806_v49  ;;  %v8818_v61 = vshrl.u32 %v8753_v7, 16  ;;  %v8837_v18 = vrot.slane %v8835_v14, 5  ;;  %v16967_v0 = vld [vmem:[%s20507_s2 + $0x5a8] sm:$0xff]   ;;  %v8759_v49 = vld [vmem:[%s18378_s27 + $0x38] sm:$0xf] }
 0x18b   : > { %15961 = vmatprep.mubr.bf16.mxu1 %v16970_v37  ;;  %v18714_v37 = vsel %vm17371_vm2, %v13229_v19, %v5346_v35  ;;  %v8832_v35 = vshrl.u32 %v8755_v60, 16  ;;  %v13232_v56 = vrot.slane %v13224_v12, 9  ;;  %v8860_v48 = vshrl.u32 %v8759_v49, 16  ;;  %v16973_v60 = vld [vmem:[%s20507_s2 + $0x5b8] sm:$0xff]  }
 0x18c   : > { %15968 = vmatpush3.bf16.msra.mxu1 %v16960_v20  ;;  %v13865_v20 = vcombine.low %v8774_v38, %v8788_v24  ;;  %v8797_v9 = vrot.slane %v8796_v10, 4  ;;  %v13251_v5 = vcombine.low %v18714_v37, %v18720_v50  ;;  %v8820_v51 = vrot.slane %v8818_v61, 4 }
 0x18d   : > { %15584 = vmatpush3.bf16.msra.mxu0 %v16959_v2  ;;  %15969 = vmatprep.subr.bf16.mxu1 %v16962_v17  ;;  %v16966_v2 = vld [vmem:[%s20509_s4 + $0xa0] sm:$0xff]   ;;  %v8811_v53 = vrot.slane %v8810_v39, 4  ;;  %v18749_v38 = vrot.slane %v8827_v55, 5  ;;  %v8841_v24 = vshll.u32 %v8756_v57, 16  ;;  %v18768_v3 = vsel %vm17371_vm2, %v13232_v56, %v5358_v32  ;;  %v13261_v32 = vld [vmem:[%s17359_s30 + $0xf8] sm:$0xe] }
 0x18e   : > { %15585 = vmatprep.subr.bf16.mxu0 %v16961_v11  ;;  %v8824_v15 = vor.u32 %v8823_v46, %v8820_v51  ;;  %v8802_v25 = vsel %vm17546_vm5, %v8797_v9, %v18702_v13  ;;  %v8863_v7 = vshll.u32 %v8759_v49, 16  ;;  %v8862_v61 = vrot.slane %v8860_v48, 4  ;;  %v13877_v51 = vld [vmem:[%s18378_s27 + $0x48] sm:$0xf]  ;;  %v13878_v57 = vld [vmem:[%s18378_s27 + $0x4c] sm:$0x1] }
 0x18f   : > { %15962 = vmatmul.mubr.bf16.gmra.mrb[12].mxu1 %v16972_v21  ;;  %v8757_v21 = vld [vmem:[%s18378_s27 + $0x30] sm:$0xf]  ;;  %v8869_v46 = vshll.u32 %v8760_v59, 16  ;;  %v13263_v56 = vld [vmem:[%s17359_s30 + $0x108] sm:$0xe]  ;;  %v16976_v49 = vld [vmem:[%s20509_s4 + $0xc0] sm:$0xff]  }
 0x190   : > { %15970 = vmatpush3.bf16.msra.mxu1 %v16962_v17  ;;  %15578 = vmatmul.mubr.bf16.gmra.mrb[4].mxu0 %v13208_v42  ;;  %v8815_v17 = vrot.slane %v8813_v45, 5  ;;  %v5544_v42 = vrot.slane %v18491_v54, 5  ;;  %v8849_v45 = vshll.u32 %v8757_v21, 16  ;;  %v16969_v54 = vld [vmem:[%s20507_s2 + $0x5b0] sm:$0xff]   ;;  %v18762_v30 = vrot.slane %v8824_v15, 4 }
 0x191   : > { %15586 = vmatpush3.bf16.msra.mxu0 %v16961_v11  ;;  %15971 = vmatprep.subr.bf16.mxu1 %v16964_v31  ;;  %v13223_v11 = vld [vmem:[%s17359_s30 + $0xd8] sm:$0xe]  ;;  %v8865_v1 = vrot.slane %v8863_v7, 5  ;;  %v9044_v15 = vshrl.u32 %v13877_v51, 16  ;;  %v9053_v48 = vshll.u32 %v13878_v57, 16 }
 0x192   : > { %15587 = vmatprep.subr.bf16.mxu0 %v16963_v27  ;;  %15597 = vmatprep.mubr.bf16.mxu0 %v13249_v62  ;;  %v8834_v62 = vrot.slane %v8832_v35, 4  ;;  %v13231_v63 = vrot.slane %v13223_v11, 9  ;;  %v8816_v10 = vsel %vm17546_vm5, %v8811_v53, %v8815_v17  ;;  %v8851_v39 = vrot.slane %v8849_v45, 5  ;;  %v13880_v11 = vld [vmem:[%s18378_s27 + $0x54] sm:$0x1] }
 0x193   : > { %15981 = vmatprep.mubr.bf16.mxu1 %v13865_v20  ;;  %v18775_v22 = vcombine.low %v8802_v25, %v8816_v10  ;;  %v8830_v35 = vsel %vm17546_vm5, %v18762_v30, %v18749_v38  ;;  %v13271_v45 = vrot.slane %v13263_v56, 9  ;;  %v13882_v57 = vld [vmem:[%s18378_s27 + $0x5c] sm:$0x1] }
 0x194   : > { %15972 = vmatpush3.bf16.msra.mxu1 %v16964_v31  ;;  %v8846_v31 = vshrl.u32 %v8757_v21, 16  ;;  %v18755_v40 = vsel %vm17371_vm2, %v13231_v63, %v5354_v43  ;;  %v8758_v43 = vld [vmem:[%s18378_s27 + $0x34] sm:$0x1]  ;;  %v8838_v20 = vor.u32 %v8837_v18, %v8834_v62  ;;  %v13879_v62 = vld [vmem:[%s18378_s27 + $0x50] sm:$0xf]  ;;  %v9047_v63 = vshll.u32 %v13877_v51, 16 }
 0x195   : > { %15588 = vmatpush3.bf16.msra.mxu0 %v16963_v27  ;;  %15973 = vmatprep.subr.bf16.mxu1 %v16966_v2  ;;  %v16971_v27 = vld [vmem:[%s20509_s4 + $0xb0] sm:$0xff]   ;;  %v13252_v19 = vcombine.low %v18755_v40, %v18768_v3  ;;  %v8855_v17 = vshll.u32 %v8758_v43, 16  ;;  %v8866_v21 = vor.u32 %v8865_v1, %v8862_v61  ;;  %v9061_v25 = vshll.u32 %v13879_v62, 16  ;;  %v13883_v51 = vld [vmem:[%s18378_s27 + $0x60] sm:$0xf] }
 0x196   : > { %15589 = vmatprep.subr.bf16.mxu0 %v16965_v47  ;;  %v8848_v13 = vrot.slane %v8846_v31, 4  ;;  %v8839_v14 = vrot.slane %v8838_v20, 4  ;;  %v9049_v38 = vrot.slane %v9047_v63, 5  ;;  %v9067_v20 = vshll.u32 %v13880_v11, 16  ;;  %v16984_v63 = vld [vmem:[%s20509_s4 + $0xe0] sm:$0xff]  }
 0x197   : > { %v18818_v59 = vsel %vm17371_vm2, %v13271_v45, %v5548_v23  ;;  %v16977_v23 = vld [vmem:[%s20507_s2 + $0x5c8] sm:$0xff]   ;;  %v9089_v11 = vshll.u32 %v13883_v51, 16  ;;  %v9081_v56 = vshll.u32 %v13882_v57, 16  ;;  %v13887_v45 = vld [vmem:[%s18378_s27 + $0x70] sm:$0xf] }
 0x198   : > { %15974 = vmatpush3.bf16.msra.mxu1 %v16966_v2  ;;  %v13262_v2 = vld [vmem:[%s17359_s30 + $0x100] sm:$0xe]  ;;  %v8852_v18 = vor.u32 %v8851_v39, %v8848_v13  ;;  %v8867_v13 = vrot.slane %v8866_v21, 4  ;;  %v13892_v57 = vld [vmem:[%s18378_s27 + $0x84] sm:$0x1] }
 0x199   : > { %15590 = vmatpush3.bf16.msra.mxu0 %v16965_v47  ;;  %15975 = vmatprep.subr.bf16.mxu1 %v16968_v4  ;;  %v13269_v47 = vrot.slane %v13261_v32, 9  ;;  %v13270_v9 = vrot.slane %v13262_v2, 9  ;;  %v16978_v2 = vld [vmem:[%s20509_s4 + $0xc8] sm:$0xff]   ;;  %v13266_v21 = vld [vmem:[%s17359_s30 + $0x120] sm:$0xe]  ;;  %v9091_v40 = vrot.slane %v9089_v11, 5 }
 0x19a   : > { %15591 = vmatprep.subr.bf16.mxu0 %v16967_v0  ;;  %v8853_v43 = vrot.slane %v8852_v18, 4  ;;  %v13265_v18 = vld [vmem:[%s17359_s30 + $0x118] sm:$0xe] }
 0x19b   : > { %v18794_v55 = vsel %vm17371_vm2, %v13269_v47, %v5540_v8  ;;  %v18798_v53 = vsel %vm17371_vm2, %v13270_v9, %v5544_v42  ;;  %v9046_v8 = vrot.slane %v9044_v15, 4  ;;  %v8857_v42 = vrot.slane %v8855_v17, 5  ;;  %v13884_v15 = vld [vmem:[%s18378_s27 + $0x64] sm:$0x1]  ;;  %v16990_v11 = vld [vmem:[%s20509_s4 + $0xf8] sm:$0xff]  }
 0x19c   : > { %15976 = vmatpush3.bf16.msra.mxu1 %v16968_v4  ;;  %v8843_v4 = vrot.slane %v8841_v24, 5  ;;  %v13293_v12 = vcombine.low %v18794_v55, %v18798_v53  ;;  %v13264_v24 = vld [vmem:[%s17359_s30 + $0x110] sm:$0xe]  ;;  %v9055_v47 = vrot.slane %v9053_v48, 5  ;;  %v9069_v9 = vrot.slane %v9067_v20, 5 }
 0x19d   : > { %15592 = vmatpush3.bf16.msra.mxu0 %v16967_v0  ;;  %15977 = vmatprep.subr.bf16.mxu1 %v16971_v27  ;;  %v9058_v0 = vshrl.u32 %v13879_v62, 16  ;;  %v13272_v30 = vrot.slane %v13264_v24, 9  ;;  %v9050_v39 = vor.u32 %v9049_v38, %v9046_v8  ;;  %v16981_v62 = vld [vmem:[%s20507_s2 + $0x5d8] sm:$0xff]   ;;  %v13273_v8 = vrot.slane %v13265_v18, 9  ;;  %v13885_v24 = vld [vmem:[%s18378_s27 + $0x68] sm:$0xf] }
 0x19e   : > { %15593 = vmatprep.subr.bf16.mxu0 %v16969_v54  ;;  %v8844_v31 = vsel %vm17546_vm5, %v8839_v14, %v8843_v4  ;;  %v16979_v14 = vld [vmem:[%s20507_s2 + $0x5d0] sm:$0xff]   ;;  %v9095_v3 = vshll.u32 %v13884_v15, 16  ;;  %v9117_v55 = vshll.u32 %v13887_v45, 16  ;;  %v5564_v53 = vrot.slane %v18596_v44, 5  ;;  %v13267_v20 = vld [vmem:[%s17359_s30 + $0x128] sm:$0xe] }
 0x19f   : > { %v9060_v10 = vrot.slane %v9058_v0, 4  ;;  %v18822_v32 = vsel %vm17371_vm2, %v13272_v30, %v5552_v29  ;;  %v13867_v1 = vcombine.low %v8830_v35, %v8844_v31  ;;  %v9051_v35 = vrot.slane %v9050_v39, 4  ;;  %v16986_v30 = vld [vmem:[%s20509_s4 + $0xe8] sm:$0xff]  }
 0x1a0   : > { %15978 = vmatpush3.bf16.msra.mxu1 %v16971_v27  ;;  %v8871_v27 = vrot.slane %v8869_v46, 5  ;;  %v13294_v61 = vcombine.low %v18818_v59, %v18822_v32  ;;  %v5556_v0 = vrot.slane %v18555_v26, 5  ;;  %v16983_v26 = vld [vmem:[%s20507_s2 + $0x5e0] sm:$0xff]   ;;  %v18898_v48 = vrot.slane %v9081_v56, 5  ;;  %v16995_v59 = vld [vmem:[%s20507_s2 + $0x610] sm:$0xff]  }
 0x1a1   : > { %15594 = vmatpush3.bf16.msra.mxu0 %v16969_v54  ;;  %15979 = vmatprep.subr.bf16.mxu1 %v16974_v33  ;;  %v9063_v54 = vrot.slane %v9061_v25, 5  ;;  %v9056_v37 = vsel %vm17546_vm5, %v9051_v35, %v9055_v47  ;;  %v5560_v25 = vrot.slane %v18560_v58, 5  ;;  %v18902_v39 = vrot.slane %v9095_v3, 5 }
 0x1a2   : > { %15595 = vmatprep.subr.bf16.mxu0 %v16973_v60  ;;  %v8872_v4 = vsel %vm17546_vm5, %v8867_v13, %v8871_v27  ;;  %v18875_v38 = vsel %vm17371_vm2, %v13273_v8, %v5556_v0  ;;  %v9100_v27 = vshrl.u32 %v13885_v24, 16  ;;  %v5568_v13 = vrot.slane %v18603_v41, 5  ;;  %v16987_v41 = vld [vmem:[%s20507_s2 + $0x5f0] sm:$0xff]  }
 0x1a3   : > { %v9064_v7 = vor.u32 %v9063_v54, %v9060_v10  ;;  %v9103_v10 = vshll.u32 %v13885_v24, 16  ;;  %v9114_v54 = vshrl.u32 %v13887_v45, 16  ;;  %v16992_v24 = vld [vmem:[%s20509_s4 + $0x100] sm:$0xff]  }
 0x1a4   : > { %15980 = vmatpush3.bf16.msra.mxu1 %v16974_v33  ;;  %v13881_v33 = vld [vmem:[%s18378_s27 + $0x58] sm:$0xf]  ;;  %v9102_v47 = vrot.slane %v9100_v27, 4 }
 0x1a5   : > { %15596 = vmatpush3.bf16.msra.mxu0 %v16973_v60  ;;  %15989 = vmatprep.subr.bf16.mxu1 %v16976_v49  ;;  %v16980_v60 = vld [vmem:[%s20509_s4 + $0xd0] sm:$0xff]   ;;  %v9065_v17 = vrot.slane %v9064_v7, 4  ;;  %v9072_v52 = vshrl.u32 %v13881_v33, 16  ;;  %v9075_v34 = vshll.u32 %v13881_v33, 16  ;;  %v13886_v7 = vld [vmem:[%s18378_s27 + $0x6c] sm:$0x1] }
 0x1a6   : > { %15605 = vmatprep.subr.bf16.mxu0 %v16975_v6  ;;  %v9116_v35 = vrot.slane %v9114_v54, 4  ;;  %v9109_v15 = vshll.u32 %v13886_v7, 16 }
 0x1a7   : > { %15982 = vmatmul.mubr.bf16.vlgmr.msra.gmra.mrb[8].mxu1 %v18775_v22  ;;  %v8858_v22 = vsel %vm17546_vm5, %v8853_v43, %v8857_v42  ;;  %v9070_v50 = vsel %vm17546_vm5, %v9065_v17, %v9069_v9  ;;  %v9074_v31 = vrot.slane %v9072_v52, 4  ;;  %v9077_v42 = vrot.slane %v9075_v34, 5  ;;  %v13890_v52 = vld [vmem:[%s18378_s27 + $0x7c] sm:$0x1] }
 0x1a8   : > { %15598 = vmatmul.mubr.bf16.vlgmr.msra.gmra.mrb[0].mxu0 %v13250_v36  ;;  %15990 = vmatpush3.bf16.msra.mxu1 %v16976_v49  ;;  %v16982_v36 = vld [vmem:[%s20509_s4 + $0xd8] sm:$0xff]   ;;  %v13868_v46 = vcombine.low %v8858_v22, %v8872_v4  ;;  %v13909_v29 = vcombine.low %v9056_v37, %v9070_v50  ;;  %v13274_v49 = vrot.slane %v13266_v21, 9  ;;  %v9105_v9 = vrot.slane %v9103_v10, 5  ;;  %v16988_v4 = vld [vmem:[%s20509_s4 + $0xf0] sm:$0xff]  }
 0x1a9   : > { %15606 = vmatpush3.bf16.msra.mxu0 %v16975_v6  ;;  %15991 = vmatprep.subr.bf16.mxu1 %v16978_v2  ;;  %v9078_v43 = vor.u32 %v9077_v42, %v9074_v31  ;;  %v9119_v17 = vrot.slane %v9117_v55, 5  ;;  %v16989_v31 = vld [vmem:[%s20507_s2 + $0x5f8] sm:$0xff]   ;;  %v9111_v45 = vrot.slane %v9109_v15, 5  ;;  %v17027_v15 = vld [vmem:[%s17359_s30 + $0x40] ss:$8 sps:$4 sm:$0xff]  }
 0x1aa   : > { %15607 = vmatprep.subr.bf16.mxu0 %v16977_v23  ;;  %15601 = vmatprep.mubr.bf16.mxu0 %v13251_v5  ;;  %v9086_v5 = vshrl.u32 %v13883_v51, 16  ;;  %v9106_v8 = vor.u32 %v9105_v9, %v9102_v47  ;;  %v17009_v47 = vld [vmem:[%s18378_s27 + $0x90] ss:$8 sps:$4 sm:$0xff]   ;;  %v17001_v9 = vld [vmem:[%s20507_s2 + $0x628] sm:$0xff]  }
 0x1ab   : > { %15985 = vmatprep.mubr.bf16.mxu1 %v13867_v1  ;;  %v13889_v1 = vld [vmem:[%s18378_s27 + $0x78] sm:$0xf]  ;;  %v9120_v0 = vor.u32 %v9119_v17, %v9116_v35  ;;  %v17008_v35 = vld [vmem:[%s20507_s2 + $0x640] sm:$0xff]  }
 0x1ac   : > { %15992 = vmatpush3.bf16.msra.mxu1 %v16978_v2  ;;  %v9088_v58 = vrot.slane %v9086_v5, 4  ;;  %v13888_v2 = vld [vmem:[%s18378_s27 + $0x74] sm:$0x1]  ;;  %v9128_v22 = vshrl.u32 %v13889_v1, 16  ;;  %v9131_v34 = vshll.u32 %v13889_v1, 16  ;;  %v9107_v10 = vrot.slane %v9106_v8, 4 }
 0x1ad   : > { %15608 = vmatpush3.bf16.msra.mxu0 %v16977_v23  ;;  %15993 = vmatprep.subr.bf16.mxu1 %v16980_v60  ;;  %v13268_v23 = vld [vmem:[%s17359_s30 + $0x130] sm:$0xe]  ;;  %v9123_v18 = vshll.u32 %v13888_v2, 16  ;;  %v9121_v54 = vrot.slane %v9120_v0, 4  ;;  %v17012_v17 = vld [vmem:[%s18378_s27 + $0xa0] ss:$8 sps:$4 sm:$0xff]  }
 0x1ae   : > { %15609 = vmatprep.subr.bf16.mxu0 %v16979_v14  ;;  %v9092_v44 = vor.u32 %v9091_v40, %v9088_v58  ;;  %v13276_v33 = vrot.slane %v13268_v23, 9  ;;  %v9130_v50 = vrot.slane %v9128_v22, 4  ;;  %v9133_v5 = vrot.slane %v9131_v34, 5  ;;  %v16991_v40 = vld [vmem:[%s20507_s2 + $0x600] sm:$0xff]   ;;  %v16996_v23 = vld [vmem:[%s20509_s4 + $0x110] sm:$0xff]   ;;  %v17006_v22 = vld [vmem:[%s20509_s4 + $0x138] sm:$0xff]  }
 0x1af   : > { %15986 = vmatmul.mubr.bf16.gmra.mrb[12].mxu1 %v13868_v46  ;;  %v17007_v1 = vld [vmem:[%s17359_s30 + $0x10] ss:$8 sps:$4 sm:$0xff]   ;;  %v17014_v34 = vld [vmem:[%s20509_s4 + $0x148] sm:$0xff]  }
 0x1b0   : > { %15994 = vmatpush3.bf16.msra.mxu1 %v16980_v60  ;;  %15602 = vmatmul.mubr.bf16.gmra.mrb[4].mxu0 %v13252_v19  ;;  %v18887_v19 = vsel %vm17371_vm2, %v13274_v49, %v5560_v25  ;;  %v13275_v60 = vrot.slane %v13267_v20, 9  ;;  %v18922_v46 = vsel %vm17371_vm2, %v13276_v33, %v5568_v13  ;;  %v9093_v21 = vrot.slane %v9092_v44, 4  ;;  %v16994_v13 = vld [vmem:[%s20509_s4 + $0x108] sm:$0xff]   ;;  %v17004_v33 = vld [vmem:[%s20509_s4 + $0x130] sm:$0xff]  }
 0x1b1   : > { %15610 = vmatpush3.bf16.msra.mxu0 %v16979_v14  ;;  %15995 = vmatprep.subr.bf16.mxu1 %v16982_v36  ;;  %v13295_v6 = vcombine.low %v18875_v38, %v18887_v19  ;;  %v13891_v14 = vld [vmem:[%s18378_s27 + $0x80] sm:$0xf]  ;;  %v9137_v25 = vshll.u32 %v13890_v52, 16  ;;  %v9151_v49 = vshll.u32 %v13892_v57, 16  ;;  %v9134_v42 = vor.u32 %v9133_v5, %v9130_v50  ;;  %v16993_v44 = vld [vmem:[%s20507_s2 + $0x608] sm:$0xff]   ;;  %v17016_v57 = vld [vmem:[%s20509_s4 + $0x150] sm:$0xff]  }
 0x1b2   : > { %15611 = vmatprep.subr.bf16.mxu0 %v16981_v62  ;;  %15621 = vmatprep.mubr.bf16.mxu0 %v13293_v12  ;;  %v16985_v12 = vld [vmem:[%s20507_s2 + $0x5e8] sm:$0xff]   ;;  %v18917_v51 = vsel %vm17371_vm2, %v13275_v60, %v5564_v53  ;;  %v9098_v27 = vsel %vm17546_vm5, %v9093_v21, %v18902_v39  ;;  %v9112_v20 = vsel %vm17546_vm5, %v9107_v10, %v9111_v45  ;;  %v16998_v60 = vld [vmem:[%s20509_s4 + $0x118] sm:$0xff]   ;;  %v17000_v38 = vld [vmem:[%s20509_s4 + $0x120] sm:$0xff]  }
 0x1b3   : > { %16005 = vmatprep.mubr.bf16.mxu1 %v13909_v29  ;;  %v13296_v37 = vcombine.low %v18917_v51, %v18922_v46  ;;  %v9145_v29 = vshll.u32 %v13891_v14, 16  ;;  %v9139_v55 = vrot.slane %v9137_v25, 5  ;;  %v9153_v53 = vrot.slane %v9151_v49, 5  ;;  %v16999_v19 = vld [vmem:[%s20507_s2 + $0x620] sm:$0xff]   ;;  %v17013_v52 = vld [vmem:[%s20507_s2 + $0x648] sm:$0xff]   ;;  %v17018_v21 = vld [vmem:[%s20509_s4 + $0x158] sm:$0xff]  }
 0x1b4   : > { %15996 = vmatpush3.bf16.msra.mxu1 %v16982_v36  ;;  %v9079_v36 = vrot.slane %v9078_v43, 4  ;;  %v17011_v51 = vld [vmem:[%s17359_s30 + $0x20] ss:$8 sps:$4 sm:$0xff]   ;;  %v17025_v46 = vld [vmem:[%s18378_s27 + $0xb0] ss:$8 sps:$4 sm:$0xff]  }
 0x1b5   : > { %15612 = vmatpush3.bf16.msra.mxu0 %v16981_v62  ;;  %15997 = vmatprep.subr.bf16.mxu1 %v16984_v63  ;;  %v9142_v62 = vshrl.u32 %v13891_v14, 16  ;;  %v9147_v56 = vrot.slane %v9145_v29, 5  ;;  %v17003_v14 = vld [vmem:[%s20507_s2 + $0x630] sm:$0xff]   ;;  %v13379_v5 = vld [vmem:[%s17359_s30 + $0x18] sm:$0xf] }
 0x1b6   : > { %15613 = vmatprep.subr.bf16.mxu0 %v16983_v26  ;;  %v9084_v3 = vsel %vm17546_vm5, %v9079_v36, %v18898_v48  ;;  %v17023_v36 = vld [vmem:[%s17359_s30 + $0x30] ss:$8 sps:$4 sm:$0xff]   ;;  %v6102_v29 = vshrl.u32 %v13379_v5, 16  ;;  %v6105_v8 = vshll.u32 %v13379_v5, 16  ;;  %v17031_v0 = vld [vmem:[%s17359_s30 + $0x60] ss:$8 sps:$4 sm:$0xff]  }
 0x1b7   : > { %v13910_v43 = vcombine.low %v9084_v3, %v9098_v27  ;;  %v13377_v50 = vld [vmem:[%s17359_s30 + $0x10] sm:$0xf]  ;;  %v17033_v25 = vld [vmem:[%s18378_s27 + $0xd8] ss:$8 sps:$4 sm:$0xff]   ;;  %v13994_v10 = vld [vmem:[%s18378_s27 + $0x94] sm:$0x1] }
 0x1b8   : > { %15998 = vmatpush3.bf16.msra.mxu1 %v16984_v63  ;;  %v9144_v63 = vrot.slane %v9142_v62, 4  ;;  %v17015_v62 = vld [vmem:[%s20507_s2 + $0x650] sm:$0xff]   ;;  %v17029_v5 = vld [vmem:[%s20507_s2 + $0x678] sm:$0xff]  }
 0x1b9   : > { %15614 = vmatpush3.bf16.msra.mxu0 %v16983_v26  ;;  %15999 = vmatprep.subr.bf16.mxu1 %v16986_v30  ;;  %v9125_v26 = vrot.slane %v9123_v18, 5  ;;  %v6088_v18 = vshrl.u32 %v13377_v50, 16  ;;  %v13993_v45 = vld [vmem:[%s18378_s27 + $0x90] sm:$0xf] }
 0x1ba   : > { %15615 = vmatprep.subr.bf16.mxu0 %v16985_v12  ;;  %v9148_v58 = vor.u32 %v9147_v56, %v9144_v63  ;;  %v6091_v63 = vshll.u32 %v13377_v50, 16  ;;  %v9672_v3 = vshrl.u32 %v13993_v45, 16  ;;  %v9675_v27 = vshll.u32 %v13993_v45, 16  ;;  %v17032_v45 = vld [vmem:[%s20507_s2 + $0x680] sm:$0xff]  }
 0x1bb   : > { %v9126_v48 = vsel %vm17546_vm5, %v9121_v54, %v9125_v26  ;;  %v6090_v56 = vrot.slane %v6088_v18, 4  ;;  %v6104_v26 = vrot.slane %v6102_v29, 4  ;;  %v13999_v18 = vld [vmem:[%s18378_s27 + $0xa8] sm:$0xf] }
 0x1bc   : > { %16000 = vmatpush3.bf16.msra.mxu1 %v16986_v30  ;;  %v9149_v30 = vrot.slane %v9148_v58, 4  ;;  %v13911_v39 = vcombine.low %v9112_v20, %v9126_v48  ;;  %v6093_v49 = vrot.slane %v6091_v63, 5  ;;  %v6107_v58 = vrot.slane %v6105_v8, 5  ;;  %v13996_v20 = vld [vmem:[%s18378_s27 + $0x9c] sm:$0x1] }
 0x1bd   : > { %15616 = vmatpush3.bf16.msra.mxu0 %v16985_v12  ;;  %16001 = vmatprep.subr.bf16.mxu1 %v16988_v4  ;;  %v9135_v12 = vrot.slane %v9134_v42, 4  ;;  %v19044_v42 = vld [vmem:[%s17359_s30 + $0x14] sm:$0x1]  ;;  %v9674_v48 = vrot.slane %v9672_v3, 4  ;;  %v13998_v63 = vld [vmem:[%s18378_s27 + $0xa4] sm:$0x1] }
 0x1be   : > { %15617 = vmatprep.subr.bf16.mxu0 %v16987_v41  ;;  %v9154_v2 = vsel %vm17546_vm5, %v9149_v30, %v9153_v53  ;;  %v17019_v53 = vld [vmem:[%s20507_s2 + $0x660] sm:$0xff]   ;;  %v6097_v30 = vshll.u32 %v19044_v42, 16  ;;  %v17035_v3 = vld [vmem:[%s17359_s30 + $0x70] ss:$8 sps:$4 sm:$0xff]  }
 0x1bf   : > { %v9140_v7 = vsel %vm17546_vm5, %v9135_v12, %v9139_v55  ;;  %v6094_v12 = vor.u32 %v6093_v49, %v6090_v56  ;;  %v14000_v56 = vld [vmem:[%s18378_s27 + $0xac] sm:$0x1]  ;;  %v9714_v49 = vshrl.u32 %v13999_v18, 16 }
 0x1c0   : > { %16002 = vmatpush3.bf16.msra.mxu1 %v16988_v4  ;;  %v13912_v32 = vcombine.low %v9140_v7, %v9154_v2  ;;  %v17010_v4 = vld [vmem:[%s20509_s4 + $0x140] sm:$0xff]   ;;  %v6108_v7 = vor.u32 %v6107_v58, %v6104_v26  ;;  %v9681_v2 = vshll.u32 %v13994_v10, 16  ;;  %v17036_v26 = vld [vmem:[%s18378_s27 + $0xe8] ss:$8 sps:$4 sm:$0xff]  }
 0x1c1   : > { %15618 = vmatpush3.bf16.msra.mxu0 %v16987_v41  ;;  %16003 = vmatprep.subr.bf16.mxu1 %v16990_v11  ;;  %v17005_v41 = vld [vmem:[%s20507_s2 + $0x638] sm:$0xff]  }
 0x1c2   : > { %15619 = vmatprep.subr.bf16.mxu0 %v16989_v31 }
 0x1c4   : > { %16004 = vmatpush3.bf16.msra.mxu1 %v16990_v11  ;;  %v17017_v11 = vld [vmem:[%s20507_s2 + $0x658] sm:$0xff]  }
 0x1c5   : > { %15620 = vmatpush3.bf16.msra.mxu0 %v16989_v31  ;;  %16013 = vmatprep.subr.bf16.mxu1 %v16992_v24  ;;  %v17020_v31 = vld [vmem:[%s20509_s4 + $0x160] sm:$0xff]  }
 0x1c6   : > { %15629 = vmatprep.subr.bf16.mxu0 %v16991_v40 }
 0x1c7   : > { %16006 = vmatmul.mubr.bf16.vlgmr.msra.gmra.mrb[8].mxu1 %v13910_v43 }
 0x1c8   : > { %15622 = vmatmul.mubr.bf16.vlgmr.msra.gmra.mrb[0].mxu0 %v13294_v61  ;;  %16014 = vmatpush3.bf16.msra.mxu1 %v16992_v24  ;;  %v16997_v61 = vld [vmem:[%s20507_s2 + $0x618] sm:$0xff]  }
 0x1c9   : > { %15630 = vmatpush3.bf16.msra.mxu0 %v16991_v40  ;;  %16015 = vmatprep.subr.bf16.mxu1 %v16994_v13  ;;  %v19047_v24 = vld [vmem:[%s17359_s30 + $0x1c] sm:$0x1]  ;;  %v13995_v40 = vld [vmem:[%s18378_s27 + $0x98] sm:$0xf] }
 0x1ca   : > { %15631 = vmatprep.subr.bf16.mxu0 %v16993_v44  ;;  %15625 = vmatprep.mubr.bf16.mxu0 %v13295_v6  ;;  %v17002_v6 = vld [vmem:[%s20509_s4 + $0x128] sm:$0xff]   ;;  %v9686_v54 = vshrl.u32 %v13995_v40, 16  ;;  %v9689_v55 = vshll.u32 %v13995_v40, 16  ;;  %v6111_v43 = vshll.u32 %v19047_v24, 16 }
 0x1cb   : > { %16009 = vmatprep.mubr.bf16.mxu1 %v13911_v39 }
 0x1cc   : > { %16016 = vmatpush3.bf16.msra.mxu1 %v16994_v13  ;;  %v9677_v13 = vrot.slane %v9675_v27, 5  ;;  %v9691_v39 = vrot.slane %v9689_v55, 5  ;;  %v17038_v55 = vld [vmem:[%s20509_s4 + $0x188] sm:$0xff]  }
 0x1cd   : > { %15632 = vmatpush3.bf16.msra.mxu0 %v16993_v44  ;;  %16017 = vmatprep.subr.bf16.mxu1 %v16996_v23  ;;  %v9688_v44 = vrot.slane %v9686_v54, 4  ;;  %v9709_v54 = vshll.u32 %v13998_v63, 16  ;;  %v14003_v63 = vld [vmem:[%s18378_s27 + $0xb8] sm:$0xf] }
 0x1ce   : > { %15633 = vmatprep.subr.bf16.mxu0 %v16995_v59 }
 0x1cf   : > { %16010 = vmatmul.mubr.bf16.gmra.mrb[12].mxu1 %v13912_v32  ;;  %v13383_v32 = vld [vmem:[%s17359_s30 + $0x28] sm:$0xf] }
 0x1d0   : > { %16018 = vmatpush3.bf16.msra.mxu1 %v16996_v23  ;;  %15626 = vmatmul.mubr.bf16.gmra.mrb[4].mxu0 %v13296_v37  ;;  %v17028_v37 = vld [vmem:[%s18378_s27 + $0xc0] ss:$8 sps:$4 sm:$0xff]  }
 0x1d1   : > { %15634 = vmatpush3.bf16.msra.mxu0 %v16995_v59  ;;  %16019 = vmatprep.subr.bf16.mxu1 %v16998_v60  ;;  %v13381_v23 = vld [vmem:[%s17359_s30 + $0x20] sm:$0xf]  ;;  %v17022_v59 = vld [vmem:[%s20509_s4 + $0x168] sm:$0xff]  }
 0x1d2   : > { %15635 = vmatprep.subr.bf16.mxu0 %v16997_v61  ;;  %15645 = vmatprep.mubr.bf16.mxu0 %v17007_v1  ;;  %v19068_v1 = vrot.slane %v6111_v43, 5  ;;  %v17037_v43 = vld [vmem:[%s20507_s2 + $0x688] sm:$0xff]  }
 0x1d3   : > { %16029 = vmatprep.mubr.bf16.mxu1 %v17009_v47  ;;  %v9695_v47 = vshll.u32 %v13996_v20, 16  ;;  %v17047_v20 = vld [vmem:[%s17359_s30 + $0x80] ss:$8 sps:$4 sm:$0xff]  }
 0x1d4   : > { %16020 = vmatpush3.bf16.msra.mxu1 %v16998_v60  ;;  %v19066_v60 = vrot.slane %v6097_v30, 5 }
 0x1d5   : > { %15636 = vmatpush3.bf16.msra.mxu0 %v16997_v61  ;;  %16021 = vmatprep.subr.bf16.mxu1 %v17000_v38  ;;  %v17021_v61 = vld [vmem:[%s20507_s2 + $0x668] sm:$0xff]  }
 0x1d6   : > { %15637 = vmatprep.subr.bf16.mxu0 %v16999_v19 }
 0x1d8   : > { %16022 = vmatpush3.bf16.msra.mxu1 %v17000_v38  ;;  %v17026_v38 = vld [vmem:[%s20509_s4 + $0x170] sm:$0xff]  }
 0x1d9   : > { %15638 = vmatpush3.bf16.msra.mxu0 %v16999_v19  ;;  %16023 = vmatprep.subr.bf16.mxu1 %v17002_v6  ;;  %v19073_v19 = vrot.slane %v6094_v12, 4  ;;  %v9716_v12 = vrot.slane %v9714_v49, 4 }
 0x1da   : > { %15639 = vmatprep.subr.bf16.mxu0 %v17001_v9 }
 0x1dc   : > { %16024 = vmatpush3.bf16.msra.mxu1 %v17002_v6  ;;  %v9678_v6 = vor.u32 %v9677_v13, %v9674_v48  ;;  %v6100_v48 = vsel %vm17546_vm5, %v19073_v19, %v19066_v60  ;;  %v19134_v19 = vrot.slane %v9709_v54, 5 }
 0x1dd   : > { %15640 = vmatpush3.bf16.msra.mxu0 %v17001_v9  ;;  %16025 = vmatprep.subr.bf16.mxu1 %v17004_v33  ;;  %v9692_v9 = vor.u32 %v9691_v39, %v9688_v44  ;;  %v9723_v44 = vshll.u32 %v14000_v56, 16  ;;  %v13385_v39 = vld [vmem:[%s17359_s30 + $0x30] sm:$0xf] }
 0x1de   : > { %15641 = vmatprep.subr.bf16.mxu0 %v17003_v14 }
 0x1e0   : > { %16026 = vmatpush3.bf16.msra.mxu1 %v17004_v33  ;;  %v6116_v33 = vshrl.u32 %v13381_v23, 16 }
 0x1e1   : > { %15642 = vmatpush3.bf16.msra.mxu0 %v17003_v14  ;;  %16027 = vmatprep.subr.bf16.mxu1 %v17006_v22  ;;  %v17024_v14 = vld [vmem:[%s20507_s2 + $0x670] sm:$0xff]  }
 0x1e2   : > { %15643 = vmatprep.subr.bf16.mxu0 %v17005_v41 }
 0x1e4   : > { %16028 = vmatpush3.bf16.msra.mxu1 %v17006_v22  ;;  %v19078_v22 = vrot.slane %v6108_v7, 4  ;;  %v13387_v7 = vld [vmem:[%s17359_s30 + $0x38] sm:$0xf] }
 0x1e5   : > { %15644 = vmatpush3.bf16.msra.mxu0 %v17005_v41  ;;  %16037 = vmatprep.subr.bf16.mxu1 %v17010_v4  ;;  %v19080_v41 = vrot.slane %v9681_v2, 5  ;;  %v17049_v2 = vld [vmem:[%s18378_s27 + $0xf8] ss:$8 sps:$4 sm:$0xff]  }
 0x1e6   : > { %15653 = vmatprep.subr.bf16.mxu0 %v17008_v35 }
 0x1e7   : > { %16030 = vmatmul.mubr.bf16.vlgmr.msra.gmra.mrb[8].mxu1 %v17012_v17  ;;  %v6130_v17 = vshrl.u32 %v13383_v32, 16 }
 0x1e8   : > { %15646 = vmatmul.mubr.bf16.vlgmr.msra.gmra.mrb[0].mxu0 %v17011_v51  ;;  %16038 = vmatpush3.bf16.msra.mxu1 %v17010_v4  ;;  %v13382_v4 = vld [vmem:[%s17359_s30 + $0x24] sm:$0x1]  ;;  %v13384_v51 = vld [vmem:[%s17359_s30 + $0x2c] sm:$0x1] }
 0x1e9   : > { %15654 = vmatpush3.bf16.msra.mxu0 %v17008_v35  ;;  %16039 = vmatprep.subr.bf16.mxu1 %v17014_v34  ;;  %v6119_v35 = vshll.u32 %v13381_v23, 16  ;;  %v6125_v50 = vshll.u32 %v13382_v4, 16  ;;  %v6114_v23 = vsel %vm17546_vm5, %v19078_v22, %v19068_v1 }
 0x1ea   : > { %15655 = vmatprep.subr.bf16.mxu0 %v17013_v52  ;;  %15649 = vmatprep.mubr.bf16.mxu0 %v17023_v36  ;;  %v13997_v36 = vld [vmem:[%s18378_s27 + $0xa0] sm:$0xf] }
 0x1eb   : > { %16033 = vmatprep.mubr.bf16.mxu1 %v17025_v46  ;;  %v17030_v46 = vld [vmem:[%s20509_s4 + $0x178] sm:$0xff]   ;;  %v9700_v29 = vshrl.u32 %v13997_v36, 16  ;;  %v19108_v10 = vrot.slane %v6125_v50, 5  ;;  %v13409_v50 = vcombine.low %v6100_v48, %v6114_v23 }
 0x1ec   : > { %16040 = vmatpush3.bf16.msra.mxu1 %v17014_v34  ;;  %v6133_v34 = vshll.u32 %v13383_v32, 16  ;;  %v13386_v32 = vld [vmem:[%s17359_s30 + $0x34] sm:$0x1] }
 0x1ed   : > { %15656 = vmatpush3.bf16.msra.mxu0 %v17013_v52  ;;  %16041 = vmatprep.subr.bf16.mxu1 %v17016_v57  ;;  %v19084_v52 = vrot.slane %v9695_v47, 5  ;;  %v9702_v58 = vrot.slane %v9700_v29, 4  ;;  %v6144_v47 = vshrl.u32 %v13385_v39, 16  ;;  %v17051_v29 = vld [vmem:[%s17359_s30 + $0x90] ss:$8 sps:$4 sm:$0xff]  }
 0x1ee   : > { %15657 = vmatprep.subr.bf16.mxu0 %v17015_v62  ;;  %v6135_v8 = vrot.slane %v6133_v34, 5 }
 0x1ef   : > { %16034 = vmatmul.mubr.bf16.gmra.mrb[12].mxu1 %v17028_v37  ;;  %v6118_v37 = vrot.slane %v6116_v33, 4  ;;  %v17040_v33 = vld [vmem:[%s20509_s4 + $0x190] sm:$0xff]   ;;  %v6146_v22 = vrot.slane %v6144_v47, 4  ;;  %v19194_v47 = vld [vmem:[%s17359_s30 + $0x4c] sm:$0x1] }
 0x1f0   : > { %16042 = vmatpush3.bf16.msra.mxu1 %v17016_v57  ;;  %15650 = vmatmul.mubr.bf16.gmra.mrb[4].mxu0 %v17027_v15  ;;  %v19090_v57 = vrot.slane %v9678_v6, 4  ;;  %v6132_v15 = vrot.slane %v6130_v17, 4  ;;  %v6158_v6 = vshrl.u32 %v13387_v7, 16  ;;  %v6153_v17 = vshll.u32 %v13386_v32, 16  ;;  %v17043_v32 = vld [vmem:[%s20507_s2 + $0x6a0] sm:$0xff]  }
 0x1f1   : > { %15658 = vmatpush3.bf16.msra.mxu0 %v17015_v62  ;;  %16043 = vmatprep.subr.bf16.mxu1 %v17018_v21  ;;  %v19092_v62 = vrot.slane %v9692_v9, 4  ;;  %v6161_v9 = vshll.u32 %v13387_v7, 16 }
 0x1f2   : > { %15659 = vmatprep.subr.bf16.mxu0 %v17017_v11  ;;  %15669 = vmatprep.mubr.bf16.mxu0 %v17031_v0  ;;  %v6139_v0 = vshll.u32 %v13384_v51, 16  ;;  %v6160_v51 = vrot.slane %v6158_v6, 4 }
 0x1f3   : > { %16053 = vmatprep.mubr.bf16.mxu1 %v17033_v25  ;;  %v17034_v25 = vld [vmem:[%s20509_s4 + $0x180] sm:$0xff]   ;;  %v6163_v34 = vrot.slane %v6161_v9, 5 }
 0x1f4   : > { %16044 = vmatpush3.bf16.msra.mxu1 %v17018_v21  ;;  %v9703_v21 = vshll.u32 %v13997_v36, 16  ;;  %v19121_v13 = vrot.slane %v6139_v0, 5  ;;  %v14004_v0 = vld [vmem:[%s18378_s27 + $0xbc] sm:$0x1] }
 0x1f5   : > { %15660 = vmatpush3.bf16.msra.mxu0 %v17017_v11  ;;  %16045 = vmatprep.subr.bf16.mxu1 %v17020_v31  ;;  %v6121_v11 = vrot.slane %v6119_v35, 5  ;;  %v17039_v35 = vld [vmem:[%s20507_s2 + $0x690] sm:$0xff]   ;;  %v6164_v49 = vor.u32 %v6163_v34, %v6160_v51 }
 0x1f6   : > { %15661 = vmatprep.subr.bf16.mxu0 %v17019_v53  ;;  %v9705_v40 = vrot.slane %v9703_v21, 5  ;;  %v9684_v21 = vsel %vm17546_vm5, %v19090_v57, %v19080_v41 }
 0x1f7   : > { %v6122_v27 = vor.u32 %v6121_v11, %v6118_v37  ;;  %v17052_v37 = vld [vmem:[%s18378_s27 + $0x108] ss:$8 sps:$4 sm:$0xff]   ;;  %v19148_v11 = vrot.slane %v9723_v44, 5  ;;  %v17044_v44 = vld [vmem:[%s20509_s4 + $0x1a0] sm:$0xff]   ;;  %v19182_v7 = vrot.slane %v6164_v49, 4 }
 0x1f8   : > { %16046 = vmatpush3.bf16.msra.mxu1 %v17020_v31  ;;  %v9717_v31 = vshll.u32 %v13999_v18, 16  ;;  %v14002_v18 = vld [vmem:[%s18378_s27 + $0xb4] sm:$0x1] }
 0x1f9   : > { %15662 = vmatpush3.bf16.msra.mxu0 %v17019_v53  ;;  %16047 = vmatprep.subr.bf16.mxu1 %v17022_v59  ;;  %v6136_v53 = vor.u32 %v6135_v8, %v6132_v15  ;;  %v19132_v60 = vrot.slane %v6122_v27, 4  ;;  %v9698_v8 = vsel %vm17546_vm5, %v19092_v62, %v19084_v52  ;;  %v9737_v57 = vshll.u32 %v14002_v18, 16  ;;  %v17041_v52 = vld [vmem:[%s20507_s2 + $0x698] sm:$0xff]  }
 0x1fa   : > { %15663 = vmatprep.subr.bf16.mxu0 %v17021_v61  ;;  %v9719_v30 = vrot.slane %v9717_v31, 5  ;;  %v9742_v31 = vshrl.u32 %v14003_v63, 16  ;;  %v17042_v62 = vld [vmem:[%s20509_s4 + $0x198] sm:$0xff]  }
 0x1fb   : > { %v19139_v1 = vrot.slane %v6136_v53, 4  ;;  %v9751_v53 = vshll.u32 %v14004_v0, 16 }
 0x1fc   : > { %16048 = vmatpush3.bf16.msra.mxu1 %v17022_v59  ;;  %v9706_v59 = vor.u32 %v9705_v40, %v9702_v58  ;;  %v19165_v40 = vrot.slane %v6153_v17, 5 }
 0x1fd   : > { %15664 = vmatpush3.bf16.msra.mxu0 %v17021_v61  ;;  %16049 = vmatprep.subr.bf16.mxu1 %v17026_v38  ;;  %v13388_v61 = vld [vmem:[%s17359_s30 + $0x3c] sm:$0x1] }
 0x1fe   : > { %15665 = vmatprep.subr.bf16.mxu0 %v17024_v14  ;;  %v6167_v36 = vshll.u32 %v13388_v61, 16  ;;  %v19191_v61 = vrot.slane %v9737_v57, 5  ;;  %v19231_v57 = vld [vmem:[%s17359_s30 + $0x64] sm:$0x1] }
 0x200   : > { %16050 = vmatpush3.bf16.msra.mxu1 %v17026_v38  ;;  %v6147_v38 = vshll.u32 %v13385_v39, 16  ;;  %v19167_v41 = vrot.slane %v6167_v36, 5  ;;  %v14025_v39 = vcombine.low %v9684_v21, %v9698_v8  ;;  %v13421_v8 = vld [vmem:[%s17359_s30 + $0x60] sm:$0xf] }
 0x201   : > { %15666 = vmatpush3.bf16.msra.mxu0 %v17024_v14  ;;  %16051 = vmatprep.subr.bf16.mxu1 %v17030_v46  ;;  %v9720_v14 = vor.u32 %v9719_v30, %v9716_v12  ;;  %v9744_v12 = vrot.slane %v9742_v31, 4 }
 0x202   : > { %15667 = vmatprep.subr.bf16.mxu0 %v17029_v5  ;;  %v6149_v4 = vrot.slane %v6147_v38, 5 }
 0x203   : > { %v19163_v58 = vrot.slane %v9720_v14, 4  ;;  %v19196_v14 = vrot.slane %v9751_v53, 5  ;;  %v6373_v53 = vshll.u32 %v13421_v8, 16 }
 0x204   : > { %16052 = vmatpush3.bf16.msra.mxu1 %v17030_v46  ;;  %v14001_v46 = vld [vmem:[%s18378_s27 + $0xb0] sm:$0xf]  ;;  %v6150_v15 = vor.u32 %v6149_v4, %v6146_v22  ;;  %v14006_v4 = vld [vmem:[%s18378_s27 + $0xc4] sm:$0x1] }
 0x205   : > { %15668 = vmatpush3.bf16.msra.mxu0 %v17029_v5  ;;  %16061 = vmatprep.subr.bf16.mxu1 %v17034_v25  ;;  %v19146_v5 = vrot.slane %v9706_v59, 4  ;;  %v9731_v56 = vshll.u32 %v14001_v46, 16  ;;  %v14005_v59 = vld [vmem:[%s18378_s27 + $0xc0] sm:$0xf]  ;;  %v9765_v21 = vshll.u32 %v14006_v4, 16  ;;  %v9726_v49 = vsel %vm17546_vm5, %v19163_v58, %v19148_v11 }
 0x206   : > { %15677 = vmatprep.subr.bf16.mxu0 %v17032_v45  ;;  %v19176_v27 = vrot.slane %v6150_v15, 4  ;;  %v9756_v36 = vshrl.u32 %v14005_v59, 16  ;;  %v14008_v15 = vld [vmem:[%s18378_s27 + $0xcc] sm:$0x1] }
 0x207   : > { %16054 = vmatmul.mubr.bf16.vlgmr.msra.gmra.mrb[8].mxu1 %v17036_v26  ;;  %v6661_v26 = vrot.slane %v19044_v42, 5  ;;  %v17073_v42 = vld [vmem:[%s20507_s2 + $0x708] sm:$0xff]  }
 0x208   : > { %15670 = vmatmul.mubr.bf16.vlgmr.msra.gmra.mrb[0].mxu0 %v17035_v3  ;;  %16062 = vmatpush3.bf16.msra.mxu1 %v17034_v25  ;;  %v9728_v25 = vshrl.u32 %v14001_v46, 16  ;;  %v13389_v3 = vld [vmem:[%s17359_s30 + $0x40] sm:$0xf]  ;;  %v6142_v46 = vsel %vm17546_vm5, %v19139_v1, %v19121_v13  ;;  %v17046_v13 = vld [vmem:[%s20509_s4 + $0x1a8] sm:$0xff]  }
 0x209   : > { %15678 = vmatpush3.bf16.msra.mxu0 %v17032_v45  ;;  %16063 = vmatprep.subr.bf16.mxu1 %v17038_v55  ;;  %v9745_v45 = vshll.u32 %v14003_v63, 16  ;;  %v6175_v48 = vshll.u32 %v13389_v3, 16 }
 0x20a   : > { %15679 = vmatprep.subr.bf16.mxu0 %v17037_v43  ;;  %15673 = vmatprep.mubr.bf16.mxu0 %v17047_v20  ;;  %v9730_v54 = vrot.slane %v9728_v25, 4  ;;  %v6172_v20 = vshrl.u32 %v13389_v3, 16  ;;  %v13423_v3 = vld [vmem:[%s17359_s30 + $0x68] sm:$0xf] }
 0x20b   : > { %16057 = vmatprep.mubr.bf16.mxu1 %v17049_v2  ;;  %v9747_v30 = vrot.slane %v9745_v45, 5  ;;  %v19185_v2 = vld [vmem:[%s17359_s30 + $0x44] sm:$0x1]  ;;  %v6177_v6 = vrot.slane %v6175_v48, 5  ;;  %v19250_v48 = vld [vmem:[%s17359_s30 + $0x6c] sm:$0x1] }
 0x20c   : > { %16064 = vmatpush3.bf16.msra.mxu1 %v17038_v55  ;;  %v9733_v55 = vrot.slane %v9731_v56, 5  ;;  %v6174_v38 = vrot.slane %v6172_v20, 4  ;;  %v9712_v56 = vsel %vm17546_vm5, %v19146_v5, %v19134_v19  ;;  %v9779_v5 = vshll.u32 %v14008_v15, 16 }
 0x20d   : > { %15680 = vmatpush3.bf16.msra.mxu0 %v17037_v43  ;;  %16065 = vmatprep.subr.bf16.mxu1 %v17040_v33  ;;  %v13391_v43 = vld [vmem:[%s17359_s30 + $0x48] sm:$0xf]  ;;  %v9748_v51 = vor.u32 %v9747_v30, %v9744_v12  ;;  %v19247_v20 = vrot.slane %v9765_v21, 5  ;;  %v19264_v4 = vcombine.low %v9712_v56, %v9726_v49  ;;  %v6393_v15 = vshll.u32 %v19250_v48, 16 }
 0x20e   : > { %15681 = vmatprep.subr.bf16.mxu0 %v17039_v35  ;;  %v6186_v23 = vshrl.u32 %v13391_v43, 16  ;;  %v6189_v9 = vshll.u32 %v13391_v43, 16  ;;  %v9734_v17 = vor.u32 %v9733_v55, %v9730_v54  ;;  %v6178_v18 = vor.u32 %v6177_v6, %v6174_v38 }
 0x20f   : > { %16058 = vmatmul.mubr.bf16.gmra.mrb[12].mxu1 %v17052_v37  ;;  %v6181_v37 = vshll.u32 %v19185_v2, 16  ;;  %v19228_v45 = vrot.slane %v9748_v51, 4  ;;  %v6370_v54 = vshrl.u32 %v13421_v8, 16  ;;  %v6384_v38 = vshrl.u32 %v13423_v3, 16  ;;  %v14038_v51 = vld [vmem:[%s18378_s27 + $0xdc] sm:$0x1] }
 0x210   : > { %16066 = vmatpush3.bf16.msra.mxu1 %v17040_v33  ;;  %15674 = vmatmul.mubr.bf16.gmra.mrb[4].mxu0 %v17051_v29  ;;  %v6188_v22 = vrot.slane %v6186_v23, 4  ;;  %v14007_v33 = vld [vmem:[%s18378_s27 + $0xc8] sm:$0xf]  ;;  %v6191_v34 = vrot.slane %v6189_v9, 5  ;;  %v6195_v29 = vshll.u32 %v19194_v47, 16  ;;  %v19226_v31 = vrot.slane %v9734_v17, 4 }
 0x211   : > { %15682 = vmatpush3.bf16.msra.mxu0 %v17039_v35  ;;  %16067 = vmatprep.subr.bf16.mxu1 %v17042_v62  ;;  %v6128_v35 = vsel %vm17546_vm5, %v19132_v60, %v19108_v10  ;;  %v17045_v10 = vld [vmem:[%s20507_s2 + $0x6a8] sm:$0xff]   ;;  %v9758_v60 = vrot.slane %v9756_v36, 4  ;;  %v9770_v0 = vshrl.u32 %v14007_v33, 16  ;;  %v9773_v25 = vshll.u32 %v14007_v33, 16  ;;  %v17048_v23 = vld [vmem:[%s20507_s2 + $0x6b0] sm:$0xff]  }
 0x212   : > { %15683 = vmatprep.subr.bf16.mxu0 %v17041_v52  ;;  %15693 = vmatprep.mubr.bf16.mxu0 %v13409_v50  ;;  %v9759_v50 = vshll.u32 %v14005_v59, 16  ;;  %v6192_v63 = vor.u32 %v6191_v34, %v6188_v22  ;;  %v19237_v55 = vrot.slane %v6178_v18, 4  ;;  %v19239_v11 = vrot.slane %v6181_v37, 5  ;;  %v17054_v22 = vld [vmem:[%s20509_s4 + $0x1b8] sm:$0xff]  }
 0x213   : > { %16077 = vmatprep.mubr.bf16.mxu1 %v14025_v39  ;;  %v9775_v19 = vrot.slane %v9773_v25, 5  ;;  %v19241_v58 = vrot.slane %v6195_v29, 5  ;;  %v19243_v12 = vcombine.low %v6128_v35, %v6142_v46  ;;  %v6387_v6 = vshll.u32 %v13423_v3, 16  ;;  %v17053_v35 = vld [vmem:[%s20507_s2 + $0x6b8] sm:$0xff]   ;;  %v17056_v3 = vld [vmem:[%s20509_s4 + $0x1c0] sm:$0xff]  }
 0x214   : > { %16068 = vmatpush3.bf16.msra.mxu1 %v17042_v62  ;;  %v9761_v1 = vrot.slane %v9759_v50, 5  ;;  %v9772_v62 = vrot.slane %v9770_v0, 4  ;;  %v19245_v30 = vrot.slane %v6192_v63, 4  ;;  %v19266_v33 = vrot.slane %v9779_v5, 5  ;;  %v14039_v50 = vld [vmem:[%s18378_s27 + $0xe0] sm:$0xf] }
 0x215   : > { %15684 = vmatpush3.bf16.msra.mxu0 %v17041_v52  ;;  %16069 = vmatprep.subr.bf16.mxu1 %v17044_v44  ;;  %v17050_v52 = vld [vmem:[%s20509_s4 + $0x1b0] sm:$0xff]   ;;  %v19268_v17 = vrot.slane %v6370_v54, 4  ;;  %v6156_v46 = vsel %vm17546_vm5, %v19176_v27, %v19165_v40  ;;  %v6375_v37 = vrot.slane %v6373_v53, 5  ;;  %v6170_v29 = vsel %vm17546_vm5, %v19182_v7, %v19167_v41  ;;  %v14040_v7 = vld [vmem:[%s18378_s27 + $0xe4] sm:$0x1] }
 0x216   : > { %15685 = vmatprep.subr.bf16.mxu0 %v17043_v32  ;;  %v9762_v43 = vor.u32 %v9761_v1, %v9758_v60  ;;  %v9776_v59 = vor.u32 %v9775_v19, %v9772_v62  ;;  %v6386_v8 = vrot.slane %v6384_v38, 4  ;;  %v6389_v40 = vrot.slane %v6387_v6, 5  ;;  %v13425_v41 = vld [vmem:[%s17359_s30 + $0x70] sm:$0xf]  ;;  %v13427_v5 = vld [vmem:[%s17359_s30 + $0x78] sm:$0xf] }
 0x217   : > { %v9740_v27 = vsel %vm17546_vm5, %v19226_v31, %v19191_v61  ;;  %v9968_v25 = vshrl.u32 %v14039_v50, 16  ;;  %v9971_v56 = vshll.u32 %v14039_v50, 16  ;;  %v17055_v61 = vld [vmem:[%s20507_s2 + $0x6c0] sm:$0xff]   ;;  %v6376_v49 = vor.u32 %v6375_v37, %v19268_v17  ;;  %v14041_v38 = vld [vmem:[%s18378_s27 + $0xe8] sm:$0xf] }
 0x218   : > { %16070 = vmatpush3.bf16.msra.mxu1 %v17044_v44  ;;  %v14037_v44 = vld [vmem:[%s18378_s27 + $0xd8] sm:$0xf]  ;;  %v19288_v21 = vrot.slane %v9762_v43, 4  ;;  %v19308_v31 = vrot.slane %v6393_v15, 5  ;;  %v6390_v62 = vor.u32 %v6389_v40, %v6386_v8  ;;  %v6401_v54 = vshll.u32 %v13425_v41, 16  ;;  %v17058_v17 = vld [vmem:[%s20509_s4 + $0x1c8] sm:$0xff]  }
 0x219   : > { %15686 = vmatpush3.bf16.msra.mxu0 %v17043_v32  ;;  %16071 = vmatprep.subr.bf16.mxu1 %v17046_v13  ;;  %v6379_v32 = vshll.u32 %v19231_v57, 16  ;;  %v9954_v34 = vshrl.u32 %v14037_v44, 16  ;;  %v9957_v18 = vshll.u32 %v14037_v44, 16  ;;  %v9973_v19 = vrot.slane %v9971_v56, 5  ;;  %v14043_v40 = vld [vmem:[%s18378_s27 + $0xf0] sm:$0xf] }
 0x21a   : > { %v19253_v39 = vpop.f32.mrb[0].mxu1  ;;  %15687 = vmatprep.subr.bf16.mxu0 %v17045_v10  ;;  %v13411_v43 = vcombine.low %v6156_v46, %v6170_v29  ;;  %v19330_v46 = vld [vmem:[%s17359_s30 + $0x7c] sm:$0x1]  ;;  %v6403_v15 = vrot.slane %v6401_v54, 5  ;;  %v6412_v8 = vshrl.u32 %v13427_v5, 16 }
 0x21b   : > { %v19259_v9 = vpop.f32.mrb[1].mxu1  ;;  %v19300_v60 = vrot.slane %v6379_v32, 5  ;;  %v9956_v1 = vrot.slane %v9954_v34, 4  ;;  %v9959_v0 = vrot.slane %v9957_v18, 5  ;;  %v19321_v32 = vld [vmem:[%s17359_s30 + $0x74] sm:$0x1] }
 0x21c   : > { %v19271_v36 = vpop.f32.mrb[2].mxu1  ;;  %16072 = vmatpush3.bf16.msra.mxu1 %v17046_v13  ;;  %v19298_v13 = vrot.slane %v9776_v59, 4  ;;  %v9977_v59 = vshll.u32 %v14040_v7, 16  ;;  %v6377_v18 = vrot.slane %v6376_v49, 4  ;;  %v9982_v7 = vshrl.u32 %v14041_v38, 16 }
 0x21d   : > { %15688 = vmatpush3.bf16.msra.mxu0 %v17045_v10  ;;  %v19282_v63 = vpop.f32.mrb[3].mxu1  ;;  %16073 = vmatprep.subr.bf16.mxu1 %v17050_v52  ;;  %v9754_v10 = vsel %vm17546_vm5, %v19228_v45, %v19196_v14  ;;  %v9963_v14 = vshll.u32 %v14038_v51, 16  ;;  %v6398_v45 = vshrl.u32 %v13425_v41, 16  ;;  %v9960_v51 = vor.u32 %v9959_v0, %v9956_v1  ;;  %v14042_v49 = vld [vmem:[%s18378_s27 + $0xec] sm:$0x1] }
 0x21e   : > { %15689 = vmatprep.subr.bf16.mxu0 %v17048_v23  ;;  %v14027_v44 = vcombine.low %v9740_v27, %v9754_v10  ;;  %v6391_v10 = vrot.slane %v6390_v62, 4  ;;  %v6415_v41 = vshll.u32 %v13427_v5, 16  ;;  %v9979_v1 = vrot.slane %v9977_v59, 5  ;;  %v17062_v59 = vld [vmem:[%s20509_s4 + $0x1d8] sm:$0xff]  }
 0x21f   : > { %v6400_v37 = vrot.slane %v6398_v45, 4  ;;  %v9965_v29 = vrot.slane %v9963_v14, 5  ;;  %v9985_v0 = vshll.u32 %v14041_v38, 16  ;;  %v6414_v14 = vrot.slane %v6412_v8, 4 }
 0x220   : > { %16074 = vmatpush3.bf16.msra.mxu1 %v17050_v52  ;;  %v9970_v52 = vrot.slane %v9968_v25, 4  ;;  %v9996_v45 = vshrl.u32 %v14043_v40, 16  ;;  %v6417_v62 = vrot.slane %v6415_v41, 5  ;;  %v9991_v38 = vshll.u32 %v14042_v49, 16 }
 0x221   : > { %15690 = vmatpush3.bf16.msra.mxu0 %v17048_v23  ;;  %16075 = vmatprep.subr.bf16.mxu1 %v17054_v22  ;;  %v6184_v23 = vsel %vm17546_vm5, %v19237_v55, %v19239_v11  ;;  %v17057_v55 = vld [vmem:[%s20507_s2 + $0x6c8] sm:$0xff]   ;;  %v6198_v11 = vsel %vm17546_vm5, %v19245_v30, %v19241_v58  ;;  %v6407_v58 = vshll.u32 %v19321_v32, 16  ;;  %v6421_v30 = vshll.u32 %v19330_v46, 16 }
 0x222   : > { %v19314_v53 = vpop.f32.mrb[4].mxu1  ;;  %15691 = vmatprep.subr.bf16.mxu0 %v17053_v35  ;;  %v9974_v34 = vor.u32 %v9973_v19, %v9970_v52  ;;  %v6404_v56 = vor.u32 %v6403_v15, %v6400_v37  ;;  %v9984_v52 = vrot.slane %v9982_v7, 4  ;;  %v9987_v19 = vrot.slane %v9985_v0, 5  ;;  %v19401_v7 = vld [vmem:[%s17359_s30 + $0x8c] sm:$0x1] }
 0x223   : > { %v19324_v6 = vpop.f32.mrb[5].mxu1  ;;  %v19363_v54 = vrot.slane %v6407_v58, 5 }
 0x224   : > { %v19332_v50 = vpop.f32.mrb[6].mxu1  ;;  %16076 = vmatpush3.bf16.msra.mxu1 %v17054_v22  ;;  %v9768_v22 = vsel %vm17546_vm5, %v19288_v21, %v19247_v20  ;;  %v9782_v20 = vsel %vm17546_vm5, %v19298_v13, %v19266_v33  ;;  %v9961_v21 = vrot.slane %v9960_v51, 4  ;;  %v9975_v25 = vrot.slane %v9974_v34, 4  ;;  %v17061_v51 = vld [vmem:[%s20507_s2 + $0x6d8] sm:$0xff]  }
 0x225   : > { %15692 = vmatpush3.bf16.msra.mxu0 %v17053_v35  ;;  %v19342_v27 = vpop.f32.mrb[7].mxu1  ;;  %16085 = vmatprep.subr.bf16.mxu1 %v17056_v3  ;;  %v17060_v35 = vld [vmem:[%s20509_s4 + $0x1d0] sm:$0xff]   ;;  %v9999_v33 = vshll.u32 %v14043_v40, 16  ;;  %v13412_v13 = vcombine.low %v6184_v23, %v6198_v11  ;;  %v14028_v5 = vcombine.low %v9768_v22, %v9782_v20  ;;  %v19377_v23 = vrot.slane %v6404_v56, 4  ;;  %v17064_v11 = vld [vmem:[%s20509_s4 + $0x1e0] sm:$0xff]  }
 0x226   : > { %15701 = vmatprep.subr.bf16.mxu0 %v17055_v61  ;;  %v9966_v34 = vsel %vm17546_vm5, %v9961_v21, %v9965_v29  ;;  %v9988_v15 = vor.u32 %v9987_v19, %v9984_v52  ;;  %v19389_v29 = vrot.slane %v9991_v38, 5  ;;  %v13429_v40 = vld [vmem:[%s17359_s30 + $0x80] sm:$0xf]  ;;  %v19393_v22 = vld [vmem:[%s17359_s30 + $0x84] sm:$0x1]  ;;  %v6665_v21 = vrot.slane %v19047_v24, 5 }
 0x227   : > { %16078 = vmatmul.mubr.bf16.vlgmr.msra.gmra.mrb[8].mxu1 %v19264_v4  ;;  %v17059_v4 = vld [vmem:[%s20507_s2 + $0x6d0] sm:$0xff]   ;;  %v10001_v37 = vrot.slane %v9999_v33, 5  ;;  %v6429_v58 = vshll.u32 %v13429_v40, 16  ;;  %v6410_v56 = vsel %vm17546_vm5, %v19377_v23, %v19363_v54  ;;  %v6449_v19 = vshll.u32 %v19401_v7, 16  ;;  %v14045_v33 = vld [vmem:[%s18378_s27 + $0xf8] sm:$0xf] }
 0x228   : > { %15694 = vmatmul.mubr.bf16.vlgmr.msra.gmra.mrb[0].mxu0 %v19243_v12  ;;  %16086 = vmatpush3.bf16.msra.mxu1 %v17056_v3  ;;  %v19365_v12 = vrot.slane %v6421_v30, 5  ;;  %v14044_v3 = vld [vmem:[%s18378_s27 + $0xf4] sm:$0x1]  ;;  %v19398_v41 = vrot.slane %v9988_v15, 4  ;;  %v17063_v30 = vld [vmem:[%s20507_s2 + $0x6e0] sm:$0xff]   ;;  %v17065_v38 = vld [vmem:[%s20507_s2 + $0x6e8] sm:$0xff]  }
 0x229   : > { %15702 = vmatpush3.bf16.msra.mxu0 %v17055_v61  ;;  %16087 = vmatprep.subr.bf16.mxu1 %v17058_v17  ;;  %v6382_v61 = vsel %vm17546_vm5, %v6377_v18, %v19300_v60  ;;  %v9998_v60 = vrot.slane %v9996_v45, 4  ;;  %v10005_v8 = vshll.u32 %v14044_v3, 16  ;;  %v17071_v54 = vld [vmem:[%s20507_s2 + $0x700] sm:$0xff]   ;;  %v17076_v24 = vld [vmem:[%s20509_s4 + $0x210] sm:$0xff]  }
 0x22a   : > { %15703 = vmatprep.subr.bf16.mxu0 %v17057_v55  ;;  %15697 = vmatprep.mubr.bf16.mxu0 %v13411_v43  ;;  %v6396_v43 = vsel %vm17546_vm5, %v6391_v10, %v19308_v31  ;;  %v6418_v31 = vor.u32 %v6417_v62, %v6414_v14  ;;  %v6435_v14 = vshll.u32 %v19393_v22, 16 }
 0x22b   : > { %16081 = vmatprep.mubr.bf16.mxu1 %v14027_v44  ;;  %v9980_v44 = vsel %vm17546_vm5, %v9975_v25, %v9979_v1  ;;  %v6426_v1 = vshrl.u32 %v13429_v40, 16  ;;  %v10002_v0 = vor.u32 %v10001_v37, %v9998_v60  ;;  %v17066_v25 = vld [vmem:[%s20509_s4 + $0x1e8] sm:$0xff]   ;;  %v19415_v45 = vrot.slane %v10005_v8, 5 }
 0x22c   : > { %16088 = vmatpush3.bf16.msra.mxu1 %v17058_v17  ;;  %v13453_v17 = vcombine.low %v6382_v61, %v6396_v43  ;;  %v14069_v18 = vcombine.low %v9966_v34, %v9980_v44  ;;  %v19396_v10 = vrot.slane %v6418_v31, 4  ;;  %v14047_v61 = vld [vmem:[%s18378_s27 + $0x100] sm:$0xf]  ;;  %v14048_v43 = vld [vmem:[%s18378_s27 + $0x104] sm:$0x1]  ;;  %v10010_v44 = vshrl.u32 %v14045_v33, 16 }
 0x22d   : > { %15704 = vmatpush3.bf16.msra.mxu0 %v17057_v55  ;;  %16089 = vmatprep.subr.bf16.mxu1 %v17060_v35  ;;  %v13431_v55 = vld [vmem:[%s17359_s30 + $0x88] sm:$0xf]  ;;  %v6428_v49 = vrot.slane %v6426_v1, 4  ;;  %v10013_v60 = vshll.u32 %v14045_v33, 16  ;;  %v19436_v37 = vrot.slane %v6435_v14, 5  ;;  %v10024_v15 = vshrl.u32 %v14047_v61, 16 }
 0x22e   : > { %15705 = vmatprep.subr.bf16.mxu0 %v17059_v4  ;;  %v6443_v20 = vshll.u32 %v13431_v55, 16  ;;  %v10012_v8 = vrot.slane %v10010_v44, 4  ;;  %v14050_v44 = vld [vmem:[%s18378_s27 + $0x10c] sm:$0x1] }
 0x22f   : > { %16082 = vmatmul.mubr.bf16.gmra.mrb[12].mxu1 %v14028_v5  ;;  %v9994_v5 = vsel %vm17546_vm5, %v19398_v41, %v19389_v29  ;;  %v19441_v29 = vrot.slane %v6449_v19, 5  ;;  %v10015_v40 = vrot.slane %v10013_v60, 5 }
 0x230   : > { %16090 = vmatpush3.bf16.msra.mxu1 %v17060_v35  ;;  %15698 = vmatmul.mubr.bf16.gmra.mrb[4].mxu0 %v13412_v13  ;;  %v6440_v35 = vshrl.u32 %v13431_v55, 16  ;;  %v6445_v52 = vrot.slane %v6443_v20, 5  ;;  %v6424_v13 = vsel %vm17546_vm5, %v19396_v10, %v19365_v12  ;;  %v17068_v12 = vld [vmem:[%s20509_s4 + $0x1f0] sm:$0xff]   ;;  %v10033_v55 = vshll.u32 %v14048_v43, 16 }
 0x231   : > { %15706 = vmatpush3.bf16.msra.mxu0 %v17059_v4  ;;  %16091 = vmatprep.subr.bf16.mxu1 %v17062_v59  ;;  %v6431_v4 = vrot.slane %v6429_v58, 5  ;;  %v13433_v10 = vld [vmem:[%s17359_s30 + $0x90] sm:$0xf]  ;;  %v10016_v20 = vor.u32 %v10015_v40, %v10012_v8 }
 0x232   : > { %15707 = vmatprep.subr.bf16.mxu0 %v17061_v51  ;;  %15717 = vmatprep.mubr.bf16.mxu0 %v13453_v17  ;;  %v6442_v62 = vrot.slane %v6440_v35, 4  ;;  %v10027_v17 = vshll.u32 %v14047_v61, 16  ;;  %v6457_v14 = vshll.u32 %v13433_v10, 16  ;;  %v19468_v61 = vrot.slane %v10033_v55, 5  ;;  %v14051_v8 = vld [vmem:[%s18378_s27 + $0x110] sm:$0xf] }
 0x233   : > { %16101 = vmatprep.mubr.bf16.mxu1 %v14069_v18  ;;  %v6432_v3 = vor.u32 %v6431_v4, %v6428_v49  ;;  %v17067_v18 = vld [vmem:[%s20507_s2 + $0x6f0] sm:$0xff]   ;;  %v13435_v49 = vld [vmem:[%s17359_s30 + $0x98] sm:$0xf]  ;;  %v19456_v4 = vld [vmem:[%s17359_s30 + $0x9c] sm:$0x1]  ;;  %v10017_v60 = vrot.slane %v10016_v20, 4 }
 0x234   : > { %16092 = vmatpush3.bf16.msra.mxu1 %v17062_v59  ;;  %v14046_v59 = vld [vmem:[%s18378_s27 + $0xfc] sm:$0x1]  ;;  %v6446_v34 = vor.u32 %v6445_v52, %v6442_v62  ;;  %v10029_v58 = vrot.slane %v10027_v17, 5  ;;  %v6477_v17 = vshll.u32 %v19456_v4, 16  ;;  %v14052_v20 = vld [vmem:[%s18378_s27 + $0x114] sm:$0x1] }
 0x235   : > { %15708 = vmatpush3.bf16.msra.mxu0 %v17061_v51  ;;  %16093 = vmatprep.subr.bf16.mxu1 %v17064_v11  ;;  %v10003_v51 = vrot.slane %v10002_v0, 4  ;;  %v10019_v31 = vshll.u32 %v14046_v59, 16  ;;  %v19444_v41 = vrot.slane %v6432_v3, 4  ;;  %v19449_v0 = vld [vmem:[%s17359_s30 + $0x94] sm:$0x1]  ;;  %v17070_v62 = vld [vmem:[%s20509_s4 + $0x1f8] sm:$0xff]  }
 0x236   : > { %15709 = vmatprep.subr.bf16.mxu0 %v17063_v30  ;;  %v19446_v1 = vrot.slane %v6446_v34, 4  ;;  %v6463_v33 = vshll.u32 %v19449_v0, 16  ;;  %v6468_v3 = vshrl.u32 %v13435_v49, 16  ;;  %v14049_v59 = vld [vmem:[%s18378_s27 + $0x108] sm:$0xf]  ;;  %v6471_v34 = vshll.u32 %v13435_v49, 16 }
 0x237   : > { %v10008_v35 = vsel %vm17546_vm5, %v10003_v51, %v19415_v45  ;;  %v19461_v52 = vrot.slane %v10019_v31, 5  ;;  %v17069_v45 = vld [vmem:[%s20507_s2 + $0x6f8] sm:$0xff]   ;;  %v6459_v51 = vrot.slane %v6457_v14, 5  ;;  %v10041_v49 = vshll.u32 %v14049_v59, 16 }
 0x238   : > { %16094 = vmatpush3.bf16.msra.mxu1 %v17064_v11  ;;  %v10026_v11 = vrot.slane %v10024_v15, 4  ;;  %v6470_v15 = vrot.slane %v6468_v3, 4  ;;  %v6473_v55 = vrot.slane %v6471_v34, 5  ;;  %v6452_v23 = vsel %vm17546_vm5, %v19446_v1, %v19441_v29 }
 0x239   : > { %15710 = vmatpush3.bf16.msra.mxu0 %v17063_v30  ;;  %16095 = vmatprep.subr.bf16.mxu1 %v17066_v25  ;;  %v6454_v30 = vshrl.u32 %v13433_v10, 16  ;;  %v10038_v10 = vshrl.u32 %v14049_v59, 16  ;;  %v10055_v14 = vshll.u32 %v14051_v8, 16  ;;  %v6479_v1 = vrot.slane %v6477_v17, 5 }
 0x23a   : > { %15711 = vmatprep.subr.bf16.mxu0 %v17065_v38  ;;  %v10030_v19 = vor.u32 %v10029_v58, %v10026_v11  ;;  %v14070_v11 = vcombine.low %v9994_v5, %v10008_v35  ;;  %v6465_v58 = vrot.slane %v6463_v33, 5  ;;  %v10047_v5 = vshll.u32 %v14050_v44, 16  ;;  %v13465_v35 = vld [vmem:[%s17359_s30 + $0x10] sm:$0xe] }
 0x23b   : > { %v6456_v43 = vrot.slane %v6454_v30, 4  ;;  %v10052_v30 = vshrl.u32 %v14051_v8, 16  ;;  %v10061_v33 = vshll.u32 %v14052_v20, 16  ;;  %v13473_v3 = vrot.slane %v13465_v35, 9  ;;  %v13467_v35 = vld [vmem:[%s17359_s30 + $0x20] sm:$0xe] }
 0x23c   : > { %16096 = vmatpush3.bf16.msra.mxu1 %v17066_v25  ;;  %v10031_v31 = vrot.slane %v10030_v19, 4  ;;  %v13454_v25 = vcombine.low %v6410_v56, %v6424_v13  ;;  %v6474_v56 = vor.u32 %v6473_v55, %v6470_v15  ;;  %v10040_v13 = vrot.slane %v10038_v10, 4  ;;  %v13466_v19 = vld [vmem:[%s17359_s30 + $0x18] sm:$0xe]  ;;  %v17074_v15 = vld [vmem:[%s20509_s4 + $0x208] sm:$0xff]   ;;  %v17075_v55 = vld [vmem:[%s20507_s2 + $0x710] sm:$0xff]  }
 0x23d   : > { %15712 = vmatpush3.bf16.msra.mxu0 %v17065_v38  ;;  %16097 = vmatprep.subr.bf16.mxu1 %v17068_v12  ;;  %v6460_v40 = vor.u32 %v6459_v51, %v6456_v43  ;;  %v6438_v38 = vsel %vm17546_vm5, %v19444_v41, %v19436_v37  ;;  %v17072_v37 = vld [vmem:[%s20509_s4 + $0x200] sm:$0xff]   ;;  %v10043_v41 = vrot.slane %v10041_v49, 5  ;;  %v10057_v43 = vrot.slane %v10055_v14, 5  ;;  %v17078_v49 = vld [vmem:[%s20509_s4 + $0x218] sm:$0xff]   ;;  %v13468_v14 = vld [vmem:[%s17359_s30 + $0x28] sm:$0xe] }
 0x23e   : > { %15713 = vmatprep.subr.bf16.mxu0 %v17067_v18  ;;  %v13474_v51 = vrot.slane %v13466_v19, 9  ;;  %v10036_v34 = vsel %vm17546_vm5, %v10031_v31, %v19468_v61  ;;  %v6475_v44 = vrot.slane %v6474_v56, 4  ;;  %v17079_v56 = vld [vmem:[%s20507_s2 + $0x720] sm:$0xff]  }
 0x23f   : > { %v6461_v29 = vrot.slane %v6460_v40, 4  ;;  %v10044_v59 = vor.u32 %v10043_v41, %v10040_v13  ;;  %v6685_v13 = vrot.slane %v19185_v2, 5  ;;  %v13472_v41 = vld [vmem:[%s17359_s30 + $0x48] sm:$0xe] }
 0x240   : > { %16098 = vmatpush3.bf16.msra.mxu1 %v17068_v12  ;;  %v10022_v12 = vsel %vm17546_vm5, %v10017_v60, %v19461_v52  ;;  %v10049_v52 = vrot.slane %v10047_v5, 5  ;;  %v6662_v60 = vsel %vm17371_vm2, %v13473_v3, %v6661_v26  ;;  %v6666_v61 = vsel %vm17371_vm2, %v13474_v51, %v6665_v21  ;;  %v17081_v2 = vld [vmem:[%s20507_s2 + $0x728] sm:$0xff]  }
 0x241   : > { %15714 = vmatpush3.bf16.msra.mxu0 %v17067_v18  ;;  %16099 = vmatprep.subr.bf16.mxu1 %v17070_v62  ;;  %v10054_v18 = vrot.slane %v10052_v30, 4  ;;  %v10045_v17 = vrot.slane %v10044_v59, 4  ;;  %v13455_v26 = vcombine.low %v6438_v38, %v6452_v23  ;;  %v14071_v31 = vcombine.low %v10022_v12, %v10036_v34  ;;  %v17080_v23 = vld [vmem:[%s20509_s4 + $0x220] sm:$0xff]   ;;  %v17082_v12 = vld [vmem:[%s20509_s4 + $0x228] sm:$0xff]   ;;  %v17084_v59 = vld [vmem:[%s20509_s4 + $0x230] sm:$0xff]  }
 0x242   : > { %15715 = vmatprep.subr.bf16.mxu0 %v17069_v45  ;;  %v6466_v10 = vsel %vm17546_vm5, %v6461_v29, %v6465_v58  ;;  %v17077_v58 = vld [vmem:[%s20507_s2 + $0x718] sm:$0xff]   ;;  %v6689_v5 = vrot.slane %v19194_v47, 5  ;;  %v13480_v47 = vrot.slane %v13472_v41, 9  ;;  %v17083_v29 = vld [vmem:[%s20507_s2 + $0x730] sm:$0xff]   ;;  %v17240_v51 = vld [vmem:[%s17359_s30 + $0x2c] sm:$0x1] }
 0x243   : > { %v10058_v8 = vor.u32 %v10057_v43, %v10054_v18  ;;  %v10050_v21 = vsel %vm17546_vm5, %v10045_v17, %v10049_v52  ;;  %v13475_v18 = vrot.slane %v13467_v35, 9  ;;  %v13476_v43 = vrot.slane %v13468_v14, 9  ;;  %v13469_v52 = vld [vmem:[%s17359_s30 + $0x30] sm:$0xe]  ;;  %v17085_v17 = vld [vmem:[%s20507_s2 + $0x738] sm:$0xff]   ;;  %v17091_v35 = vld [vmem:[%s20507_s2 + $0x748] sm:$0xff]  }
 0x244   : > { %16100 = vmatpush3.bf16.msra.mxu1 %v17070_v62  ;;  %v10063_v62 = vrot.slane %v10061_v33, 5  ;;  %v19564_v3 = vsel %vm17371_vm2, %v13480_v47, %v6689_v5  ;;  %v6673_v34 = vrot.slane %v17240_v51, 5  ;;  %v6875_v47 = vrot.slane %v19250_v48, 5 }
 0x245   : > { %15716 = vmatpush3.bf16.msra.mxu0 %v17069_v45  ;;  %16109 = vmatprep.subr.bf16.mxu1 %v17072_v37  ;;  %v13497_v45 = vcombine.low %v6662_v60, %v6666_v61  ;;  %v10059_v40 = vrot.slane %v10058_v8, 4  ;;  %v17086_v60 = vld [vmem:[%s20509_s4 + $0x238] sm:$0xff]   ;;  %v13511_v8 = vld [vmem:[%s17359_s30 + $0x70] sm:$0xe]  ;;  %v17241_v61 = vld [vmem:[%s17359_s30 + $0x34] sm:$0x1] }
 0x246   : > { %15725 = vmatprep.subr.bf16.mxu0 %v17071_v54 }
 0x247   : > { %16102 = vmatmul.mubr.bf16.vlgmr.msra.gmra.mrb[8].mxu1 %v14070_v11  ;;  %v10064_v11 = vsel %vm17546_vm5, %v10059_v40, %v10063_v62  ;;  %v13512_v62 = vld [vmem:[%s17359_s30 + $0x78] sm:$0xe]  ;;  %v13477_v40 = vrot.slane %v13469_v52, 9 }
 0x248   : > { %15718 = vmatmul.mubr.bf16.vlgmr.msra.gmra.mrb[0].mxu0 %v13454_v25  ;;  %16110 = vmatpush3.bf16.msra.mxu1 %v17072_v37  ;;  %v6480_v25 = vsel %vm17546_vm5, %v6475_v44, %v6479_v1  ;;  %v14072_v38 = vcombine.low %v10050_v21, %v10064_v11  ;;  %v13471_v37 = vld [vmem:[%s17359_s30 + $0x40] sm:$0xe]  ;;  %v17239_v1 = vld [vmem:[%s17359_s30 + $0x24] sm:$0x1] }
 0x249   : > { %15726 = vmatpush3.bf16.msra.mxu0 %v17071_v54  ;;  %16111 = vmatprep.subr.bf16.mxu1 %v17074_v15  ;;  %v13456_v20 = vcombine.low %v6466_v10, %v6480_v25  ;;  %v17088_v54 = vld [vmem:[%s18378_s27 + $0x8] ss:$8 sps:$4 sm:$0xff]   ;;  %v13479_v30 = vrot.slane %v13471_v37, 9  ;;  %v6669_v33 = vrot.slane %v17239_v1, 5  ;;  %v6883_v10 = vrot.slane %v19330_v46, 5  ;;  %v17089_v25 = vld [vmem:[%s20509_s4 + $0x240] sm:$0xff]  }
 0x24a   : > { %15727 = vmatprep.subr.bf16.mxu0 %v17073_v42  ;;  %15721 = vmatprep.mubr.bf16.mxu0 %v13455_v26  ;;  %v13519_v26 = vrot.slane %v13511_v8, 9  ;;  %v17092_v37 = vld [vmem:[%s20509_s4 + $0x248] sm:$0xff]   ;;  %v6891_v1 = vrot.slane %v19401_v7, 5  ;;  %v17104_v7 = vld [vmem:[%s18378_s27 + $0x38] ss:$8 sps:$4 sm:$0xff]  }
 0x24b   : > { %16105 = vmatprep.mubr.bf16.mxu1 %v14071_v31  ;;  %v19556_v19 = vsel %vm17371_vm2, %v13479_v30, %v6685_v13  ;;  %v13520_v31 = vrot.slane %v13512_v62, 9  ;;  %v6670_v46 = vsel %vm17371_vm2, %v13475_v18, %v6669_v33  ;;  %v13510_v13 = vld [vmem:[%s17359_s30 + $0x68] sm:$0xe]  ;;  %v6871_v30 = vrot.slane %v19231_v57, 5  ;;  %v17093_v33 = vld [vmem:[%s20507_s2 + $0x750] sm:$0xff]  }
 0x24c   : > { %16112 = vmatpush3.bf16.msra.mxu1 %v17074_v15  ;;  %v13500_v44 = vcombine.low %v19556_v19, %v19564_v3  ;;  %v13470_v15 = vld [vmem:[%s17359_s30 + $0x38] sm:$0xe]  ;;  %v13518_v14 = vrot.slane %v13510_v13, 9  ;;  %v17094_v57 = vld [vmem:[%s20509_s4 + $0x250] sm:$0xff]   ;;  %v13514_v18 = vld [vmem:[%s17359_s30 + $0x88] sm:$0xe] }
 0x24d   : > { %15728 = vmatpush3.bf16.msra.mxu0 %v17073_v42  ;;  %16113 = vmatprep.subr.bf16.mxu1 %v17076_v24  ;;  %v6677_v42 = vrot.slane %v17241_v61, 5  ;;  %v13515_v62 = vld [vmem:[%s17359_s30 + $0x90] sm:$0xe]  ;;  %v13516_v61 = vld [vmem:[%s17359_s30 + $0x98] sm:$0xe]  ;;  %v17100_v19 = vld [vmem:[%s20509_s4 + $0x268] sm:$0xff]  }
 0x24e   : > { %15729 = vmatprep.subr.bf16.mxu0 %v17075_v55  ;;  %v6876_v51 = vsel %vm17371_vm2, %v13518_v14, %v6875_v47  ;;  %v17099_v3 = vld [vmem:[%s20507_s2 + $0x768] sm:$0xff]   ;;  %v17109_v13 = vld [vmem:[%s20509_s4 + $0x280] sm:$0xff]  }
 0x24f   : > { %16106 = vmatmul.mubr.bf16.gmra.mrb[12].mxu1 %v14072_v38  ;;  %v19598_v38 = vsel %vm17371_vm2, %v13520_v31, %v6883_v10  ;;  %v17103_v10 = vld [vmem:[%s20509_s4 + $0x270] sm:$0xff]   ;;  %v17110_v14 = vld [vmem:[%s18378_s27 + $0x60] ss:$8 sps:$4 sm:$0xff]  }
 0x250   : > { %16114 = vmatpush3.bf16.msra.mxu1 %v17076_v24  ;;  %15722 = vmatmul.mubr.bf16.gmra.mrb[4].mxu0 %v13456_v20  ;;  %v17242_v24 = vld [vmem:[%s17359_s30 + $0x3c] sm:$0x1]  ;;  %v6674_v20 = vsel %vm17371_vm2, %v13476_v43, %v6673_v34 }
 0x251   : > { %15730 = vmatpush3.bf16.msra.mxu0 %v17075_v55  ;;  %16115 = vmatprep.subr.bf16.mxu1 %v17078_v49  ;;  %v13478_v55 = vrot.slane %v13470_v15, 9  ;;  %v6681_v21 = vrot.slane %v17242_v24, 5  ;;  %v13498_v5 = vcombine.low %v6670_v46, %v6674_v20  ;;  %v6899_v15 = vrot.slane %v19456_v4, 5  ;;  %v17098_v24 = vld [vmem:[%s20509_s4 + $0x260] sm:$0xff]  }
 0x252   : > { %15731 = vmatprep.subr.bf16.mxu0 %v17077_v58  ;;  %15741 = vmatprep.mubr.bf16.mxu0 %v13497_v45  ;;  %v6879_v45 = vrot.slane %v19321_v32, 5  ;;  %v17087_v32 = vld [vmem:[%s20507_s2 + $0x740] sm:$0xff]  }
 0x253   : > { %16125 = vmatprep.mubr.bf16.mxu1 %v17088_v54  ;;  %v13509_v54 = vld [vmem:[%s17359_s30 + $0x60] sm:$0xe] }
 0x254   : > { %16116 = vmatpush3.bf16.msra.mxu1 %v17078_v49  ;;  %v19591_v11 = vsel %vm17371_vm2, %v13519_v26, %v6879_v45  ;;  %v17090_v49 = vld [vmem:[%s18378_s27 + $0x18] ss:$8 sps:$4 sm:$0xff]   ;;  %v13517_v41 = vrot.slane %v13509_v54, 9  ;;  %v13524_v26 = vrot.slane %v13516_v61, 9 }
 0x255   : > { %15732 = vmatpush3.bf16.msra.mxu0 %v17077_v58  ;;  %16117 = vmatprep.subr.bf16.mxu1 %v17080_v23  ;;  %v13542_v58 = vcombine.low %v19591_v11, %v19598_v38  ;;  %v17108_v45 = vld [vmem:[%s18378_s27 + $0x50] ss:$8 sps:$4 sm:$0xff]  }
 0x256   : > { %15733 = vmatprep.subr.bf16.mxu0 %v17079_v56  ;;  %v6872_v43 = vsel %vm17371_vm2, %v13517_v41, %v6871_v30  ;;  %v14156_v30 = vld [vmem:[%s18378_s27 + $0x14] sm:$0x1] }
 0x257   : > { %v13541_v4 = vcombine.low %v6872_v43, %v6876_v51  ;;  %v17113_v11 = vld [vmem:[%s20507_s2 + $0x790] sm:$0xff]  }
 0x258   : > { %16118 = vmatpush3.bf16.msra.mxu1 %v17080_v23  ;;  %v6678_v23 = vsel %vm17371_vm2, %v13477_v40, %v6677_v42  ;;  %v13523_v42 = vrot.slane %v13515_v62, 9  ;;  %v19664_v40 = vsel %vm17371_vm2, %v13524_v26, %v6899_v15  ;;  %v17114_v15 = vld [vmem:[%s20509_s4 + $0x290] sm:$0xff]   ;;  %v17124_v62 = vld [vmem:[%s18378_s27 + $0x80] ss:$8 sps:$4 sm:$0xff]  }
 0x259   : > { %15734 = vmatpush3.bf16.msra.mxu0 %v17079_v56  ;;  %16119 = vmatprep.subr.bf16.mxu1 %v17082_v12  ;;  %v6682_v56 = vsel %vm17371_vm2, %v13478_v55, %v6681_v21  ;;  %v17097_v21 = vld [vmem:[%s20507_s2 + $0x760] sm:$0xff]  }
 0x25a   : > { %15735 = vmatprep.subr.bf16.mxu0 %v17081_v2 }
 0x25c   : > { %16120 = vmatpush3.bf16.msra.mxu1 %v17082_v12  ;;  %v17102_v12 = vld [vmem:[%s18378_s27 + $0x28] ss:$8 sps:$4 sm:$0xff]  }
 0x25d   : > { %15736 = vmatpush3.bf16.msra.mxu0 %v17081_v2  ;;  %16121 = vmatprep.subr.bf16.mxu1 %v17084_v59  ;;  %v13499_v2 = vcombine.low %v6678_v23, %v6682_v56  ;;  %v17105_v56 = vld [vmem:[%s20507_s2 + $0x778] sm:$0xff]  }
 0x25e   : > { %15737 = vmatprep.subr.bf16.mxu0 %v17083_v29 }
 0x260   : > { %16122 = vmatpush3.bf16.msra.mxu1 %v17084_v59  ;;  %v13513_v59 = vld [vmem:[%s17359_s30 + $0x80] sm:$0xe] }
 0x261   : > { %15738 = vmatpush3.bf16.msra.mxu0 %v17083_v29  ;;  %16123 = vmatprep.subr.bf16.mxu1 %v17086_v60  ;;  %v6887_v29 = vrot.slane %v19393_v22, 5  ;;  %v13521_v48 = vrot.slane %v13513_v59, 9  ;;  %v13522_v22 = vrot.slane %v13514_v18, 9  ;;  %v17111_v59 = vld [vmem:[%s20507_s2 + $0x788] sm:$0xff]   ;;  %v17122_v18 = vld [vmem:[%s18378_s27 + $0x70] ss:$8 sps:$4 sm:$0xff]  }
 0x262   : > { %15739 = vmatprep.subr.bf16.mxu0 %v17085_v17 }
 0x263   : > { %v19639_v34 = vsel %vm17371_vm2, %v13521_v48, %v6887_v29  ;;  %v19643_v52 = vsel %vm17371_vm2, %v13522_v22, %v6891_v1  ;;  %v14157_v48 = vld [vmem:[%s18378_s27 + $0x18] sm:$0xf]  ;;  %v14159_v22 = vld [vmem:[%s18378_s27 + $0x20] sm:$0xf] }
 0x264   : > { %16124 = vmatpush3.bf16.msra.mxu1 %v17086_v60  ;;  %v6895_v60 = vrot.slane %v19449_v0, 5  ;;  %v13543_v8 = vcombine.low %v19639_v34, %v19643_v52  ;;  %v17095_v0 = vld [vmem:[%s20507_s2 + $0x758] sm:$0xff]   ;;  %v10609_v38 = vshrl.u32 %v14157_v48, 16  ;;  %v10626_v61 = vshll.u32 %v14159_v22, 16 }
 0x265   : > { %15740 = vmatpush3.bf16.msra.mxu0 %v17085_v17  ;;  %16133 = vmatprep.subr.bf16.mxu1 %v17089_v25  ;;  %v17096_v17 = vld [vmem:[%s20509_s4 + $0x258] sm:$0xff]  }
 0x266   : > { %15749 = vmatprep.subr.bf16.mxu0 %v17087_v32  ;;  %v19660_v31 = vsel %vm17371_vm2, %v13523_v42, %v6895_v60  ;;  %v17116_v34 = vld [vmem:[%s20509_s4 + $0x298] sm:$0xff]  }
 0x267   : > { %16126 = vmatmul.mubr.bf16.vlgmr.msra.gmra.mrb[8].mxu1 %v17090_v49  ;;  %v13544_v55 = vcombine.low %v19660_v31, %v19664_v40  ;;  %v17106_v49 = vld [vmem:[%s20509_s4 + $0x278] sm:$0xff]  }
 0x268   : > { %15742 = vmatmul.mubr.bf16.vlgmr.msra.gmra.mrb[0].mxu0 %v13498_v5  ;;  %16134 = vmatpush3.bf16.msra.mxu1 %v17089_v25  ;;  %v14155_v25 = vld [vmem:[%s18378_s27 + $0x10] sm:$0xf]  ;;  %v14154_v5 = vld [vmem:[%s18378_s27 + $0xc] sm:$0x1] }
 0x269   : > { %15750 = vmatpush3.bf16.msra.mxu0 %v17087_v32  ;;  %16135 = vmatprep.subr.bf16.mxu1 %v17092_v37  ;;  %v17101_v32 = vld [vmem:[%s20507_s2 + $0x770] sm:$0xff]   ;;  %v10595_v54 = vshrl.u32 %v14155_v25, 16  ;;  %v10598_v23 = vshll.u32 %v14155_v25, 16  ;;  %v10590_v29 = vshll.u32 %v14154_v5, 16  ;;  %v10628_v25 = vrot.slane %v10626_v61, 5 }
 0x26a   : > { %15751 = vmatprep.subr.bf16.mxu0 %v17091_v35  ;;  %15745 = vmatprep.mubr.bf16.mxu0 %v13499_v2  ;;  %v17107_v2 = vld [vmem:[%s20507_s2 + $0x780] sm:$0xff]   ;;  %v17127_v52 = vld [vmem:[%s17359_s30 + $0xb0] ss:$8 sps:$4 sm:$0xff]  }
 0x26b   : > { %16129 = vmatprep.mubr.bf16.mxu1 %v17102_v12  ;;  %v10597_v12 = vrot.slane %v10595_v54, 4  ;;  %v10600_v41 = vrot.slane %v10598_v23, 5  ;;  %v10592_v43 = vrot.slane %v10590_v29, 5  ;;  %v17121_v61 = vld [vmem:[%s20507_s2 + $0x7b0] sm:$0xff]  }
 0x26c   : > { %16136 = vmatpush3.bf16.msra.mxu1 %v17092_v37 }
 0x26d   : > { %15752 = vmatpush3.bf16.msra.mxu0 %v17091_v35  ;;  %16137 = vmatprep.subr.bf16.mxu1 %v17094_v57  ;;  %v10601_v1 = vor.u32 %v10600_v41, %v10597_v12  ;;  %v14165_v41 = vld [vmem:[%s18378_s27 + $0x38] sm:$0xf] }
 0x26e   : > { %15753 = vmatprep.subr.bf16.mxu0 %v17093_v33 }
 0x26f   : > { %16130 = vmatmul.mubr.bf16.gmra.mrb[12].mxu1 %v17104_v7  ;;  %v10602_v51 = vrot.slane %v10601_v1, 4 }
 0x270   : > { %16138 = vmatpush3.bf16.msra.mxu1 %v17094_v57  ;;  %15746 = vmatmul.mubr.bf16.gmra.mrb[4].mxu0 %v13500_v44  ;;  %v14153_v44 = vld [vmem:[%s18378_s27 + $0x8] sm:$0xf] }
 0x271   : > { %15754 = vmatpush3.bf16.msra.mxu0 %v17093_v33  ;;  %16139 = vmatprep.subr.bf16.mxu1 %v17096_v17  ;;  %v10581_v46 = vshrl.u32 %v14153_v44, 16  ;;  %v10584_v20 = vshll.u32 %v14153_v44, 16  ;;  %v10604_v33 = vshll.u32 %v14156_v30, 16  ;;  %v17112_v57 = vld [vmem:[%s20509_s4 + $0x288] sm:$0xff]   ;;  %v17118_v44 = vld [vmem:[%s20509_s4 + $0x2a0] sm:$0xff]  }
 0x272   : > { %15755 = vmatprep.subr.bf16.mxu0 %v17095_v0  ;;  %15765 = vmatprep.mubr.bf16.mxu0 %v13541_v4  ;;  %v17115_v4 = vld [vmem:[%s20507_s2 + $0x798] sm:$0xff]   ;;  %v14167_v30 = vld [vmem:[%s18378_s27 + $0x40] sm:$0xf] }
 0x273   : > { %16149 = vmatprep.mubr.bf16.mxu1 %v17108_v45  ;;  %v10583_v35 = vrot.slane %v10581_v46, 4  ;;  %v10586_v37 = vrot.slane %v10584_v20, 5  ;;  %v10606_v60 = vrot.slane %v10604_v33, 5  ;;  %v14158_v45 = vld [vmem:[%s18378_s27 + $0x1c] sm:$0x1]  ;;  %v17117_v20 = vld [vmem:[%s20507_s2 + $0x7a0] sm:$0xff]  }
 0x274   : > { %16140 = vmatpush3.bf16.msra.mxu1 %v17096_v17  ;;  %v10623_v17 = vshrl.u32 %v14159_v22, 16  ;;  %v10618_v5 = vshll.u32 %v14158_v45, 16  ;;  %v14168_v33 = vld [vmem:[%s18378_s27 + $0x44] sm:$0x1]  ;;  %v10682_v22 = vshll.u32 %v14167_v30, 16 }
 0x275   : > { %15756 = vmatpush3.bf16.msra.mxu0 %v17095_v0  ;;  %16141 = vmatprep.subr.bf16.mxu1 %v17098_v24  ;;  %v10587_v47 = vor.u32 %v10586_v37, %v10583_v35  ;;  %v10607_v26 = vsel %vm17546_vm5, %v10602_v51, %v10606_v60  ;;  %v14161_v0 = vld [vmem:[%s18378_s27 + $0x28] sm:$0xf] }
 0x276   : > { %15757 = vmatprep.subr.bf16.mxu0 %v17097_v21  ;;  %v10640_v46 = vshll.u32 %v14161_v0, 16 }
 0x277   : > { %v10588_v7 = vrot.slane %v10587_v47, 4  ;;  %v14166_v47 = vld [vmem:[%s18378_s27 + $0x3c] sm:$0x1] }
 0x278   : > { %16142 = vmatpush3.bf16.msra.mxu1 %v17098_v24  ;;  %v14160_v24 = vld [vmem:[%s18378_s27 + $0x24] sm:$0x1]  ;;  %v10642_v40 = vrot.slane %v10640_v46, 5 }
 0x279   : > { %15758 = vmatpush3.bf16.msra.mxu0 %v17097_v21  ;;  %16143 = vmatprep.subr.bf16.mxu1 %v17100_v19  ;;  %v10593_v42 = vsel %vm17546_vm5, %v10588_v7, %v10592_v43  ;;  %v10611_v21 = vrot.slane %v10609_v38, 4  ;;  %v10632_v35 = vshll.u32 %v14160_v24, 16  ;;  %v17123_v7 = vld [vmem:[%s20509_s4 + $0x2b0] sm:$0xff]   ;;  %v10620_v43 = vrot.slane %v10618_v5, 5 }
 0x27a   : > { %15759 = vmatprep.subr.bf16.mxu0 %v17099_v3  ;;  %v10688_v38 = vshll.u32 %v14168_v33, 16  ;;  %v10684_v24 = vrot.slane %v10682_v22, 5  ;;  %v14198_v5 = vld [vmem:[%s18378_s27 + $0x54] sm:$0x1] }
 0x27b   : > { %v10634_v51 = vrot.slane %v10632_v35, 5  ;;  %v17128_v35 = vld [vmem:[%s20507_s2 + $0x7c0] sm:$0xff]  }
 0x27c   : > { %16144 = vmatpush3.bf16.msra.mxu1 %v17100_v19 }
 0x27d   : > { %15760 = vmatpush3.bf16.msra.mxu0 %v17099_v3  ;;  %16145 = vmatprep.subr.bf16.mxu1 %v17103_v10  ;;  %v10625_v3 = vrot.slane %v10623_v17, 4 }
 0x27e   : > { %15761 = vmatprep.subr.bf16.mxu0 %v17101_v32 }
 0x27f   : > { %v10629_v1 = vor.u32 %v10628_v25, %v10625_v3 }
 0x280   : > { %16146 = vmatpush3.bf16.msra.mxu1 %v17103_v10  ;;  %v14185_v10 = vcombine.low %v10593_v42, %v10607_v26 }
 0x281   : > { %15762 = vmatpush3.bf16.msra.mxu0 %v17101_v32  ;;  %16147 = vmatprep.subr.bf16.mxu1 %v17106_v49  ;;  %v10637_v32 = vshrl.u32 %v14161_v0, 16  ;;  %v10630_v26 = vrot.slane %v10629_v1, 4  ;;  %v10872_v1 = vshll.u32 %v14198_v5, 16 }
 0x282   : > { %15763 = vmatprep.subr.bf16.mxu0 %v17105_v56 }
 0x283   : > { %v10639_v31 = vrot.slane %v10637_v32, 4  ;;  %v10690_v32 = vrot.slane %v10688_v38, 5  ;;  %v14201_v38 = vld [vmem:[%s18378_s27 + $0x60] sm:$0xf] }
 0x284   : > { %16148 = vmatpush3.bf16.msra.mxu1 %v17106_v49  ;;  %v14162_v49 = vld [vmem:[%s18378_s27 + $0x2c] sm:$0x1] }
 0x285   : > { %15764 = vmatpush3.bf16.msra.mxu0 %v17105_v56  ;;  %16157 = vmatprep.subr.bf16.mxu1 %v17109_v13  ;;  %v14164_v56 = vld [vmem:[%s18378_s27 + $0x34] sm:$0x1]  ;;  %v10643_v60 = vor.u32 %v10642_v40, %v10639_v31 }
 0x286   : > { %15773 = vmatprep.subr.bf16.mxu0 %v17107_v2 }
 0x287   : > { %16150 = vmatmul.mubr.bf16.vlgmr.msra.gmra.mrb[8].mxu1 %v17110_v14  ;;  %v10660_v14 = vshll.u32 %v14164_v56, 16 }
 0x288   : > { %15766 = vmatmul.mubr.bf16.vlgmr.msra.gmra.mrb[0].mxu0 %v13542_v58  ;;  %16158 = vmatpush3.bf16.msra.mxu1 %v17109_v13  ;;  %v10612_v58 = vshll.u32 %v14157_v48, 16  ;;  %v17120_v13 = vld [vmem:[%s20509_s4 + $0x2a8] sm:$0xff]   ;;  %v10679_v48 = vshrl.u32 %v14167_v30, 16 }
 0x289   : > { %15774 = vmatpush3.bf16.msra.mxu0 %v17107_v2  ;;  %16159 = vmatprep.subr.bf16.mxu1 %v17112_v57  ;;  %v10646_v2 = vshll.u32 %v14162_v49, 16  ;;  %v17129_v49 = vld [vmem:[%s20509_s4 + $0x2c0] sm:$0xff]  }
 0x28a   : > { %15775 = vmatprep.subr.bf16.mxu0 %v17111_v59  ;;  %15769 = vmatprep.mubr.bf16.mxu0 %v13543_v8  ;;  %v14163_v8 = vld [vmem:[%s18378_s27 + $0x30] sm:$0xf]  ;;  %v10614_v19 = vrot.slane %v10612_v58, 5  ;;  %v14199_v58 = vld [vmem:[%s18378_s27 + $0x58] sm:$0xf]  ;;  %v10681_v45 = vrot.slane %v10679_v48, 4 }
 0x28b   : > { %16153 = vmatprep.mubr.bf16.mxu1 %v17122_v18  ;;  %v10651_v54 = vshrl.u32 %v14163_v8, 16  ;;  %v10654_v23 = vshll.u32 %v14163_v8, 16  ;;  %v10668_v18 = vshll.u32 %v14165_v41, 16  ;;  %v10648_v0 = vrot.slane %v10646_v2, 5 }
 0x28c   : > { %16160 = vmatpush3.bf16.msra.mxu1 %v17112_v57  ;;  %v10615_v29 = vor.u32 %v10614_v19, %v10611_v21  ;;  %v14197_v57 = vld [vmem:[%s18378_s27 + $0x50] sm:$0xf]  ;;  %v17125_v21 = vld [vmem:[%s20507_s2 + $0x7b8] sm:$0xff]   ;;  %v10644_v19 = vrot.slane %v10643_v60, 4  ;;  %v10874_v60 = vrot.slane %v10872_v1, 5 }
 0x28d   : > { %15776 = vmatpush3.bf16.msra.mxu0 %v17111_v59  ;;  %16161 = vmatprep.subr.bf16.mxu1 %v17114_v15  ;;  %v10653_v37 = vrot.slane %v10651_v54, 4  ;;  %v10656_v12 = vrot.slane %v10654_v23, 5  ;;  %v10665_v59 = vshrl.u32 %v14165_v41, 16  ;;  %v10863_v17 = vshrl.u32 %v14197_v57, 16 }
 0x28e   : > { %15777 = vmatprep.subr.bf16.mxu0 %v17113_v11  ;;  %v10616_v42 = vrot.slane %v10615_v29, 4  ;;  %v10635_v23 = vsel %vm17546_vm5, %v10630_v26, %v10634_v51  ;;  %v10649_v41 = vsel %vm17546_vm5, %v10644_v19, %v10648_v0  ;;  %v10891_v0 = vshrl.u32 %v14201_v38, 16  ;;  %v17136_v19 = vld [vmem:[%s20509_s4 + $0x2d8] sm:$0xff]  }
 0x28f   : > { %16154 = vmatmul.mubr.bf16.gmra.mrb[12].mxu1 %v17124_v62  ;;  %v10866_v62 = vshll.u32 %v14197_v57, 16  ;;  %v10667_v8 = vrot.slane %v10665_v59, 4  ;;  %v10865_v46 = vrot.slane %v10863_v17, 4  ;;  %v17132_v59 = vld [vmem:[%s20509_s4 + $0x2c8] sm:$0xff]  }
 0x290   : > { %16162 = vmatpush3.bf16.msra.mxu1 %v17114_v15  ;;  %15770 = vmatmul.mubr.bf16.gmra.mrb[4].mxu0 %v13544_v55  ;;  %v17119_v55 = vld [vmem:[%s20507_s2 + $0x7a8] sm:$0xff]   ;;  %v10657_v15 = vor.u32 %v10656_v12, %v10653_v37  ;;  %v10621_v54 = vsel %vm17546_vm5, %v10616_v42, %v10620_v43  ;;  %v17133_v43 = vld [vmem:[%s20507_s2 + $0x7d0] sm:$0xff]  }
 0x291   : > { %15778 = vmatpush3.bf16.msra.mxu0 %v17113_v11  ;;  %16163 = vmatprep.subr.bf16.mxu1 %v17116_v34  ;;  %v10674_v11 = vshll.u32 %v14166_v47, 16  ;;  %v17130_v37 = vld [vmem:[%s17359_s30 + $0xc0] ss:$8 sps:$4 sm:$0xff]   ;;  %v14186_v12 = vcombine.low %v10621_v54, %v10635_v23  ;;  %v14204_v42 = vld [vmem:[%s18378_s27 + $0x6c] sm:$0x1] }
 0x292   : > { %15779 = vmatprep.subr.bf16.mxu0 %v17115_v4  ;;  %15789 = vmatprep.mubr.bf16.mxu0 %v17127_v52  ;;  %v17126_v52 = vld [vmem:[%s20509_s4 + $0x2b8] sm:$0xff]   ;;  %v10658_v3 = vrot.slane %v10657_v15, 4  ;;  %v17131_v47 = vld [vmem:[%s20507_s2 + $0x7c8] sm:$0xff]  }
 0x293   : > { %16173 = vmatprep.mubr.bf16.mxu1 %v14185_v10  ;;  %v10880_v10 = vshll.u32 %v14199_v58, 16  ;;  %v10676_v25 = vrot.slane %v10674_v11, 5  ;;  %v14203_v17 = vld [vmem:[%s18378_s27 + $0x68] sm:$0xf] }
 0x294   : > { %16164 = vmatpush3.bf16.msra.mxu1 %v17116_v34  ;;  %v10662_v34 = vrot.slane %v10660_v14, 5 }
 0x295   : > { %15780 = vmatpush3.bf16.msra.mxu0 %v17115_v4  ;;  %16165 = vmatprep.subr.bf16.mxu1 %v17118_v44  ;;  %v10670_v4 = vrot.slane %v10668_v18, 5  ;;  %v10882_v40 = vrot.slane %v10880_v10, 5  ;;  %v17141_v18 = vld [vmem:[%s17359_s30 + $0xd0] ss:$8 sps:$4 sm:$0xff]  }
 0x296   : > { %15781 = vmatprep.subr.bf16.mxu0 %v17117_v20  ;;  %v10663_v30 = vsel %vm17546_vm5, %v10658_v3, %v10662_v34  ;;  %v10894_v34 = vshll.u32 %v14201_v38, 16  ;;  %v17147_v3 = vld [vmem:[%s17359_s30 + $0x100] ss:$8 sps:$4 sm:$0xff]  }
 0x297   : > { %v10671_v56 = vor.u32 %v10670_v4, %v10667_v8  ;;  %v14187_v48 = vcombine.low %v10649_v41, %v10663_v30  ;;  %v17140_v41 = vld [vmem:[%s20509_s4 + $0x2e8] sm:$0xff]  }
 0x298   : > { %16166 = vmatpush3.bf16.msra.mxu1 %v17118_v44  ;;  %v10877_v44 = vshrl.u32 %v14199_v58, 16  ;;  %v17134_v58 = vld [vmem:[%s20509_s4 + $0x2d0] sm:$0xff]  }
 0x299   : > { %15782 = vmatpush3.bf16.msra.mxu0 %v17117_v20  ;;  %16167 = vmatprep.subr.bf16.mxu1 %v17120_v13  ;;  %v10868_v20 = vrot.slane %v10866_v62, 5  ;;  %v10672_v2 = vrot.slane %v10671_v56, 4  ;;  %v17144_v62 = vld [vmem:[%s17359_s30 + $0xe0] ss:$8 sps:$4 sm:$0xff]   ;;  %v10893_v56 = vrot.slane %v10891_v0, 4 }
 0x29a   : > { %15783 = vmatprep.subr.bf16.mxu0 %v17119_v55  ;;  %v10879_v31 = vrot.slane %v10877_v44, 4  ;;  %v17135_v44 = vld [vmem:[%s20507_s2 + $0x7d8] sm:$0xff]  }
 0x29b   : > { %v10869_v29 = vor.u32 %v10868_v20, %v10865_v46  ;;  %v10677_v22 = vsel %vm17546_vm5, %v10672_v2, %v10676_v25  ;;  %v17138_v46 = vld [vmem:[%s20509_s4 + $0x2e0] sm:$0xff]  }
 0x29c   : > { %16168 = vmatpush3.bf16.msra.mxu1 %v17120_v13  ;;  %v10685_v13 = vor.u32 %v10684_v24, %v10681_v45  ;;  %v10883_v33 = vor.u32 %v10882_v40, %v10879_v31  ;;  %v10905_v45 = vshrl.u32 %v14203_v17, 16  ;;  %v10908_v24 = vshll.u32 %v14203_v17, 16  ;;  %v14206_v31 = vld [vmem:[%s18378_s27 + $0x74] sm:$0x1]  ;;  %v14208_v40 = vld [vmem:[%s18378_s27 + $0x7c] sm:$0x1] }
 0x29d   : > { %15784 = vmatpush3.bf16.msra.mxu0 %v17119_v55  ;;  %16169 = vmatprep.subr.bf16.mxu1 %v17123_v7  ;;  %v14200_v55 = vld [vmem:[%s18378_s27 + $0x5c] sm:$0x1]  ;;  %v10870_v51 = vrot.slane %v10869_v29, 4  ;;  %v17139_v29 = vld [vmem:[%s20507_s2 + $0x7e8] sm:$0xff]   ;;  %v10928_v1 = vshll.u32 %v14206_v31, 16  ;;  %v17148_v31 = vld [vmem:[%s20507_s2 + $0x800] sm:$0xff]  }
 0x29e   : > { %15785 = vmatprep.subr.bf16.mxu0 %v17121_v61  ;;  %v10686_v14 = vrot.slane %v10685_v13, 4  ;;  %v10886_v57 = vshll.u32 %v14200_v55, 16  ;;  %v10884_v15 = vrot.slane %v10883_v33, 4  ;;  %v10896_v13 = vrot.slane %v10894_v34, 5  ;;  %v17137_v55 = vld [vmem:[%s20507_s2 + $0x7e0] sm:$0xff]  }
 0x29f   : > { %v10875_v8 = vsel %vm17546_vm5, %v10870_v51, %v10874_v60  ;;  %v10907_v5 = vrot.slane %v10905_v45, 4  ;;  %v10942_v33 = vshll.u32 %v14208_v40, 16  ;;  %v14212_v51 = vld [vmem:[%s18378_s27 + $0x8c] sm:$0x1]  ;;  %v13627_v60 = vld [vmem:[%s17359_s30 + $0xb8] sm:$0xf] }
 0x2a0   : > { %16170 = vmatpush3.bf16.msra.mxu1 %v17123_v7  ;;  %v10691_v7 = vsel %vm17546_vm5, %v10686_v14, %v10690_v32  ;;  %v10888_v11 = vrot.slane %v10886_v57, 5  ;;  %v14209_v57 = vld [vmem:[%s18378_s27 + $0x80] sm:$0xf]  ;;  %v10930_v45 = vrot.slane %v10928_v1, 5 }
 0x2a1   : > { %15786 = vmatpush3.bf16.msra.mxu0 %v17121_v61  ;;  %16171 = vmatprep.subr.bf16.mxu1 %v17126_v52  ;;  %v14202_v61 = vld [vmem:[%s18378_s27 + $0x64] sm:$0x1]  ;;  %v14188_v26 = vcombine.low %v10677_v22, %v10691_v7  ;;  %v14211_v22 = vld [vmem:[%s18378_s27 + $0x88] sm:$0xf]  ;;  %v13625_v7 = vld [vmem:[%s17359_s30 + $0xb0] sm:$0xf] }
 0x2a2   : > { %15787 = vmatprep.subr.bf16.mxu0 %v17125_v21  ;;  %v10889_v4 = vsel %vm17546_vm5, %v10884_v15, %v10888_v11  ;;  %v10900_v10 = vshll.u32 %v14202_v61, 16  ;;  %v10947_v11 = vshrl.u32 %v14209_v57, 16  ;;  %v10950_v38 = vshll.u32 %v14209_v57, 16 }
 0x2a3   : > { %v14229_v20 = vcombine.low %v10875_v8, %v10889_v4  ;;  %v10964_v17 = vshll.u32 %v14211_v22, 16  ;;  %v7421_v61 = vshll.u32 %v13625_v7, 16  ;;  %v7435_v8 = vshll.u32 %v13627_v60, 16 }
 0x2a4   : > { %16172 = vmatpush3.bf16.msra.mxu1 %v17126_v52  ;;  %v14205_v52 = vld [vmem:[%s18378_s27 + $0x70] sm:$0xf]  ;;  %v19841_v30 = vrot.slane %v10900_v10, 5  ;;  %v10970_v10 = vshll.u32 %v14212_v51, 16 }
 0x2a5   : > { %15788 = vmatpush3.bf16.msra.mxu0 %v17125_v21  ;;  %16181 = vmatprep.subr.bf16.mxu1 %v17129_v49  ;;  %v14207_v21 = vld [vmem:[%s18378_s27 + $0x78] sm:$0xf]  ;;  %v10919_v25 = vshrl.u32 %v14205_v52, 16  ;;  %v10922_v32 = vshll.u32 %v14205_v52, 16  ;;  %v7432_v52 = vshrl.u32 %v13627_v60, 16 }
 0x2a6   : > { %15797 = vmatprep.subr.bf16.mxu0 %v17128_v35  ;;  %v10933_v54 = vshrl.u32 %v14207_v21, 16  ;;  %v10936_v23 = vshll.u32 %v14207_v21, 16  ;;  %v13629_v60 = vld [vmem:[%s17359_s30 + $0xc0] sm:$0xf] }
 0x2a7   : > { %16174 = vmatmul.mubr.bf16.vlgmr.msra.gmra.mrb[8].mxu1 %v14186_v12  ;;  %v10924_v12 = vrot.slane %v10922_v32, 5  ;;  %v17146_v32 = vld [vmem:[%s20509_s4 + $0x2f8] sm:$0xff]  }
 0x2a8   : > { %15790 = vmatmul.mubr.bf16.vlgmr.msra.gmra.mrb[0].mxu0 %v17130_v37  ;;  %16182 = vmatpush3.bf16.msra.mxu1 %v17129_v49  ;;  %v10914_v49 = vshll.u32 %v14204_v42, 16  ;;  %v10921_v37 = vrot.slane %v10919_v25, 4  ;;  %v10935_v14 = vrot.slane %v10933_v54, 4  ;;  %v17142_v42 = vld [vmem:[%s20507_s2 + $0x7f0] sm:$0xff]   ;;  %v17145_v25 = vld [vmem:[%s20507_s2 + $0x7f8] sm:$0xff]   ;;  %v7423_v54 = vrot.slane %v7421_v61, 5 }
 0x2a9   : > { %15798 = vmatpush3.bf16.msra.mxu0 %v17128_v35  ;;  %16183 = vmatprep.subr.bf16.mxu1 %v17132_v59  ;;  %v10910_v35 = vrot.slane %v10908_v24, 5  ;;  %v10944_v24 = vrot.slane %v10942_v33, 5 }
 0x2aa   : > { %15799 = vmatprep.subr.bf16.mxu0 %v17131_v47  ;;  %15793 = vmatprep.mubr.bf16.mxu0 %v17141_v18  ;;  %v19843_v2 = vrot.slane %v10914_v49, 5 }
 0x2ab   : > { %16177 = vmatprep.mubr.bf16.mxu1 %v14187_v48  ;;  %v10911_v18 = vor.u32 %v10910_v35, %v10907_v5  ;;  %v14210_v48 = vld [vmem:[%s18378_s27 + $0x84] sm:$0x1]  ;;  %v19873_v35 = vld [vmem:[%s17359_s30 + $0xb4] sm:$0x1] }
 0x2ac   : > { %16184 = vmatpush3.bf16.msra.mxu1 %v17132_v59  ;;  %v10897_v59 = vor.u32 %v10896_v13, %v10893_v56  ;;  %v10956_v21 = vshll.u32 %v14210_v48, 16  ;;  %v7437_v56 = vrot.slane %v7435_v8, 5  ;;  %v7427_v33 = vshll.u32 %v19873_v35, 16  ;;  %v17164_v8 = vld [vmem:[%s17359_s30 + $0x130] ss:$8 sps:$4 sm:$0xff]  }
 0x2ad   : > { %15800 = vmatpush3.bf16.msra.mxu0 %v17131_v47  ;;  %16185 = vmatprep.subr.bf16.mxu1 %v17134_v58  ;;  %v10938_v47 = vrot.slane %v10936_v23, 5  ;;  %v10912_v34 = vrot.slane %v10911_v18, 4  ;;  %v7434_v23 = vrot.slane %v7432_v52, 4  ;;  %v17153_v52 = vld [vmem:[%s20507_s2 + $0x810] sm:$0xff]  }
 0x2ae   : > { %15801 = vmatprep.subr.bf16.mxu0 %v17133_v43  ;;  %v10898_v0 = vrot.slane %v10897_v59, 4 }
 0x2af   : > { %16178 = vmatmul.mubr.bf16.gmra.mrb[12].mxu1 %v14188_v26  ;;  %v10939_v15 = vor.u32 %v10938_v47, %v10935_v14  ;;  %v17143_v26 = vld [vmem:[%s20509_s4 + $0x2f0] sm:$0xff]   ;;  %v10917_v5 = vsel %vm17546_vm5, %v10912_v34, %v19843_v2  ;;  %v10958_v47 = vrot.slane %v10956_v21, 5  ;;  %v7438_v57 = vor.u32 %v7437_v56, %v7434_v23  ;;  %v13639_v23 = vld [vmem:[%s17359_s30 + $0xe8] sm:$0xf]  ;;  %v17155_v56 = vld [vmem:[%s20507_s2 + $0x818] sm:$0xff]  }
 0x2b0   : > { %16186 = vmatpush3.bf16.msra.mxu1 %v17134_v58  ;;  %15794 = vmatmul.mubr.bf16.gmra.mrb[4].mxu0 %v17144_v62  ;;  %v10961_v58 = vshrl.u32 %v14211_v22, 16  ;;  %v7418_v62 = vshrl.u32 %v13625_v7, 16  ;;  %v10903_v13 = vsel %vm17546_vm5, %v10898_v0, %v19841_v30  ;;  %v17150_v30 = vld [vmem:[%s17359_s30 + $0x110] ss:$8 sps:$4 sm:$0xff]   ;;  %v17152_v22 = vld [vmem:[%s20509_s4 + $0x308] sm:$0xff]   ;;  %v7446_v34 = vshrl.u32 %v13629_v60, 16 }
 0x2b1   : > { %15802 = vmatpush3.bf16.msra.mxu0 %v17133_v43  ;;  %16187 = vmatprep.subr.bf16.mxu1 %v17136_v19  ;;  %v10925_v43 = vor.u32 %v10924_v12, %v10921_v37  ;;  %v19879_v37 = vld [vmem:[%s17359_s30 + $0xbc] sm:$0x1]  ;;  %v17149_v12 = vld [vmem:[%s20509_s4 + $0x300] sm:$0xff]   ;;  %v17151_v7 = vld [vmem:[%s20507_s2 + $0x808] sm:$0xff]  }
 0x2b2   : > { %15803 = vmatprep.subr.bf16.mxu0 %v17135_v44  ;;  %15813 = vmatprep.mubr.bf16.mxu0 %v17147_v3  ;;  %v10949_v3 = vrot.slane %v10947_v11, 4  ;;  %v7420_v49 = vrot.slane %v7418_v62, 4  ;;  %v7441_v59 = vshll.u32 %v19879_v37, 16  ;;  %v7429_v11 = vrot.slane %v7427_v33, 5  ;;  %v19911_v0 = vld [vmem:[%s17359_s30 + $0xcc] sm:$0x1] }
 0x2b3   : > { %16197 = vmatprep.mubr.bf16.mxu1 %v14229_v20  ;;  %v10926_v4 = vrot.slane %v10925_v43, 4  ;;  %v10966_v20 = vrot.slane %v10964_v17, 5  ;;  %v17161_v43 = vld [vmem:[%s17359_s30 + $0x120] ss:$8 sps:$4 sm:$0xff]   ;;  %v7516_v33 = vshrl.u32 %v13639_v23, 16 }
 0x2b4   : > { %16188 = vmatpush3.bf16.msra.mxu1 %v17136_v19  ;;  %v10940_v19 = vrot.slane %v10939_v15, 4  ;;  %v7424_v1 = vor.u32 %v7423_v54, %v7420_v49  ;;  %v13631_v17 = vld [vmem:[%s17359_s30 + $0xc8] sm:$0xf]  ;;  %v7469_v49 = vshll.u32 %v19911_v0, 16  ;;  %v13637_v54 = vld [vmem:[%s17359_s30 + $0xe0] sm:$0xf] }
 0x2b5   : > { %15804 = vmatpush3.bf16.msra.mxu0 %v17135_v44  ;;  %16189 = vmatprep.subr.bf16.mxu1 %v17138_v46  ;;  %v10952_v44 = vrot.slane %v10950_v38, 5  ;;  %v10931_v2 = vsel %vm17546_vm5, %v10926_v4, %v10930_v45  ;;  %v7439_v38 = vrot.slane %v7438_v57, 4  ;;  %v7449_v4 = vshll.u32 %v13629_v60, 16  ;;  %v19957_v60 = vld [vmem:[%s17359_s30 + $0xec] sm:$0x1] }
 0x2b6   : > { %15805 = vmatprep.subr.bf16.mxu0 %v17137_v55  ;;  %v10945_v14 = vsel %vm17546_vm5, %v10940_v19, %v10944_v24  ;;  %v7425_v15 = vrot.slane %v7424_v1, 4  ;;  %v7460_v45 = vshrl.u32 %v13631_v17, 16  ;;  %v7463_v24 = vshll.u32 %v13631_v17, 16 }
 0x2b7   : > { %v10953_v40 = vor.u32 %v10952_v44, %v10949_v3  ;;  %v14231_v51 = vcombine.low %v10931_v2, %v10945_v14  ;;  %v13633_v44 = vld [vmem:[%s17359_s30 + $0xd0] sm:$0xf]  ;;  %v17157_v14 = vld [vmem:[%s20507_s2 + $0x820] sm:$0xff]   ;;  %v7505_v1 = vshll.u32 %v13637_v54, 16  ;;  %v7519_v57 = vshll.u32 %v13639_v23, 16 }
 0x2b8   : > { %16190 = vmatpush3.bf16.msra.mxu1 %v17138_v46  ;;  %v10963_v46 = vrot.slane %v10961_v58, 4  ;;  %v7443_v58 = vrot.slane %v7441_v59, 5  ;;  %v7430_v19 = vsel %vm17546_vm5, %v7425_v15, %v7429_v11  ;;  %v19948_v59 = vld [vmem:[%s17359_s30 + $0xdc] sm:$0x1]  ;;  %v17159_v15 = vld [vmem:[%s20507_s2 + $0x828] sm:$0xff]  }
 0x2b9   : > { %15806 = vmatpush3.bf16.msra.mxu0 %v17137_v55  ;;  %16191 = vmatprep.subr.bf16.mxu1 %v17140_v41  ;;  %v10954_v18 = vrot.slane %v10953_v40, 4  ;;  %v7477_v40 = vshll.u32 %v13633_v44, 16  ;;  %v7521_v17 = vrot.slane %v7519_v57, 5 }
 0x2ba   : > { %15807 = vmatprep.subr.bf16.mxu0 %v17139_v29  ;;  %v10967_v55 = vor.u32 %v10966_v20, %v10963_v46  ;;  %v7444_v3 = vsel %vm17546_vm5, %v7439_v38, %v7443_v58  ;;  %v17168_v46 = vld [vmem:[%s18378_s27 + $0x98] ss:$8 sps:$4 sm:$0xff]   ;;  %v19928_v20 = vrot.slane %v7446_v34, 4  ;;  %v7507_v38 = vrot.slane %v7505_v1, 5 }
 0x2bb   : > { %v10959_v62 = vsel %vm17546_vm5, %v10954_v18, %v10958_v47  ;;  %v19945_v47 = vld [vmem:[%s17359_s30 + $0xd4] sm:$0x1]  ;;  %v7518_v58 = vrot.slane %v7516_v33, 4  ;;  %v7497_v34 = vshll.u32 %v19948_v59, 16 }
 0x2bc   : > { %16192 = vmatpush3.bf16.msra.mxu1 %v17140_v41  ;;  %v14230_v41 = vcombine.low %v10903_v13, %v10917_v5  ;;  %v10968_v48 = vrot.slane %v10967_v55, 4  ;;  %v13657_v13 = vcombine.low %v7430_v19, %v7444_v3  ;;  %v19936_v5 = vrot.slane %v7449_v4, 5  ;;  %v17158_v55 = vld [vmem:[%s20509_s4 + $0x320] sm:$0xff]  }
 0x2bd   : > { %15808 = vmatpush3.bf16.msra.mxu0 %v17139_v29  ;;  %16193 = vmatprep.subr.bf16.mxu1 %v17143_v26  ;;  %v10972_v29 = vrot.slane %v10970_v10, 5  ;;  %v17156_v10 = vld [vmem:[%s20509_s4 + $0x318] sm:$0xff]   ;;  %v13669_v4 = vld [vmem:[%s17359_s30 + $0x100] sm:$0xf] }
 0x2be   : > { %15809 = vmatprep.subr.bf16.mxu0 %v17142_v42 }
 0x2bf   : > { %v10973_v61 = vsel %vm17546_vm5, %v10968_v48, %v10972_v29  ;;  %v7502_v29 = vshrl.u32 %v13637_v54, 16  ;;  %v7479_v48 = vrot.slane %v7477_v40, 5  ;;  %v7499_v40 = vrot.slane %v7497_v34, 5 }
 0x2c0   : > { %16194 = vmatpush3.bf16.msra.mxu1 %v17143_v26  ;;  %v17154_v26 = vld [vmem:[%s20509_s4 + $0x310] sm:$0xff]   ;;  %v14232_v21 = vcombine.low %v10959_v62, %v10973_v61  ;;  %v19964_v61 = vrot.slane %v7469_v49, 5  ;;  %v7703_v49 = vshll.u32 %v13669_v4, 16 }
 0x2c1   : > { %15810 = vmatpush3.bf16.msra.mxu0 %v17142_v42  ;;  %16195 = vmatprep.subr.bf16.mxu1 %v17146_v32  ;;  %v19905_v42 = vld [vmem:[%s17359_s30 + $0xc4] sm:$0x1]  ;;  %v7504_v11 = vrot.slane %v7502_v29, 4 }
 0x2c2   : > { %15811 = vmatprep.subr.bf16.mxu0 %v17145_v25 }
 0x2c4   : > { %16196 = vmatpush3.bf16.msra.mxu1 %v17146_v32  ;;  %v13635_v32 = vld [vmem:[%s17359_s30 + $0xd8] sm:$0xf] }
 0x2c5   : > { %15812 = vmatpush3.bf16.msra.mxu0 %v17145_v25  ;;  %16205 = vmatprep.subr.bf16.mxu1 %v17149_v12  ;;  %v7455_v25 = vshll.u32 %v19905_v42, 16  ;;  %v7491_v2 = vshll.u32 %v13635_v32, 16 }
 0x2c6   : > { %15821 = vmatprep.subr.bf16.mxu0 %v17148_v31 }
 0x2c7   : > { %16198 = vmatmul.mubr.bf16.vlgmr.msra.gmra.mrb[8].mxu1 %v14230_v41  ;;  %v7465_v41 = vrot.slane %v7463_v24, 5  ;;  %v19962_v62 = vrot.slane %v7455_v25, 5  ;;  %v17163_v24 = vld [vmem:[%s20509_s4 + $0x330] sm:$0xff]   ;;  %v7522_v25 = vor.u32 %v7521_v17, %v7518_v58  ;;  %v13675_v58 = vld [vmem:[%s17359_s30 + $0x118] sm:$0xf] }
 0x2c8   : > { %15814 = vmatmul.mubr.bf16.vlgmr.msra.gmra.mrb[0].mxu0 %v17150_v30  ;;  %16206 = vmatpush3.bf16.msra.mxu1 %v17149_v12  ;;  %v7462_v12 = vrot.slane %v7460_v45, 4  ;;  %v7488_v30 = vshrl.u32 %v13635_v32, 16  ;;  %v13671_v45 = vld [vmem:[%s17359_s30 + $0x108] sm:$0xf]  ;;  %v19978_v32 = vld [vmem:[%s17359_s30 + $0x104] sm:$0x1] }
 0x2c9   : > { %15822 = vmatpush3.bf16.msra.mxu0 %v17148_v31  ;;  %16207 = vmatprep.subr.bf16.mxu1 %v17152_v22  ;;  %v7474_v31 = vshrl.u32 %v13633_v44, 16  ;;  %v7525_v44 = vshll.u32 %v19957_v60, 16  ;;  %v7714_v54 = vshrl.u32 %v13671_v45, 16  ;;  %v7717_v23 = vshll.u32 %v13671_v45, 16 }
 0x2ca   : > { %15823 = vmatprep.subr.bf16.mxu0 %v17151_v7  ;;  %15817 = vmatprep.mubr.bf16.mxu0 %v17161_v43  ;;  %v7493_v43 = vrot.slane %v7491_v2, 5  ;;  %v19998_v1 = vrot.slane %v7522_v25, 4  ;;  %v7709_v33 = vshll.u32 %v19978_v32, 16  ;;  %v20028_v25 = vld [vmem:[%s17359_s30 + $0x114] sm:$0x1] }
 0x2cb   : > { %16201 = vmatprep.mubr.bf16.mxu1 %v14231_v51  ;;  %v7476_v18 = vrot.slane %v7474_v31, 4  ;;  %v19954_v51 = vld [vmem:[%s17359_s30 + $0xe4] sm:$0x1]  ;;  %v19991_v2 = vrot.slane %v7525_v44, 5 }
 0x2cc   : > { %16208 = vmatpush3.bf16.msra.mxu1 %v17152_v22  ;;  %v17160_v22 = vld [vmem:[%s20509_s4 + $0x328] sm:$0xff]   ;;  %v7511_v3 = vshll.u32 %v19954_v51, 16  ;;  %v7711_v34 = vrot.slane %v7709_v33, 5 }
 0x2cd   : > { %15824 = vmatpush3.bf16.msra.mxu0 %v17151_v7  ;;  %16209 = vmatprep.subr.bf16.mxu1 %v17154_v26  ;;  %v7490_v7 = vrot.slane %v7488_v30, 4 }
 0x2ce   : > { %15825 = vmatprep.subr.bf16.mxu0 %v17153_v52  ;;  %v19989_v30 = vrot.slane %v7511_v3, 5  ;;  %v7745_v3 = vshll.u32 %v13675_v58, 16 }
 0x2cf   : > { %16202 = vmatmul.mubr.bf16.gmra.mrb[12].mxu1 %v14232_v21  ;;  %v7480_v21 = vor.u32 %v7479_v48, %v7476_v18  ;;  %v7494_v19 = vor.u32 %v7493_v43, %v7490_v7  ;;  %v7705_v48 = vrot.slane %v7703_v49, 5  ;;  %v7716_v7 = vrot.slane %v7714_v54, 4  ;;  %v13673_v43 = vld [vmem:[%s17359_s30 + $0x110] sm:$0xf] }
 0x2d0   : > { %16210 = vmatpush3.bf16.msra.mxu1 %v17154_v26  ;;  %15818 = vmatmul.mubr.bf16.gmra.mrb[4].mxu0 %v17164_v8  ;;  %v7483_v26 = vshll.u32 %v19945_v47, 16  ;;  %v7466_v8 = vor.u32 %v7465_v41, %v7462_v12  ;;  %v7728_v45 = vshrl.u32 %v13673_v43, 16 }
 0x2d1   : > { %15826 = vmatpush3.bf16.msra.mxu0 %v17153_v52  ;;  %16211 = vmatprep.subr.bf16.mxu1 %v17156_v10  ;;  %v7452_v52 = vor.u32 %v19936_v5, %v19928_v20  ;;  %v7700_v20 = vshrl.u32 %v13669_v4, 16  ;;  %v7481_v12 = vrot.slane %v7480_v21, 4  ;;  %v7495_v41 = vrot.slane %v7494_v19, 4  ;;  %v17172_v21 = vld [vmem:[%s20509_s4 + $0x348] sm:$0xff]  }
 0x2d2   : > { %15827 = vmatprep.subr.bf16.mxu0 %v17155_v56  ;;  %15837 = vmatprep.mubr.bf16.mxu0 %v13657_v13  ;;  %v7467_v5 = vrot.slane %v7466_v8, 4  ;;  %v7485_v31 = vrot.slane %v7483_v26, 5  ;;  %v17170_v26 = vld [vmem:[%s18378_s27 + $0xa8] ss:$8 sps:$4 sm:$0xff]   ;;  %v7742_v19 = vshrl.u32 %v13675_v58, 16  ;;  %v8003_v58 = vrot.slane %v19911_v0, 5 }
 0x2d3   : > { %16221 = vmatprep.mubr.bf16.mxu1 %v17168_v46  ;;  %v19981_v46 = vld [vmem:[%s17359_s30 + $0x10c] sm:$0x1]  ;;  %v7453_v13 = vrot.slane %v7452_v52, 4  ;;  %v7702_v18 = vrot.slane %v7700_v20, 4  ;;  %v20031_v20 = vld [vmem:[%s17359_s30 + $0x11c] sm:$0x1] }
 0x2d4   : > { %16212 = vmatpush3.bf16.msra.mxu1 %v17156_v10  ;;  %v7508_v10 = vor.u32 %v7507_v38, %v7504_v11  ;;  %v7723_v57 = vshll.u32 %v19981_v46, 16  ;;  %v17169_v11 = vld [vmem:[%s20509_s4 + $0x340] sm:$0xff]   ;;  %v7472_v17 = vsel %vm17546_vm5, %v7467_v5, %v19964_v61  ;;  %v7500_v61 = vsel %vm17546_vm5, %v7495_v41, %v7499_v40 }
 0x2d5   : > { %15828 = vmatpush3.bf16.msra.mxu0 %v17155_v56  ;;  %16213 = vmatprep.subr.bf16.mxu1 %v17158_v55  ;;  %v17162_v56 = vld [vmem:[%s20507_s2 + $0x830] sm:$0xff]   ;;  %v17167_v38 = vld [vmem:[%s20507_s2 + $0x840] sm:$0xff]   ;;  %v7706_v8 = vor.u32 %v7705_v48, %v7702_v18  ;;  %v7747_v40 = vrot.slane %v7745_v3, 5  ;;  %v7528_v41 = vsel %vm17546_vm5, %v19998_v1, %v19991_v2  ;;  %v7751_v33 = vshll.u32 %v20031_v20, 16 }
 0x2d6   : > { %15829 = vmatprep.subr.bf16.mxu0 %v17157_v14  ;;  %v19996_v29 = vrot.slane %v7508_v10, 4  ;;  %v7725_v52 = vrot.slane %v7723_v57, 5  ;;  %v17171_v10 = vld [vmem:[%s20507_s2 + $0x848] sm:$0xff]   ;;  %v17173_v57 = vld [vmem:[%s20507_s2 + $0x850] sm:$0xff]   ;;  %v7991_v18 = vrot.slane %v19873_v35, 5  ;;  %v8011_v3 = vrot.slane %v19948_v59, 5 }
 0x2d7   : > { %v7707_v54 = vrot.slane %v7706_v8, 4  ;;  %v17184_v2 = vld [vmem:[%s18378_s27 + $0xc8] ss:$8 sps:$4 sm:$0xff]   ;;  %v20072_v8 = vld [vmem:[%s17359_s30 + $0x124] sm:$0x1]  ;;  %v17196_v59 = vld [vmem:[%s20509_s4 + $0x398] sm:$0xff]  }
 0x2d8   : > { %16214 = vmatpush3.bf16.msra.mxu1 %v17158_v55  ;;  %v17166_v55 = vld [vmem:[%s20509_s4 + $0x338] sm:$0xff]   ;;  %v17189_v0 = vld [vmem:[%s20509_s4 + $0x380] sm:$0xff]  }
 0x2d9   : > { %15830 = vmatpush3.bf16.msra.mxu0 %v17157_v14  ;;  %16215 = vmatprep.subr.bf16.mxu1 %v17160_v22  ;;  %v17165_v14 = vld [vmem:[%s20507_s2 + $0x838] sm:$0xff]   ;;  %v7712_v1 = vsel %vm17546_vm5, %v7707_v54, %v7711_v34 }
 0x2da   : > { %15831 = vmatprep.subr.bf16.mxu0 %v17159_v15 }
 0x2dc   : > { %16216 = vmatpush3.bf16.msra.mxu1 %v17160_v22  ;;  %v7719_v22 = vrot.slane %v7717_v23, 5 }
 0x2dd   : > { %15832 = vmatpush3.bf16.msra.mxu0 %v17159_v15  ;;  %16217 = vmatprep.subr.bf16.mxu1 %v17163_v24  ;;  %v7458_v15 = vsel %vm17546_vm5, %v7453_v13, %v19962_v62  ;;  %v7486_v62 = vsel %vm17546_vm5, %v7481_v12, %v7485_v31  ;;  %v7730_v13 = vrot.slane %v7728_v45, 4  ;;  %v7744_v31 = vrot.slane %v7742_v19, 4  ;;  %v17178_v45 = vld [vmem:[%s20509_s4 + $0x360] sm:$0xff]  }
 0x2de   : > { %15833 = vmatprep.subr.bf16.mxu0 %v17162_v56  ;;  %v7720_v4 = vor.u32 %v7719_v22, %v7716_v7  ;;  %v13658_v44 = vcombine.low %v7458_v15, %v7472_v17  ;;  %v13659_v49 = vcombine.low %v7486_v62, %v7500_v61  ;;  %v7514_v12 = vsel %vm17546_vm5, %v19996_v29, %v19989_v30  ;;  %v17176_v29 = vld [vmem:[%s20509_s4 + $0x358] sm:$0xff]   ;;  %v17188_v15 = vld [vmem:[%s18378_s27 + $0xe0] ss:$8 sps:$4 sm:$0xff]   ;;  %v13681_v62 = vld [vmem:[%s17359_s30 + $0x130] sm:$0xf] }
 0x2df   : > { %v7995_v30 = vrot.slane %v19879_v37, 5  ;;  %v7748_v22 = vor.u32 %v7747_v40, %v7744_v31  ;;  %v17177_v61 = vld [vmem:[%s20507_s2 + $0x860] sm:$0xff]   ;;  %v8007_v19 = vrot.slane %v19945_v47, 5  ;;  %v7784_v31 = vshrl.u32 %v13681_v62, 16  ;;  %v17180_v40 = vld [vmem:[%s20509_s4 + $0x368] sm:$0xff]  }
 0x2e0   : > { %16218 = vmatpush3.bf16.msra.mxu1 %v17163_v24  ;;  %v7731_v24 = vshll.u32 %v13673_v43, 16  ;;  %v7721_v23 = vrot.slane %v7720_v4, 4  ;;  %v17175_v43 = vld [vmem:[%s20507_s2 + $0x858] sm:$0xff]   ;;  %v13679_v4 = vld [vmem:[%s17359_s30 + $0x128] sm:$0xf] }
 0x2e1   : > { %15834 = vmatpush3.bf16.msra.mxu0 %v17162_v56  ;;  %16219 = vmatprep.subr.bf16.mxu1 %v17166_v55  ;;  %v17182_v56 = vld [vmem:[%s18378_s27 + $0xb8] ss:$8 sps:$4 sm:$0xff]   ;;  %v7786_v35 = vrot.slane %v7784_v31, 4 }
 0x2e2   : > { %15835 = vmatprep.subr.bf16.mxu0 %v17165_v14  ;;  %v7733_v5 = vrot.slane %v7731_v24, 5  ;;  %v7726_v48 = vsel %vm17546_vm5, %v7721_v23, %v7725_v52  ;;  %v13677_v52 = vld [vmem:[%s17359_s30 + $0x120] sm:$0xf]  ;;  %v7765_v23 = vshll.u32 %v20072_v8, 16 }
 0x2e3   : > { %v13701_v34 = vcombine.low %v7712_v1, %v7726_v48  ;;  %v7759_v54 = vshll.u32 %v13677_v52, 16  ;;  %v17179_v48 = vld [vmem:[%s20507_s2 + $0x868] sm:$0xff]   ;;  %v13715_v37 = vld [vmem:[%s17359_s30 + $0xc0] sm:$0xe] }
 0x2e4   : > { %16220 = vmatpush3.bf16.msra.mxu1 %v17166_v55  ;;  %v17174_v55 = vld [vmem:[%s20509_s4 + $0x350] sm:$0xff]   ;;  %v7734_v7 = vor.u32 %v7733_v5, %v7730_v13  ;;  %v13683_v13 = vld [vmem:[%s17359_s30 + $0x138] sm:$0xf]  ;;  %v7773_v5 = vshll.u32 %v13679_v4, 16 }
 0x2e5   : > { %15836 = vmatpush3.bf16.msra.mxu0 %v17165_v14  ;;  %16229 = vmatprep.subr.bf16.mxu1 %v17169_v11  ;;  %v7737_v14 = vshll.u32 %v20028_v25, 16 }
 0x2e6   : > { %15845 = vmatprep.subr.bf16.mxu0 %v17167_v38  ;;  %v20078_v24 = vrot.slane %v7734_v7, 4  ;;  %v20101_v7 = vld [vmem:[%s17359_s30 + $0x12c] sm:$0x1] }
 0x2e7   : > { %16222 = vmatmul.mubr.bf16.vlgmr.msra.gmra.mrb[8].mxu1 %v17170_v26  ;;  %v20066_v17 = vrot.slane %v7737_v14, 5  ;;  %v20068_v26 = vrot.slane %v7751_v33, 5  ;;  %v7779_v31 = vshll.u32 %v20101_v7, 16 }
 0x2e8   : > { %15838 = vmatmul.mubr.bf16.vlgmr.msra.gmra.mrb[0].mxu0 %v13658_v44  ;;  %16230 = vmatpush3.bf16.msra.mxu1 %v17169_v11  ;;  %v13660_v11 = vcombine.low %v7514_v12, %v7528_v41  ;;  %v7787_v12 = vshll.u32 %v13681_v62, 16  ;;  %v13714_v41 = vld [vmem:[%s17359_s30 + $0xb8] sm:$0xe] }
 0x2e9   : > { %15846 = vmatpush3.bf16.msra.mxu0 %v17167_v38  ;;  %16231 = vmatprep.subr.bf16.mxu1 %v17172_v21  ;;  %v7999_v38 = vrot.slane %v19905_v42, 5  ;;  %v13722_v1 = vrot.slane %v13714_v41, 9  ;;  %v17185_v42 = vld [vmem:[%s20507_s2 + $0x878] sm:$0xff]  }
 0x2ea   : > { %15847 = vmatprep.subr.bf16.mxu0 %v17171_v10  ;;  %15841 = vmatprep.mubr.bf16.mxu0 %v13659_v49  ;;  %v7756_v49 = vshrl.u32 %v13677_v52, 16  ;;  %v20116_v52 = vld [vmem:[%s17359_s30 + $0x13c] sm:$0x1]  ;;  %v7789_v62 = vrot.slane %v7787_v12, 5  ;;  %v13723_v12 = vrot.slane %v13715_v37, 9 }
 0x2eb   : > { %16225 = vmatprep.mubr.bf16.mxu1 %v17182_v56  ;;  %v7770_v56 = vshrl.u32 %v13679_v4, 16  ;;  %v20122_v4 = vsel %vm17371_vm2, %v13722_v1, %v7995_v30  ;;  %v17181_v30 = vld [vmem:[%s20507_s2 + $0x870] sm:$0xff]   ;;  %v14316_v1 = vld [vmem:[%s18378_s27 + $0xa4] sm:$0x1] }
 0x2ec   : > { %16232 = vmatpush3.bf16.msra.mxu1 %v17172_v21  ;;  %v20080_v21 = vrot.slane %v7748_v22, 4  ;;  %v7758_v33 = vrot.slane %v7756_v49, 4  ;;  %v14313_v49 = vld [vmem:[%s18378_s27 + $0x98] sm:$0xf] }
 0x2ed   : > { %15848 = vmatpush3.bf16.msra.mxu0 %v17171_v10  ;;  %16233 = vmatprep.subr.bf16.mxu1 %v17174_v55  ;;  %v7772_v22 = vrot.slane %v7770_v56, 4 }
 0x2ee   : > { %15849 = vmatprep.subr.bf16.mxu0 %v17173_v57 }
 0x2ef   : > { %16226 = vmatmul.mubr.bf16.gmra.mrb[12].mxu1 %v17184_v2  ;;  %v7801_v2 = vshll.u32 %v13683_v13, 16 }
 0x2f0   : > { %16234 = vmatpush3.bf16.msra.mxu1 %v17174_v55  ;;  %15842 = vmatmul.mubr.bf16.gmra.mrb[4].mxu0 %v13660_v11  ;;  %v13713_v55 = vld [vmem:[%s17359_s30 + $0xb0] sm:$0xe]  ;;  %v7775_v11 = vrot.slane %v7773_v5, 5 }
 0x2f1   : > { %15850 = vmatpush3.bf16.msra.mxu0 %v17173_v57  ;;  %16235 = vmatprep.subr.bf16.mxu1 %v17176_v29  ;;  %v13721_v14 = vrot.slane %v13713_v55, 9  ;;  %v7798_v57 = vshrl.u32 %v13683_v13, 16  ;;  %v7803_v56 = vrot.slane %v7801_v2, 5  ;;  %v14315_v13 = vld [vmem:[%s18378_s27 + $0xa0] sm:$0xf] }
 0x2f2   : > { %15851 = vmatprep.subr.bf16.mxu0 %v17175_v43  ;;  %15861 = vmatprep.mubr.bf16.mxu0 %v13701_v34  ;;  %v20113_v34 = vld [vmem:[%s17359_s30 + $0x134] sm:$0x1]  ;;  %v7776_v5 = vor.u32 %v7775_v11, %v7772_v22  ;;  %v13716_v55 = vld [vmem:[%s17359_s30 + $0xc8] sm:$0xe]  ;;  %v11505_v10 = vshrl.u32 %v14315_v13, 16  ;;  %v11508_v44 = vshll.u32 %v14315_v13, 16  ;;  %v7790_v11 = vor.u32 %v7789_v62, %v7786_v35 }
 0x2f3   : > { %16245 = vmatprep.mubr.bf16.mxu1 %v17188_v15  ;;  %v17183_v15 = vld [vmem:[%s20509_s4 + $0x370] sm:$0xff]   ;;  %v7793_v41 = vshll.u32 %v20113_v34, 16  ;;  %v13724_v2 = vrot.slane %v13716_v55, 9  ;;  %v7767_v22 = vrot.slane %v7765_v23, 5  ;;  %v11514_v62 = vshll.u32 %v14316_v1, 16 }
 0x2f4   : > { %16236 = vmatpush3.bf16.msra.mxu1 %v17176_v29  ;;  %v7761_v29 = vrot.slane %v7759_v54, 5  ;;  %v7800_v54 = vrot.slane %v7798_v57, 4  ;;  %v11491_v57 = vshrl.u32 %v14313_v49, 16  ;;  %v7740_v55 = vsel %vm17546_vm5, %v20078_v24, %v20066_v17 }
 0x2f5   : > { %15852 = vmatpush3.bf16.msra.mxu0 %v17175_v43  ;;  %16237 = vmatprep.subr.bf16.mxu1 %v17178_v45  ;;  %v20107_v43 = vsel %vm17371_vm2, %v13721_v14, %v7991_v18  ;;  %v14314_v14 = vld [vmem:[%s18378_s27 + $0x9c] sm:$0x1]  ;;  %v11494_v18 = vshll.u32 %v14313_v49, 16  ;;  %v7781_v49 = vrot.slane %v7779_v31, 5  ;;  %v20161_v23 = vrot.slane %v7793_v41, 5 }
 0x2f6   : > { %15853 = vmatprep.subr.bf16.mxu0 %v17177_v61  ;;  %v7804_v37 = vor.u32 %v7803_v56, %v7800_v54  ;;  %v11500_v35 = vshll.u32 %v14314_v14, 16  ;;  %v17187_v54 = vld [vmem:[%s20507_s2 + $0x880] sm:$0xff]   ;;  %v11493_v56 = vrot.slane %v11491_v57, 4  ;;  %v11510_v31 = vrot.slane %v11508_v44, 5  ;;  %v17192_v44 = vld [vmem:[%s20509_s4 + $0x388] sm:$0xff]  }
 0x2f7   : > { %v7791_v41 = vrot.slane %v7790_v11, 4 }
 0x2f8   : > { %16238 = vmatpush3.bf16.msra.mxu1 %v17178_v45  ;;  %v7762_v45 = vor.u32 %v7761_v29, %v7758_v33  ;;  %v20142_v33 = vsel %vm17371_vm2, %v13723_v12, %v7999_v38  ;;  %v17186_v29 = vld [vmem:[%s20509_s4 + $0x378] sm:$0xff]   ;;  %v20185_v24 = vrot.slane %v11500_v35, 5 }
 0x2f9   : > { %15854 = vmatpush3.bf16.msra.mxu0 %v17177_v61  ;;  %16239 = vmatprep.subr.bf16.mxu1 %v17180_v40  ;;  %v7807_v61 = vshll.u32 %v20116_v52, 16  ;;  %v17190_v12 = vld [vmem:[%s18378_s27 + $0xf0] ss:$8 sps:$4 sm:$0xff]  }
 0x2fa   : > { %15855 = vmatprep.subr.bf16.mxu0 %v17179_v48  ;;  %v7763_v38 = vrot.slane %v7762_v45, 4  ;;  %v11496_v45 = vrot.slane %v11494_v18, 5  ;;  %v14317_v18 = vld [vmem:[%s18378_s27 + $0xa8] sm:$0xf] }
 0x2fb   : > { %v11519_v1 = vshrl.u32 %v14317_v18, 16 }
 0x2fc   : > { %16240 = vmatpush3.bf16.msra.mxu1 %v17180_v40  ;;  %v20151_v40 = vsel %vm17371_vm2, %v13724_v2, %v8003_v58  ;;  %v20163_v58 = vrot.slane %v7807_v61, 5  ;;  %v7805_v61 = vrot.slane %v7804_v37, 4  ;;  %v11497_v14 = vor.u32 %v11496_v45, %v11493_v56  ;;  %v17202_v2 = vld [vmem:[%s18378_s27 + $0x100] ss:$8 sps:$4 sm:$0xff]   ;;  %v13717_v37 = vld [vmem:[%s17359_s30 + $0xd0] sm:$0xe] }
 0x2fd   : > { %15856 = vmatpush3.bf16.msra.mxu0 %v17179_v48  ;;  %16241 = vmatprep.subr.bf16.mxu1 %v17183_v15  ;;  %v7777_v48 = vrot.slane %v7776_v5, 4  ;;  %v13746_v13 = vcombine.low %v20142_v33, %v20151_v40  ;;  %v11507_v5 = vrot.slane %v11505_v10, 4  ;;  %v7768_v10 = vsel %vm17546_vm5, %v7763_v38, %v7767_v22  ;;  %v13718_v38 = vld [vmem:[%s17359_s30 + $0xd8] sm:$0xe]  ;;  %v17194_v56 = vld [vmem:[%s20509_s4 + $0x390] sm:$0xff]  }
 0x2fe   : > { %15857 = vmatprep.subr.bf16.mxu0 %v17181_v30  ;;  %v11522_v22 = vshll.u32 %v14317_v18, 16  ;;  %v13725_v35 = vrot.slane %v13717_v37, 9  ;;  %v7810_v45 = vsel %vm17546_vm5, %v7805_v61, %v20163_v58  ;;  %v17204_v58 = vld [vmem:[%s18378_s27 + $0x110] ss:$8 sps:$4 sm:$0xff]  }
 0x2ff   : > { %v7782_v17 = vsel %vm17546_vm5, %v7777_v48, %v7781_v49  ;;  %v11511_v57 = vor.u32 %v11510_v31, %v11507_v5  ;;  %v14319_v49 = vld [vmem:[%s18378_s27 + $0xb0] sm:$0xf]  ;;  %v11521_v5 = vrot.slane %v11519_v1, 4  ;;  %v14318_v31 = vld [vmem:[%s18378_s27 + $0xac] sm:$0x1] }
 0x300   : > { %16242 = vmatpush3.bf16.msra.mxu1 %v17183_v15  ;;  %v7754_v15 = vsel %vm17546_vm5, %v20080_v21, %v20068_v26  ;;  %v20187_v26 = vrot.slane %v11514_v62, 5  ;;  %v13703_v11 = vcombine.low %v7768_v10, %v7782_v17  ;;  %v13726_v62 = vrot.slane %v13718_v38, 9  ;;  %v14320_v1 = vld [vmem:[%s18378_s27 + $0xb4] sm:$0x1] }
 0x301   : > { %15858 = vmatpush3.bf16.msra.mxu0 %v17181_v30  ;;  %16243 = vmatprep.subr.bf16.mxu1 %v17186_v29  ;;  %v13702_v21 = vcombine.low %v7740_v55, %v7754_v15  ;;  %v17191_v30 = vld [vmem:[%s20507_s2 + $0x888] sm:$0xff]   ;;  %v11512_v48 = vrot.slane %v11511_v57, 4  ;;  %v20213_v55 = vsel %vm17371_vm2, %v13725_v35, %v8007_v19  ;;  %v13719_v15 = vld [vmem:[%s17359_s30 + $0xe0] sm:$0xe]  ;;  %v11536_v61 = vshll.u32 %v14319_v49, 16  ;;  %v17211_v33 = vld [vmem:[%s20507_s2 + $0x8d0] sm:$0xff]  }
 0x302   : > { %15859 = vmatprep.subr.bf16.mxu0 %v17185_v42  ;;  %v13727_v10 = vrot.slane %v13719_v15, 9 }
 0x303   : > { %v11517_v18 = vsel %vm17546_vm5, %v11512_v48, %v20187_v26  ;;  %v8201_v26 = vrot.slane %v19978_v32, 5  ;;  %v11538_v38 = vrot.slane %v11536_v61, 5  ;;  %v17198_v32 = vld [vmem:[%s20509_s4 + $0x3a0] sm:$0xff]  }
 0x304   : > { %16244 = vmatpush3.bf16.msra.mxu1 %v17186_v29  ;;  %v11498_v29 = vrot.slane %v11497_v14, 4  ;;  %v14321_v14 = vld [vmem:[%s18378_s27 + $0xb8] sm:$0xf] }
 0x305   : > { %15860 = vmatpush3.bf16.msra.mxu0 %v17185_v42  ;;  %16253 = vmatprep.subr.bf16.mxu1 %v17189_v0  ;;  %v17193_v42 = vld [vmem:[%s20507_s2 + $0x890] sm:$0xff]  }
 0x306   : > { %15869 = vmatprep.subr.bf16.mxu0 %v17187_v54 }
 0x307   : > { %16246 = vmatmul.mubr.bf16.vlgmr.msra.gmra.mrb[8].mxu1 %v17190_v12  ;;  %v13720_v12 = vld [vmem:[%s17359_s30 + $0xe8] sm:$0xe] }
 0x308   : > { %15862 = vmatmul.mubr.bf16.vlgmr.msra.gmra.mrb[0].mxu0 %v13702_v21  ;;  %16254 = vmatpush3.bf16.msra.mxu1 %v17189_v0  ;;  %v7796_v0 = vsel %vm17546_vm5, %v7791_v41, %v20161_v23  ;;  %v20219_v23 = vsel %vm17371_vm2, %v13726_v62, %v8011_v3  ;;  %v11533_v41 = vshrl.u32 %v14319_v49, 16  ;;  %v11503_v3 = vsel %vm17546_vm5, %v11498_v29, %v20185_v24 }
 0x309   : > { %15870 = vmatpush3.bf16.msra.mxu0 %v17187_v54  ;;  %16255 = vmatprep.subr.bf16.mxu1 %v17192_v44  ;;  %v11524_v54 = vrot.slane %v11522_v22, 5  ;;  %v13747_v47 = vcombine.low %v20213_v55, %v20219_v23  ;;  %v13704_v19 = vcombine.low %v7796_v0, %v7810_v45  ;;  %v11528_v21 = vshll.u32 %v14318_v31, 16  ;;  %v14325_v31 = vld [vmem:[%s18378_s27 + $0xc8] sm:$0xf]  ;;  %v14363_v23 = vld [vmem:[%s18378_s27 + $0xf8] sm:$0xf] }
 0x30a   : > { %15871 = vmatprep.subr.bf16.mxu0 %v17191_v30  ;;  %15865 = vmatprep.mubr.bf16.mxu0 %v13703_v11  ;;  %v13728_v57 = vrot.slane %v13720_v12, 9  ;;  %v20516_v24 = vrot.slane %v19954_v51, 5  ;;  %v14345_v11 = vcombine.low %v11503_v3, %v11517_v18  ;;  %v11535_v37 = vrot.slane %v11533_v41, 4  ;;  %v17197_v51 = vld [vmem:[%s20507_s2 + $0x8a0] sm:$0xff]   ;;  %v14327_v12 = vld [vmem:[%s18378_s27 + $0xd0] sm:$0xf] }
 0x30b   : > { %16249 = vmatprep.mubr.bf16.mxu1 %v17202_v2  ;;  %v11525_v17 = vor.u32 %v11524_v54, %v11521_v5  ;;  %v17195_v2 = vld [vmem:[%s20507_s2 + $0x898] sm:$0xff]   ;;  %v20517_v29 = vrot.slane %v19957_v60, 5  ;;  %v11550_v49 = vshll.u32 %v14321_v14, 16  ;;  %v11542_v0 = vshll.u32 %v14320_v1, 16  ;;  %v13758_v3 = vld [vmem:[%s17359_s30 + $0x108] sm:$0xe] }
 0x30c   : > { %16256 = vmatpush3.bf16.msra.mxu1 %v17192_v44  ;;  %v14323_v44 = vld [vmem:[%s18378_s27 + $0xc0] sm:$0xf]  ;;  %v20245_v22 = vsel %vm17371_vm2, %v13727_v10, %v20516_v24  ;;  %v20518_v5 = vcombine.low %v20107_v43, %v20122_v4  ;;  %v14322_v54 = vld [vmem:[%s18378_s27 + $0xbc] sm:$0x1]  ;;  %v11539_v15 = vor.u32 %v11538_v38, %v11535_v37  ;;  %v14324_v43 = vld [vmem:[%s18378_s27 + $0xc4] sm:$0x1] }
 0x30d   : > { %15872 = vmatpush3.bf16.msra.mxu0 %v17191_v30  ;;  %16257 = vmatprep.subr.bf16.mxu1 %v17194_v56  ;;  %v8205_v30 = vrot.slane %v19981_v46, 5  ;;  %v20253_v48 = vsel %vm17371_vm2, %v13728_v57, %v20517_v29  ;;  %v11547_v46 = vshrl.u32 %v14321_v14, 16  ;;  %v11561_v60 = vshrl.u32 %v14323_v44, 16  ;;  %v13759_v37 = vld [vmem:[%s17359_s30 + $0x110] sm:$0xe] }
 0x30e   : > { %15873 = vmatprep.subr.bf16.mxu0 %v17193_v42  ;;  %v13748_v35 = vcombine.low %v20245_v22, %v20253_v48  ;;  %v20263_v62 = vrot.slane %v11525_v17, 4  ;;  %v11564_v45 = vshll.u32 %v14323_v44, 16  ;;  %v11552_v61 = vrot.slane %v11550_v49, 5  ;;  %v13760_v38 = vld [vmem:[%s17359_s30 + $0x118] sm:$0xe]  ;;  %v17218_v22 = vld [vmem:[%s20509_s4 + $0x3e8] sm:$0xff]  }
 0x30f   : > { %16250 = vmatmul.mubr.bf16.gmra.mrb[12].mxu1 %v17204_v58  ;;  %v13757_v58 = vld [vmem:[%s17359_s30 + $0x100] sm:$0xe]  ;;  %v11549_v41 = vrot.slane %v11547_v46, 4  ;;  %v11575_v10 = vshrl.u32 %v14325_v31, 16  ;;  %v11578_v17 = vshll.u32 %v14325_v31, 16  ;;  %v20284_v14 = vrot.slane %v11542_v0, 5 }
 0x310   : > { %16258 = vmatpush3.bf16.msra.mxu1 %v17194_v56  ;;  %15866 = vmatmul.mubr.bf16.gmra.mrb[4].mxu0 %v13704_v19  ;;  %v20265_v56 = vrot.slane %v11528_v21, 5  ;;  %v20277_v19 = vrot.slane %v11561_v60, 4  ;;  %v13765_v18 = vrot.slane %v13757_v58, 9  ;;  %v11566_v4 = vrot.slane %v11564_v45, 5  ;;  %v14357_v49 = vld [vmem:[%s18378_s27 + $0xe0] sm:$0xf] }
 0x311   : > { %15874 = vmatpush3.bf16.msra.mxu0 %v17193_v42  ;;  %16259 = vmatprep.subr.bf16.mxu1 %v17196_v59  ;;  %v17200_v42 = vld [vmem:[%s20509_s4 + $0x3a8] sm:$0xff]   ;;  %v13766_v21 = vrot.slane %v13758_v3, 9  ;;  %v11589_v44 = vshrl.u32 %v14327_v12, 16  ;;  %v11592_v57 = vshll.u32 %v14327_v12, 16  ;;  %v20290_v1 = vrot.slane %v11539_v15, 4 }
 0x312   : > { %15875 = vmatprep.subr.bf16.mxu0 %v17195_v2  ;;  %15885 = vmatprep.mubr.bf16.mxu0 %v20518_v5  ;;  %v11556_v24 = vshll.u32 %v14322_v54, 16  ;;  %v11531_v29 = vsel %vm17546_vm5, %v20263_v62, %v20265_v56  ;;  %v11570_v46 = vshll.u32 %v14324_v43, 16  ;;  %v14359_v60 = vld [vmem:[%s18378_s27 + $0xe8] sm:$0xf]  ;;  %v8209_v0 = vrot.slane %v20028_v25, 5 }
 0x313   : > { %16269 = vmatprep.mubr.bf16.mxu1 %v14345_v11  ;;  %v20294_v11 = vsel %vm17371_vm2, %v13766_v21, %v8205_v30  ;;  %v17201_v30 = vld [vmem:[%s20507_s2 + $0x8b0] sm:$0xff]   ;;  %v11553_v62 = vor.u32 %v11552_v61, %v11549_v41  ;;  %v11567_v56 = vor.u32 %v11566_v4, %v20277_v19  ;;  %v11577_v45 = vrot.slane %v11575_v10, 4  ;;  %v14326_v54 = vld [vmem:[%s18378_s27 + $0xcc] sm:$0x1]  ;;  %v17206_v41 = vld [vmem:[%s20509_s4 + $0x3b8] sm:$0xff]  }
 0x314   : > { %16260 = vmatpush3.bf16.msra.mxu1 %v17196_v59  ;;  %v17199_v59 = vld [vmem:[%s20507_s2 + $0x8a8] sm:$0xff]   ;;  %v11580_v5 = vrot.slane %v11578_v17, 5  ;;  %v11591_v31 = vrot.slane %v11589_v44, 4  ;;  %v11594_v15 = vrot.slane %v11592_v57, 5  ;;  %v13767_v25 = vrot.slane %v13759_v37, 9 }
 0x315   : > { %15876 = vmatpush3.bf16.msra.mxu0 %v17195_v2  ;;  %16261 = vmatprep.subr.bf16.mxu1 %v17198_v32  ;;  %v20288_v2 = vsel %vm17371_vm2, %v13765_v18, %v8201_v26  ;;  %v14328_v12 = vld [vmem:[%s18378_s27 + $0xd4] sm:$0x1]  ;;  %v11773_v58 = vshrl.u32 %v14357_v49, 16  ;;  %v11776_v3 = vshll.u32 %v14357_v49, 16  ;;  %v11787_v18 = vshrl.u32 %v14359_v60, 16 }
 0x316   : > { %15877 = vmatprep.subr.bf16.mxu0 %v17197_v51  ;;  %v13789_v26 = vcombine.low %v20288_v2, %v20294_v11  ;;  %v8213_v43 = vrot.slane %v20031_v20, 5  ;;  %v11558_v61 = vrot.slane %v11556_v24, 5  ;;  %v11572_v19 = vrot.slane %v11570_v46, 5  ;;  %v13761_v44 = vld [vmem:[%s17359_s30 + $0x120] sm:$0xe] }
 0x317   : > { %v11790_v4 = vshll.u32 %v14359_v60, 16  ;;  %v20322_v10 = vsel %vm17371_vm2, %v13767_v25, %v8209_v0  ;;  %v11545_v20 = vsel %vm17546_vm5, %v20290_v1, %v20284_v14  ;;  %v11584_v17 = vshll.u32 %v14326_v54, 16  ;;  %v13762_v57 = vld [vmem:[%s17359_s30 + $0x128] sm:$0xe]  ;;  %v14358_v46 = vld [vmem:[%s18378_s27 + $0xe4] sm:$0x1] }
 0x318   : > { %16262 = vmatpush3.bf16.msra.mxu1 %v17198_v32  ;;  %v17203_v32 = vld [vmem:[%s20509_s4 + $0x3b0] sm:$0xff]   ;;  %v11568_v24 = vrot.slane %v11567_v56, 4  ;;  %v11581_v37 = vor.u32 %v11580_v5, %v11577_v45  ;;  %v11595_v1 = vor.u32 %v11594_v15, %v11591_v31  ;;  %v11775_v49 = vrot.slane %v11773_v58, 4  ;;  %v17208_v56 = vld [vmem:[%s20509_s4 + $0x3c0] sm:$0xff]  }
 0x319   : > { %15878 = vmatpush3.bf16.msra.mxu0 %v17197_v51  ;;  %16263 = vmatprep.subr.bf16.mxu1 %v17200_v42  ;;  %v13768_v51 = vrot.slane %v13760_v38, 9  ;;  %v11598_v38 = vshll.u32 %v14328_v12, 16  ;;  %v11778_v60 = vrot.slane %v11776_v3, 5  ;;  %v11789_v0 = vrot.slane %v11787_v18, 4 }
 0x31a   : > { %15879 = vmatprep.subr.bf16.mxu0 %v17199_v59  ;;  %v11792_v54 = vrot.slane %v11790_v4, 5  ;;  %v13769_v25 = vrot.slane %v13761_v44, 9  ;;  %v14346_v45 = vcombine.low %v11531_v29, %v11545_v20  ;;  %v11586_v31 = vrot.slane %v11584_v17, 5  ;;  %v17210_v17 = vld [vmem:[%s20509_s4 + $0x3c8] sm:$0xff]  }
 0x31b   : > { %v20330_v21 = vsel %vm17371_vm2, %v13768_v51, %v8213_v43  ;;  %v8217_v51 = vrot.slane %v20072_v8, 5  ;;  %v13770_v43 = vrot.slane %v13762_v57, 9  ;;  %v17207_v8 = vld [vmem:[%s20507_s2 + $0x8c0] sm:$0xff]   ;;  %v11582_v15 = vrot.slane %v11581_v37, 4  ;;  %v17209_v44 = vld [vmem:[%s20507_s2 + $0x8c8] sm:$0xff]  }
 0x31c   : > { %16264 = vmatpush3.bf16.msra.mxu1 %v17200_v42  ;;  %v11554_v42 = vrot.slane %v11553_v62, 4  ;;  %v13790_v14 = vcombine.low %v20322_v10, %v20330_v21  ;;  %v14360_v62 = vld [vmem:[%s18378_s27 + $0xec] sm:$0x1]  ;;  %v11600_v12 = vrot.slane %v11598_v38, 5  ;;  %v11596_v58 = vrot.slane %v11595_v1, 4 }
 0x31d   : > { %15880 = vmatpush3.bf16.msra.mxu0 %v17199_v59  ;;  %16265 = vmatprep.subr.bf16.mxu1 %v17203_v32  ;;  %v17205_v59 = vld [vmem:[%s20507_s2 + $0x8b8] sm:$0xff]   ;;  %v20355_v29 = vsel %vm17371_vm2, %v13769_v25, %v8217_v51  ;;  %v11782_v3 = vshll.u32 %v14358_v46, 16  ;;  %v11796_v18 = vshll.u32 %v14360_v62, 16  ;;  %v11779_v4 = vor.u32 %v11778_v60, %v11775_v49  ;;  %v17212_v62 = vld [vmem:[%s20509_s4 + $0x3d0] sm:$0xff]   ;;  %v14401_v21 = vld [vmem:[%s20508_s3] ss:$0 sm:$0xff] }
 0x31e   : > { %15881 = vmatprep.subr.bf16.mxu0 %v17201_v30  ;;  %v11559_v5 = vsel %vm17546_vm5, %v11554_v42, %v11558_v61  ;;  %v13763_v61 = vld [vmem:[%s17359_s30 + $0x130] sm:$0xe]  ;;  %v11793_v20 = vor.u32 %v11792_v54, %v11789_v0  ;;  %v13764_v42 = vld [vmem:[%s17359_s30 + $0x138] sm:$0xe]  ;;  %v8225_v37 = vrot.slane %v20113_v34, 5  ;;  %v8229_v34 = vrot.slane %v20116_v52, 5 }
 0x31f   : > { %v11784_v38 = vrot.slane %v11782_v3, 5  ;;  %v11798_v1 = vrot.slane %v11796_v18, 5  ;;  %v13772_v46 = vrot.slane %v13764_v42, 9  ;;  %v11780_v49 = vrot.slane %v11779_v4, 4  ;;  %v17215_v3 = vld [vmem:[%s20507_s2 + $0x8e0] sm:$0xff]  }
 0x320   : > { %16266 = vmatpush3.bf16.msra.mxu1 %v17203_v32  ;;  %v8221_v32 = vrot.slane %v20101_v7, 5  ;;  %v11794_v60 = vrot.slane %v11793_v20, 4  ;;  %v14362_v4 = vld [vmem:[%s18378_s27 + $0xf4] sm:$0x1]  ;;  %v14364_v20 = vld [vmem:[%s18378_s27 + $0xfc] sm:$0x1] }
 0x321   : > { %15882 = vmatpush3.bf16.msra.mxu0 %v17201_v30  ;;  %16267 = vmatprep.subr.bf16.mxu1 %v17206_v41  ;;  %v11573_v30 = vsel %vm17546_vm5, %v11568_v24, %v11572_v19  ;;  %v13771_v24 = vrot.slane %v13763_v61, 9  ;;  %v20395_v40 = vsel %vm17371_vm2, %v13772_v46, %v8229_v34  ;;  %v11785_v25 = vsel %vm17546_vm5, %v11780_v49, %v11784_v38  ;;  %v14369_v42 = vld [vmem:[%s18378_s27 + $0x110] sm:$0xf] }
 0x322   : > { %15883 = vmatprep.subr.bf16.mxu0 %v17205_v59  ;;  %v20359_v7 = vsel %vm17371_vm2, %v13770_v43, %v8221_v32  ;;  %v14347_v57 = vcombine.low %v11559_v5, %v11573_v30  ;;  %v11799_v55 = vsel %vm17546_vm5, %v11794_v60, %v11798_v1  ;;  %v14365_v43 = vld [vmem:[%s18378_s27 + $0x100] sm:$0xf]  ;;  %v11818_v32 = vshll.u32 %v14363_v23, 16 }
 0x323   : > { %v13791_v19 = vcombine.low %v20355_v29, %v20359_v7  ;;  %v20381_v0 = vsel %vm17371_vm2, %v13771_v24, %v8225_v37  ;;  %v11829_v30 = vshrl.u32 %v14365_v43, 16  ;;  %v14368_v24 = vld [vmem:[%s18378_s27 + $0x10c] sm:$0x1]  ;;  %v11824_v1 = vshll.u32 %v14364_v20, 16 }
 0x324   : > { %16268 = vmatpush3.bf16.msra.mxu1 %v17206_v41  ;;  %v11587_v41 = vsel %vm17546_vm5, %v11582_v15, %v11586_v31  ;;  %v13792_v54 = vcombine.low %v20381_v0, %v20395_v40  ;;  %v11815_v31 = vshrl.u32 %v14363_v23, 16  ;;  %v11832_v15 = vshll.u32 %v14365_v43, 16  ;;  %v17222_v23 = vld [vmem:[%s20509_s4 + $0x3f8] sm:$0xff]  }
 0x325   : > { %15884 = vmatpush3.bf16.msra.mxu0 %v17205_v59  ;;  %16277 = vmatprep.subr.bf16.mxu1 %v17208_v56  ;;  %v11601_v59 = vsel %vm17546_vm5, %v11596_v58, %v11600_v12  ;;  %v11820_v61 = vrot.slane %v11818_v32, 5  ;;  %v11831_v2 = vrot.slane %v11829_v30, 4  ;;  %v11857_v46 = vshrl.u32 %v14369_v42, 16 }
 0x326   : > { %15893 = vmatprep.subr.bf16.mxu0 %v17207_v8  ;;  %v14348_v52 = vcombine.low %v11587_v41, %v11601_v59  ;;  %v11817_v18 = vrot.slane %v11815_v31, 4  ;;  %v11834_v11 = vrot.slane %v11832_v15, 5  ;;  %v14366_v41 = vld [vmem:[%s18378_s27 + $0x104] sm:$0x1]  ;;  %v11810_v59 = vshll.u32 %v14362_v4, 16 }
 0x327   : > { %16270 = vmatmul.mubr.bf16.vlgmr.msra.gmra.mrb[8].mxu1 %v14346_v45  ;;  %v14389_v45 = vcombine.low %v11785_v25, %v11799_v55  ;;  %v11860_v49 = vshll.u32 %v14369_v42, 16  ;;  %v11852_v25 = vshll.u32 %v14368_v24, 16  ;;  %v17219_v55 = vld [vmem:[%s20507_s2 + $0x8f0] sm:$0xff]   ;;  %v11826_v43 = vrot.slane %v11824_v1, 5 }
 0x328   : > { %15886 = vmatmul.mubr.bf16.vlgmr.msra.gmra.mrb[0].mxu0 %v13746_v13  ;;  %16278 = vmatpush3.bf16.msra.mxu1 %v17208_v56  ;;  %v14361_v13 = vld [vmem:[%s18378_s27 + $0xf0] sm:$0xf]  ;;  %v14367_v56 = vld [vmem:[%s18378_s27 + $0x108] sm:$0xf]  ;;  %v11821_v38 = vor.u32 %v11820_v61, %v11817_v18 }
 0x329   : > { %15894 = vmatpush3.bf16.msra.mxu0 %v17207_v8  ;;  %16279 = vmatprep.subr.bf16.mxu1 %v17210_v17  ;;  %v11801_v51 = vshrl.u32 %v14361_v13, 16  ;;  %v11804_v5 = vshll.u32 %v14361_v13, 16  ;;  %v17216_v8 = vld [vmem:[%s20509_s4 + $0x3e0] sm:$0xff]   ;;  %v11843_v12 = vshrl.u32 %v14367_v56, 16  ;;  %v11846_v58 = vshll.u32 %v14367_v56, 16 }
 0x32a   : > { %15895 = vmatprep.subr.bf16.mxu0 %v17209_v44  ;;  %15889 = vmatprep.mubr.bf16.mxu0 %v13747_v47  ;;  %v17213_v47 = vld [vmem:[%s20507_s2 + $0x8d8] sm:$0xff]   ;;  %v14370_v56 = vld [vmem:[%s18378_s27 + $0x114] sm:$0x1] }
 0x32b   : > { %16273 = vmatprep.mubr.bf16.mxu1 %v14347_v57  ;;  %v11803_v48 = vrot.slane %v11801_v51, 4  ;;  %v17217_v57 = vld [vmem:[%s20507_s2 + $0x8e8] sm:$0xff]   ;;  %v11822_v51 = vrot.slane %v11821_v38, 4 }
 0x32c   : > { %16280 = vmatpush3.bf16.msra.mxu1 %v17210_v17  ;;  %v11848_v17 = vrot.slane %v11846_v58, 5  ;;  %v14372_v58 = vld [vmem:[%s18378_s27 + $0x11c] sm:$0x1] }
 0x32d   : > { %15896 = vmatpush3.bf16.msra.mxu0 %v17209_v44  ;;  %16281 = vmatprep.subr.bf16.mxu1 %v17212_v62  ;;  %v14371_v44 = vld [vmem:[%s18378_s27 + $0x118] sm:$0xf]  ;;  %v11880_v4 = vshll.u32 %v14372_v58, 16 }
 0x32e   : > { %15897 = vmatprep.subr.bf16.mxu0 %v17211_v33  ;;  %v11871_v60 = vshrl.u32 %v14371_v44, 16  ;;  %v11874_v34 = vshll.u32 %v14371_v44, 16 }
 0x32f   : > { %16274 = vmatmul.mubr.bf16.gmra.mrb[12].mxu1 %v14348_v52  ;;  %v11838_v52 = vshll.u32 %v14366_v41, 16 }
 0x330   : > { %16282 = vmatpush3.bf16.msra.mxu1 %v17212_v62  ;;  %15890 = vmatmul.mubr.bf16.gmra.mrb[4].mxu0 %v13748_v35  ;;  %v11806_v35 = vrot.slane %v11804_v5, 5  ;;  %v17220_v62 = vld [vmem:[%s20509_s4 + $0x3f0] sm:$0xff]   ;;  %v11862_v5 = vrot.slane %v11860_v49, 5  ;;  %v11873_v31 = vrot.slane %v11871_v60, 4  ;;  %v11876_v32 = vrot.slane %v11874_v34, 5 }
 0x331   : > { %15898 = vmatpush3.bf16.msra.mxu0 %v17211_v33  ;;  %16283 = vmatprep.subr.bf16.mxu1 %v17214_v16  ;;  %v11835_v33 = vor.u32 %v11834_v11, %v11831_v2  ;;  %v11840_v30 = vrot.slane %v11838_v52, 5 }
 0x332   : > { %15899 = vmatprep.subr.bf16.mxu0 %v17213_v47  ;;  %15909 = vmatprep.mubr.bf16.mxu0 %v13789_v26  ;;  %v11845_v26 = vrot.slane %v11843_v12, 4  ;;  %v11807_v37 = vor.u32 %v11806_v35, %v11803_v48  ;;  %v11854_v12 = vrot.slane %v11852_v25, 5  ;;  %v11866_v48 = vshll.u32 %v14370_v56, 16 }
 0x333   : > { %16293 = vmatprep.mubr.bf16.mxu1 %v14389_v45  ;;  %v11859_v45 = vrot.slane %v11857_v46, 4  ;;  %v11827_v35 = vsel %vm17546_vm5, %v11822_v51, %v11826_v43  ;;  %v11877_v61 = vor.u32 %v11876_v32, %v11873_v31 }
 0x334   : > { %16284 = vmatpush3.bf16.msra.mxu1 %v17214_v16  ;;  %v11849_v13 = vor.u32 %v11848_v17, %v11845_v26  ;;  %v11808_v16 = vrot.slane %v11807_v37, 4  ;;  %v11868_v11 = vrot.slane %v11866_v48, 5 }
 0x335   : > { %15900 = vmatpush3.bf16.msra.mxu0 %v17213_v47  ;;  %16285 = vmatprep.subr.bf16.mxu1 %v17216_v8  ;;  %v11812_v47 = vrot.slane %v11810_v59, 5  ;;  %v11863_v18 = vor.u32 %v11862_v5, %v11859_v45  ;;  %v11878_v44 = vrot.slane %v11877_v61, 4 }
 0x336   : > { %15901 = vmatprep.subr.bf16.mxu0 %v17215_v3  ;;  %v11850_v15 = vrot.slane %v11849_v13, 4 }
 0x337   : > { %v11864_v17 = vrot.slane %v11863_v18, 4 }
 0x338   : > { %16286 = vmatpush3.bf16.msra.mxu1 %v17216_v8  ;;  %v11836_v8 = vrot.slane %v11835_v33, 4  ;;  %v11855_v42 = vsel %vm17546_vm5, %v11850_v15, %v11854_v12 }
 0x339   : > { %15902 = vmatpush3.bf16.msra.mxu0 %v17215_v3  ;;  %16287 = vmatprep.subr.bf16.mxu1 %v17218_v22  ;;  %v17221_v3 = vld [vmem:[%s20507_s2 + $0x8f8] sm:$0xff]   ;;  %v11869_v41 = vsel %vm17546_vm5, %v11864_v17, %v11868_v11 }
 0x33a   : > { %15903 = vmatprep.subr.bf16.mxu0 %v17217_v57  ;;  %v11841_v20 = vsel %vm17546_vm5, %v11836_v8, %v11840_v30 }
 0x33b   : > { %v14391_v26 = vcombine.low %v11841_v20, %v11855_v42 }
 0x33c   : > { %16288 = vmatpush3.bf16.msra.mxu1 %v17218_v22  ;;  %v11813_v22 = vsel %vm17546_vm5, %v11808_v16, %v11812_v47 }
 0x33d   : > { %15904 = vmatpush3.bf16.msra.mxu0 %v17217_v57  ;;  %16289 = vmatprep.subr.bf16.mxu1 %v17220_v62  ;;  %v14390_v2 = vcombine.low %v11813_v22, %v11827_v35  ;;  %v11882_v57 = vrot.slane %v11880_v4, 5 }
 0x33e   : > { %15905 = vmatprep.subr.bf16.mxu0 %v17219_v55 }
 0x33f   : > { %v11883_v24 = vsel %vm17546_vm5, %v11878_v44, %v11882_v57 }
 0x340   : > { %16290 = vmatpush3.bf16.msra.mxu1 %v17220_v62  ;;  %v14392_v37 = vcombine.low %v11869_v41, %v11883_v24 }
 0x341   : > { %15906 = vmatpush3.bf16.msra.mxu0 %v17219_v55  ;;  %16291 = vmatprep.subr.bf16.mxu1 %v17222_v23 }
 0x342   : > { %15907 = vmatprep.subr.bf16.mxu0 %v17221_v3 }
 0x344   : > { %16292 = vmatpush3.bf16.msra.mxu1 %v17222_v23 }
 0x345   : > { %15908 = vmatpush3.bf16.msra.mxu0 %v17221_v3 }
 0x347   : > { %16294 = vmatmul.mubr.bf16.vlgmr.msra.gmra.mrb[8].mxu1 %v14390_v2 }
 0x348   : > { %15910 = vmatmul.mubr.bf16.vlgmr.msra.gmra.mrb[0].mxu0 %v13790_v14  ;;  %16297 = vmatprep.mubr.bf16.mxu1 %v14391_v26 }
 0x349   : > { %15913 = vmatprep.mubr.bf16.mxu0 %v13791_v19 }
 0x34f   : > { %16298 = vmatmul.mubr.bf16.gmra.mrb[12].mxu1 %v14392_v37 }
 0x350   : > { %15914 = vmatmul.mubr.bf16.gmra.mrb[4].mxu0 %v13792_v54 }
 0x41a   : > { %v16295_v59 = vpop.f32.mrb[8].mxu1 }
 0x41b   : > { %v15911_v10 = vpop.f32.mrb[0].mxu0  ;;  %v11999_v14 = vpop.f32.mrb[9].mxu1 }
 0x41c   : > { %v16301_v28 = vadd.f32 %v15911_v10, %v19253_v39  ;;  %v8346_v38 = vpop.f32.mrb[1].mxu0  ;;  %v16296_v1 = vpop.f32.mrb[10].mxu1 }
 0x41d   : > { %v16302_v29 = vadd.f32 %v8346_v38, %v19259_v9  ;;  %v15912_v7 = vpop.f32.mrb[2].mxu0  ;;  %v12002_v19 = vpop.f32.mrb[11].mxu1  ;;  %v14402_v9 = vld [vmem:[%s20510_s5] ss:$0 sm:$0xff] }
 0x41e   : > { %v12058_v46 = vadd.f32 %v16301_v28, %v14401_v21  ;;  %v16303_v49 = vadd.f32 %v15912_v7, %v19271_v36  ;;  %v8349_v0 = vpop.f32.mrb[3].mxu0 }
 0x41f   : > { %v12056_v40 = vadd.f32 %v16302_v29, %v14401_v21  ;;  %v16304_v54 = vadd.f32 %v8349_v0, %v19282_v63 }
 0x420   : > { %vm12066_vm6 = vcmp.ge.f32.partialorder %v12058_v46, 0.0  ;;  %v12074_v60 = vmul.f32 0.2, %v12058_v46  ;;  %v12059_v34 = vadd.f32 %v16303_v49, %v14401_v21 }
 0x421   : > { %vm12064_vm7 = vcmp.ge.f32.partialorder %v12056_v40, 0.0  ;;  %v12072_v62 = vmul.f32 0.2, %v12056_v40  ;;  %v12057_v33 = vadd.f32 %v16304_v54, %v14401_v21 }
 0x422   : > { %v12082_v39 = vsel %vm12066_vm6, %v12058_v46, %v12074_v60  ;;  %vm12067_vm8 = vcmp.ge.f32.partialorder %v12059_v34, 0.0  ;;  %v12075_v52 = vmul.f32 0.2, %v12059_v34  ;;  %v16299_v13 = vpop.f32.mrb[12].mxu1 }
 0x423   : > { %v12090_v36 = vadd.f32 %v16295_v59, %v12082_v39  ;;  %v12080_v25 = vsel %vm12064_vm7, %v12056_v40, %v12072_v62  ;;  %vm12065_vm9 = vcmp.ge.f32.partialorder %v12057_v33, 0.0  ;;  %v12073_v55 = vmul.f32 0.2, %v12057_v33  ;;  %v15915_v63 = vpop.f32.mrb[4].mxu0  ;;  %v12015_v23 = vpop.f32.mrb[13].mxu1 }
 0x424   : > { %v12088_v16 = vadd.f32 %v12080_v25, %v11999_v14  ;;  %v12083_v47 = vsel %vm12067_vm8, %v12059_v34, %v12075_v52  ;;  %v16305_v51 = vadd.f32 %v15915_v63, %v19314_v53  ;;  %v8362_v43 = vpop.f32.mrb[5].mxu0  ;;  %v16300_v56 = vpop.f32.mrb[14].mxu1 }
 0x425   : > { %v12091_v45 = vadd.f32 %v16296_v1, %v12083_v47  ;;  %v12081_v5 = vsel %vm12065_vm9, %v12057_v33, %v12073_v55  ;;  %v16306_v31 = vadd.f32 %v8362_v43, %v19324_v6  ;;  %v15916_v32 = vpop.f32.mrb[6].mxu0  ;;  %v12018_v8 = vpop.f32.mrb[15].mxu1  ;;  %v12105_v30 = vadd.f32 %v14402_v9, %v12090_v36 }
 0x426   : > { %v12089_v15 = vadd.f32 %v12081_v5, %v12002_v19  ;;  %v12062_v12 = vadd.f32 %v16305_v51, %v14401_v21  ;;  %v16307_v58 = vadd.f32 %v15916_v32, %v19332_v50  ;;  %v8365_v3 = vpop.f32.mrb[7].mxu0  ;;  %v12103_v22 = vadd.f32 %v14402_v9, %v12088_v16 }
 0x427   : > { %v12106_v48 = vadd.f32 %v14402_v9, %v12091_v45  ;;  %v12060_v35 = vadd.f32 %v16306_v31, %v14401_v21  ;;  %v16308_v53 = vadd.f32 %v8365_v3, %v19342_v27 }
 0x428   : > { %v12104_v6 = vadd.f32 %v14402_v9, %v12089_v15  ;;  %vm12070_vm10 = vcmp.ge.f32.partialorder %v12062_v12, 0.0  ;;  %v12078_v18 = vmul.f32 0.2, %v12062_v12  ;;  %v12063_v61 = vadd.f32 %v16307_v58, %v14401_v21 }
 0x429   : > { %v14414_v4 = vpack.c.bf16 %v12106_v48, %v12105_v30  ;;  %vm12068_vm11 = vcmp.ge.f32.partialorder %v12060_v35, 0.0  ;;  %v12076_v50 = vmul.f32 0.2, %v12060_v35  ;;  %v12061_v20 = vadd.f32 %v16308_v53, %v14401_v21 }
 0x42a   : > { %v14409_v42 = vpack.c.bf16 %v12104_v6, %v12103_v22  ;;  %v12086_v2 = vsel %vm12070_vm10, %v12062_v12, %v12078_v18  ;;  %vm12071_vm12 = vcmp.ge.f32.partialorder %v12063_v61, 0.0  ;;  %v12079_v11 = vmul.f32 0.2, %v12063_v61 }
 0x42b   : > { %14426 = vst [vmem:[%s20490_s21 + $0x8] sm:$0xff] %v14414_v4   ;;  %v12094_v27 = vadd.f32 %v16299_v13, %v12086_v2  ;;  %v12084_v26 = vsel %vm12068_vm11, %v12060_v35, %v12076_v50  ;;  %vm12069_vm13 = vcmp.ge.f32.partialorder %v12061_v20, 0.0  ;;  %v12077_v17 = vmul.f32 0.2, %v12061_v20 }
 0x42c   : > { %14410 = vst [vmem:[%s20490_s21] sm:$0xff] %v14409_v42   ;;  %v12092_v44 = vadd.f32 %v12084_v26, %v12015_v23  ;;  %v12087_v57 = vsel %vm12071_vm12, %v12063_v61, %v12079_v11 }
 0x42d   : > { %v12095_v41 = vadd.f32 %v16300_v56, %v12087_v57  ;;  %v12085_v24 = vsel %vm12069_vm13, %v12061_v20, %v12077_v17  ;;  %v12109_v59 = vadd.f32 %v14402_v9, %v12094_v27 }
 0x42e   : > { %v12093_v37 = vadd.f32 %v12085_v24, %v12018_v8  ;;  %v12107_v21 = vadd.f32 %v14402_v9, %v12092_v44 }
 0x42f   : > { %v12110_v10 = vadd.f32 %v14402_v9, %v12095_v41 }
 0x430   : > { %v12108_v14 = vadd.f32 %v14402_v9, %v12093_v37 }
 0x431   : > { %v14424_v28 = vpack.c.bf16 %v12110_v10, %v12109_v59 }
 0x432   : > { %v14419_v38 = vpack.c.bf16 %v12108_v14, %v12107_v21 }
 0x433   : > { %14428 = vst [vmem:[%s20490_s21 + $0x18] sm:$0xff] %v14424_v28  }
 0x434   : > { %14427 = vst [vmem:[%s20490_s21 + $0x10] sm:$0xff] %v14419_v38  }
 0x435 PF: > { %s16_s23 = sadd.s32 1, %s17265_s23   ;;  %s20519_s21 = smov %s17261_s22 }
 0x436   : > { %p13_p5 = scmp.ge.s32.totalorder %s16_s23, 4   ;;  %s20520_s22 = smov %s20522_s24 }
 0x438   :  { %15 = sbr.rel (!%p13_p5) target bundleno = 2 (0x2), region = 161 }

</bundles_post_ra>
